<compile_context>
chip_gen: v7x
topology: tpu7x:2x2x1
jax: 0.10.0
libtpu: 0.0.40
codegen_flags: <defaults>
</compile_context>

<pallas_src>
import functools
import math

import numpy as np
import jax
import jax.numpy as jnp
from jax.experimental import pallas as pl
from jax.experimental.pallas import tpu as pltpu

_VMEM_LIMIT = 32 * 1024 * 1024  # explicit scoped-VMEM limit, safe on v5e/v6e/v7x


def _round_up(x, m):
    return (x + m - 1) // m * m


# ----------------------------------------------------------------------------
# Tiled conv-as-matmul kernels (BN affine + ReLU [+ residual] fused epilogue)
# ----------------------------------------------------------------------------

def _mm_bn_kernel(x_ref, w_ref, s_ref, b_ref, o_ref, acc_ref, *, relu):
    # Multi-K-step path: f32 accumulator in VMEM, epilogue on last K step.
    @pl.when(pl.program_id(2) == 0)
    def _():
        acc_ref[...] = jnp.zeros_like(acc_ref)

    acc_ref[...] += jnp.dot(x_ref[...], w_ref[...],
                            preferred_element_type=jnp.float32)

    @pl.when(pl.program_id(2) == pl.num_programs(2) - 1)
    def _():
        y = acc_ref[...] * s_ref[...] + b_ref[...]
        if relu:
            y = jnp.maximum(y, 0.0)
        o_ref[...] = y.astype(o_ref.dtype)


def _mm_bn_add_relu_kernel(x_ref, w_ref, s_ref, b_ref, r_ref, o_ref, acc_ref):
    @pl.when(pl.program_id(2) == 0)
    def _():
        acc_ref[...] = jnp.zeros_like(acc_ref)

    acc_ref[...] += jnp.dot(x_ref[...], w_ref[...],
                            preferred_element_type=jnp.float32)

    @pl.when(pl.program_id(2) == pl.num_programs(2) - 1)
    def _():
        y = acc_ref[...] * s_ref[...] + b_ref[...] + r_ref[...].astype(jnp.float32)
        o_ref[...] = jnp.maximum(y, 0.0).astype(o_ref.dtype)


def _mm_bn_single_kernel(x_ref, w_ref, s_ref, b_ref, o_ref, *, relu):
    # Single-K-step fast path: no scratch, no accumulator round trip.
    y = jnp.dot(x_ref[...], w_ref[...], preferred_element_type=jnp.float32)
    y = y * s_ref[...] + b_ref[...]
    if relu:
        y = jnp.maximum(y, 0.0)
    o_ref[...] = y.astype(o_ref.dtype)


def _mm_bn_add_relu_single_kernel(x_ref, w_ref, s_ref, b_ref, r_ref, o_ref):
    y = jnp.dot(x_ref[...], w_ref[...], preferred_element_type=jnp.float32)
    y = y * s_ref[...] + b_ref[...] + r_ref[...].astype(jnp.float32)
    o_ref[...] = jnp.maximum(y, 0.0).astype(o_ref.dtype)


def _pick_tiles(m, k, n):
    # Sized for v7x's 64 MiB physical VMEM (worst case): even at the maxima
    # (tm=1024, tk=2048, tn=256) double-buffered inputs + accumulator stay
    # around ~12 MiB, well under the 32 MiB scoped limit.  Bigger M tiles cut
    # per-grid-step overhead (~0.35 us/step).
    tm = _round_up(m, 8) if m <= 1024 else 512
    tn = _round_up(n, 128) if n <= 256 else 256       # lane-dense (>=128) outputs
    tk = _round_up(k, 128) if k <= 2048 else 512
    return tm, tn, tk


def matmul_affine(x2d, w2d, scale, shift, relu=True, residual=None,
                  out_dtype=jnp.bfloat16):
    """act((x2d @ w2d) * scale + shift [+ residual]) with a tiled MXU matmul.

    Inputs are cast to bf16 for the MXU; accumulation / epilogue stay in f32.
    M, K, N are zero-padded to tile multiples (N padded to >=128 so stores are
    lane-dense); the result is sliced back to (M, N).
    """
    m, k = x2d.shape
    n = w2d.shape[1]
    tm, tn, tk = _pick_tiles(m, k, n)
    mp, kp, np_ = _round_up(m, tm), _round_up(k, tk), _round_up(n, tn)
    nk = kp // tk

    xb = jnp.pad(x2d.astype(jnp.bfloat16), ((0, mp - m), (0, kp - k)))
    wb = jnp.pad(w2d.astype(jnp.bfloat16), ((0, kp - k), (0, np_ - n)))
    sb = jnp.pad(scale.astype(jnp.float32).reshape(1, n), ((0, 0), (0, np_ - n)))
    bb = jnp.pad(shift.astype(jnp.float32).reshape(1, n), ((0, 0), (0, np_ - n)))
    rb = None
    if residual is not None:
        rb = jnp.pad(residual.astype(jnp.bfloat16), ((0, mp - m), (0, np_ - n)))

    cost = pl.CostEstimate(
        flops=2 * mp * np_ * kp,
        transcendentals=0,
        bytes_accessed=2 * (mp * kp + kp * np_ + mp * np_) + 8 * np_)

    if nk == 1:
        # Whole K fits one tile: 2-D grid, scratch-free epilogue-fused kernel.
        grid = (mp // tm, np_ // tn)
        x_spec = pl.BlockSpec((tm, kp), lambda i, j: (i, 0))
        w_spec = pl.BlockSpec((kp, tn), lambda i, j: (0, j))
        v_spec = pl.BlockSpec((1, tn), lambda i, j: (0, j))
        o_spec = pl.BlockSpec((tm, tn), lambda i, j: (i, j))
        cp = pltpu.CompilerParams(
            dimension_semantics=("parallel", "parallel"),
            vmem_limit_bytes=_VMEM_LIMIT)
        if residual is None:
            out = pl.pallas_call(
                functools.partial(_mm_bn_single_kernel, relu=relu),
                grid=grid,
                in_specs=[x_spec, w_spec, v_spec, v_spec],
                out_specs=o_spec,
                out_shape=jax.ShapeDtypeStruct((mp, np_), out_dtype),
                compiler_params=cp,
                cost_estimate=cost,
            )(xb, wb, sb, bb)
        else:
            out = pl.pallas_call(
                _mm_bn_add_relu_single_kernel,
                grid=grid,
                in_specs=[x_spec, w_spec, v_spec, v_spec, o_spec],
                out_specs=o_spec,
                out_shape=jax.ShapeDtypeStruct((mp, np_), out_dtype),
                compiler_params=cp,
                cost_estimate=cost,
            )(xb, wb, sb, bb, rb)
        return out[:m, :n]

    # General path: 3-D grid with K as the innermost (reduction) axis.
    grid = (mp // tm, np_ // tn, nk)
    x_spec = pl.BlockSpec((tm, tk), lambda i, j, l: (i, l))
    w_spec = pl.BlockSpec((tk, tn), lambda i, j, l: (l, j))
    v_spec = pl.BlockSpec((1, tn), lambda i, j, l: (0, j))
    o_spec = pl.BlockSpec((tm, tn), lambda i, j, l: (i, j))
    cp = pltpu.CompilerParams(
        dimension_semantics=("parallel", "parallel", "arbitrary"),
        vmem_limit_bytes=_VMEM_LIMIT)

    if residual is None:
        out = pl.pallas_call(
            functools.partial(_mm_bn_kernel, relu=relu),
            grid=grid,
            in_specs=[x_spec, w_spec, v_spec, v_spec],
            out_specs=o_spec,
            out_shape=jax.ShapeDtypeStruct((mp, np_), out_dtype),
            scratch_shapes=[pltpu.VMEM((tm, tn), jnp.float32)],
            compiler_params=cp,
            cost_estimate=cost,
        )(xb, wb, sb, bb)
    else:
        out = pl.pallas_call(
            _mm_bn_add_relu_kernel,
            grid=grid,
            in_specs=[x_spec, w_spec, v_spec, v_spec, o_spec],
            out_specs=o_spec,
            out_shape=jax.ShapeDtypeStruct((mp, np_), out_dtype),
            scratch_shapes=[pltpu.VMEM((tm, tn), jnp.float32)],
            compiler_params=cp,
            cost_estimate=cost,
        )(xb, wb, sb, bb, rb)
    return out[:m, :n]


# ----------------------------------------------------------------------------
# Max-pool 3x3 / stride 2 / pad 1 (9-way max fused in one tiled kernel).
# Views are flattened to (N*Ho, Wo*C) so the output store is much wider
# (lane-denser) than a (M, C) layout when C is small.
# ----------------------------------------------------------------------------

def _max9_kernel(*refs):
    o_ref = refs[-1]
    m = refs[0][...]
    for r in refs[1:-1]:
        m = jnp.maximum(m, r[...])
    o_ref[...] = m


def maxpool3x3_s2_p1(x):
    n, h, w, c = x.shape
    ho = (h + 2 - 3) // 2 + 1
    wo = (w + 2 - 3) // 2 + 1
    xp = jnp.pad(x, ((0, 0), (1, 1), (1, 1), (0, 0)), constant_values=-jnp.inf)
    rows, cols = n * ho, wo * c
    tm = _round_up(rows, 8) if rows <= 1024 else 512
    rp = _round_up(rows, tm)
    views = []
    for i in range(3):
        for j in range(3):
            v = xp[:, i:i + 2 * (ho - 1) + 1:2, j:j + 2 * (wo - 1) + 1:2, :]
            views.append(jnp.pad(v.reshape(rows, cols), ((0, rp - rows), (0, 0))))
    spec = pl.BlockSpec((tm, cols), lambda i: (i, 0))
    out = pl.pallas_call(
        _max9_kernel,
        grid=(rp // tm,),
        in_specs=[spec] * 9,
        out_specs=spec,
        out_shape=jax.ShapeDtypeStruct((rp, cols), x.dtype),
        compiler_params=pltpu.CompilerParams(
            dimension_semantics=("parallel",), vmem_limit_bytes=_VMEM_LIMIT),
    )(*views)
    return out[:rows].reshape(n, ho, wo, c)


# ----------------------------------------------------------------------------
# PPM branch: adaptive-avg-pool -> 1x1 conv + BN + ReLU -> bilinear upsample,
# all fused in one kernel (gridded over batch) using kron mixing matrices.
# ----------------------------------------------------------------------------

def _ppm_branch_kernel(pool_ref, up_ref, w_ref, s_ref, b_ref, x_ref, o_ref):
    x = x_ref[0].astype(jnp.float32)                                     # (HW, C)
    pooled = jnp.dot(pool_ref[...], x, preferred_element_type=jnp.float32)
    y = jnp.dot(pooled, w_ref[...], preferred_element_type=jnp.float32)
    y = jnp.maximum(y * s_ref[...] + b_ref[...], 0.0)
    o_ref[0] = jnp.dot(up_ref[...], y,
                       preferred_element_type=jnp.float32).astype(o_ref.dtype)


def _resize_to_nchw_kernel(rt_ref, x_ref, o_ref):
    # x_ref[0]: (C, Q) ; rt_ref: (Q, Po) -> lane-dense (C, Po) output
    o_ref[0] = jnp.dot(x_ref[0], rt_ref[...],
                       preferred_element_type=jnp.float32).astype(o_ref.dtype)


def bilinear_matrix(out_size, in_size):
    """Row-mixing matrix for F.interpolate(mode='bilinear', align_corners=True)."""
    a = np.zeros((out_size, in_size), np.float32)
    for i in range(out_size):
        if out_size == 1 or in_size == 1:
            src = 0.0
        else:
            src = i * (in_size - 1) / (out_size - 1)
        lo = int(math.floor(src))
        hi = min(lo + 1, in_size - 1)
        f = src - lo
        a[i, lo] += 1.0 - f
        a[i, hi] += f
    return a


def adaptive_pool_matrix(in_size, out_size):
    """Row-mixing matrix for nn.AdaptiveAvgPool2d (PyTorch start/end rule)."""
    a = np.zeros((out_size, in_size), np.float32)
    for i in range(out_size):
        s = (i * in_size) // out_size
        e = ((i + 1) * in_size + out_size - 1) // out_size
        a[i, s:e] = 1.0 / (e - s)
    return a


def ppm_forward(x, ppm_params, bins):
    n, h, w, c = x.shape
    hw = h * w
    x_flat = x.reshape(n, hw, c)
    outs = [x]
    for bin_size, p in zip(bins, ppm_params):
        b2 = bin_size * bin_size
        pool = np.kron(adaptive_pool_matrix(h, bin_size),
                       adaptive_pool_matrix(w, bin_size))            # (b2, hw)
        up = np.kron(bilinear_matrix(h, bin_size),
                     bilinear_matrix(w, bin_size))                    # (hw, b2)
        red = p["w"].shape[-1]
        y = pl.pallas_call(
            _ppm_branch_kernel,
            grid=(n,),
            in_specs=[
                pl.BlockSpec((b2, hw), lambda b: (0, 0)),
                pl.BlockSpec((hw, b2), lambda b: (0, 0)),
                pl.BlockSpec((c, red), lambda b: (0, 0)),
                pl.BlockSpec((1, red), lambda b: (0, 0)),
                pl.BlockSpec((1, red), lambda b: (0, 0)),
                pl.BlockSpec((1, hw, c), lambda b: (b, 0, 0)),
            ],
            out_specs=pl.BlockSpec((1, hw, red), lambda b: (b, 0, 0)),
            out_shape=jax.ShapeDtypeStruct((n, hw, red), jnp.bfloat16),
            compiler_params=pltpu.CompilerParams(
                dimension_semantics=("parallel",), vmem_limit_bytes=_VMEM_LIMIT),
        )(jnp.asarray(pool), jnp.asarray(up),
          p["w"].reshape(c, red).astype(jnp.float32),
          p["scale"].reshape(1, red).astype(jnp.float32),
          p["shift"].reshape(1, red).astype(jnp.float32),
          x_flat)
        outs.append(y.reshape(n, h, w, red))
    return jnp.concatenate(outs, axis=-1)


def bilinear_resize_to_nchw(y_nhwc, h_out, w_out):
    """align_corners=True bilinear resize; emits NCHW directly (lane-dense)."""
    n, h, w, c = y_nhwc.shape
    q = h * w
    po = h_out * w_out
    rt = np.kron(bilinear_matrix(h_out, h), bilinear_matrix(w_out, w)).T  # (q, po)
    x_cq = jnp.transpose(y_nhwc.reshape(n, q, c), (0, 2, 1)).astype(jnp.float32)
    out = pl.pallas_call(
        _resize_to_nchw_kernel,
        grid=(n,),
        in_specs=[pl.BlockSpec((q, po), lambda b: (0, 0)),
                  pl.BlockSpec((1, c, q), lambda b: (b, 0, 0))],
        out_specs=pl.BlockSpec((1, c, po), lambda b: (b, 0, 0)),
        out_shape=jax.ShapeDtypeStruct((n, c, po), jnp.float32),
        compiler_params=pltpu.CompilerParams(
            dimension_semantics=("parallel",), vmem_limit_bytes=_VMEM_LIMIT),
    )(jnp.asarray(rt), x_cq)
    return out.reshape(n, c, h_out, w_out)


# ----------------------------------------------------------------------------
# JAX glue (patch extraction for conv-as-matmul)
# ----------------------------------------------------------------------------

def im2col(x, kh, kw, stride, padding, dilation):
    # TODO(synk): stream the kh*kw taps straight from a single padded copy via
    # per-tap index_maps (K-reduction over taps) instead of materializing the
    # kh*kw-duplicated im2col matrix in HBM.
    n, h, w, c = x.shape
    ho = (h + 2 * padding - dilation * (kh - 1) - 1) // stride + 1
    wo = (w + 2 * padding - dilation * (kw - 1) - 1) // stride + 1
    xp = jnp.pad(x, ((0, 0), (padding, padding), (padding, padding), (0, 0)))
    cols = []
    for i in range(kh):
        for j in range(kw):
            cols.append(
                xp[:, i * dilation:i * dilation + stride * (ho - 1) + 1:stride,
                   j * dilation:j * dilation + stride * (wo - 1) + 1:stride, :])
    cols = jnp.concatenate(cols, axis=-1)            # [n, ho, wo, kh*kw*c]
    return cols.reshape(n * ho * wo, kh * kw * c), ho, wo


def conv_bn(x, p, stride=1, padding=0, dilation=1, relu=True, residual=None):
    kh, kw, cin, cout = p["w"].shape
    n = x.shape[0]
    if kh == 1 and kw == 1 and padding == 0:
        xs = x[:, ::stride, ::stride, :]
        _, ho, wo, _ = xs.shape
        cols = xs.reshape(n * ho * wo, cin)
    else:
        cols, ho, wo = im2col(x, kh, kw, stride, padding, dilation)
    res2d = None if residual is None else residual.reshape(n * ho * wo, cout)
    y = matmul_affine(cols, p["w"].reshape(kh * kw * cin, cout),
                      p["scale"], p["shift"], relu=relu, residual=res2d)
    return y.reshape(n, ho, wo, cout)


# ----------------------------------------------------------------------------
# Deterministic synthetic parameters (1/8-width ResNet-50 backbone)
# ----------------------------------------------------------------------------

def conv_bn_params(key, kh, kw, cin, cout):
    k1, k2, k3 = jax.random.split(key, 3)
    fan_in = kh * kw * cin
    w = jax.random.normal(k1, (kh, kw, cin, cout), jnp.float32) * np.sqrt(2.0 / fan_in)
    scale = 1.0 + 0.05 * jax.random.normal(k2, (cout,), jnp.float32)
    shift = 0.05 * jax.random.normal(k3, (cout,), jnp.float32)
    return {"w": w, "scale": scale, "shift": shift}


def make_layer(key, in_ch, planes, blocks, stride, dilation):
    layer = []
    for b in range(blocks):
        kb = jax.random.fold_in(key, b)
        blk = {
            "conv1": conv_bn_params(jax.random.fold_in(kb, 0), 1, 1, in_ch, planes),
            "conv2": conv_bn_params(jax.random.fold_in(kb, 1), 3, 3, planes, planes),
            "conv3": conv_bn_params(jax.random.fold_in(kb, 2), 1, 1, planes, planes * 4),
            "stride": stride if b == 0 else 1,
            "dilation": dilation,
            "downsample": None,
            "ds_stride": 1,
        }
        if b == 0 and (stride != 1 or in_ch != planes * 4):
            blk["downsample"] = conv_bn_params(jax.random.fold_in(kb, 3), 1, 1,
                                               in_ch, planes * 4)
            blk["ds_stride"] = stride
        layer.append(blk)
        in_ch = planes * 4
    return layer, in_ch


def init_pspnet_params(key, in_c=3, classes=2, bins=(1, 2, 3, 6), width=8):
    # width=8 -> 1/8-scaled ResNet-50 channel widths so the synthetic demo is
    # small; topology (block counts [3,4,6,3], strides, layer3/4 dilation=2/4
    # with stride forced to 1, PPM, cls head) follows PSPNet_of exactly.
    keys = jax.random.split(key, 8)
    params = {}
    params["conv1"] = conv_bn_params(keys[0], 7, 7, in_c, width)
    in_ch = width
    params["layer1"], in_ch = make_layer(keys[1], in_ch, width, 3, 1, 1)
    params["layer2"], in_ch = make_layer(keys[2], in_ch, width * 2, 4, 2, 1)
    params["layer3"], in_ch = make_layer(keys[3], in_ch, width * 4, 6, 1, 2)
    params["layer4"], in_ch = make_layer(keys[4], in_ch, width * 8, 3, 1, 4)
    fea_dim = in_ch                                  # scaled analogue of 2048
    assert fea_dim % len(bins) == 0
    red = fea_dim // len(bins)
    params["ppm"] = [conv_bn_params(jax.random.fold_in(keys[5], i), 1, 1, fea_dim, red)
                     for i in range(len(bins))]
    cls_hidden = width * 8                           # scaled analogue of 512
    params["cls_conv1"] = conv_bn_params(keys[6], 3, 3, fea_dim * 2, cls_hidden)
    kw2, kb2 = jax.random.split(keys[7])
    params["cls_w2"] = (jax.random.normal(kw2, (1, 1, cls_hidden, classes), jnp.float32)
                        * np.sqrt(2.0 / cls_hidden))
    params["cls_b2"] = 0.05 * jax.random.normal(kb2, (classes,), jnp.float32)
    params["bins"] = tuple(bins)
    params["classes"] = classes
    return params


# ----------------------------------------------------------------------------
# Forward pass
# ----------------------------------------------------------------------------

def bottleneck_forward(x, blk):
    out = conv_bn(x, blk["conv1"], relu=True)
    out = conv_bn(out, blk["conv2"], stride=blk["stride"],
                  padding=blk["dilation"], dilation=blk["dilation"], relu=True)
    if blk["downsample"] is not None:
        identity = conv_bn(x, blk["downsample"], stride=blk["ds_stride"], relu=False)
    else:
        identity = x
    # conv3 + BN with residual add + ReLU fused into the matmul epilogue.
    return conv_bn(out, blk["conv3"], relu=True, residual=identity)


def pspnet_forward(params, x_nchw, zoom_factor=8):
    n, _, h_in, w_in = x_nchw.shape
    h_out = int((h_in - 1) / 8 * zoom_factor + 1)
    w_out = int((w_in - 1) / 8 * zoom_factor + 1)
    x = jnp.transpose(x_nchw, (0, 2, 3, 1)).astype(jnp.bfloat16)   # NHWC bf16

    # layer0: conv7x7/s2 + BN + ReLU + maxpool3x3/s2
    x = conv_bn(x, params["conv1"], stride=2, padding=3, relu=True)
    x = maxpool3x3_s2_p1(x)
    for layer in ("layer1", "layer2", "layer3", "layer4"):
        for blk in params[layer]:
            x = bottleneck_forward(x, blk)

    x = ppm_forward(x, params["ppm"], params["bins"])

    # cls head: conv3x3 + BN + ReLU + Dropout2d(identity) + conv1x1(bias)
    x = conv_bn(x, params["cls_conv1"], stride=1, padding=1, dilation=1, relu=True)
    n2, h2, w2, ch = x.shape
    classes = params["classes"]
    y = matmul_affine(x.reshape(n2 * h2 * w2, ch),
                      params["cls_w2"].reshape(ch, classes),
                      jnp.ones((classes,), jnp.float32), params["cls_b2"],
                      relu=False, out_dtype=jnp.float32)
    y = y.reshape(n2, h2, w2, classes)

    if zoom_factor != 1:
        return bilinear_resize_to_nchw(y, h_out, w_out)              # NCHW f32
    return jnp.transpose(y, (0, 3, 1, 2)).astype(jnp.float32)


# ----------------------------------------------------------------------------

if __name__ == "__main__":
    key = jax.random.PRNGKey(0)
    pkey, xkey = jax.random.split(key)
    params = init_pspnet_params(pkey, in_c=3, classes=2, bins=(1, 2, 3, 6), width=8)

    # input: N=2, C=3, H=W=49  ->  layer4/PPM features at 7x7, output 2x2x49x49
    x = jax.random.normal(xkey, (2, 3, 49, 49), jnp.float32)

    fwd = jax.jit(lambda inp: pspnet_forward(params, inp, zoom_factor=8))
    out = jax.block_until_ready(fwd(x))

    assert out.shape == (2, 2, 49, 49), out.shape
    assert bool(jnp.all(jnp.isfinite(out)))
    print("KERNEL_OK")
</pallas_src>

<mosaic_0001>
module attributes {stable_mosaic.version = 11 : i64} {
  func.func @_mm_bn_single_kernel(%arg0: i32, %arg1: i32, %arg2: memref<512x256xbf16, #tpu.memory_space<vmem>>, %arg3: memref<256x128xbf16, #tpu.memory_space<vmem>>, %arg4: memref<1x128xf32, #tpu.memory_space<vmem>>, %arg5: memref<1x128xf32, #tpu.memory_space<vmem>>, %arg6: memref<512x128xbf16, #tpu.memory_space<vmem>>) attributes {dimension_semantics = [#tpu.dimension_semantics<parallel>, #tpu.dimension_semantics<parallel>], iteration_bounds = array<i64: 3, 1>, scalar_prefetch = 0 : i64, scratch_operands = 0 : i64, tpu.core_type = #tpu.core_type<tc>, window_params = [{transform_indices = @transform_0, window_bounds = array<i64: 512, 256>}, {transform_indices = @transform_1, window_bounds = array<i64: 256, 128>}, {transform_indices = @transform_2, window_bounds = array<i64: 1, 128>}, {transform_indices = @transform_3, window_bounds = array<i64: 1, 128>}, {transform_indices = @transform_4, window_bounds = array<i64: 512, 128>}]} {
    %c0 = arith.constant 0 : index
    %c0_0 = arith.constant 0 : index
    %0 = vector.load %arg2[%c0, %c0_0] : memref<512x256xbf16, #tpu.memory_space<vmem>>, vector<512x256xbf16>
    %c0_1 = arith.constant 0 : index
    %c0_2 = arith.constant 0 : index
    %1 = vector.load %arg3[%c0_1, %c0_2] : memref<256x128xbf16, #tpu.memory_space<vmem>>, vector<256x128xbf16>
    %cst = arith.constant dense<0.000000e+00> : vector<512x128xf32>
    %2 = tpu.matmul %0, %1, %cst {dimension_numbers = #tpu.dot_dimension_numbers<[1], [0], [0], [1], [0, 0, 1, 1], [], []>} : vector<512x256xbf16>, vector<256x128xbf16>, vector<512x128xf32> -> vector<512x128xf32>
    %c0_3 = arith.constant 0 : index
    %c0_4 = arith.constant 0 : index
    %3 = vector.load %arg4[%c0_3, %c0_4] : memref<1x128xf32, #tpu.memory_space<vmem>>, vector<1x128xf32>
    %4 = vector.broadcast %3 : vector<1x128xf32> to vector<512x128xf32>
    %5 = arith.mulf %2, %4 : vector<512x128xf32>
    %c0_5 = arith.constant 0 : index
    %c0_6 = arith.constant 0 : index
    %6 = vector.load %arg5[%c0_5, %c0_6] : memref<1x128xf32, #tpu.memory_space<vmem>>, vector<1x128xf32>
    %7 = vector.broadcast %6 : vector<1x128xf32> to vector<512x128xf32>
    %8 = arith.addf %5, %7 : vector<512x128xf32>
    %cst_7 = arith.constant 0.000000e+00 : f32
    %9 = vector.broadcast %cst_7 : f32 to vector<512x128xf32>
    %10 = arith.maximumf %8, %9 : vector<512x128xf32>
    %11 = arith.truncf %10 : vector<512x128xf32> to vector<512x128xbf16>
    %c0_8 = arith.constant 0 : index
    %c0_9 = arith.constant 0 : index
    %12 = vector.load %arg6[%c0_8, %c0_9] : memref<512x128xbf16, #tpu.memory_space<vmem>>, vector<512x128xbf16>
    tpu.vector_store %arg6[%c0_8, %c0_9], %11 {strides = array<i32>} : memref<512x128xbf16, #tpu.memory_space<vmem>>, vector<512x128xbf16>,
    return
  }
  func.func @transform_0(%arg0: i32, %arg1: i32) -> (i32, i32) {
    %c0_i32 = arith.constant 0 : i32
    %c0_i32_0 = arith.constant 0 : i32
    return %arg0, %c0_i32 : i32, i32
  }
  func.func @transform_1(%arg0: i32, %arg1: i32) -> (i32, i32) {
    %c0_i32 = arith.constant 0 : i32
    %c0_i32_0 = arith.constant 0 : i32
    return %c0_i32, %arg1 : i32, i32
  }
  func.func @transform_2(%arg0: i32, %arg1: i32) -> (i32, i32) {
    %c0_i32 = arith.constant 0 : i32
    %c0_i32_0 = arith.constant 0 : i32
    return %c0_i32, %arg1 : i32, i32
  }
  func.func @transform_3(%arg0: i32, %arg1: i32) -> (i32, i32) {
    %c0_i32 = arith.constant 0 : i32
    %c0_i32_0 = arith.constant 0 : i32
    return %c0_i32, %arg1 : i32, i32
  }
  func.func @transform_4(%arg0: i32, %arg1: i32) -> (i32, i32) {
    %c0_i32 = arith.constant 0 : i32
    return %arg0, %arg1 : i32, i32
  }
}

module attributes {stable_mosaic.version = 11 : i64} {
  func.func @_max9_kernel(%arg0: i32, %arg1: memref<32x104xbf16, #tpu.memory_space<vmem>>, %arg2: memref<32x104xbf16, #tpu.memory_space<vmem>>, %arg3: memref<32x104xbf16, #tpu.memory_space<vmem>>, %arg4: memref<32x104xbf16, #tpu.memory_space<vmem>>, %arg5: memref<32x104xbf16, #tpu.memory_space<vmem>>, %arg6: memref<32x104xbf16, #tpu.memory_space<vmem>>, %arg7: memref<32x104xbf16, #tpu.memory_space<vmem>>, %arg8: memref<32x104xbf16, #tpu.memory_space<vmem>>, %arg9: memref<32x104xbf16, #tpu.memory_space<vmem>>, %arg10: memref<32x104xbf16, #tpu.memory_space<vmem>>) attributes {dimension_semantics = [#tpu.dimension_semantics<parallel>], iteration_bounds = array<i64: 1>, scalar_prefetch = 0 : i64, scratch_operands = 0 : i64, tpu.core_type = #tpu.core_type<tc>, window_params = [{transform_indices = @transform_0, window_bounds = array<i64: 32, 104>}, {transform_indices = @transform_1, window_bounds = array<i64: 32, 104>}, {transform_indices = @transform_2, window_bounds = array<i64: 32, 104>}, {transform_indices = @transform_3, window_bounds = array<i64: 32, 104>}, {transform_indices = @transform_4, window_bounds = array<i64: 32, 104>}, {transform_indices = @transform_5, window_bounds = array<i64: 32, 104>}, {transform_indices = @transform_6, window_bounds = array<i64: 32, 104>}, {transform_indices = @transform_7, window_bounds = array<i64: 32, 104>}, {transform_indices = @transform_8, window_bounds = array<i64: 32, 104>}, {transform_indices = @transform_9, window_bounds = array<i64: 32, 104>}]} {
    %c0 = arith.constant 0 : index
    %c0_0 = arith.constant 0 : index
    %0 = vector.load %arg1[%c0, %c0_0] : memref<32x104xbf16, #tpu.memory_space<vmem>>, vector<32x104xbf16>
    %c0_1 = arith.constant 0 : index
    %c0_2 = arith.constant 0 : index
    %1 = vector.load %arg2[%c0_1, %c0_2] : memref<32x104xbf16, #tpu.memory_space<vmem>>, vector<32x104xbf16>
    %2 = arith.maximumf %0, %1 : vector<32x104xbf16>
    %c0_3 = arith.constant 0 : index
    %c0_4 = arith.constant 0 : index
    %3 = vector.load %arg3[%c0_3, %c0_4] : memref<32x104xbf16, #tpu.memory_space<vmem>>, vector<32x104xbf16>
    %4 = arith.maximumf %2, %3 : vector<32x104xbf16>
    %c0_5 = arith.constant 0 : index
    %c0_6 = arith.constant 0 : index
    %5 = vector.load %arg4[%c0_5, %c0_6] : memref<32x104xbf16, #tpu.memory_space<vmem>>, vector<32x104xbf16>
    %6 = arith.maximumf %4, %5 : vector<32x104xbf16>
    %c0_7 = arith.constant 0 : index
    %c0_8 = arith.constant 0 : index
    %7 = vector.load %arg5[%c0_7, %c0_8] : memref<32x104xbf16, #tpu.memory_space<vmem>>, vector<32x104xbf16>
    %8 = arith.maximumf %6, %7 : vector<32x104xbf16>
    %c0_9 = arith.constant 0 : index
    %c0_10 = arith.constant 0 : index
    %9 = vector.load %arg6[%c0_9, %c0_10] : memref<32x104xbf16, #tpu.memory_space<vmem>>, vector<32x104xbf16>
    %10 = arith.maximumf %8, %9 : vector<32x104xbf16>
    %c0_11 = arith.constant 0 : index
    %c0_12 = arith.constant 0 : index
    %11 = vector.load %arg7[%c0_11, %c0_12] : memref<32x104xbf16, #tpu.memory_space<vmem>>, vector<32x104xbf16>
    %12 = arith.maximumf %10, %11 : vector<32x104xbf16>
    %c0_13 = arith.constant 0 : index
    %c0_14 = arith.constant 0 : index
    %13 = vector.load %arg8[%c0_13, %c0_14] : memref<32x104xbf16, #tpu.memory_space<vmem>>, vector<32x104xbf16>
    %14 = arith.maximumf %12, %13 : vector<32x104xbf16>
    %c0_15 = arith.constant 0 : index
    %c0_16 = arith.constant 0 : index
    %15 = vector.load %arg9[%c0_15, %c0_16] : memref<32x104xbf16, #tpu.memory_space<vmem>>, vector<32x104xbf16>
    %16 = arith.maximumf %14, %15 : vector<32x104xbf16>
    %c0_17 = arith.constant 0 : index
    %c0_18 = arith.constant 0 : index
    %17 = vector.load %arg10[%c0_17, %c0_18] : memref<32x104xbf16, #tpu.memory_space<vmem>>, vector<32x104xbf16>
    tpu.vector_store %arg10[%c0_17, %c0_18], %16 {strides = array<i32>} : memref<32x104xbf16, #tpu.memory_space<vmem>>, vector<32x104xbf16>,
    return
  }
  func.func @transform_0(%arg0: i32) -> (i32, i32) {
    %c0_i32 = arith.constant 0 : i32
    %c0_i32_0 = arith.constant 0 : i32
    return %arg0, %c0_i32 : i32, i32
  }
  func.func @transform_1(%arg0: i32) -> (i32, i32) {
    %c0_i32 = arith.constant 0 : i32
    %c0_i32_0 = arith.constant 0 : i32
    return %arg0, %c0_i32 : i32, i32
  }
  func.func @transform_2(%arg0: i32) -> (i32, i32) {
    %c0_i32 = arith.constant 0 : i32
    %c0_i32_0 = arith.constant 0 : i32
    return %arg0, %c0_i32 : i32, i32
  }
  func.func @transform_3(%arg0: i32) -> (i32, i32) {
    %c0_i32 = arith.constant 0 : i32
    %c0_i32_0 = arith.constant 0 : i32
    return %arg0, %c0_i32 : i32, i32
  }
  func.func @transform_4(%arg0: i32) -> (i32, i32) {
    %c0_i32 = arith.constant 0 : i32
    %c0_i32_0 = arith.constant 0 : i32
    return %arg0, %c0_i32 : i32, i32
  }
  func.func @transform_5(%arg0: i32) -> (i32, i32) {
    %c0_i32 = arith.constant 0 : i32
    %c0_i32_0 = arith.constant 0 : i32
    return %arg0, %c0_i32 : i32, i32
  }
  func.func @transform_6(%arg0: i32) -> (i32, i32) {
    %c0_i32 = arith.constant 0 : i32
    %c0_i32_0 = arith.constant 0 : i32
    return %arg0, %c0_i32 : i32, i32
  }
  func.func @transform_7(%arg0: i32) -> (i32, i32) {
    %c0_i32 = arith.constant 0 : i32
    %c0_i32_0 = arith.constant 0 : i32
    return %arg0, %c0_i32 : i32, i32
  }
  func.func @transform_8(%arg0: i32) -> (i32, i32) {
    %c0_i32 = arith.constant 0 : i32
    %c0_i32_0 = arith.constant 0 : i32
    return %arg0, %c0_i32 : i32, i32
  }
  func.func @transform_9(%arg0: i32) -> (i32, i32) {
    %c0_i32 = arith.constant 0 : i32
    %c0_i32_0 = arith.constant 0 : i32
    return %arg0, %c0_i32 : i32, i32
  }
}

module attributes {stable_mosaic.version = 11 : i64} {
  func.func @_mm_bn_single_kernel(%arg0: i32, %arg1: i32, %arg2: memref<344x128xbf16, #tpu.memory_space<vmem>>, %arg3: memref<128x128xbf16, #tpu.memory_space<vmem>>, %arg4: memref<1x128xf32, #tpu.memory_space<vmem>>, %arg5: memref<1x128xf32, #tpu.memory_space<vmem>>, %arg6: memref<344x128xbf16, #tpu.memory_space<vmem>>) attributes {dimension_semantics = [#tpu.dimension_semantics<parallel>, #tpu.dimension_semantics<parallel>], iteration_bounds = array<i64: 1, 1>, scalar_prefetch = 0 : i64, scratch_operands = 0 : i64, tpu.core_type = #tpu.core_type<tc>, window_params = [{transform_indices = @transform_0, window_bounds = array<i64: 344, 128>}, {transform_indices = @transform_1, window_bounds = array<i64: 128, 128>}, {transform_indices = @transform_2, window_bounds = array<i64: 1, 128>}, {transform_indices = @transform_3, window_bounds = array<i64: 1, 128>}, {transform_indices = @transform_4, window_bounds = array<i64: 344, 128>}]} {
    %c0 = arith.constant 0 : index
    %c0_0 = arith.constant 0 : index
    %0 = vector.load %arg2[%c0, %c0_0] : memref<344x128xbf16, #tpu.memory_space<vmem>>, vector<344x128xbf16>
    %c0_1 = arith.constant 0 : index
    %c0_2 = arith.constant 0 : index
    %1 = vector.load %arg3[%c0_1, %c0_2] : memref<128x128xbf16, #tpu.memory_space<vmem>>, vector<128x128xbf16>
    %cst = arith.constant dense<0.000000e+00> : vector<344x128xf32>
    %2 = tpu.matmul %0, %1, %cst {dimension_numbers = #tpu.dot_dimension_numbers<[1], [0], [0], [1], [0, 0, 1, 1], [], []>} : vector<344x128xbf16>, vector<128x128xbf16>, vector<344x128xf32> -> vector<344x128xf32>
    %c0_3 = arith.constant 0 : index
    %c0_4 = arith.constant 0 : index
    %3 = vector.load %arg4[%c0_3, %c0_4] : memref<1x128xf32, #tpu.memory_space<vmem>>, vector<1x128xf32>
    %4 = vector.broadcast %3 : vector<1x128xf32> to vector<344x128xf32>
    %5 = arith.mulf %2, %4 : vector<344x128xf32>
    %c0_5 = arith.constant 0 : index
    %c0_6 = arith.constant 0 : index
    %6 = vector.load %arg5[%c0_5, %c0_6] : memref<1x128xf32, #tpu.memory_space<vmem>>, vector<1x128xf32>
    %7 = vector.broadcast %6 : vector<1x128xf32> to vector<344x128xf32>
    %8 = arith.addf %5, %7 : vector<344x128xf32>
    %cst_7 = arith.constant 0.000000e+00 : f32
    %9 = vector.broadcast %cst_7 : f32 to vector<344x128xf32>
    %10 = arith.maximumf %8, %9 : vector<344x128xf32>
    %11 = arith.truncf %10 : vector<344x128xf32> to vector<344x128xbf16>
    %c0_8 = arith.constant 0 : index
    %c0_9 = arith.constant 0 : index
    %12 = vector.load %arg6[%c0_8, %c0_9] : memref<344x128xbf16, #tpu.memory_space<vmem>>, vector<344x128xbf16>
    tpu.vector_store %arg6[%c0_8, %c0_9], %11 {strides = array<i32>} : memref<344x128xbf16, #tpu.memory_space<vmem>>, vector<344x128xbf16>,
    return
  }
  func.func @transform_0(%arg0: i32, %arg1: i32) -> (i32, i32) {
    %c0_i32 = arith.constant 0 : i32
    %c0_i32_0 = arith.constant 0 : i32
    return %arg0, %c0_i32 : i32, i32
  }
  func.func @transform_1(%arg0: i32, %arg1: i32) -> (i32, i32) {
    %c0_i32 = arith.constant 0 : i32
    %c0_i32_0 = arith.constant 0 : i32
    return %c0_i32, %arg1 : i32, i32
  }
  func.func @transform_2(%arg0: i32, %arg1: i32) -> (i32, i32) {
    %c0_i32 = arith.constant 0 : i32
    %c0_i32_0 = arith.constant 0 : i32
    return %c0_i32, %arg1 : i32, i32
  }
  func.func @transform_3(%arg0: i32, %arg1: i32) -> (i32, i32) {
    %c0_i32 = arith.constant 0 : i32
    %c0_i32_0 = arith.constant 0 : i32
    return %c0_i32, %arg1 : i32, i32
  }
  func.func @transform_4(%arg0: i32, %arg1: i32) -> (i32, i32) {
    %c0_i32 = arith.constant 0 : i32
    return %arg0, %arg1 : i32, i32
  }
}

module attributes {stable_mosaic.version = 11 : i64} {
  func.func @_mm_bn_single_kernel(%arg0: i32, %arg1: i32, %arg2: memref<344x128xbf16, #tpu.memory_space<vmem>>, %arg3: memref<128x128xbf16, #tpu.memory_space<vmem>>, %arg4: memref<1x128xf32, #tpu.memory_space<vmem>>, %arg5: memref<1x128xf32, #tpu.memory_space<vmem>>, %arg6: memref<344x128xbf16, #tpu.memory_space<vmem>>) attributes {dimension_semantics = [#tpu.dimension_semantics<parallel>, #tpu.dimension_semantics<parallel>], iteration_bounds = array<i64: 1, 1>, scalar_prefetch = 0 : i64, scratch_operands = 0 : i64, tpu.core_type = #tpu.core_type<tc>, window_params = [{transform_indices = @transform_0, window_bounds = array<i64: 344, 128>}, {transform_indices = @transform_1, window_bounds = array<i64: 128, 128>}, {transform_indices = @transform_2, window_bounds = array<i64: 1, 128>}, {transform_indices = @transform_3, window_bounds = array<i64: 1, 128>}, {transform_indices = @transform_4, window_bounds = array<i64: 344, 128>}]} {
    %c0 = arith.constant 0 : index
    %c0_0 = arith.constant 0 : index
    %0 = vector.load %arg2[%c0, %c0_0] : memref<344x128xbf16, #tpu.memory_space<vmem>>, vector<344x128xbf16>
    %c0_1 = arith.constant 0 : index
    %c0_2 = arith.constant 0 : index
    %1 = vector.load %arg3[%c0_1, %c0_2] : memref<128x128xbf16, #tpu.memory_space<vmem>>, vector<128x128xbf16>
    %cst = arith.constant dense<0.000000e+00> : vector<344x128xf32>
    %2 = tpu.matmul %0, %1, %cst {dimension_numbers = #tpu.dot_dimension_numbers<[1], [0], [0], [1], [0, 0, 1, 1], [], []>} : vector<344x128xbf16>, vector<128x128xbf16>, vector<344x128xf32> -> vector<344x128xf32>
    %c0_3 = arith.constant 0 : index
    %c0_4 = arith.constant 0 : index
    %3 = vector.load %arg4[%c0_3, %c0_4] : memref<1x128xf32, #tpu.memory_space<vmem>>, vector<1x128xf32>
    %4 = vector.broadcast %3 : vector<1x128xf32> to vector<344x128xf32>
    %5 = arith.mulf %2, %4 : vector<344x128xf32>
    %c0_5 = arith.constant 0 : index
    %c0_6 = arith.constant 0 : index
    %6 = vector.load %arg5[%c0_5, %c0_6] : memref<1x128xf32, #tpu.memory_space<vmem>>, vector<1x128xf32>
    %7 = vector.broadcast %6 : vector<1x128xf32> to vector<344x128xf32>
    %8 = arith.addf %5, %7 : vector<344x128xf32>
    %9 = arith.truncf %8 : vector<344x128xf32> to vector<344x128xbf16>
    %c0_7 = arith.constant 0 : index
    %c0_8 = arith.constant 0 : index
    %10 = vector.load %arg6[%c0_7, %c0_8] : memref<344x128xbf16, #tpu.memory_space<vmem>>, vector<344x128xbf16>
    tpu.vector_store %arg6[%c0_7, %c0_8], %9 {strides = array<i32>} : memref<344x128xbf16, #tpu.memory_space<vmem>>, vector<344x128xbf16>,
    return
  }
  func.func @transform_0(%arg0: i32, %arg1: i32) -> (i32, i32) {
    %c0_i32 = arith.constant 0 : i32
    %c0_i32_0 = arith.constant 0 : i32
    return %arg0, %c0_i32 : i32, i32
  }
  func.func @transform_1(%arg0: i32, %arg1: i32) -> (i32, i32) {
    %c0_i32 = arith.constant 0 : i32
    %c0_i32_0 = arith.constant 0 : i32
    return %c0_i32, %arg1 : i32, i32
  }
  func.func @transform_2(%arg0: i32, %arg1: i32) -> (i32, i32) {
    %c0_i32 = arith.constant 0 : i32
    %c0_i32_0 = arith.constant 0 : i32
    return %c0_i32, %arg1 : i32, i32
  }
  func.func @transform_3(%arg0: i32, %arg1: i32) -> (i32, i32) {
    %c0_i32 = arith.constant 0 : i32
    %c0_i32_0 = arith.constant 0 : i32
    return %c0_i32, %arg1 : i32, i32
  }
  func.func @transform_4(%arg0: i32, %arg1: i32) -> (i32, i32) {
    %c0_i32 = arith.constant 0 : i32
    return %arg0, %arg1 : i32, i32
  }
}

module attributes {stable_mosaic.version = 11 : i64} {
  func.func @_mm_bn_add_relu_single_kernel(%arg0: i32, %arg1: i32, %arg2: memref<344x128xbf16, #tpu.memory_space<vmem>>, %arg3: memref<128x128xbf16, #tpu.memory_space<vmem>>, %arg4: memref<1x128xf32, #tpu.memory_space<vmem>>, %arg5: memref<1x128xf32, #tpu.memory_space<vmem>>, %arg6: memref<344x128xbf16, #tpu.memory_space<vmem>>, %arg7: memref<344x128xbf16, #tpu.memory_space<vmem>>) attributes {dimension_semantics = [#tpu.dimension_semantics<parallel>, #tpu.dimension_semantics<parallel>], iteration_bounds = array<i64: 1, 1>, scalar_prefetch = 0 : i64, scratch_operands = 0 : i64, tpu.core_type = #tpu.core_type<tc>, window_params = [{transform_indices = @transform_0, window_bounds = array<i64: 344, 128>}, {transform_indices = @transform_1, window_bounds = array<i64: 128, 128>}, {transform_indices = @transform_2, window_bounds = array<i64: 1, 128>}, {transform_indices = @transform_3, window_bounds = array<i64: 1, 128>}, {transform_indices = @transform_4, window_bounds = array<i64: 344, 128>}, {transform_indices = @transform_5, window_bounds = array<i64: 344, 128>}]} {
    %c0 = arith.constant 0 : index
    %c0_0 = arith.constant 0 : index
    %0 = vector.load %arg2[%c0, %c0_0] : memref<344x128xbf16, #tpu.memory_space<vmem>>, vector<344x128xbf16>
    %c0_1 = arith.constant 0 : index
    %c0_2 = arith.constant 0 : index
    %1 = vector.load %arg3[%c0_1, %c0_2] : memref<128x128xbf16, #tpu.memory_space<vmem>>, vector<128x128xbf16>
    %cst = arith.constant dense<0.000000e+00> : vector<344x128xf32>
    %2 = tpu.matmul %0, %1, %cst {dimension_numbers = #tpu.dot_dimension_numbers<[1], [0], [0], [1], [0, 0, 1, 1], [], []>} : vector<344x128xbf16>, vector<128x128xbf16>, vector<344x128xf32> -> vector<344x128xf32>
    %c0_3 = arith.constant 0 : index
    %c0_4 = arith.constant 0 : index
    %3 = vector.load %arg4[%c0_3, %c0_4] : memref<1x128xf32, #tpu.memory_space<vmem>>, vector<1x128xf32>
    %4 = vector.broadcast %3 : vector<1x128xf32> to vector<344x128xf32>
    %5 = arith.mulf %2, %4 : vector<344x128xf32>
    %c0_5 = arith.constant 0 : index
    %c0_6 = arith.constant 0 : index
    %6 = vector.load %arg5[%c0_5, %c0_6] : memref<1x128xf32, #tpu.memory_space<vmem>>, vector<1x128xf32>
    %7 = vector.broadcast %6 : vector<1x128xf32> to vector<344x128xf32>
    %8 = arith.addf %5, %7 : vector<344x128xf32>
    %c0_7 = arith.constant 0 : index
    %c0_8 = arith.constant 0 : index
    %9 = vector.load %arg6[%c0_7, %c0_8] : memref<344x128xbf16, #tpu.memory_space<vmem>>, vector<344x128xbf16>
    %10 = arith.extf %9 : vector<344x128xbf16> to vector<344x128xf32>
    %11 = arith.addf %8, %10 : vector<344x128xf32>
    %cst_9 = arith.constant 0.000000e+00 : f32
    %12 = vector.broadcast %cst_9 : f32 to vector<344x128xf32>
    %13 = arith.maximumf %11, %12 : vector<344x128xf32>
    %14 = arith.truncf %13 : vector<344x128xf32> to vector<344x128xbf16>
    %c0_10 = arith.constant 0 : index
    %c0_11 = arith.constant 0 : index
    %15 = vector.load %arg7[%c0_10, %c0_11] : memref<344x128xbf16, #tpu.memory_space<vmem>>, vector<344x128xbf16>
    tpu.vector_store %arg7[%c0_10, %c0_11], %14 {strides = array<i32>} : memref<344x128xbf16, #tpu.memory_space<vmem>>, vector<344x128xbf16>,
    return
  }
  func.func @transform_0(%arg0: i32, %arg1: i32) -> (i32, i32) {
    %c0_i32 = arith.constant 0 : i32
    %c0_i32_0 = arith.constant 0 : i32
    return %arg0, %c0_i32 : i32, i32
  }
  func.func @transform_1(%arg0: i32, %arg1: i32) -> (i32, i32) {
    %c0_i32 = arith.constant 0 : i32
    %c0_i32_0 = arith.constant 0 : i32
    return %c0_i32, %arg1 : i32, i32
  }
  func.func @transform_2(%arg0: i32, %arg1: i32) -> (i32, i32) {
    %c0_i32 = arith.constant 0 : i32
    %c0_i32_0 = arith.constant 0 : i32
    return %c0_i32, %arg1 : i32, i32
  }
  func.func @transform_3(%arg0: i32, %arg1: i32) -> (i32, i32) {
    %c0_i32 = arith.constant 0 : i32
    %c0_i32_0 = arith.constant 0 : i32
    return %c0_i32, %arg1 : i32, i32
  }
  func.func @transform_4(%arg0: i32, %arg1: i32) -> (i32, i32) {
    %c0_i32 = arith.constant 0 : i32
    return %arg0, %arg1 : i32, i32
  }
  func.func @transform_5(%arg0: i32, %arg1: i32) -> (i32, i32) {
    %c0_i32 = arith.constant 0 : i32
    return %arg0, %arg1 : i32, i32
  }
}

module attributes {stable_mosaic.version = 11 : i64} {
  func.func @_mm_bn_single_kernel(%arg0: i32, %arg1: i32, %arg2: memref<104x256xbf16, #tpu.memory_space<vmem>>, %arg3: memref<256x128xbf16, #tpu.memory_space<vmem>>, %arg4: memref<1x128xf32, #tpu.memory_space<vmem>>, %arg5: memref<1x128xf32, #tpu.memory_space<vmem>>, %arg6: memref<104x128xbf16, #tpu.memory_space<vmem>>) attributes {dimension_semantics = [#tpu.dimension_semantics<parallel>, #tpu.dimension_semantics<parallel>], iteration_bounds = array<i64: 1, 1>, scalar_prefetch = 0 : i64, scratch_operands = 0 : i64, tpu.core_type = #tpu.core_type<tc>, window_params = [{transform_indices = @transform_0, window_bounds = array<i64: 104, 256>}, {transform_indices = @transform_1, window_bounds = array<i64: 256, 128>}, {transform_indices = @transform_2, window_bounds = array<i64: 1, 128>}, {transform_indices = @transform_3, window_bounds = array<i64: 1, 128>}, {transform_indices = @transform_4, window_bounds = array<i64: 104, 128>}]} {
    %c0 = arith.constant 0 : index
    %c0_0 = arith.constant 0 : index
    %0 = vector.load %arg2[%c0, %c0_0] : memref<104x256xbf16, #tpu.memory_space<vmem>>, vector<104x256xbf16>
    %c0_1 = arith.constant 0 : index
    %c0_2 = arith.constant 0 : index
    %1 = vector.load %arg3[%c0_1, %c0_2] : memref<256x128xbf16, #tpu.memory_space<vmem>>, vector<256x128xbf16>
    %cst = arith.constant dense<0.000000e+00> : vector<104x128xf32>
    %2 = tpu.matmul %0, %1, %cst {dimension_numbers = #tpu.dot_dimension_numbers<[1], [0], [0], [1], [0, 0, 1, 1], [], []>} : vector<104x256xbf16>, vector<256x128xbf16>, vector<104x128xf32> -> vector<104x128xf32>
    %c0_3 = arith.constant 0 : index
    %c0_4 = arith.constant 0 : index
    %3 = vector.load %arg4[%c0_3, %c0_4] : memref<1x128xf32, #tpu.memory_space<vmem>>, vector<1x128xf32>
    %4 = vector.broadcast %3 : vector<1x128xf32> to vector<104x128xf32>
    %5 = arith.mulf %2, %4 : vector<104x128xf32>
    %c0_5 = arith.constant 0 : index
    %c0_6 = arith.constant 0 : index
    %6 = vector.load %arg5[%c0_5, %c0_6] : memref<1x128xf32, #tpu.memory_space<vmem>>, vector<1x128xf32>
    %7 = vector.broadcast %6 : vector<1x128xf32> to vector<104x128xf32>
    %8 = arith.addf %5, %7 : vector<104x128xf32>
    %cst_7 = arith.constant 0.000000e+00 : f32
    %9 = vector.broadcast %cst_7 : f32 to vector<104x128xf32>
    %10 = arith.maximumf %8, %9 : vector<104x128xf32>
    %11 = arith.truncf %10 : vector<104x128xf32> to vector<104x128xbf16>
    %c0_8 = arith.constant 0 : index
    %c0_9 = arith.constant 0 : index
    %12 = vector.load %arg6[%c0_8, %c0_9] : memref<104x128xbf16, #tpu.memory_space<vmem>>, vector<104x128xbf16>
    tpu.vector_store %arg6[%c0_8, %c0_9], %11 {strides = array<i32>} : memref<104x128xbf16, #tpu.memory_space<vmem>>, vector<104x128xbf16>,
    return
  }
  func.func @transform_0(%arg0: i32, %arg1: i32) -> (i32, i32) {
    %c0_i32 = arith.constant 0 : i32
    %c0_i32_0 = arith.constant 0 : i32
    return %arg0, %c0_i32 : i32, i32
  }
  func.func @transform_1(%arg0: i32, %arg1: i32) -> (i32, i32) {
    %c0_i32 = arith.constant 0 : i32
    %c0_i32_0 = arith.constant 0 : i32
    return %c0_i32, %arg1 : i32, i32
  }
  func.func @transform_2(%arg0: i32, %arg1: i32) -> (i32, i32) {
    %c0_i32 = arith.constant 0 : i32
    %c0_i32_0 = arith.constant 0 : i32
    return %c0_i32, %arg1 : i32, i32
  }
  func.func @transform_3(%arg0: i32, %arg1: i32) -> (i32, i32) {
    %c0_i32 = arith.constant 0 : i32
    %c0_i32_0 = arith.constant 0 : i32
    return %c0_i32, %arg1 : i32, i32
  }
  func.func @transform_4(%arg0: i32, %arg1: i32) -> (i32, i32) {
    %c0_i32 = arith.constant 0 : i32
    return %arg0, %arg1 : i32, i32
  }
}

module attributes {stable_mosaic.version = 11 : i64} {
  func.func @_mm_bn_single_kernel(%arg0: i32, %arg1: i32, %arg2: memref<104x128xbf16, #tpu.memory_space<vmem>>, %arg3: memref<128x128xbf16, #tpu.memory_space<vmem>>, %arg4: memref<1x128xf32, #tpu.memory_space<vmem>>, %arg5: memref<1x128xf32, #tpu.memory_space<vmem>>, %arg6: memref<104x128xbf16, #tpu.memory_space<vmem>>) attributes {dimension_semantics = [#tpu.dimension_semantics<parallel>, #tpu.dimension_semantics<parallel>], iteration_bounds = array<i64: 1, 1>, scalar_prefetch = 0 : i64, scratch_operands = 0 : i64, tpu.core_type = #tpu.core_type<tc>, window_params = [{transform_indices = @transform_0, window_bounds = array<i64: 104, 128>}, {transform_indices = @transform_1, window_bounds = array<i64: 128, 128>}, {transform_indices = @transform_2, window_bounds = array<i64: 1, 128>}, {transform_indices = @transform_3, window_bounds = array<i64: 1, 128>}, {transform_indices = @transform_4, window_bounds = array<i64: 104, 128>}]} {
    %c0 = arith.constant 0 : index
    %c0_0 = arith.constant 0 : index
    %0 = vector.load %arg2[%c0, %c0_0] : memref<104x128xbf16, #tpu.memory_space<vmem>>, vector<104x128xbf16>
    %c0_1 = arith.constant 0 : index
    %c0_2 = arith.constant 0 : index
    %1 = vector.load %arg3[%c0_1, %c0_2] : memref<128x128xbf16, #tpu.memory_space<vmem>>, vector<128x128xbf16>
    %cst = arith.constant dense<0.000000e+00> : vector<104x128xf32>
    %2 = tpu.matmul %0, %1, %cst {dimension_numbers = #tpu.dot_dimension_numbers<[1], [0], [0], [1], [0, 0, 1, 1], [], []>} : vector<104x128xbf16>, vector<128x128xbf16>, vector<104x128xf32> -> vector<104x128xf32>
    %c0_3 = arith.constant 0 : index
    %c0_4 = arith.constant 0 : index
    %3 = vector.load %arg4[%c0_3, %c0_4] : memref<1x128xf32, #tpu.memory_space<vmem>>, vector<1x128xf32>
    %4 = vector.broadcast %3 : vector<1x128xf32> to vector<104x128xf32>
    %5 = arith.mulf %2, %4 : vector<104x128xf32>
    %c0_5 = arith.constant 0 : index
    %c0_6 = arith.constant 0 : index
    %6 = vector.load %arg5[%c0_5, %c0_6] : memref<1x128xf32, #tpu.memory_space<vmem>>, vector<1x128xf32>
    %7 = vector.broadcast %6 : vector<1x128xf32> to vector<104x128xf32>
    %8 = arith.addf %5, %7 : vector<104x128xf32>
    %9 = arith.truncf %8 : vector<104x128xf32> to vector<104x128xbf16>
    %c0_7 = arith.constant 0 : index
    %c0_8 = arith.constant 0 : index
    %10 = vector.load %arg6[%c0_7, %c0_8] : memref<104x128xbf16, #tpu.memory_space<vmem>>, vector<104x128xbf16>
    tpu.vector_store %arg6[%c0_7, %c0_8], %9 {strides = array<i32>} : memref<104x128xbf16, #tpu.memory_space<vmem>>, vector<104x128xbf16>,
    return
  }
  func.func @transform_0(%arg0: i32, %arg1: i32) -> (i32, i32) {
    %c0_i32 = arith.constant 0 : i32
    %c0_i32_0 = arith.constant 0 : i32
    return %arg0, %c0_i32 : i32, i32
  }
  func.func @transform_1(%arg0: i32, %arg1: i32) -> (i32, i32) {
    %c0_i32 = arith.constant 0 : i32
    %c0_i32_0 = arith.constant 0 : i32
    return %c0_i32, %arg1 : i32, i32
  }
  func.func @transform_2(%arg0: i32, %arg1: i32) -> (i32, i32) {
    %c0_i32 = arith.constant 0 : i32
    %c0_i32_0 = arith.constant 0 : i32
    return %c0_i32, %arg1 : i32, i32
  }
  func.func @transform_3(%arg0: i32, %arg1: i32) -> (i32, i32) {
    %c0_i32 = arith.constant 0 : i32
    %c0_i32_0 = arith.constant 0 : i32
    return %c0_i32, %arg1 : i32, i32
  }
  func.func @transform_4(%arg0: i32, %arg1: i32) -> (i32, i32) {
    %c0_i32 = arith.constant 0 : i32
    return %arg0, %arg1 : i32, i32
  }
}

module attributes {stable_mosaic.version = 11 : i64} {
  func.func @_mm_bn_add_relu_single_kernel(%arg0: i32, %arg1: i32, %arg2: memref<104x128xbf16, #tpu.memory_space<vmem>>, %arg3: memref<128x128xbf16, #tpu.memory_space<vmem>>, %arg4: memref<1x128xf32, #tpu.memory_space<vmem>>, %arg5: memref<1x128xf32, #tpu.memory_space<vmem>>, %arg6: memref<104x128xbf16, #tpu.memory_space<vmem>>, %arg7: memref<104x128xbf16, #tpu.memory_space<vmem>>) attributes {dimension_semantics = [#tpu.dimension_semantics<parallel>, #tpu.dimension_semantics<parallel>], iteration_bounds = array<i64: 1, 1>, scalar_prefetch = 0 : i64, scratch_operands = 0 : i64, tpu.core_type = #tpu.core_type<tc>, window_params = [{transform_indices = @transform_0, window_bounds = array<i64: 104, 128>}, {transform_indices = @transform_1, window_bounds = array<i64: 128, 128>}, {transform_indices = @transform_2, window_bounds = array<i64: 1, 128>}, {transform_indices = @transform_3, window_bounds = array<i64: 1, 128>}, {transform_indices = @transform_4, window_bounds = array<i64: 104, 128>}, {transform_indices = @transform_5, window_bounds = array<i64: 104, 128>}]} {
    %c0 = arith.constant 0 : index
    %c0_0 = arith.constant 0 : index
    %0 = vector.load %arg2[%c0, %c0_0] : memref<104x128xbf16, #tpu.memory_space<vmem>>, vector<104x128xbf16>
    %c0_1 = arith.constant 0 : index
    %c0_2 = arith.constant 0 : index
    %1 = vector.load %arg3[%c0_1, %c0_2] : memref<128x128xbf16, #tpu.memory_space<vmem>>, vector<128x128xbf16>
    %cst = arith.constant dense<0.000000e+00> : vector<104x128xf32>
    %2 = tpu.matmul %0, %1, %cst {dimension_numbers = #tpu.dot_dimension_numbers<[1], [0], [0], [1], [0, 0, 1, 1], [], []>} : vector<104x128xbf16>, vector<128x128xbf16>, vector<104x128xf32> -> vector<104x128xf32>
    %c0_3 = arith.constant 0 : index
    %c0_4 = arith.constant 0 : index
    %3 = vector.load %arg4[%c0_3, %c0_4] : memref<1x128xf32, #tpu.memory_space<vmem>>, vector<1x128xf32>
    %4 = vector.broadcast %3 : vector<1x128xf32> to vector<104x128xf32>
    %5 = arith.mulf %2, %4 : vector<104x128xf32>
    %c0_5 = arith.constant 0 : index
    %c0_6 = arith.constant 0 : index
    %6 = vector.load %arg5[%c0_5, %c0_6] : memref<1x128xf32, #tpu.memory_space<vmem>>, vector<1x128xf32>
    %7 = vector.broadcast %6 : vector<1x128xf32> to vector<104x128xf32>
    %8 = arith.addf %5, %7 : vector<104x128xf32>
    %c0_7 = arith.constant 0 : index
    %c0_8 = arith.constant 0 : index
    %9 = vector.load %arg6[%c0_7, %c0_8] : memref<104x128xbf16, #tpu.memory_space<vmem>>, vector<104x128xbf16>
    %10 = arith.extf %9 : vector<104x128xbf16> to vector<104x128xf32>
    %11 = arith.addf %8, %10 : vector<104x128xf32>
    %cst_9 = arith.constant 0.000000e+00 : f32
    %12 = vector.broadcast %cst_9 : f32 to vector<104x128xf32>
    %13 = arith.maximumf %11, %12 : vector<104x128xf32>
    %14 = arith.truncf %13 : vector<104x128xf32> to vector<104x128xbf16>
    %c0_10 = arith.constant 0 : index
    %c0_11 = arith.constant 0 : index
    %15 = vector.load %arg7[%c0_10, %c0_11] : memref<104x128xbf16, #tpu.memory_space<vmem>>, vector<104x128xbf16>
    tpu.vector_store %arg7[%c0_10, %c0_11], %14 {strides = array<i32>} : memref<104x128xbf16, #tpu.memory_space<vmem>>, vector<104x128xbf16>,
    return
  }
  func.func @transform_0(%arg0: i32, %arg1: i32) -> (i32, i32) {
    %c0_i32 = arith.constant 0 : i32
    %c0_i32_0 = arith.constant 0 : i32
    return %arg0, %c0_i32 : i32, i32
  }
  func.func @transform_1(%arg0: i32, %arg1: i32) -> (i32, i32) {
    %c0_i32 = arith.constant 0 : i32
    %c0_i32_0 = arith.constant 0 : i32
    return %c0_i32, %arg1 : i32, i32
  }
  func.func @transform_2(%arg0: i32, %arg1: i32) -> (i32, i32) {
    %c0_i32 = arith.constant 0 : i32
    %c0_i32_0 = arith.constant 0 : i32
    return %c0_i32, %arg1 : i32, i32
  }
  func.func @transform_3(%arg0: i32, %arg1: i32) -> (i32, i32) {
    %c0_i32 = arith.constant 0 : i32
    %c0_i32_0 = arith.constant 0 : i32
    return %c0_i32, %arg1 : i32, i32
  }
  func.func @transform_4(%arg0: i32, %arg1: i32) -> (i32, i32) {
    %c0_i32 = arith.constant 0 : i32
    return %arg0, %arg1 : i32, i32
  }
  func.func @transform_5(%arg0: i32, %arg1: i32) -> (i32, i32) {
    %c0_i32 = arith.constant 0 : i32
    return %arg0, %arg1 : i32, i32
  }
}

module attributes {stable_mosaic.version = 11 : i64} {
  func.func @_mm_bn_single_kernel(%arg0: i32, %arg1: i32, %arg2: memref<104x128xbf16, #tpu.memory_space<vmem>>, %arg3: memref<128x128xbf16, #tpu.memory_space<vmem>>, %arg4: memref<1x128xf32, #tpu.memory_space<vmem>>, %arg5: memref<1x128xf32, #tpu.memory_space<vmem>>, %arg6: memref<104x128xbf16, #tpu.memory_space<vmem>>) attributes {dimension_semantics = [#tpu.dimension_semantics<parallel>, #tpu.dimension_semantics<parallel>], iteration_bounds = array<i64: 1, 1>, scalar_prefetch = 0 : i64, scratch_operands = 0 : i64, tpu.core_type = #tpu.core_type<tc>, window_params = [{transform_indices = @transform_0, window_bounds = array<i64: 104, 128>}, {transform_indices = @transform_1, window_bounds = array<i64: 128, 128>}, {transform_indices = @transform_2, window_bounds = array<i64: 1, 128>}, {transform_indices = @transform_3, window_bounds = array<i64: 1, 128>}, {transform_indices = @transform_4, window_bounds = array<i64: 104, 128>}]} {
    %c0 = arith.constant 0 : index
    %c0_0 = arith.constant 0 : index
    %0 = vector.load %arg2[%c0, %c0_0] : memref<104x128xbf16, #tpu.memory_space<vmem>>, vector<104x128xbf16>
    %c0_1 = arith.constant 0 : index
    %c0_2 = arith.constant 0 : index
    %1 = vector.load %arg3[%c0_1, %c0_2] : memref<128x128xbf16, #tpu.memory_space<vmem>>, vector<128x128xbf16>
    %cst = arith.constant dense<0.000000e+00> : vector<104x128xf32>
    %2 = tpu.matmul %0, %1, %cst {dimension_numbers = #tpu.dot_dimension_numbers<[1], [0], [0], [1], [0, 0, 1, 1], [], []>} : vector<104x128xbf16>, vector<128x128xbf16>, vector<104x128xf32> -> vector<104x128xf32>
    %c0_3 = arith.constant 0 : index
    %c0_4 = arith.constant 0 : index
    %3 = vector.load %arg4[%c0_3, %c0_4] : memref<1x128xf32, #tpu.memory_space<vmem>>, vector<1x128xf32>
    %4 = vector.broadcast %3 : vector<1x128xf32> to vector<104x128xf32>
    %5 = arith.mulf %2, %4 : vector<104x128xf32>
    %c0_5 = arith.constant 0 : index
    %c0_6 = arith.constant 0 : index
    %6 = vector.load %arg5[%c0_5, %c0_6] : memref<1x128xf32, #tpu.memory_space<vmem>>, vector<1x128xf32>
    %7 = vector.broadcast %6 : vector<1x128xf32> to vector<104x128xf32>
    %8 = arith.addf %5, %7 : vector<104x128xf32>
    %cst_7 = arith.constant 0.000000e+00 : f32
    %9 = vector.broadcast %cst_7 : f32 to vector<104x128xf32>
    %10 = arith.maximumf %8, %9 : vector<104x128xf32>
    %11 = arith.truncf %10 : vector<104x128xf32> to vector<104x128xbf16>
    %c0_8 = arith.constant 0 : index
    %c0_9 = arith.constant 0 : index
    %12 = vector.load %arg6[%c0_8, %c0_9] : memref<104x128xbf16, #tpu.memory_space<vmem>>, vector<104x128xbf16>
    tpu.vector_store %arg6[%c0_8, %c0_9], %11 {strides = array<i32>} : memref<104x128xbf16, #tpu.memory_space<vmem>>, vector<104x128xbf16>,
    return
  }
  func.func @transform_0(%arg0: i32, %arg1: i32) -> (i32, i32) {
    %c0_i32 = arith.constant 0 : i32
    %c0_i32_0 = arith.constant 0 : i32
    return %arg0, %c0_i32 : i32, i32
  }
  func.func @transform_1(%arg0: i32, %arg1: i32) -> (i32, i32) {
    %c0_i32 = arith.constant 0 : i32
    %c0_i32_0 = arith.constant 0 : i32
    return %c0_i32, %arg1 : i32, i32
  }
  func.func @transform_2(%arg0: i32, %arg1: i32) -> (i32, i32) {
    %c0_i32 = arith.constant 0 : i32
    %c0_i32_0 = arith.constant 0 : i32
    return %c0_i32, %arg1 : i32, i32
  }
  func.func @transform_3(%arg0: i32, %arg1: i32) -> (i32, i32) {
    %c0_i32 = arith.constant 0 : i32
    %c0_i32_0 = arith.constant 0 : i32
    return %c0_i32, %arg1 : i32, i32
  }
  func.func @transform_4(%arg0: i32, %arg1: i32) -> (i32, i32) {
    %c0_i32 = arith.constant 0 : i32
    return %arg0, %arg1 : i32, i32
  }
}

module attributes {stable_mosaic.version = 11 : i64} {
  func.func @_mm_bn_single_kernel(%arg0: i32, %arg1: i32, %arg2: memref<104x384xbf16, #tpu.memory_space<vmem>>, %arg3: memref<384x128xbf16, #tpu.memory_space<vmem>>, %arg4: memref<1x128xf32, #tpu.memory_space<vmem>>, %arg5: memref<1x128xf32, #tpu.memory_space<vmem>>, %arg6: memref<104x128xbf16, #tpu.memory_space<vmem>>) attributes {dimension_semantics = [#tpu.dimension_semantics<parallel>, #tpu.dimension_semantics<parallel>], iteration_bounds = array<i64: 1, 1>, scalar_prefetch = 0 : i64, scratch_operands = 0 : i64, tpu.core_type = #tpu.core_type<tc>, window_params = [{transform_indices = @transform_0, window_bounds = array<i64: 104, 384>}, {transform_indices = @transform_1, window_bounds = array<i64: 384, 128>}, {transform_indices = @transform_2, window_bounds = array<i64: 1, 128>}, {transform_indices = @transform_3, window_bounds = array<i64: 1, 128>}, {transform_indices = @transform_4, window_bounds = array<i64: 104, 128>}]} {
    %c0 = arith.constant 0 : index
    %c0_0 = arith.constant 0 : index
    %0 = vector.load %arg2[%c0, %c0_0] : memref<104x384xbf16, #tpu.memory_space<vmem>>, vector<104x384xbf16>
    %c0_1 = arith.constant 0 : index
    %c0_2 = arith.constant 0 : index
    %1 = vector.load %arg3[%c0_1, %c0_2] : memref<384x128xbf16, #tpu.memory_space<vmem>>, vector<384x128xbf16>
    %cst = arith.constant dense<0.000000e+00> : vector<104x128xf32>
    %2 = tpu.matmul %0, %1, %cst {dimension_numbers = #tpu.dot_dimension_numbers<[1], [0], [0], [1], [0, 0, 1, 1], [], []>} : vector<104x384xbf16>, vector<384x128xbf16>, vector<104x128xf32> -> vector<104x128xf32>
    %c0_3 = arith.constant 0 : index
    %c0_4 = arith.constant 0 : index
    %3 = vector.load %arg4[%c0_3, %c0_4] : memref<1x128xf32, #tpu.memory_space<vmem>>, vector<1x128xf32>
    %4 = vector.broadcast %3 : vector<1x128xf32> to vector<104x128xf32>
    %5 = arith.mulf %2, %4 : vector<104x128xf32>
    %c0_5 = arith.constant 0 : index
    %c0_6 = arith.constant 0 : index
    %6 = vector.load %arg5[%c0_5, %c0_6] : memref<1x128xf32, #tpu.memory_space<vmem>>, vector<1x128xf32>
    %7 = vector.broadcast %6 : vector<1x128xf32> to vector<104x128xf32>
    %8 = arith.addf %5, %7 : vector<104x128xf32>
    %cst_7 = arith.constant 0.000000e+00 : f32
    %9 = vector.broadcast %cst_7 : f32 to vector<104x128xf32>
    %10 = arith.maximumf %8, %9 : vector<104x128xf32>
    %11 = arith.truncf %10 : vector<104x128xf32> to vector<104x128xbf16>
    %c0_8 = arith.constant 0 : index
    %c0_9 = arith.constant 0 : index
    %12 = vector.load %arg6[%c0_8, %c0_9] : memref<104x128xbf16, #tpu.memory_space<vmem>>, vector<104x128xbf16>
    tpu.vector_store %arg6[%c0_8, %c0_9], %11 {strides = array<i32>} : memref<104x128xbf16, #tpu.memory_space<vmem>>, vector<104x128xbf16>,
    return
  }
  func.func @transform_0(%arg0: i32, %arg1: i32) -> (i32, i32) {
    %c0_i32 = arith.constant 0 : i32
    %c0_i32_0 = arith.constant 0 : i32
    return %arg0, %c0_i32 : i32, i32
  }
  func.func @transform_1(%arg0: i32, %arg1: i32) -> (i32, i32) {
    %c0_i32 = arith.constant 0 : i32
    %c0_i32_0 = arith.constant 0 : i32
    return %c0_i32, %arg1 : i32, i32
  }
  func.func @transform_2(%arg0: i32, %arg1: i32) -> (i32, i32) {
    %c0_i32 = arith.constant 0 : i32
    %c0_i32_0 = arith.constant 0 : i32
    return %c0_i32, %arg1 : i32, i32
  }
  func.func @transform_3(%arg0: i32, %arg1: i32) -> (i32, i32) {
    %c0_i32 = arith.constant 0 : i32
    %c0_i32_0 = arith.constant 0 : i32
    return %c0_i32, %arg1 : i32, i32
  }
  func.func @transform_4(%arg0: i32, %arg1: i32) -> (i32, i32) {
    %c0_i32 = arith.constant 0 : i32
    return %arg0, %arg1 : i32, i32
  }
}

module attributes {stable_mosaic.version = 11 : i64} {
  func.func @_mm_bn_single_kernel(%arg0: i32, %arg1: i32, %arg2: memref<104x640xbf16, #tpu.memory_space<vmem>>, %arg3: memref<640x128xbf16, #tpu.memory_space<vmem>>, %arg4: memref<1x128xf32, #tpu.memory_space<vmem>>, %arg5: memref<1x128xf32, #tpu.memory_space<vmem>>, %arg6: memref<104x128xbf16, #tpu.memory_space<vmem>>) attributes {dimension_semantics = [#tpu.dimension_semantics<parallel>, #tpu.dimension_semantics<parallel>], iteration_bounds = array<i64: 1, 1>, scalar_prefetch = 0 : i64, scratch_operands = 0 : i64, tpu.core_type = #tpu.core_type<tc>, window_params = [{transform_indices = @transform_0, window_bounds = array<i64: 104, 640>}, {transform_indices = @transform_1, window_bounds = array<i64: 640, 128>}, {transform_indices = @transform_2, window_bounds = array<i64: 1, 128>}, {transform_indices = @transform_3, window_bounds = array<i64: 1, 128>}, {transform_indices = @transform_4, window_bounds = array<i64: 104, 128>}]} {
    %c0 = arith.constant 0 : index
    %c0_0 = arith.constant 0 : index
    %0 = vector.load %arg2[%c0, %c0_0] : memref<104x640xbf16, #tpu.memory_space<vmem>>, vector<104x640xbf16>
    %c0_1 = arith.constant 0 : index
    %c0_2 = arith.constant 0 : index
    %1 = vector.load %arg3[%c0_1, %c0_2] : memref<640x128xbf16, #tpu.memory_space<vmem>>, vector<640x128xbf16>
    %cst = arith.constant dense<0.000000e+00> : vector<104x128xf32>
    %2 = tpu.matmul %0, %1, %cst {dimension_numbers = #tpu.dot_dimension_numbers<[1], [0], [0], [1], [0, 0, 1, 1], [], []>} : vector<104x640xbf16>, vector<640x128xbf16>, vector<104x128xf32> -> vector<104x128xf32>
    %c0_3 = arith.constant 0 : index
    %c0_4 = arith.constant 0 : index
    %3 = vector.load %arg4[%c0_3, %c0_4] : memref<1x128xf32, #tpu.memory_space<vmem>>, vector<1x128xf32>
    %4 = vector.broadcast %3 : vector<1x128xf32> to vector<104x128xf32>
    %5 = arith.mulf %2, %4 : vector<104x128xf32>
    %c0_5 = arith.constant 0 : index
    %c0_6 = arith.constant 0 : index
    %6 = vector.load %arg5[%c0_5, %c0_6] : memref<1x128xf32, #tpu.memory_space<vmem>>, vector<1x128xf32>
    %7 = vector.broadcast %6 : vector<1x128xf32> to vector<104x128xf32>
    %8 = arith.addf %5, %7 : vector<104x128xf32>
    %cst_7 = arith.constant 0.000000e+00 : f32
    %9 = vector.broadcast %cst_7 : f32 to vector<104x128xf32>
    %10 = arith.maximumf %8, %9 : vector<104x128xf32>
    %11 = arith.truncf %10 : vector<104x128xf32> to vector<104x128xbf16>
    %c0_8 = arith.constant 0 : index
    %c0_9 = arith.constant 0 : index
    %12 = vector.load %arg6[%c0_8, %c0_9] : memref<104x128xbf16, #tpu.memory_space<vmem>>, vector<104x128xbf16>
    tpu.vector_store %arg6[%c0_8, %c0_9], %11 {strides = array<i32>} : memref<104x128xbf16, #tpu.memory_space<vmem>>, vector<104x128xbf16>,
    return
  }
  func.func @transform_0(%arg0: i32, %arg1: i32) -> (i32, i32) {
    %c0_i32 = arith.constant 0 : i32
    %c0_i32_0 = arith.constant 0 : i32
    return %arg0, %c0_i32 : i32, i32
  }
  func.func @transform_1(%arg0: i32, %arg1: i32) -> (i32, i32) {
    %c0_i32 = arith.constant 0 : i32
    %c0_i32_0 = arith.constant 0 : i32
    return %c0_i32, %arg1 : i32, i32
  }
  func.func @transform_2(%arg0: i32, %arg1: i32) -> (i32, i32) {
    %c0_i32 = arith.constant 0 : i32
    %c0_i32_0 = arith.constant 0 : i32
    return %c0_i32, %arg1 : i32, i32
  }
  func.func @transform_3(%arg0: i32, %arg1: i32) -> (i32, i32) {
    %c0_i32 = arith.constant 0 : i32
    %c0_i32_0 = arith.constant 0 : i32
    return %c0_i32, %arg1 : i32, i32
  }
  func.func @transform_4(%arg0: i32, %arg1: i32) -> (i32, i32) {
    %c0_i32 = arith.constant 0 : i32
    return %arg0, %arg1 : i32, i32
  }
}

module attributes {stable_mosaic.version = 11 : i64} {
  func.func @_mm_bn_single_kernel(%arg0: i32, %arg1: i32, %arg2: memref<104x128xbf16, #tpu.memory_space<vmem>>, %arg3: memref<128x256xbf16, #tpu.memory_space<vmem>>, %arg4: memref<1x256xf32, #tpu.memory_space<vmem>>, %arg5: memref<1x256xf32, #tpu.memory_space<vmem>>, %arg6: memref<104x256xbf16, #tpu.memory_space<vmem>>) attributes {dimension_semantics = [#tpu.dimension_semantics<parallel>, #tpu.dimension_semantics<parallel>], iteration_bounds = array<i64: 1, 1>, scalar_prefetch = 0 : i64, scratch_operands = 0 : i64, tpu.core_type = #tpu.core_type<tc>, window_params = [{transform_indices = @transform_0, window_bounds = array<i64: 104, 128>}, {transform_indices = @transform_1, window_bounds = array<i64: 128, 256>}, {transform_indices = @transform_2, window_bounds = array<i64: 1, 256>}, {transform_indices = @transform_3, window_bounds = array<i64: 1, 256>}, {transform_indices = @transform_4, window_bounds = array<i64: 104, 256>}]} {
    %c0 = arith.constant 0 : index
    %c0_0 = arith.constant 0 : index
    %0 = vector.load %arg2[%c0, %c0_0] : memref<104x128xbf16, #tpu.memory_space<vmem>>, vector<104x128xbf16>
    %c0_1 = arith.constant 0 : index
    %c0_2 = arith.constant 0 : index
    %1 = vector.load %arg3[%c0_1, %c0_2] : memref<128x256xbf16, #tpu.memory_space<vmem>>, vector<128x256xbf16>
    %cst = arith.constant dense<0.000000e+00> : vector<104x256xf32>
    %2 = tpu.matmul %0, %1, %cst {dimension_numbers = #tpu.dot_dimension_numbers<[1], [0], [0], [1], [0, 0, 1, 1], [], []>} : vector<104x128xbf16>, vector<128x256xbf16>, vector<104x256xf32> -> vector<104x256xf32>
    %c0_3 = arith.constant 0 : index
    %c0_4 = arith.constant 0 : index
    %3 = vector.load %arg4[%c0_3, %c0_4] : memref<1x256xf32, #tpu.memory_space<vmem>>, vector<1x256xf32>
    %4 = vector.broadcast %3 : vector<1x256xf32> to vector<104x256xf32>
    %5 = arith.mulf %2, %4 : vector<104x256xf32>
    %c0_5 = arith.constant 0 : index
    %c0_6 = arith.constant 0 : index
    %6 = vector.load %arg5[%c0_5, %c0_6] : memref<1x256xf32, #tpu.memory_space<vmem>>, vector<1x256xf32>
    %7 = vector.broadcast %6 : vector<1x256xf32> to vector<104x256xf32>
    %8 = arith.addf %5, %7 : vector<104x256xf32>
    %9 = arith.truncf %8 : vector<104x256xf32> to vector<104x256xbf16>
    %c0_7 = arith.constant 0 : index
    %c0_8 = arith.constant 0 : index
    %10 = vector.load %arg6[%c0_7, %c0_8] : memref<104x256xbf16, #tpu.memory_space<vmem>>, vector<104x256xbf16>
    tpu.vector_store %arg6[%c0_7, %c0_8], %9 {strides = array<i32>} : memref<104x256xbf16, #tpu.memory_space<vmem>>, vector<104x256xbf16>,
    return
  }
  func.func @transform_0(%arg0: i32, %arg1: i32) -> (i32, i32) {
    %c0_i32 = arith.constant 0 : i32
    %c0_i32_0 = arith.constant 0 : i32
    return %arg0, %c0_i32 : i32, i32
  }
  func.func @transform_1(%arg0: i32, %arg1: i32) -> (i32, i32) {
    %c0_i32 = arith.constant 0 : i32
    %c0_i32_0 = arith.constant 0 : i32
    return %c0_i32, %arg1 : i32, i32
  }
  func.func @transform_2(%arg0: i32, %arg1: i32) -> (i32, i32) {
    %c0_i32 = arith.constant 0 : i32
    %c0_i32_0 = arith.constant 0 : i32
    return %c0_i32, %arg1 : i32, i32
  }
  func.func @transform_3(%arg0: i32, %arg1: i32) -> (i32, i32) {
    %c0_i32 = arith.constant 0 : i32
    %c0_i32_0 = arith.constant 0 : i32
    return %c0_i32, %arg1 : i32, i32
  }
  func.func @transform_4(%arg0: i32, %arg1: i32) -> (i32, i32) {
    %c0_i32 = arith.constant 0 : i32
    return %arg0, %arg1 : i32, i32
  }
}

module attributes {stable_mosaic.version = 11 : i64} {
  func.func @_mm_bn_add_relu_single_kernel(%arg0: i32, %arg1: i32, %arg2: memref<104x128xbf16, #tpu.memory_space<vmem>>, %arg3: memref<128x256xbf16, #tpu.memory_space<vmem>>, %arg4: memref<1x256xf32, #tpu.memory_space<vmem>>, %arg5: memref<1x256xf32, #tpu.memory_space<vmem>>, %arg6: memref<104x256xbf16, #tpu.memory_space<vmem>>, %arg7: memref<104x256xbf16, #tpu.memory_space<vmem>>) attributes {dimension_semantics = [#tpu.dimension_semantics<parallel>, #tpu.dimension_semantics<parallel>], iteration_bounds = array<i64: 1, 1>, scalar_prefetch = 0 : i64, scratch_operands = 0 : i64, tpu.core_type = #tpu.core_type<tc>, window_params = [{transform_indices = @transform_0, window_bounds = array<i64: 104, 128>}, {transform_indices = @transform_1, window_bounds = array<i64: 128, 256>}, {transform_indices = @transform_2, window_bounds = array<i64: 1, 256>}, {transform_indices = @transform_3, window_bounds = array<i64: 1, 256>}, {transform_indices = @transform_4, window_bounds = array<i64: 104, 256>}, {transform_indices = @transform_5, window_bounds = array<i64: 104, 256>}]} {
    %c0 = arith.constant 0 : index
    %c0_0 = arith.constant 0 : index
    %0 = vector.load %arg2[%c0, %c0_0] : memref<104x128xbf16, #tpu.memory_space<vmem>>, vector<104x128xbf16>
    %c0_1 = arith.constant 0 : index
    %c0_2 = arith.constant 0 : index
    %1 = vector.load %arg3[%c0_1, %c0_2] : memref<128x256xbf16, #tpu.memory_space<vmem>>, vector<128x256xbf16>
    %cst = arith.constant dense<0.000000e+00> : vector<104x256xf32>
    %2 = tpu.matmul %0, %1, %cst {dimension_numbers = #tpu.dot_dimension_numbers<[1], [0], [0], [1], [0, 0, 1, 1], [], []>} : vector<104x128xbf16>, vector<128x256xbf16>, vector<104x256xf32> -> vector<104x256xf32>
    %c0_3 = arith.constant 0 : index
    %c0_4 = arith.constant 0 : index
    %3 = vector.load %arg4[%c0_3, %c0_4] : memref<1x256xf32, #tpu.memory_space<vmem>>, vector<1x256xf32>
    %4 = vector.broadcast %3 : vector<1x256xf32> to vector<104x256xf32>
    %5 = arith.mulf %2, %4 : vector<104x256xf32>
    %c0_5 = arith.constant 0 : index
    %c0_6 = arith.constant 0 : index
    %6 = vector.load %arg5[%c0_5, %c0_6] : memref<1x256xf32, #tpu.memory_space<vmem>>, vector<1x256xf32>
    %7 = vector.broadcast %6 : vector<1x256xf32> to vector<104x256xf32>
    %8 = arith.addf %5, %7 : vector<104x256xf32>
    %c0_7 = arith.constant 0 : index
    %c0_8 = arith.constant 0 : index
    %9 = vector.load %arg6[%c0_7, %c0_8] : memref<104x256xbf16, #tpu.memory_space<vmem>>, vector<104x256xbf16>
    %10 = arith.extf %9 : vector<104x256xbf16> to vector<104x256xf32>
    %11 = arith.addf %8, %10 : vector<104x256xf32>
    %cst_9 = arith.constant 0.000000e+00 : f32
    %12 = vector.broadcast %cst_9 : f32 to vector<104x256xf32>
    %13 = arith.maximumf %11, %12 : vector<104x256xf32>
    %14 = arith.truncf %13 : vector<104x256xf32> to vector<104x256xbf16>
    %c0_10 = arith.constant 0 : index
    %c0_11 = arith.constant 0 : index
    %15 = vector.load %arg7[%c0_10, %c0_11] : memref<104x256xbf16, #tpu.memory_space<vmem>>, vector<104x256xbf16>
    tpu.vector_store %arg7[%c0_10, %c0_11], %14 {strides = array<i32>} : memref<104x256xbf16, #tpu.memory_space<vmem>>, vector<104x256xbf16>,
    return
  }
  func.func @transform_0(%arg0: i32, %arg1: i32) -> (i32, i32) {
    %c0_i32 = arith.constant 0 : i32
    %c0_i32_0 = arith.constant 0 : i32
    return %arg0, %c0_i32 : i32, i32
  }
  func.func @transform_1(%arg0: i32, %arg1: i32) -> (i32, i32) {
    %c0_i32 = arith.constant 0 : i32
    %c0_i32_0 = arith.constant 0 : i32
    return %c0_i32, %arg1 : i32, i32
  }
  func.func @transform_2(%arg0: i32, %arg1: i32) -> (i32, i32) {
    %c0_i32 = arith.constant 0 : i32
    %c0_i32_0 = arith.constant 0 : i32
    return %c0_i32, %arg1 : i32, i32
  }
  func.func @transform_3(%arg0: i32, %arg1: i32) -> (i32, i32) {
    %c0_i32 = arith.constant 0 : i32
    %c0_i32_0 = arith.constant 0 : i32
    return %c0_i32, %arg1 : i32, i32
  }
  func.func @transform_4(%arg0: i32, %arg1: i32) -> (i32, i32) {
    %c0_i32 = arith.constant 0 : i32
    return %arg0, %arg1 : i32, i32
  }
  func.func @transform_5(%arg0: i32, %arg1: i32) -> (i32, i32) {
    %c0_i32 = arith.constant 0 : i32
    return %arg0, %arg1 : i32, i32
  }
}

module attributes {stable_mosaic.version = 11 : i64} {
  func.func @_ppm_branch_kernel(%arg0: i32, %arg1: memref<1x49xf32, #tpu.memory_space<vmem>>, %arg2: memref<49x1xf32, #tpu.memory_space<vmem>>, %arg3: memref<256x64xf32, #tpu.memory_space<vmem>>, %arg4: memref<1x64xf32, #tpu.memory_space<vmem>>, %arg5: memref<1x64xf32, #tpu.memory_space<vmem>>, %arg6: memref<1x49x256xbf16, #tpu.memory_space<vmem>>, %arg7: memref<1x49x64xbf16, #tpu.memory_space<vmem>>) attributes {dimension_semantics = [#tpu.dimension_semantics<parallel>], iteration_bounds = array<i64: 2>, scalar_prefetch = 0 : i64, scratch_operands = 0 : i64, tpu.core_type = #tpu.core_type<tc>, window_params = [{pipeline_mode = #tpu.pipeline_mode<synchronous>, transform_indices = @transform_0, window_bounds = array<i64: 1, 49>}, {pipeline_mode = #tpu.pipeline_mode<synchronous>, transform_indices = @transform_1, window_bounds = array<i64: 49, 1>}, {pipeline_mode = #tpu.pipeline_mode<synchronous>, transform_indices = @transform_2, window_bounds = array<i64: 256, 64>}, {pipeline_mode = #tpu.pipeline_mode<synchronous>, transform_indices = @transform_3, window_bounds = array<i64: 1, 64>}, {pipeline_mode = #tpu.pipeline_mode<synchronous>, transform_indices = @transform_4, window_bounds = array<i64: 1, 64>}, {transform_indices = @transform_5, window_bounds = array<i64: 1, 49, 256>}, {transform_indices = @transform_6, window_bounds = array<i64: 1, 49, 64>}]} {
    %c0 = arith.constant 0 : index
    %c0_0 = arith.constant 0 : index
    %c0_1 = arith.constant 0 : index
    %0 = vector.load %arg6[%c0, %c0_0, %c0_1] : memref<1x49x256xbf16, #tpu.memory_space<vmem>>, vector<1x49x256xbf16>
    %1 = vector.shape_cast %0 : vector<1x49x256xbf16> to vector<49x256xbf16>
    %2 = arith.extf %1 : vector<49x256xbf16> to vector<49x256xf32>
    %c0_2 = arith.constant 0 : index
    %c0_3 = arith.constant 0 : index
    %3 = vector.load %arg1[%c0_2, %c0_3] : memref<1x49xf32, #tpu.memory_space<vmem>>, vector<1x49xf32>
    %cst = arith.constant dense<0.000000e+00> : vector<1x256xf32>
    %4 = tpu.matmul %3, %2, %cst {dimension_numbers = #tpu.dot_dimension_numbers<[1], [0], [0], [1], [0, 0, 1, 1], [], []>} : vector<1x49xf32>, vector<49x256xf32>, vector<1x256xf32> -> vector<1x256xf32>
    %c0_4 = arith.constant 0 : index
    %c0_5 = arith.constant 0 : index
    %5 = vector.load %arg3[%c0_4, %c0_5] : memref<256x64xf32, #tpu.memory_space<vmem>>, vector<256x64xf32>
    %cst_6 = arith.constant dense<0.000000e+00> : vector<1x64xf32>
    %6 = tpu.matmul %4, %5, %cst_6 {dimension_numbers = #tpu.dot_dimension_numbers<[1], [0], [0], [1], [0, 0, 1, 1], [], []>} : vector<1x256xf32>, vector<256x64xf32>, vector<1x64xf32> -> vector<1x64xf32>
    %c0_7 = arith.constant 0 : index
    %c0_8 = arith.constant 0 : index
    %7 = vector.load %arg4[%c0_7, %c0_8] : memref<1x64xf32, #tpu.memory_space<vmem>>, vector<1x64xf32>
    %8 = arith.mulf %6, %7 : vector<1x64xf32>
    %c0_9 = arith.constant 0 : index
    %c0_10 = arith.constant 0 : index
    %9 = vector.load %arg5[%c0_9, %c0_10] : memref<1x64xf32, #tpu.memory_space<vmem>>, vector<1x64xf32>
    %10 = arith.addf %8, %9 : vector<1x64xf32>
    %cst_11 = arith.constant 0.000000e+00 : f32
    %11 = vector.broadcast %cst_11 : f32 to vector<1x64xf32>
    %12 = arith.maximumf %10, %11 : vector<1x64xf32>
    %c0_12 = arith.constant 0 : index
    %c0_13 = arith.constant 0 : index
    %13 = vector.load %arg2[%c0_12, %c0_13] : memref<49x1xf32, #tpu.memory_space<vmem>>, vector<49x1xf32>
    %cst_14 = arith.constant dense<0.000000e+00> : vector<49x64xf32>
    %14 = tpu.matmul %13, %12, %cst_14 {dimension_numbers = #tpu.dot_dimension_numbers<[1], [0], [0], [1], [0, 0, 1, 1], [], []>} : vector<49x1xf32>, vector<1x64xf32>, vector<49x64xf32> -> vector<49x64xf32>
    %15 = arith.truncf %14 : vector<49x64xf32> to vector<49x64xbf16>
    %c0_15 = arith.constant 0 : index
    %c0_16 = arith.constant 0 : index
    %c0_17 = arith.constant 0 : index
    %16 = vector.load %arg7[%c0_15, %c0_16, %c0_17] : memref<1x49x64xbf16, #tpu.memory_space<vmem>>, vector<1x49x64xbf16>
    %17 = vector.shape_cast %16 : vector<1x49x64xbf16> to vector<49x64xbf16>
    %18 = vector.shape_cast %15 : vector<49x64xbf16> to vector<1x49x64xbf16>
    tpu.vector_store %arg7[%c0_15, %c0_16, %c0_17], %18 {strides = array<i32>} : memref<1x49x64xbf16, #tpu.memory_space<vmem>>, vector<1x49x64xbf16>,
    return
  }
  func.func @transform_0(%arg0: i32) -> (i32, i32) {
    %c0_i32 = arith.constant 0 : i32
    %c0_i32_0 = arith.constant 0 : i32
    %c0_i32_1 = arith.constant 0 : i32
    return %c0_i32, %c0_i32_0 : i32, i32
  }
  func.func @transform_1(%arg0: i32) -> (i32, i32) {
    %c0_i32 = arith.constant 0 : i32
    %c0_i32_0 = arith.constant 0 : i32
    %c0_i32_1 = arith.constant 0 : i32
    return %c0_i32, %c0_i32_0 : i32, i32
  }
  func.func @transform_2(%arg0: i32) -> (i32, i32) {
    %c0_i32 = arith.constant 0 : i32
    %c0_i32_0 = arith.constant 0 : i32
    %c0_i32_1 = arith.constant 0 : i32
    return %c0_i32, %c0_i32_0 : i32, i32
  }
  func.func @transform_3(%arg0: i32) -> (i32, i32) {
    %c0_i32 = arith.constant 0 : i32
    %c0_i32_0 = arith.constant 0 : i32
    %c0_i32_1 = arith.constant 0 : i32
    return %c0_i32, %c0_i32_0 : i32, i32
  }
  func.func @transform_4(%arg0: i32) -> (i32, i32) {
    %c0_i32 = arith.constant 0 : i32
    %c0_i32_0 = arith.constant 0 : i32
    %c0_i32_1 = arith.constant 0 : i32
    return %c0_i32, %c0_i32_0 : i32, i32
  }
  func.func @transform_5(%arg0: i32) -> (i32, i32, i32) {
    %c0_i32 = arith.constant 0 : i32
    %c0_i32_0 = arith.constant 0 : i32
    %c0_i32_1 = arith.constant 0 : i32
    return %arg0, %c0_i32, %c0_i32_0 : i32, i32, i32
  }
  func.func @transform_6(%arg0: i32) -> (i32, i32, i32) {
    %c0_i32 = arith.constant 0 : i32
    %c0_i32_0 = arith.constant 0 : i32
    %c0_i32_1 = arith.constant 0 : i32
    return %arg0, %c0_i32, %c0_i32_0 : i32, i32, i32
  }
}

module attributes {stable_mosaic.version = 11 : i64} {
  func.func @_ppm_branch_kernel(%arg0: i32, %arg1: memref<4x49xf32, #tpu.memory_space<vmem>>, %arg2: memref<49x4xf32, #tpu.memory_space<vmem>>, %arg3: memref<256x64xf32, #tpu.memory_space<vmem>>, %arg4: memref<1x64xf32, #tpu.memory_space<vmem>>, %arg5: memref<1x64xf32, #tpu.memory_space<vmem>>, %arg6: memref<1x49x256xbf16, #tpu.memory_space<vmem>>, %arg7: memref<1x49x64xbf16, #tpu.memory_space<vmem>>) attributes {dimension_semantics = [#tpu.dimension_semantics<parallel>], iteration_bounds = array<i64: 2>, scalar_prefetch = 0 : i64, scratch_operands = 0 : i64, tpu.core_type = #tpu.core_type<tc>, window_params = [{pipeline_mode = #tpu.pipeline_mode<synchronous>, transform_indices = @transform_0, window_bounds = array<i64: 4, 49>}, {pipeline_mode = #tpu.pipeline_mode<synchronous>, transform_indices = @transform_1, window_bounds = array<i64: 49, 4>}, {pipeline_mode = #tpu.pipeline_mode<synchronous>, transform_indices = @transform_2, window_bounds = array<i64: 256, 64>}, {pipeline_mode = #tpu.pipeline_mode<synchronous>, transform_indices = @transform_3, window_bounds = array<i64: 1, 64>}, {pipeline_mode = #tpu.pipeline_mode<synchronous>, transform_indices = @transform_4, window_bounds = array<i64: 1, 64>}, {transform_indices = @transform_5, window_bounds = array<i64: 1, 49, 256>}, {transform_indices = @transform_6, window_bounds = array<i64: 1, 49, 64>}]} {
    %c0 = arith.constant 0 : index
    %c0_0 = arith.constant 0 : index
    %c0_1 = arith.constant 0 : index
    %0 = vector.load %arg6[%c0, %c0_0, %c0_1] : memref<1x49x256xbf16, #tpu.memory_space<vmem>>, vector<1x49x256xbf16>
    %1 = vector.shape_cast %0 : vector<1x49x256xbf16> to vector<49x256xbf16>
    %2 = arith.extf %1 : vector<49x256xbf16> to vector<49x256xf32>
    %c0_2 = arith.constant 0 : index
    %c0_3 = arith.constant 0 : index
    %3 = vector.load %arg1[%c0_2, %c0_3] : memref<4x49xf32, #tpu.memory_space<vmem>>, vector<4x49xf32>
    %cst = arith.constant dense<0.000000e+00> : vector<4x256xf32>
    %4 = tpu.matmul %3, %2, %cst {dimension_numbers = #tpu.dot_dimension_numbers<[1], [0], [0], [1], [0, 0, 1, 1], [], []>} : vector<4x49xf32>, vector<49x256xf32>, vector<4x256xf32> -> vector<4x256xf32>
    %c0_4 = arith.constant 0 : index
    %c0_5 = arith.constant 0 : index
    %5 = vector.load %arg3[%c0_4, %c0_5] : memref<256x64xf32, #tpu.memory_space<vmem>>, vector<256x64xf32>
    %cst_6 = arith.constant dense<0.000000e+00> : vector<4x64xf32>
    %6 = tpu.matmul %4, %5, %cst_6 {dimension_numbers = #tpu.dot_dimension_numbers<[1], [0], [0], [1], [0, 0, 1, 1], [], []>} : vector<4x256xf32>, vector<256x64xf32>, vector<4x64xf32> -> vector<4x64xf32>
    %c0_7 = arith.constant 0 : index
    %c0_8 = arith.constant 0 : index
    %7 = vector.load %arg4[%c0_7, %c0_8] : memref<1x64xf32, #tpu.memory_space<vmem>>, vector<1x64xf32>
    %8 = vector.broadcast %7 : vector<1x64xf32> to vector<4x64xf32>
    %9 = arith.mulf %6, %8 : vector<4x64xf32>
    %c0_9 = arith.constant 0 : index
    %c0_10 = arith.constant 0 : index
    %10 = vector.load %arg5[%c0_9, %c0_10] : memref<1x64xf32, #tpu.memory_space<vmem>>, vector<1x64xf32>
    %11 = vector.broadcast %10 : vector<1x64xf32> to vector<4x64xf32>
    %12 = arith.addf %9, %11 : vector<4x64xf32>
    %cst_11 = arith.constant 0.000000e+00 : f32
    %13 = vector.broadcast %cst_11 : f32 to vector<4x64xf32>
    %14 = arith.maximumf %12, %13 : vector<4x64xf32>
    %c0_12 = arith.constant 0 : index
    %c0_13 = arith.constant 0 : index
    %15 = vector.load %arg2[%c0_12, %c0_13] : memref<49x4xf32, #tpu.memory_space<vmem>>, vector<49x4xf32>
    %cst_14 = arith.constant dense<0.000000e+00> : vector<49x64xf32>
    %16 = tpu.matmul %15, %14, %cst_14 {dimension_numbers = #tpu.dot_dimension_numbers<[1], [0], [0], [1], [0, 0, 1, 1], [], []>} : vector<49x4xf32>, vector<4x64xf32>, vector<49x64xf32> -> vector<49x64xf32>
    %17 = arith.truncf %16 : vector<49x64xf32> to vector<49x64xbf16>
    %c0_15 = arith.constant 0 : index
    %c0_16 = arith.constant 0 : index
    %c0_17 = arith.constant 0 : index
    %18 = vector.load %arg7[%c0_15, %c0_16, %c0_17] : memref<1x49x64xbf16, #tpu.memory_space<vmem>>, vector<1x49x64xbf16>
    %19 = vector.shape_cast %18 : vector<1x49x64xbf16> to vector<49x64xbf16>
    %20 = vector.shape_cast %17 : vector<49x64xbf16> to vector<1x49x64xbf16>
    tpu.vector_store %arg7[%c0_15, %c0_16, %c0_17], %20 {strides = array<i32>} : memref<1x49x64xbf16, #tpu.memory_space<vmem>>, vector<1x49x64xbf16>,
    return
  }
  func.func @transform_0(%arg0: i32) -> (i32, i32) {
    %c0_i32 = arith.constant 0 : i32
    %c0_i32_0 = arith.constant 0 : i32
    %c0_i32_1 = arith.constant 0 : i32
    return %c0_i32, %c0_i32_0 : i32, i32
  }
  func.func @transform_1(%arg0: i32) -> (i32, i32) {
    %c0_i32 = arith.constant 0 : i32
    %c0_i32_0 = arith.constant 0 : i32
    %c0_i32_1 = arith.constant 0 : i32
    return %c0_i32, %c0_i32_0 : i32, i32
  }
  func.func @transform_2(%arg0: i32) -> (i32, i32) {
    %c0_i32 = arith.constant 0 : i32
    %c0_i32_0 = arith.constant 0 : i32
    %c0_i32_1 = arith.constant 0 : i32
    return %c0_i32, %c0_i32_0 : i32, i32
  }
  func.func @transform_3(%arg0: i32) -> (i32, i32) {
    %c0_i32 = arith.constant 0 : i32
    %c0_i32_0 = arith.constant 0 : i32
    %c0_i32_1 = arith.constant 0 : i32
    return %c0_i32, %c0_i32_0 : i32, i32
  }
  func.func @transform_4(%arg0: i32) -> (i32, i32) {
    %c0_i32 = arith.constant 0 : i32
    %c0_i32_0 = arith.constant 0 : i32
    %c0_i32_1 = arith.constant 0 : i32
    return %c0_i32, %c0_i32_0 : i32, i32
  }
  func.func @transform_5(%arg0: i32) -> (i32, i32, i32) {
    %c0_i32 = arith.constant 0 : i32
    %c0_i32_0 = arith.constant 0 : i32
    %c0_i32_1 = arith.constant 0 : i32
    return %arg0, %c0_i32, %c0_i32_0 : i32, i32, i32
  }
  func.func @transform_6(%arg0: i32) -> (i32, i32, i32) {
    %c0_i32 = arith.constant 0 : i32
    %c0_i32_0 = arith.constant 0 : i32
    %c0_i32_1 = arith.constant 0 : i32
    return %arg0, %c0_i32, %c0_i32_0 : i32, i32, i32
  }
}

module attributes {stable_mosaic.version = 11 : i64} {
  func.func @_ppm_branch_kernel(%arg0: i32, %arg1: memref<9x49xf32, #tpu.memory_space<vmem>>, %arg2: memref<49x9xf32, #tpu.memory_space<vmem>>, %arg3: memref<256x64xf32, #tpu.memory_space<vmem>>, %arg4: memref<1x64xf32, #tpu.memory_space<vmem>>, %arg5: memref<1x64xf32, #tpu.memory_space<vmem>>, %arg6: memref<1x49x256xbf16, #tpu.memory_space<vmem>>, %arg7: memref<1x49x64xbf16, #tpu.memory_space<vmem>>) attributes {dimension_semantics = [#tpu.dimension_semantics<parallel>], iteration_bounds = array<i64: 2>, scalar_prefetch = 0 : i64, scratch_operands = 0 : i64, tpu.core_type = #tpu.core_type<tc>, window_params = [{pipeline_mode = #tpu.pipeline_mode<synchronous>, transform_indices = @transform_0, window_bounds = array<i64: 9, 49>}, {pipeline_mode = #tpu.pipeline_mode<synchronous>, transform_indices = @transform_1, window_bounds = array<i64: 49, 9>}, {pipeline_mode = #tpu.pipeline_mode<synchronous>, transform_indices = @transform_2, window_bounds = array<i64: 256, 64>}, {pipeline_mode = #tpu.pipeline_mode<synchronous>, transform_indices = @transform_3, window_bounds = array<i64: 1, 64>}, {pipeline_mode = #tpu.pipeline_mode<synchronous>, transform_indices = @transform_4, window_bounds = array<i64: 1, 64>}, {transform_indices = @transform_5, window_bounds = array<i64: 1, 49, 256>}, {transform_indices = @transform_6, window_bounds = array<i64: 1, 49, 64>}]} {
    %c0 = arith.constant 0 : index
    %c0_0 = arith.constant 0 : index
    %c0_1 = arith.constant 0 : index
    %0 = vector.load %arg6[%c0, %c0_0, %c0_1] : memref<1x49x256xbf16, #tpu.memory_space<vmem>>, vector<1x49x256xbf16>
    %1 = vector.shape_cast %0 : vector<1x49x256xbf16> to vector<49x256xbf16>
    %2 = arith.extf %1 : vector<49x256xbf16> to vector<49x256xf32>
    %c0_2 = arith.constant 0 : index
    %c0_3 = arith.constant 0 : index
    %3 = vector.load %arg1[%c0_2, %c0_3] : memref<9x49xf32, #tpu.memory_space<vmem>>, vector<9x49xf32>
    %cst = arith.constant dense<0.000000e+00> : vector<9x256xf32>
    %4 = tpu.matmul %3, %2, %cst {dimension_numbers = #tpu.dot_dimension_numbers<[1], [0], [0], [1], [0, 0, 1, 1], [], []>} : vector<9x49xf32>, vector<49x256xf32>, vector<9x256xf32> -> vector<9x256xf32>
    %c0_4 = arith.constant 0 : index
    %c0_5 = arith.constant 0 : index
    %5 = vector.load %arg3[%c0_4, %c0_5] : memref<256x64xf32, #tpu.memory_space<vmem>>, vector<256x64xf32>
    %cst_6 = arith.constant dense<0.000000e+00> : vector<9x64xf32>
    %6 = tpu.matmul %4, %5, %cst_6 {dimension_numbers = #tpu.dot_dimension_numbers<[1], [0], [0], [1], [0, 0, 1, 1], [], []>} : vector<9x256xf32>, vector<256x64xf32>, vector<9x64xf32> -> vector<9x64xf32>
    %c0_7 = arith.constant 0 : index
    %c0_8 = arith.constant 0 : index
    %7 = vector.load %arg4[%c0_7, %c0_8] : memref<1x64xf32, #tpu.memory_space<vmem>>, vector<1x64xf32>
    %8 = vector.broadcast %7 : vector<1x64xf32> to vector<9x64xf32>
    %9 = arith.mulf %6, %8 : vector<9x64xf32>
    %c0_9 = arith.constant 0 : index
    %c0_10 = arith.constant 0 : index
    %10 = vector.load %arg5[%c0_9, %c0_10] : memref<1x64xf32, #tpu.memory_space<vmem>>, vector<1x64xf32>
    %11 = vector.broadcast %10 : vector<1x64xf32> to vector<9x64xf32>
    %12 = arith.addf %9, %11 : vector<9x64xf32>
    %cst_11 = arith.constant 0.000000e+00 : f32
    %13 = vector.broadcast %cst_11 : f32 to vector<9x64xf32>
    %14 = arith.maximumf %12, %13 : vector<9x64xf32>
    %c0_12 = arith.constant 0 : index
    %c0_13 = arith.constant 0 : index
    %15 = vector.load %arg2[%c0_12, %c0_13] : memref<49x9xf32, #tpu.memory_space<vmem>>, vector<49x9xf32>
    %cst_14 = arith.constant dense<0.000000e+00> : vector<49x64xf32>
    %16 = tpu.matmul %15, %14, %cst_14 {dimension_numbers = #tpu.dot_dimension_numbers<[1], [0], [0], [1], [0, 0, 1, 1], [], []>} : vector<49x9xf32>, vector<9x64xf32>, vector<49x64xf32> -> vector<49x64xf32>
    %17 = arith.truncf %16 : vector<49x64xf32> to vector<49x64xbf16>
    %c0_15 = arith.constant 0 : index
    %c0_16 = arith.constant 0 : index
    %c0_17 = arith.constant 0 : index
    %18 = vector.load %arg7[%c0_15, %c0_16, %c0_17] : memref<1x49x64xbf16, #tpu.memory_space<vmem>>, vector<1x49x64xbf16>
    %19 = vector.shape_cast %18 : vector<1x49x64xbf16> to vector<49x64xbf16>
    %20 = vector.shape_cast %17 : vector<49x64xbf16> to vector<1x49x64xbf16>
    tpu.vector_store %arg7[%c0_15, %c0_16, %c0_17], %20 {strides = array<i32>} : memref<1x49x64xbf16, #tpu.memory_space<vmem>>, vector<1x49x64xbf16>,
    return
  }
  func.func @transform_0(%arg0: i32) -> (i32, i32) {
    %c0_i32 = arith.constant 0 : i32
    %c0_i32_0 = arith.constant 0 : i32
    %c0_i32_1 = arith.constant 0 : i32
    return %c0_i32, %c0_i32_0 : i32, i32
  }
  func.func @transform_1(%arg0: i32) -> (i32, i32) {
    %c0_i32 = arith.constant 0 : i32
    %c0_i32_0 = arith.constant 0 : i32
    %c0_i32_1 = arith.constant 0 : i32
    return %c0_i32, %c0_i32_0 : i32, i32
  }
  func.func @transform_2(%arg0: i32) -> (i32, i32) {
    %c0_i32 = arith.constant 0 : i32
    %c0_i32_0 = arith.constant 0 : i32
    %c0_i32_1 = arith.constant 0 : i32
    return %c0_i32, %c0_i32_0 : i32, i32
  }
  func.func @transform_3(%arg0: i32) -> (i32, i32) {
    %c0_i32 = arith.constant 0 : i32
    %c0_i32_0 = arith.constant 0 : i32
    %c0_i32_1 = arith.constant 0 : i32
    return %c0_i32, %c0_i32_0 : i32, i32
  }
  func.func @transform_4(%arg0: i32) -> (i32, i32) {
    %c0_i32 = arith.constant 0 : i32
    %c0_i32_0 = arith.constant 0 : i32
    %c0_i32_1 = arith.constant 0 : i32
    return %c0_i32, %c0_i32_0 : i32, i32
  }
  func.func @transform_5(%arg0: i32) -> (i32, i32, i32) {
    %c0_i32 = arith.constant 0 : i32
    %c0_i32_0 = arith.constant 0 : i32
    %c0_i32_1 = arith.constant 0 : i32
    return %arg0, %c0_i32, %c0_i32_0 : i32, i32, i32
  }
  func.func @transform_6(%arg0: i32) -> (i32, i32, i32) {
    %c0_i32 = arith.constant 0 : i32
    %c0_i32_0 = arith.constant 0 : i32
    %c0_i32_1 = arith.constant 0 : i32
    return %arg0, %c0_i32, %c0_i32_0 : i32, i32, i32
  }
}

module attributes {stable_mosaic.version = 11 : i64} {
  func.func @_ppm_branch_kernel(%arg0: i32, %arg1: memref<36x49xf32, #tpu.memory_space<vmem>>, %arg2: memref<49x36xf32, #tpu.memory_space<vmem>>, %arg3: memref<256x64xf32, #tpu.memory_space<vmem>>, %arg4: memref<1x64xf32, #tpu.memory_space<vmem>>, %arg5: memref<1x64xf32, #tpu.memory_space<vmem>>, %arg6: memref<1x49x256xbf16, #tpu.memory_space<vmem>>, %arg7: memref<1x49x64xbf16, #tpu.memory_space<vmem>>) attributes {dimension_semantics = [#tpu.dimension_semantics<parallel>], iteration_bounds = array<i64: 2>, scalar_prefetch = 0 : i64, scratch_operands = 0 : i64, tpu.core_type = #tpu.core_type<tc>, window_params = [{pipeline_mode = #tpu.pipeline_mode<synchronous>, transform_indices = @transform_0, window_bounds = array<i64: 36, 49>}, {pipeline_mode = #tpu.pipeline_mode<synchronous>, transform_indices = @transform_1, window_bounds = array<i64: 49, 36>}, {pipeline_mode = #tpu.pipeline_mode<synchronous>, transform_indices = @transform_2, window_bounds = array<i64: 256, 64>}, {pipeline_mode = #tpu.pipeline_mode<synchronous>, transform_indices = @transform_3, window_bounds = array<i64: 1, 64>}, {pipeline_mode = #tpu.pipeline_mode<synchronous>, transform_indices = @transform_4, window_bounds = array<i64: 1, 64>}, {transform_indices = @transform_5, window_bounds = array<i64: 1, 49, 256>}, {transform_indices = @transform_6, window_bounds = array<i64: 1, 49, 64>}]} {
    %c0 = arith.constant 0 : index
    %c0_0 = arith.constant 0 : index
    %c0_1 = arith.constant 0 : index
    %0 = vector.load %arg6[%c0, %c0_0, %c0_1] : memref<1x49x256xbf16, #tpu.memory_space<vmem>>, vector<1x49x256xbf16>
    %1 = vector.shape_cast %0 : vector<1x49x256xbf16> to vector<49x256xbf16>
    %2 = arith.extf %1 : vector<49x256xbf16> to vector<49x256xf32>
    %c0_2 = arith.constant 0 : index
    %c0_3 = arith.constant 0 : index
    %3 = vector.load %arg1[%c0_2, %c0_3] : memref<36x49xf32, #tpu.memory_space<vmem>>, vector<36x49xf32>
    %cst = arith.constant dense<0.000000e+00> : vector<36x256xf32>
    %4 = tpu.matmul %3, %2, %cst {dimension_numbers = #tpu.dot_dimension_numbers<[1], [0], [0], [1], [0, 0, 1, 1], [], []>} : vector<36x49xf32>, vector<49x256xf32>, vector<36x256xf32> -> vector<36x256xf32>
    %c0_4 = arith.constant 0 : index
    %c0_5 = arith.constant 0 : index
    %5 = vector.load %arg3[%c0_4, %c0_5] : memref<256x64xf32, #tpu.memory_space<vmem>>, vector<256x64xf32>
    %cst_6 = arith.constant dense<0.000000e+00> : vector<36x64xf32>
    %6 = tpu.matmul %4, %5, %cst_6 {dimension_numbers = #tpu.dot_dimension_numbers<[1], [0], [0], [1], [0, 0, 1, 1], [], []>} : vector<36x256xf32>, vector<256x64xf32>, vector<36x64xf32> -> vector<36x64xf32>
    %c0_7 = arith.constant 0 : index
    %c0_8 = arith.constant 0 : index
    %7 = vector.load %arg4[%c0_7, %c0_8] : memref<1x64xf32, #tpu.memory_space<vmem>>, vector<1x64xf32>
    %8 = vector.broadcast %7 : vector<1x64xf32> to vector<36x64xf32>
    %9 = arith.mulf %6, %8 : vector<36x64xf32>
    %c0_9 = arith.constant 0 : index
    %c0_10 = arith.constant 0 : index
    %10 = vector.load %arg5[%c0_9, %c0_10] : memref<1x64xf32, #tpu.memory_space<vmem>>, vector<1x64xf32>
    %11 = vector.broadcast %10 : vector<1x64xf32> to vector<36x64xf32>
    %12 = arith.addf %9, %11 : vector<36x64xf32>
    %cst_11 = arith.constant 0.000000e+00 : f32
    %13 = vector.broadcast %cst_11 : f32 to vector<36x64xf32>
    %14 = arith.maximumf %12, %13 : vector<36x64xf32>
    %c0_12 = arith.constant 0 : index
    %c0_13 = arith.constant 0 : index
    %15 = vector.load %arg2[%c0_12, %c0_13] : memref<49x36xf32, #tpu.memory_space<vmem>>, vector<49x36xf32>
    %cst_14 = arith.constant dense<0.000000e+00> : vector<49x64xf32>
    %16 = tpu.matmul %15, %14, %cst_14 {dimension_numbers = #tpu.dot_dimension_numbers<[1], [0], [0], [1], [0, 0, 1, 1], [], []>} : vector<49x36xf32>, vector<36x64xf32>, vector<49x64xf32> -> vector<49x64xf32>
    %17 = arith.truncf %16 : vector<49x64xf32> to vector<49x64xbf16>
    %c0_15 = arith.constant 0 : index
    %c0_16 = arith.constant 0 : index
    %c0_17 = arith.constant 0 : index
    %18 = vector.load %arg7[%c0_15, %c0_16, %c0_17] : memref<1x49x64xbf16, #tpu.memory_space<vmem>>, vector<1x49x64xbf16>
    %19 = vector.shape_cast %18 : vector<1x49x64xbf16> to vector<49x64xbf16>
    %20 = vector.shape_cast %17 : vector<49x64xbf16> to vector<1x49x64xbf16>
    tpu.vector_store %arg7[%c0_15, %c0_16, %c0_17], %20 {strides = array<i32>} : memref<1x49x64xbf16, #tpu.memory_space<vmem>>, vector<1x49x64xbf16>,
    return
  }
  func.func @transform_0(%arg0: i32) -> (i32, i32) {
    %c0_i32 = arith.constant 0 : i32
    %c0_i32_0 = arith.constant 0 : i32
    %c0_i32_1 = arith.constant 0 : i32
    return %c0_i32, %c0_i32_0 : i32, i32
  }
  func.func @transform_1(%arg0: i32) -> (i32, i32) {
    %c0_i32 = arith.constant 0 : i32
    %c0_i32_0 = arith.constant 0 : i32
    %c0_i32_1 = arith.constant 0 : i32
    return %c0_i32, %c0_i32_0 : i32, i32
  }
  func.func @transform_2(%arg0: i32) -> (i32, i32) {
    %c0_i32 = arith.constant 0 : i32
    %c0_i32_0 = arith.constant 0 : i32
    %c0_i32_1 = arith.constant 0 : i32
    return %c0_i32, %c0_i32_0 : i32, i32
  }
  func.func @transform_3(%arg0: i32) -> (i32, i32) {
    %c0_i32 = arith.constant 0 : i32
    %c0_i32_0 = arith.constant 0 : i32
    %c0_i32_1 = arith.constant 0 : i32
    return %c0_i32, %c0_i32_0 : i32, i32
  }
  func.func @transform_4(%arg0: i32) -> (i32, i32) {
    %c0_i32 = arith.constant 0 : i32
    %c0_i32_0 = arith.constant 0 : i32
    %c0_i32_1 = arith.constant 0 : i32
    return %c0_i32, %c0_i32_0 : i32, i32
  }
  func.func @transform_5(%arg0: i32) -> (i32, i32, i32) {
    %c0_i32 = arith.constant 0 : i32
    %c0_i32_0 = arith.constant 0 : i32
    %c0_i32_1 = arith.constant 0 : i32
    return %arg0, %c0_i32, %c0_i32_0 : i32, i32, i32
  }
  func.func @transform_6(%arg0: i32) -> (i32, i32, i32) {
    %c0_i32 = arith.constant 0 : i32
    %c0_i32_0 = arith.constant 0 : i32
    %c0_i32_1 = arith.constant 0 : i32
    return %arg0, %c0_i32, %c0_i32_0 : i32, i32, i32
  }
}

module attributes {stable_mosaic.version = 11 : i64} {
  func.func @_mm_bn_kernel(%arg0: i32, %arg1: i32, %arg2: i32, %arg3: memref<104x512xbf16, #tpu.memory_space<vmem>>, %arg4: memref<512x128xbf16, #tpu.memory_space<vmem>>, %arg5: memref<1x128xf32, #tpu.memory_space<vmem>>, %arg6: memref<1x128xf32, #tpu.memory_space<vmem>>, %arg7: memref<104x128xbf16, #tpu.memory_space<vmem>>, %arg8: memref<104x128xf32, #tpu.memory_space<vmem>>) attributes {dimension_semantics = [#tpu.dimension_semantics<parallel>, #tpu.dimension_semantics<parallel>, #tpu.dimension_semantics<arbitrary>], iteration_bounds = array<i64: 1, 1, 9>, scalar_prefetch = 0 : i64, scratch_operands = 1 : i64, tpu.core_type = #tpu.core_type<tc>, window_params = [{transform_indices = @transform_0, window_bounds = array<i64: 104, 512>}, {transform_indices = @transform_1, window_bounds = array<i64: 512, 128>}, {transform_indices = @transform_2, window_bounds = array<i64: 1, 128>}, {transform_indices = @transform_3, window_bounds = array<i64: 1, 128>}, {transform_indices = @transform_4, window_bounds = array<i64: 104, 128>}]} {
    %c0_i32 = arith.constant 0 : i32
    %0 = arith.cmpi eq, %arg2, %c0_i32 : i32
    %1 = arith.extui %0 : i1 to i32
    %c0_i32_0 = arith.constant 0 : i32
    %2 = arith.cmpi ne, %1, %c0_i32_0 : i32
    scf.if %2 {
      %cst_9 = arith.constant 0.000000e+00 : f32
      %12 = vector.broadcast %cst_9 : f32 to vector<104x128xf32>
      %c0_10 = arith.constant 0 : index
      %c0_11 = arith.constant 0 : index
      %13 = vector.load %arg8[%c0_10, %c0_11] : memref<104x128xf32, #tpu.memory_space<vmem>>, vector<104x128xf32>
      tpu.vector_store %arg8[%c0_10, %c0_11], %12 {strides = array<i32>} : memref<104x128xf32, #tpu.memory_space<vmem>>, vector<104x128xf32>,
    } else {
    }
    %c0 = arith.constant 0 : index
    %c0_1 = arith.constant 0 : index
    %3 = vector.load %arg8[%c0, %c0_1] : memref<104x128xf32, #tpu.memory_space<vmem>>, vector<104x128xf32>
    %c0_2 = arith.constant 0 : index
    %c0_3 = arith.constant 0 : index
    %4 = vector.load %arg3[%c0_2, %c0_3] : memref<104x512xbf16, #tpu.memory_space<vmem>>, vector<104x512xbf16>
    %c0_4 = arith.constant 0 : index
    %c0_5 = arith.constant 0 : index
    %5 = vector.load %arg4[%c0_4, %c0_5] : memref<512x128xbf16, #tpu.memory_space<vmem>>, vector<512x128xbf16>
    %cst = arith.constant dense<0.000000e+00> : vector<104x128xf32>
    %6 = tpu.matmul %4, %5, %cst {dimension_numbers = #tpu.dot_dimension_numbers<[1], [0], [0], [1], [0, 0, 1, 1], [], []>} : vector<104x512xbf16>, vector<512x128xbf16>, vector<104x128xf32> -> vector<104x128xf32>
    %7 = arith.addf %3, %6 : vector<104x128xf32>
    %c0_6 = arith.constant 0 : index
    %c0_7 = arith.constant 0 : index
    %8 = vector.load %arg8[%c0_6, %c0_7] : memref<104x128xf32, #tpu.memory_space<vmem>>, vector<104x128xf32>
    tpu.vector_store %arg8[%c0_6, %c0_7], %7 {strides = array<i32>} : memref<104x128xf32, #tpu.memory_space<vmem>>, vector<104x128xf32>,
    %c8_i32 = arith.constant 8 : i32
    %9 = arith.cmpi eq, %arg2, %c8_i32 : i32
    %10 = arith.extui %9 : i1 to i32
    %c0_i32_8 = arith.constant 0 : i32
    %11 = arith.cmpi ne, %10, %c0_i32_8 : i32
    scf.if %11 {
      %c0_9 = arith.constant 0 : index
      %c0_10 = arith.constant 0 : index
      %12 = vector.load %arg8[%c0_9, %c0_10] : memref<104x128xf32, #tpu.memory_space<vmem>>, vector<104x128xf32>
      %c0_11 = arith.constant 0 : index
      %c0_12 = arith.constant 0 : index
      %13 = vector.load %arg5[%c0_11, %c0_12] : memref<1x128xf32, #tpu.memory_space<vmem>>, vector<1x128xf32>
      %14 = vector.broadcast %13 : vector<1x128xf32> to vector<104x128xf32>
      %15 = arith.mulf %12, %14 : vector<104x128xf32>
      %c0_13 = arith.constant 0 : index
      %c0_14 = arith.constant 0 : index
      %16 = vector.load %arg6[%c0_13, %c0_14] : memref<1x128xf32, #tpu.memory_space<vmem>>, vector<1x128xf32>
      %17 = vector.broadcast %16 : vector<1x128xf32> to vector<104x128xf32>
      %18 = arith.addf %15, %17 : vector<104x128xf32>
      %cst_15 = arith.constant 0.000000e+00 : f32
      %19 = vector.broadcast %cst_15 : f32 to vector<104x128xf32>
      %20 = arith.maximumf %18, %19 : vector<104x128xf32>
      %21 = arith.truncf %20 : vector<104x128xf32> to vector<104x128xbf16>
      %c0_16 = arith.constant 0 : index
      %c0_17 = arith.constant 0 : index
      %22 = vector.load %arg7[%c0_16, %c0_17] : memref<104x128xbf16, #tpu.memory_space<vmem>>, vector<104x128xbf16>
      tpu.vector_store %arg7[%c0_16, %c0_17], %21 {strides = array<i32>} : memref<104x128xbf16, #tpu.memory_space<vmem>>, vector<104x128xbf16>,
    } else {
    }
    return
  }
  func.func @transform_0(%arg0: i32, %arg1: i32, %arg2: i32) -> (i32, i32) {
    %c0_i32 = arith.constant 0 : i32
    return %arg0, %arg2 : i32, i32
  }
  func.func @transform_1(%arg0: i32, %arg1: i32, %arg2: i32) -> (i32, i32) {
    %c0_i32 = arith.constant 0 : i32
    return %arg2, %arg1 : i32, i32
  }
  func.func @transform_2(%arg0: i32, %arg1: i32, %arg2: i32) -> (i32, i32) {
    %c0_i32 = arith.constant 0 : i32
    %c0_i32_0 = arith.constant 0 : i32
    return %c0_i32, %arg1 : i32, i32
  }
  func.func @transform_3(%arg0: i32, %arg1: i32, %arg2: i32) -> (i32, i32) {
    %c0_i32 = arith.constant 0 : i32
    %c0_i32_0 = arith.constant 0 : i32
    return %c0_i32, %arg1 : i32, i32
  }
  func.func @transform_4(%arg0: i32, %arg1: i32, %arg2: i32) -> (i32, i32) {
    %c0_i32 = arith.constant 0 : i32
    return %arg0, %arg1 : i32, i32
  }
}

module attributes {stable_mosaic.version = 11 : i64} {
  func.func @_mm_bn_single_kernel(%arg0: i32, %arg1: i32, %arg2: memref<104x128xbf16, #tpu.memory_space<vmem>>, %arg3: memref<128x128xbf16, #tpu.memory_space<vmem>>, %arg4: memref<1x128xf32, #tpu.memory_space<vmem>>, %arg5: memref<1x128xf32, #tpu.memory_space<vmem>>, %arg6: memref<104x128xf32, #tpu.memory_space<vmem>>) attributes {dimension_semantics = [#tpu.dimension_semantics<parallel>, #tpu.dimension_semantics<parallel>], iteration_bounds = array<i64: 1, 1>, scalar_prefetch = 0 : i64, scratch_operands = 0 : i64, tpu.core_type = #tpu.core_type<tc>, window_params = [{transform_indices = @transform_0, window_bounds = array<i64: 104, 128>}, {transform_indices = @transform_1, window_bounds = array<i64: 128, 128>}, {transform_indices = @transform_2, window_bounds = array<i64: 1, 128>}, {transform_indices = @transform_3, window_bounds = array<i64: 1, 128>}, {transform_indices = @transform_4, window_bounds = array<i64: 104, 128>}]} {
    %c0 = arith.constant 0 : index
    %c0_0 = arith.constant 0 : index
    %0 = vector.load %arg2[%c0, %c0_0] : memref<104x128xbf16, #tpu.memory_space<vmem>>, vector<104x128xbf16>
    %c0_1 = arith.constant 0 : index
    %c0_2 = arith.constant 0 : index
    %1 = vector.load %arg3[%c0_1, %c0_2] : memref<128x128xbf16, #tpu.memory_space<vmem>>, vector<128x128xbf16>
    %cst = arith.constant dense<0.000000e+00> : vector<104x128xf32>
    %2 = tpu.matmul %0, %1, %cst {dimension_numbers = #tpu.dot_dimension_numbers<[1], [0], [0], [1], [0, 0, 1, 1], [], []>} : vector<104x128xbf16>, vector<128x128xbf16>, vector<104x128xf32> -> vector<104x128xf32>
    %c0_3 = arith.constant 0 : index
    %c0_4 = arith.constant 0 : index
    %3 = vector.load %arg4[%c0_3, %c0_4] : memref<1x128xf32, #tpu.memory_space<vmem>>, vector<1x128xf32>
    %4 = vector.broadcast %3 : vector<1x128xf32> to vector<104x128xf32>
    %5 = arith.mulf %2, %4 : vector<104x128xf32>
    %c0_5 = arith.constant 0 : index
    %c0_6 = arith.constant 0 : index
    %6 = vector.load %arg5[%c0_5, %c0_6] : memref<1x128xf32, #tpu.memory_space<vmem>>, vector<1x128xf32>
    %7 = vector.broadcast %6 : vector<1x128xf32> to vector<104x128xf32>
    %8 = arith.addf %5, %7 : vector<104x128xf32>
    %c0_7 = arith.constant 0 : index
    %c0_8 = arith.constant 0 : index
    %9 = vector.load %arg6[%c0_7, %c0_8] : memref<104x128xf32, #tpu.memory_space<vmem>>, vector<104x128xf32>
    tpu.vector_store %arg6[%c0_7, %c0_8], %8 {strides = array<i32>} : memref<104x128xf32, #tpu.memory_space<vmem>>, vector<104x128xf32>,
    return
  }
  func.func @transform_0(%arg0: i32, %arg1: i32) -> (i32, i32) {
    %c0_i32 = arith.constant 0 : i32
    %c0_i32_0 = arith.constant 0 : i32
    return %arg0, %c0_i32 : i32, i32
  }
  func.func @transform_1(%arg0: i32, %arg1: i32) -> (i32, i32) {
    %c0_i32 = arith.constant 0 : i32
    %c0_i32_0 = arith.constant 0 : i32
    return %c0_i32, %arg1 : i32, i32
  }
  func.func @transform_2(%arg0: i32, %arg1: i32) -> (i32, i32) {
    %c0_i32 = arith.constant 0 : i32
    %c0_i32_0 = arith.constant 0 : i32
    return %c0_i32, %arg1 : i32, i32
  }
  func.func @transform_3(%arg0: i32, %arg1: i32) -> (i32, i32) {
    %c0_i32 = arith.constant 0 : i32
    %c0_i32_0 = arith.constant 0 : i32
    return %c0_i32, %arg1 : i32, i32
  }
  func.func @transform_4(%arg0: i32, %arg1: i32) -> (i32, i32) {
    %c0_i32 = arith.constant 0 : i32
    return %arg0, %arg1 : i32, i32
  }
}

module attributes {stable_mosaic.version = 11 : i64} {
  func.func @_resize_to_nchw_kernel(%arg0: i32, %arg1: memref<49x2401xf32, #tpu.memory_space<vmem>>, %arg2: memref<1x2x49xf32, #tpu.memory_space<vmem>>, %arg3: memref<1x2x2401xf32, #tpu.memory_space<vmem>>) attributes {dimension_semantics = [#tpu.dimension_semantics<parallel>], iteration_bounds = array<i64: 2>, scalar_prefetch = 0 : i64, scratch_operands = 0 : i64, tpu.core_type = #tpu.core_type<tc>, window_params = [{pipeline_mode = #tpu.pipeline_mode<synchronous>, transform_indices = @transform_0, window_bounds = array<i64: 49, 2401>}, {transform_indices = @transform_1, window_bounds = array<i64: 1, 2, 49>}, {transform_indices = @transform_2, window_bounds = array<i64: 1, 2, 2401>}]} {
    %c0 = arith.constant 0 : index
    %c0_0 = arith.constant 0 : index
    %c0_1 = arith.constant 0 : index
    %0 = vector.load %arg2[%c0, %c0_0, %c0_1] : memref<1x2x49xf32, #tpu.memory_space<vmem>>, vector<1x2x49xf32>
    %1 = vector.shape_cast %0 : vector<1x2x49xf32> to vector<2x49xf32>
    %c0_2 = arith.constant 0 : index
    %c0_3 = arith.constant 0 : index
    %2 = vector.load %arg1[%c0_2, %c0_3] : memref<49x2401xf32, #tpu.memory_space<vmem>>, vector<49x2401xf32>
    %cst = arith.constant dense<0.000000e+00> : vector<2x2401xf32>
    %3 = tpu.matmul %1, %2, %cst {dimension_numbers = #tpu.dot_dimension_numbers<[1], [0], [0], [1], [0, 0, 1, 1], [], []>} : vector<2x49xf32>, vector<49x2401xf32>, vector<2x2401xf32> -> vector<2x2401xf32>
    %c0_4 = arith.constant 0 : index
    %c0_5 = arith.constant 0 : index
    %c0_6 = arith.constant 0 : index
    %4 = vector.load %arg3[%c0_4, %c0_5, %c0_6] : memref<1x2x2401xf32, #tpu.memory_space<vmem>>, vector<1x2x2401xf32>
    %5 = vector.shape_cast %4 : vector<1x2x2401xf32> to vector<2x2401xf32>
    %6 = vector.shape_cast %3 : vector<2x2401xf32> to vector<1x2x2401xf32>
    tpu.vector_store %arg3[%c0_4, %c0_5, %c0_6], %6 {strides = array<i32>} : memref<1x2x2401xf32, #tpu.memory_space<vmem>>, vector<1x2x2401xf32>,
    return
  }
  func.func @transform_0(%arg0: i32) -> (i32, i32) {
    %c0_i32 = arith.constant 0 : i32
    %c0_i32_0 = arith.constant 0 : i32
    %c0_i32_1 = arith.constant 0 : i32
    return %c0_i32, %c0_i32_0 : i32, i32
  }
  func.func @transform_1(%arg0: i32) -> (i32, i32, i32) {
    %c0_i32 = arith.constant 0 : i32
    %c0_i32_0 = arith.constant 0 : i32
    %c0_i32_1 = arith.constant 0 : i32
    return %arg0, %c0_i32, %c0_i32_0 : i32, i32, i32
  }
  func.func @transform_2(%arg0: i32) -> (i32, i32, i32) {
    %c0_i32 = arith.constant 0 : i32
    %c0_i32_0 = arith.constant 0 : i32
    %c0_i32_1 = arith.constant 0 : i32
    return %arg0, %c0_i32, %c0_i32_0 : i32, i32, i32
  }
}

</mosaic_0001>

<bundles_post_ra>
// kernel: _lambda_.61
= control target key start
LH: loop header
LB: loop body
LE: loop exit
PB: predicated region body
PF: predicated region fallthrough
CT: control target
= control target key end

     0   :  { %s2347_s15 = smov 0   ;;  %s2349_s16 = smov 0   ;;  %s2702_s0 = inlined_call_operand.vmem [shape: bf16[1536,256], index: 0, kind: input, shape index: {}]   ;;  %s2703_s1 = inlined_call_operand.vmem [shape: bf16[256,128], index: 1, kind: input, shape index: {}]   ;;  %s2704_s2 = inlined_call_operand.vmem [shape: f32[1,128], index: 2, kind: input, shape index: {}]   ;;  %s2705_s3 = inlined_call_operand.vmem [shape: f32[1,128], index: 3, kind: input, shape index: {}]   ;;  %s2706_s4 = inlined_call_operand.vmem [shape: bf16[1536,128], index: 4, kind: output, shape index: {}]  }
   0x1   :  { %s2351_s17 = smov 0  }
   0x2 LB: > { %s26_s18 = sadd.s32 1, %s2315_s16  ;;  %p1718_p0 = scmp.ge.s32.totalorder %s2319_s17, 1  ;;  %s2319_s17 = sphi %s2351_s17, %s14_s17   ;;  %s2315_s16 = sphi %s2349_s16, %s2708_s16   ;;  %s2311_s15 = sphi %s2347_s15, %s2707_s15  }
   0x3   : > { %p28_p1 = scmp.ge.s32.totalorder %s26_s18, 3  ;;  %p203_p2 = scmp.lt.s32.totalorder %s2319_s17, 4 }
   0x5   : > { %s2710_s18 = smov (%p28_p1, %s26_s18), 0  ;;  %p204_p3 = pnand %p1718_p0, %p203_p2 }
   0x6   : > { %v2185_v0 = vld [vmem:[%s2703_s1] sm:$0xff] (!%p204_p3)   ;;  %v2321_v1 = vmov (!%p204_p3), 0   ;;  %s1719_s21 = sshll.u32 (!%p204_p3), %s2311_s15, 6  ;;  %v2186_v2 = vld [vmem:[%s2703_s1 + $0x8] sm:$0xff] (!%p204_p3)   ;;  %v2187_v3 = vld [vmem:[%s2703_s1 + $0x10] sm:$0xff] (!%p204_p3)  }
   0x7   : > { %207 = sbr.rel (%p204_p3) target bundleno = 415 (0x19f), region = 36  ;;  %782 = vmatprep.subr.bf16.mxu0 (!%p204_p3), %v2321_v1  ;;  %2128 = vmatprep.subr.bf16.mxu1 (!%p204_p3), %v2321_v1  ;;  %p244_p4 = scmp.lt.s32.totalorder (!%p204_p3), %s1719_s21, 191  ;;  %v2188_v4 = vld [vmem:[%s2703_s1 + $0x18] sm:$0xff] (!%p204_p3)   ;;  %v2189_v5 = vld [vmem:[%s2703_s1 + $0x20] sm:$0xff] (!%p204_p3)   ;;  %v2190_v7 = vld [vmem:[%s2703_s1 + $0x28] sm:$0xff] (!%p204_p3)  }
   0x8   : > { %783 = vmatpush1.bf16.msra.mxu0 (!%p204_p3), %v2185_v0  ;;  %2144 = vmatpush1.bf16.msra.mxu1 (!%p204_p3), %v2185_v0  ;;  %v2191_v9 = vld [vmem:[%s2703_s1 + $0x30] sm:$0xff] (!%p204_p3)   ;;  %v2192_v10 = vld [vmem:[%s2703_s1 + $0x38] sm:$0xff] (!%p204_p3)   ;;  %v2193_v11 = vld [vmem:[%s2703_s1 + $0x40] sm:$0xff] (!%p204_p3)  }
   0x9   : > { %784 = vmatprep.subr.bf16.mxu0 (!%p204_p3), %v2321_v1  ;;  %2129 = vmatprep.subr.bf16.mxu1 (!%p204_p3), %v2321_v1  ;;  %v2194_v12 = vld [vmem:[%s2703_s1 + $0x48] sm:$0xff] (!%p204_p3)   ;;  %v2195_v13 = vld [vmem:[%s2703_s1 + $0x50] sm:$0xff] (!%p204_p3)   ;;  %v2196_v14 = vld [vmem:[%s2703_s1 + $0x58] sm:$0xff] (!%p204_p3)  }
   0xa   : > { %v2197_v15 = vld [vmem:[%s2703_s1 + $0x60] sm:$0xff] (!%p204_p3)   ;;  %v2198_v16 = vld [vmem:[%s2703_s1 + $0x68] sm:$0xff] (!%p204_p3)   ;;  %v2199_v17 = vld [vmem:[%s2703_s1 + $0x70] sm:$0xff] (!%p204_p3)  }
   0xb   : > { %v2200_v18 = vld [vmem:[%s2703_s1 + $0x78] sm:$0xff] (!%p204_p3)  }
   0xc   : > { %785 = vmatpush1.bf16.msra.mxu0 (!%p204_p3), %v2186_v2  ;;  %2145 = vmatpush1.bf16.msra.mxu1 (!%p204_p3), %v2186_v2 }
   0xd   : > { %786 = vmatprep.subr.bf16.mxu0 (!%p204_p3), %v2321_v1  ;;  %2130 = vmatprep.subr.bf16.mxu1 (!%p204_p3), %v2321_v1 }
   0xe   : > { %s2712_s21 = smov (!%p244_p4, %s1719_s21), 191 }
   0xf   : > { %s1872_s28 = sshll.u32 %s2712_s21, 3 }
  0x10   : > { %787 = vmatpush1.bf16.msra.mxu0 %v2187_v3  ;;  %2146 = vmatpush1.bf16.msra.mxu1 %v2187_v3  ;;  %s2394_s7 = scalar_lea.vmem %s2702_s0, %s1872_s28 }
  0x11   : > { %788 = vmatprep.subr.bf16.mxu0 %v2321_v1  ;;  %2131 = vmatprep.subr.bf16.mxu1 %v2321_v1  ;;  %v2203_v6 = vld [vmem:[%s2394_s7 + $0x4] ss:$8 sps:$4 sm:$0xff]   ;;  %v2201_v19 = vld [vmem:[%s2394_s7] ss:$8 sps:$4 sm:$0xff]   ;;  %v2207_v21 = vld [vmem:[%s2394_s7 + $0x14] ss:$8 sps:$4 sm:$0xff]  }
  0x12   : > { %v2206_v8 = vld [vmem:[%s2394_s7 + $0x104] ss:$8 sps:$4 sm:$0xff]   ;;  %814 = vmatprep.mubr.bf16.mxu0 %v2203_v6  ;;  %v2204_v20 = vld [vmem:[%s2394_s7 + $0x100] ss:$8 sps:$4 sm:$0xff]   ;;  %v2209_v22 = vld [vmem:[%s2394_s7 + $0x114] ss:$8 sps:$4 sm:$0xff]  }
  0x13   : > { %942 = vmatprep.mubr.bf16.mxu1 %v2206_v8  ;;  %v2211_v23 = vld [vmem:[%s2394_s7 + $0x10] ss:$8 sps:$4 sm:$0xff]   ;;  %v2213_v25 = vld [vmem:[%s2394_s7 + $0x24] ss:$8 sps:$4 sm:$0xff]   ;;  %v2217_v27 = vld [vmem:[%s2394_s7 + $0x20] ss:$8 sps:$4 sm:$0xff]  }
  0x14   : > { %789 = vmatpush1.bf16.msra.mxu0 %v2188_v4  ;;  %2147 = vmatpush1.bf16.msra.mxu1 %v2188_v4  ;;  %v2212_v24 = vld [vmem:[%s2394_s7 + $0x110] ss:$8 sps:$4 sm:$0xff]   ;;  %v2215_v26 = vld [vmem:[%s2394_s7 + $0x124] ss:$8 sps:$4 sm:$0xff]   ;;  %v2218_v28 = vld [vmem:[%s2394_s7 + $0x120] ss:$8 sps:$4 sm:$0xff]  }
  0x15   : > { %790 = vmatprep.subr.bf16.mxu0 %v2321_v1  ;;  %2132 = vmatprep.subr.bf16.mxu1 %v2321_v1  ;;  %v2219_v29 = vld [vmem:[%s2394_s7 + $0x34] ss:$8 sps:$4 sm:$0xff]   ;;  %v2223_v31 = vld [vmem:[%s2394_s7 + $0x30] ss:$8 sps:$4 sm:$0xff]   ;;  %v2225_v33 = vld [vmem:[%s2394_s7 + $0x44] ss:$8 sps:$4 sm:$0xff]  }
  0x16   : > { %v2221_v30 = vld [vmem:[%s2394_s7 + $0x134] ss:$8 sps:$4 sm:$0xff]   ;;  %v2224_v32 = vld [vmem:[%s2394_s7 + $0x130] ss:$8 sps:$4 sm:$0xff]   ;;  %v2227_v34 = vld [vmem:[%s2394_s7 + $0x144] ss:$8 sps:$4 sm:$0xff]  }
  0x17   : > { %v2229_v35 = vld [vmem:[%s2394_s7 + $0x40] ss:$8 sps:$4 sm:$0xff]   ;;  %v2231_v37 = vld [vmem:[%s2394_s7 + $0x54] ss:$8 sps:$4 sm:$0xff]   ;;  %v2235_v39 = vld [vmem:[%s2394_s7 + $0x50] ss:$8 sps:$4 sm:$0xff]  }
  0x18   : > { %791 = vmatpush1.bf16.msra.mxu0 %v2189_v5  ;;  %2148 = vmatpush1.bf16.msra.mxu1 %v2189_v5  ;;  %v2230_v36 = vld [vmem:[%s2394_s7 + $0x140] ss:$8 sps:$4 sm:$0xff]   ;;  %v2233_v38 = vld [vmem:[%s2394_s7 + $0x154] ss:$8 sps:$4 sm:$0xff]   ;;  %v2236_v40 = vld [vmem:[%s2394_s7 + $0x150] ss:$8 sps:$4 sm:$0xff]  }
  0x19   : > { %792 = vmatprep.subr.bf16.mxu0 %v2321_v1  ;;  %2133 = vmatprep.subr.bf16.mxu1 %v2321_v1  ;;  %v2237_v41 = vld [vmem:[%s2394_s7 + $0x64] ss:$8 sps:$4 sm:$0xff]   ;;  %v2241_v43 = vld [vmem:[%s2394_s7 + $0x60] ss:$8 sps:$4 sm:$0xff]   ;;  %v2243_v45 = vld [vmem:[%s2394_s7 + $0x74] ss:$8 sps:$4 sm:$0xff]  }
  0x1a   : > { %v2239_v42 = vld [vmem:[%s2394_s7 + $0x164] ss:$8 sps:$4 sm:$0xff]   ;;  %v2242_v44 = vld [vmem:[%s2394_s7 + $0x160] ss:$8 sps:$4 sm:$0xff]   ;;  %v2245_v46 = vld [vmem:[%s2394_s7 + $0x174] ss:$8 sps:$4 sm:$0xff]  }
  0x1b   : > { %v2247_v47 = vld [vmem:[%s2394_s7 + $0x70] ss:$8 sps:$4 sm:$0xff]   ;;  %v2249_v49 = vld [vmem:[%s2394_s7 + $0x84] ss:$8 sps:$4 sm:$0xff]   ;;  %v2253_v51 = vld [vmem:[%s2394_s7 + $0x80] ss:$8 sps:$4 sm:$0xff]  }
  0x1c   : > { %793 = vmatpush1.bf16.msra.mxu0 %v2190_v7  ;;  %2149 = vmatpush1.bf16.msra.mxu1 %v2190_v7  ;;  %v2248_v48 = vld [vmem:[%s2394_s7 + $0x170] ss:$8 sps:$4 sm:$0xff]   ;;  %v2251_v50 = vld [vmem:[%s2394_s7 + $0x184] ss:$8 sps:$4 sm:$0xff]   ;;  %v2254_v52 = vld [vmem:[%s2394_s7 + $0x180] ss:$8 sps:$4 sm:$0xff]  }
  0x1d   : > { %794 = vmatprep.subr.bf16.mxu0 %v2321_v1  ;;  %2134 = vmatprep.subr.bf16.mxu1 %v2321_v1  ;;  %v2255_v53 = vld [vmem:[%s2394_s7 + $0x94] ss:$8 sps:$4 sm:$0xff]   ;;  %v2259_v55 = vld [vmem:[%s2394_s7 + $0x90] ss:$8 sps:$4 sm:$0xff]   ;;  %v2261_v57 = vld [vmem:[%s2394_s7 + $0xa4] ss:$8 sps:$4 sm:$0xff]  }
  0x1e   : > { %v2257_v54 = vld [vmem:[%s2394_s7 + $0x194] ss:$8 sps:$4 sm:$0xff]   ;;  %v2260_v56 = vld [vmem:[%s2394_s7 + $0x190] ss:$8 sps:$4 sm:$0xff]   ;;  %v2263_v58 = vld [vmem:[%s2394_s7 + $0x1a4] ss:$8 sps:$4 sm:$0xff]  }
  0x1f   : > { %v2265_v59 = vld [vmem:[%s2394_s7 + $0xa0] ss:$8 sps:$4 sm:$0xff]   ;;  %v2267_v61 = vld [vmem:[%s2394_s7 + $0xb4] ss:$8 sps:$4 sm:$0xff]   ;;  %v2271_v63 = vld [vmem:[%s2394_s7 + $0xb0] ss:$8 sps:$4 sm:$0xff]  }
  0x20   : > { %795 = vmatpush1.bf16.msra.mxu0 %v2191_v9  ;;  %2150 = vmatpush1.bf16.msra.mxu1 %v2191_v9  ;;  %v2266_v60 = vld [vmem:[%s2394_s7 + $0x1a0] ss:$8 sps:$4 sm:$0xff]   ;;  %v2269_v62 = vld [vmem:[%s2394_s7 + $0x1b4] ss:$8 sps:$4 sm:$0xff]   ;;  %v2272_v0 = vld [vmem:[%s2394_s7 + $0x1b0] ss:$8 sps:$4 sm:$0xff]  }
  0x21   : > { %796 = vmatprep.subr.bf16.mxu0 %v2321_v1  ;;  %2135 = vmatprep.subr.bf16.mxu1 %v2321_v1  ;;  %v2275_v2 = vld [vmem:[%s2394_s7 + $0x1c4] ss:$8 sps:$4 sm:$0xff]   ;;  %v2277_v3 = vld [vmem:[%s2394_s7 + $0xc0] ss:$8 sps:$4 sm:$0xff]   ;;  %v2279_v5 = vld [vmem:[%s2394_s7 + $0xd4] ss:$8 sps:$4 sm:$0xff]  }
  0x22   : > { %v2278_v4 = vld [vmem:[%s2394_s7 + $0x1c0] ss:$8 sps:$4 sm:$0xff]   ;;  %v2281_v6 = vld [vmem:[%s2394_s7 + $0x1d4] ss:$8 sps:$4 sm:$0xff]   ;;  %v2283_v7 = vld [vmem:[%s2394_s7 + $0xd0] ss:$8 sps:$4 sm:$0xff]  }
  0x23   : > { %v2284_v8 = vld [vmem:[%s2394_s7 + $0x1d0] ss:$8 sps:$4 sm:$0xff]   ;;  %v2285_v9 = vld [vmem:[%s2394_s7 + $0xe4] ss:$8 sps:$4 sm:$0xff]  }
  0x24   : > { %797 = vmatpush1.bf16.msra.mxu0 %v2192_v10  ;;  %2151 = vmatpush1.bf16.msra.mxu1 %v2192_v10  ;;  %v2287_v10 = vld [vmem:[%s2394_s7 + $0x1e4] ss:$8 sps:$4 sm:$0xff]  }
  0x25   : > { %798 = vmatprep.subr.bf16.mxu0 %v2321_v1  ;;  %2136 = vmatprep.subr.bf16.mxu1 %v2321_v1 }
  0x28   : > { %799 = vmatpush1.bf16.msra.mxu0 %v2193_v11  ;;  %2152 = vmatpush1.bf16.msra.mxu1 %v2193_v11  ;;  %v2289_v11 = vld [vmem:[%s2394_s7 + $0xe0] ss:$8 sps:$4 sm:$0xff]  }
  0x29   : > { %800 = vmatprep.subr.bf16.mxu0 %v2321_v1  ;;  %2137 = vmatprep.subr.bf16.mxu1 %v2321_v1 }
  0x2c   : > { %801 = vmatpush1.bf16.msra.mxu0 %v2194_v12  ;;  %2153 = vmatpush1.bf16.msra.mxu1 %v2194_v12  ;;  %v2290_v12 = vld [vmem:[%s2394_s7 + $0x1e0] ss:$8 sps:$4 sm:$0xff]  }
  0x2d   : > { %802 = vmatprep.subr.bf16.mxu0 %v2321_v1  ;;  %2138 = vmatprep.subr.bf16.mxu1 %v2321_v1 }
  0x30   : > { %803 = vmatpush1.bf16.msra.mxu0 %v2195_v13  ;;  %2154 = vmatpush1.bf16.msra.mxu1 %v2195_v13  ;;  %v2291_v13 = vld [vmem:[%s2394_s7 + $0xf4] ss:$8 sps:$4 sm:$0xff]  }
  0x31   : > { %804 = vmatprep.subr.bf16.mxu0 %v2321_v1  ;;  %2139 = vmatprep.subr.bf16.mxu1 %v2321_v1 }
  0x34   : > { %805 = vmatpush1.bf16.msra.mxu0 %v2196_v14  ;;  %2155 = vmatpush1.bf16.msra.mxu1 %v2196_v14  ;;  %v2293_v14 = vld [vmem:[%s2394_s7 + $0x1f4] ss:$8 sps:$4 sm:$0xff]  }
  0x35   : > { %806 = vmatprep.subr.bf16.mxu0 %v2321_v1  ;;  %2140 = vmatprep.subr.bf16.mxu1 %v2321_v1 }
  0x38   : > { %807 = vmatpush1.bf16.msra.mxu0 %v2197_v15  ;;  %2156 = vmatpush1.bf16.msra.mxu1 %v2197_v15  ;;  %v2295_v15 = vld [vmem:[%s2394_s7 + $0xf0] ss:$8 sps:$4 sm:$0xff]  }
  0x39   : > { %808 = vmatprep.subr.bf16.mxu0 %v2321_v1  ;;  %2141 = vmatprep.subr.bf16.mxu1 %v2321_v1 }
  0x3c   : > { %809 = vmatpush1.bf16.msra.mxu0 %v2198_v16  ;;  %2157 = vmatpush1.bf16.msra.mxu1 %v2198_v16  ;;  %v2296_v16 = vld [vmem:[%s2394_s7 + $0x1f0] ss:$8 sps:$4 sm:$0xff]  }
  0x3d   : > { %810 = vmatprep.subr.bf16.mxu0 %v2321_v1  ;;  %2142 = vmatprep.subr.bf16.mxu1 %v2321_v1 }
  0x40   : > { %811 = vmatpush1.bf16.msra.mxu0 %v2199_v17  ;;  %2158 = vmatpush1.bf16.msra.mxu1 %v2199_v17  ;;  %v2520_v17 = vld [vmem:[%s2704_s2] ss:$0 sm:$0xff] }
  0x41   : > { %812 = vmatprep.subr.bf16.mxu0 %v2321_v1  ;;  %2143 = vmatprep.subr.bf16.mxu1 %v2321_v1  ;;  %v2273_v1 = vld [vmem:[%s2394_s7 + $0xc4] ss:$8 sps:$4 sm:$0xff]   ;;  %s1723_s7 = sshll.u32 %s2712_s21, 2 }
  0x42   : > { %s2539_s15 = scalar_lea.vmem %s2706_s4, %s1723_s7 }
  0x44   : > { %813 = vmatpush1.bf16.msra.mxu0 %v2200_v18  ;;  %2159 = vmatpush1.bf16.msra.mxu1 %v2200_v18 }
  0x47   : > { %815 = vmatmul.mubr.bf16.vlgmr.msra.gmra.mrb[0].mxu0 %v2201_v19  ;;  %943 = vmatmul.mubr.bf16.vlgmr.msra.gmra.mrb[0].mxu1 %v2204_v20  ;;  %v2525_v19 = vld [vmem:[%s2705_s3] ss:$0 sm:$0xff] }
  0x48   : > { %822 = vmatprep.mubr.bf16.mxu0 %v2207_v21  ;;  %950 = vmatprep.mubr.bf16.mxu1 %v2209_v22 }
  0x4f   : > { %823 = vmatmul.mubr.bf16.gmra.mrb[4].mxu0 %v2211_v23  ;;  %951 = vmatmul.mubr.bf16.gmra.mrb[4].mxu1 %v2212_v24 }
  0x50   : > { %830 = vmatprep.mubr.bf16.mxu0 %v2213_v25  ;;  %958 = vmatprep.mubr.bf16.mxu1 %v2215_v26 }
  0x57   : > { %831 = vmatmul.mubr.bf16.gmra.mrb[8].mxu0 %v2217_v27  ;;  %959 = vmatmul.mubr.bf16.gmra.mrb[8].mxu1 %v2218_v28 }
  0x58   : > { %838 = vmatprep.mubr.bf16.mxu0 %v2219_v29  ;;  %966 = vmatprep.mubr.bf16.mxu1 %v2221_v30 }
  0x5f   : > { %839 = vmatmul.mubr.bf16.gmra.mrb[12].mxu0 %v2223_v31  ;;  %967 = vmatmul.mubr.bf16.gmra.mrb[12].mxu1 %v2224_v32 }
  0x60   : > { %846 = vmatprep.mubr.bf16.mxu0 %v2225_v33  ;;  %974 = vmatprep.mubr.bf16.mxu1 %v2227_v34 }
  0x67   : > { %847 = vmatmul.mubr.bf16.gmra.mrb[16].mxu0 %v2229_v35  ;;  %975 = vmatmul.mubr.bf16.gmra.mrb[16].mxu1 %v2230_v36 }
  0x68   : > { %854 = vmatprep.mubr.bf16.mxu0 %v2231_v37  ;;  %982 = vmatprep.mubr.bf16.mxu1 %v2233_v38 }
  0x6f   : > { %855 = vmatmul.mubr.bf16.gmra.mrb[20].mxu0 %v2235_v39  ;;  %983 = vmatmul.mubr.bf16.gmra.mrb[20].mxu1 %v2236_v40 }
  0x70   : > { %862 = vmatprep.mubr.bf16.mxu0 %v2237_v41  ;;  %990 = vmatprep.mubr.bf16.mxu1 %v2239_v42 }
  0x77   : > { %863 = vmatmul.mubr.bf16.gmra.mrb[24].mxu0 %v2241_v43  ;;  %991 = vmatmul.mubr.bf16.gmra.mrb[24].mxu1 %v2242_v44 }
  0x78   : > { %870 = vmatprep.mubr.bf16.mxu0 %v2243_v45  ;;  %998 = vmatprep.mubr.bf16.mxu1 %v2245_v46 }
  0x7f   : > { %871 = vmatmul.mubr.bf16.gmra.mrb[28].mxu0 %v2247_v47  ;;  %999 = vmatmul.mubr.bf16.gmra.mrb[28].mxu1 %v2248_v48 }
  0x80   : > { %878 = vmatprep.mubr.bf16.mxu0 %v2249_v49  ;;  %1006 = vmatprep.mubr.bf16.mxu1 %v2251_v50 }
  0x87   : > { %879 = vmatmul.mubr.bf16.gmra.mrb[32].mxu0 %v2253_v51  ;;  %1007 = vmatmul.mubr.bf16.gmra.mrb[32].mxu1 %v2254_v52 }
  0x88   : > { %886 = vmatprep.mubr.bf16.mxu0 %v2255_v53  ;;  %1014 = vmatprep.mubr.bf16.mxu1 %v2257_v54 }
  0x8f   : > { %887 = vmatmul.mubr.bf16.gmra.mrb[36].mxu0 %v2259_v55  ;;  %1015 = vmatmul.mubr.bf16.gmra.mrb[36].mxu1 %v2260_v56 }
  0x90   : > { %894 = vmatprep.mubr.bf16.mxu0 %v2261_v57  ;;  %1022 = vmatprep.mubr.bf16.mxu1 %v2263_v58 }
  0x97   : > { %895 = vmatmul.mubr.bf16.gmra.mrb[40].mxu0 %v2265_v59  ;;  %1023 = vmatmul.mubr.bf16.gmra.mrb[40].mxu1 %v2266_v60 }
  0x98   : > { %902 = vmatprep.mubr.bf16.mxu0 %v2267_v61  ;;  %1030 = vmatprep.mubr.bf16.mxu1 %v2269_v62 }
  0x9f   : > { %903 = vmatmul.mubr.bf16.gmra.mrb[44].mxu0 %v2271_v63  ;;  %1031 = vmatmul.mubr.bf16.gmra.mrb[44].mxu1 %v2272_v0 }
  0xa0   : > { %910 = vmatprep.mubr.bf16.mxu0 %v2273_v1  ;;  %1038 = vmatprep.mubr.bf16.mxu1 %v2275_v2 }
  0xa7   : > { %911 = vmatmul.mubr.bf16.gmra.mrb[48].mxu0 %v2277_v3  ;;  %1039 = vmatmul.mubr.bf16.gmra.mrb[48].mxu1 %v2278_v4 }
  0xa8   : > { %918 = vmatprep.mubr.bf16.mxu0 %v2279_v5  ;;  %1046 = vmatprep.mubr.bf16.mxu1 %v2281_v6 }
  0xaf   : > { %919 = vmatmul.mubr.bf16.gmra.mrb[52].mxu0 %v2283_v7  ;;  %1047 = vmatmul.mubr.bf16.gmra.mrb[52].mxu1 %v2284_v8 }
  0xb0   : > { %926 = vmatprep.mubr.bf16.mxu0 %v2285_v9  ;;  %1054 = vmatprep.mubr.bf16.mxu1 %v2287_v10 }
  0xb7   : > { %927 = vmatmul.mubr.bf16.gmra.mrb[56].mxu0 %v2289_v11  ;;  %1055 = vmatmul.mubr.bf16.gmra.mrb[56].mxu1 %v2290_v12 }
  0xb8   : > { %934 = vmatprep.mubr.bf16.mxu0 %v2291_v13  ;;  %1062 = vmatprep.mubr.bf16.mxu1 %v2293_v14 }
  0xbf   : > { %935 = vmatmul.mubr.bf16.gmra.mrb[60].mxu0 %v2295_v15  ;;  %1063 = vmatmul.mubr.bf16.gmra.mrb[60].mxu1 %v2296_v16 }
 0x11a   : > { %v816_v18 = vpop.f32.mrb[0].mxu0  ;;  %v944_v20 = vpop.f32.mrb[0].mxu1 }
 0x11b   : > { %v1078_v21 = vmul.f32 %v2520_v17, %v816_v18  ;;  %v1110_v22 = vmul.f32 %v2520_v17, %v944_v20  ;;  %v818_v23 = vpop.f32.mrb[1].mxu0  ;;  %v946_v24 = vpop.f32.mrb[1].mxu1 }
 0x11c   : > { %v819_v25 = vpop.f32.mrb[2].mxu0  ;;  %v947_v26 = vpop.f32.mrb[2].mxu1 }
 0x11d   : > { %v1149_v27 = vadd.f32 %v2525_v19, %v1078_v21  ;;  %v1181_v28 = vadd.f32 %v2525_v19, %v1110_v22  ;;  %v1079_v29 = vmul.f32 %v2520_v17, %v819_v25  ;;  %v1111_v30 = vmul.f32 %v2520_v17, %v947_v26  ;;  %v821_v31 = vpop.f32.mrb[3].mxu0  ;;  %v949_v32 = vpop.f32.mrb[3].mxu1 }
 0x11f   : > { %v1150_v33 = vadd.f32 %v2525_v19, %v1079_v29  ;;  %v1182_v34 = vadd.f32 %v2525_v19, %v1111_v30  ;;  %v1213_v35 = vmax.f32 %v1149_v27, 0.0  ;;  %v1245_v36 = vmax.f32 %v1181_v28, 0.0 }
 0x121   : > { %v1214_v37 = vmax.f32 %v1150_v33, 0.0  ;;  %v1246_v38 = vmax.f32 %v1182_v34, 0.0 }
 0x122   : > { %v824_v39 = vpop.f32.mrb[4].mxu0  ;;  %v952_v40 = vpop.f32.mrb[4].mxu1 }
 0x123   : > { %v1940_v41 = vpack.c.bf16 %v1214_v37, %v1213_v35  ;;  %v2020_v42 = vpack.c.bf16 %v1246_v38, %v1245_v36  ;;  %v1080_v43 = vmul.f32 %v2520_v17, %v824_v39  ;;  %v1112_v44 = vmul.f32 %v2520_v17, %v952_v40  ;;  %v826_v45 = vpop.f32.mrb[5].mxu0  ;;  %v954_v46 = vpop.f32.mrb[5].mxu1 }
 0x124   : > { %v827_v47 = vpop.f32.mrb[6].mxu0  ;;  %v955_v48 = vpop.f32.mrb[6].mxu1 }
 0x125   : > { %1941 = vst [vmem:[%s2539_s15] sm:$0xff] %v1940_v41   ;;  %2112 = vst [vmem:[%s2539_s15 + $0x80] sm:$0xff] %v2020_v42   ;;  %v1151_v49 = vadd.f32 %v2525_v19, %v1080_v43  ;;  %v1183_v50 = vadd.f32 %v2525_v19, %v1112_v44  ;;  %v1081_v51 = vmul.f32 %v2520_v17, %v827_v47  ;;  %v829_v53 = vpop.f32.mrb[7].mxu0  ;;  %v957_v54 = vpop.f32.mrb[7].mxu1 }
 0x126   : > { %v1113_v52 = vmul.f32 %v2520_v17, %v955_v48 }
 0x127   : > { %v1152_v55 = vadd.f32 %v2525_v19, %v1081_v51  ;;  %v1215_v57 = vmax.f32 %v1151_v49, 0.0  ;;  %v1247_v58 = vmax.f32 %v1183_v50, 0.0 }
 0x128   : > { %v1184_v56 = vadd.f32 %v2525_v19, %v1113_v52 }
 0x129   : > { %v1216_v59 = vmax.f32 %v1152_v55, 0.0 }
 0x12a   : > { %v1248_v60 = vmax.f32 %v1184_v56, 0.0  ;;  %v832_v61 = vpop.f32.mrb[8].mxu0  ;;  %v960_v62 = vpop.f32.mrb[8].mxu1 }
 0x12b   : > { %v1945_v63 = vpack.c.bf16 %v1216_v59, %v1215_v57  ;;  %v1082_v1 = vmul.f32 %v2520_v17, %v832_v61  ;;  %v1114_v2 = vmul.f32 %v2520_v17, %v960_v62  ;;  %v834_v3 = vpop.f32.mrb[9].mxu0  ;;  %v962_v4 = vpop.f32.mrb[9].mxu1 }
 0x12c   : > { %v2025_v0 = vpack.c.bf16 %v1248_v60, %v1247_v58  ;;  %v835_v5 = vpop.f32.mrb[10].mxu0  ;;  %v963_v6 = vpop.f32.mrb[10].mxu1 }
 0x12d   : > { %2097 = vst [vmem:[%s2539_s15 + $0x8] sm:$0xff] %v1945_v63   ;;  %v1153_v7 = vadd.f32 %v2525_v19, %v1082_v1  ;;  %v1185_v8 = vadd.f32 %v2525_v19, %v1114_v2  ;;  %v1083_v9 = vmul.f32 %v2520_v17, %v835_v5  ;;  %v1115_v10 = vmul.f32 %v2520_v17, %v963_v6  ;;  %v837_v11 = vpop.f32.mrb[11].mxu0  ;;  %v965_v12 = vpop.f32.mrb[11].mxu1 }
 0x12e   : > { %2113 = vst [vmem:[%s2539_s15 + $0x88] sm:$0xff] %v2025_v0  }
 0x12f   : > { %v1154_v13 = vadd.f32 %v2525_v19, %v1083_v9  ;;  %v1186_v14 = vadd.f32 %v2525_v19, %v1115_v10  ;;  %v1217_v15 = vmax.f32 %v1153_v7, 0.0  ;;  %v1249_v16 = vmax.f32 %v1185_v8, 0.0 }
 0x131   : > { %v1218_v18 = vmax.f32 %v1154_v13, 0.0  ;;  %v1250_v20 = vmax.f32 %v1186_v14, 0.0 }
 0x132   : > { %v840_v21 = vpop.f32.mrb[12].mxu0  ;;  %v968_v22 = vpop.f32.mrb[12].mxu1 }
 0x133   : > { %v1950_v23 = vpack.c.bf16 %v1218_v18, %v1217_v15  ;;  %v2030_v24 = vpack.c.bf16 %v1250_v20, %v1249_v16  ;;  %v1084_v25 = vmul.f32 %v2520_v17, %v840_v21  ;;  %v1116_v26 = vmul.f32 %v2520_v17, %v968_v22  ;;  %v842_v27 = vpop.f32.mrb[13].mxu0  ;;  %v970_v28 = vpop.f32.mrb[13].mxu1 }
 0x134   : > { %v843_v29 = vpop.f32.mrb[14].mxu0  ;;  %v971_v30 = vpop.f32.mrb[14].mxu1 }
 0x135   : > { %2098 = vst [vmem:[%s2539_s15 + $0x10] sm:$0xff] %v1950_v23   ;;  %2114 = vst [vmem:[%s2539_s15 + $0x90] sm:$0xff] %v2030_v24   ;;  %v1155_v31 = vadd.f32 %v2525_v19, %v1084_v25  ;;  %v1187_v32 = vadd.f32 %v2525_v19, %v1116_v26  ;;  %v1085_v33 = vmul.f32 %v2520_v17, %v843_v29  ;;  %v845_v35 = vpop.f32.mrb[15].mxu0  ;;  %v973_v36 = vpop.f32.mrb[15].mxu1 }
 0x136   : > { %v1117_v34 = vmul.f32 %v2520_v17, %v971_v30 }
 0x137   : > { %v1156_v37 = vadd.f32 %v2525_v19, %v1085_v33  ;;  %v1219_v39 = vmax.f32 %v1155_v31, 0.0  ;;  %v1251_v40 = vmax.f32 %v1187_v32, 0.0 }
 0x138   : > { %v1188_v38 = vadd.f32 %v2525_v19, %v1117_v34 }
 0x139   : > { %v1220_v41 = vmax.f32 %v1156_v37, 0.0 }
 0x13a   : > { %v1252_v42 = vmax.f32 %v1188_v38, 0.0  ;;  %v848_v43 = vpop.f32.mrb[16].mxu0  ;;  %v976_v44 = vpop.f32.mrb[16].mxu1 }
 0x13b   : > { %v1955_v45 = vpack.c.bf16 %v1220_v41, %v1219_v39  ;;  %v1086_v47 = vmul.f32 %v2520_v17, %v848_v43  ;;  %v1118_v48 = vmul.f32 %v2520_v17, %v976_v44  ;;  %v850_v49 = vpop.f32.mrb[17].mxu0  ;;  %v978_v50 = vpop.f32.mrb[17].mxu1 }
 0x13c   : > { %v2035_v46 = vpack.c.bf16 %v1252_v42, %v1251_v40  ;;  %v851_v51 = vpop.f32.mrb[18].mxu0  ;;  %v979_v52 = vpop.f32.mrb[18].mxu1 }
 0x13d   : > { %2099 = vst [vmem:[%s2539_s15 + $0x18] sm:$0xff] %v1955_v45   ;;  %v1157_v53 = vadd.f32 %v2525_v19, %v1086_v47  ;;  %v1189_v54 = vadd.f32 %v2525_v19, %v1118_v48  ;;  %v1087_v55 = vmul.f32 %v2520_v17, %v851_v51  ;;  %v1119_v56 = vmul.f32 %v2520_v17, %v979_v52  ;;  %v853_v57 = vpop.f32.mrb[19].mxu0  ;;  %v981_v58 = vpop.f32.mrb[19].mxu1 }
 0x13e   : > { %2115 = vst [vmem:[%s2539_s15 + $0x98] sm:$0xff] %v2035_v46  }
 0x13f   : > { %v1158_v59 = vadd.f32 %v2525_v19, %v1087_v55  ;;  %v1190_v60 = vadd.f32 %v2525_v19, %v1119_v56  ;;  %v1221_v61 = vmax.f32 %v1157_v53, 0.0  ;;  %v1253_v62 = vmax.f32 %v1189_v54, 0.0 }
 0x141   : > { %v1222_v63 = vmax.f32 %v1158_v59, 0.0  ;;  %v1254_v0 = vmax.f32 %v1190_v60, 0.0 }
 0x142   : > { %v856_v1 = vpop.f32.mrb[20].mxu0  ;;  %v984_v2 = vpop.f32.mrb[20].mxu1 }
 0x143   : > { %v1960_v3 = vpack.c.bf16 %v1222_v63, %v1221_v61  ;;  %v2040_v4 = vpack.c.bf16 %v1254_v0, %v1253_v62  ;;  %v1088_v5 = vmul.f32 %v2520_v17, %v856_v1  ;;  %v1120_v6 = vmul.f32 %v2520_v17, %v984_v2  ;;  %v858_v7 = vpop.f32.mrb[21].mxu0  ;;  %v986_v8 = vpop.f32.mrb[21].mxu1 }
 0x144   : > { %v859_v9 = vpop.f32.mrb[22].mxu0  ;;  %v987_v10 = vpop.f32.mrb[22].mxu1 }
 0x145   : > { %2100 = vst [vmem:[%s2539_s15 + $0x20] sm:$0xff] %v1960_v3   ;;  %2116 = vst [vmem:[%s2539_s15 + $0xa0] sm:$0xff] %v2040_v4   ;;  %v1159_v11 = vadd.f32 %v2525_v19, %v1088_v5  ;;  %v1191_v12 = vadd.f32 %v2525_v19, %v1120_v6  ;;  %v1089_v13 = vmul.f32 %v2520_v17, %v859_v9  ;;  %v861_v15 = vpop.f32.mrb[23].mxu0  ;;  %v989_v16 = vpop.f32.mrb[23].mxu1 }
 0x146   : > { %v1121_v14 = vmul.f32 %v2520_v17, %v987_v10 }
 0x147   : > { %v1160_v18 = vadd.f32 %v2525_v19, %v1089_v13  ;;  %v1223_v21 = vmax.f32 %v1159_v11, 0.0  ;;  %v1255_v22 = vmax.f32 %v1191_v12, 0.0 }
 0x148   : > { %v1192_v20 = vadd.f32 %v2525_v19, %v1121_v14 }
 0x149   : > { %v1224_v23 = vmax.f32 %v1160_v18, 0.0 }
 0x14a   : > { %v1256_v24 = vmax.f32 %v1192_v20, 0.0  ;;  %v864_v25 = vpop.f32.mrb[24].mxu0  ;;  %v992_v26 = vpop.f32.mrb[24].mxu1 }
 0x14b   : > { %v1965_v27 = vpack.c.bf16 %v1224_v23, %v1223_v21  ;;  %v1090_v29 = vmul.f32 %v2520_v17, %v864_v25  ;;  %v1122_v30 = vmul.f32 %v2520_v17, %v992_v26  ;;  %v866_v31 = vpop.f32.mrb[25].mxu0  ;;  %v994_v32 = vpop.f32.mrb[25].mxu1 }
 0x14c   : > { %v2045_v28 = vpack.c.bf16 %v1256_v24, %v1255_v22  ;;  %v867_v33 = vpop.f32.mrb[26].mxu0  ;;  %v995_v34 = vpop.f32.mrb[26].mxu1 }
 0x14d   : > { %2101 = vst [vmem:[%s2539_s15 + $0x28] sm:$0xff] %v1965_v27   ;;  %v1161_v35 = vadd.f32 %v2525_v19, %v1090_v29  ;;  %v1193_v36 = vadd.f32 %v2525_v19, %v1122_v30  ;;  %v1091_v37 = vmul.f32 %v2520_v17, %v867_v33  ;;  %v1123_v38 = vmul.f32 %v2520_v17, %v995_v34  ;;  %v869_v39 = vpop.f32.mrb[27].mxu0  ;;  %v997_v40 = vpop.f32.mrb[27].mxu1 }
 0x14e   : > { %2117 = vst [vmem:[%s2539_s15 + $0xa8] sm:$0xff] %v2045_v28  }
 0x14f   : > { %v1162_v41 = vadd.f32 %v2525_v19, %v1091_v37  ;;  %v1194_v42 = vadd.f32 %v2525_v19, %v1123_v38  ;;  %v1225_v43 = vmax.f32 %v1161_v35, 0.0  ;;  %v1257_v44 = vmax.f32 %v1193_v36, 0.0 }
 0x151   : > { %v1226_v45 = vmax.f32 %v1162_v41, 0.0  ;;  %v1258_v46 = vmax.f32 %v1194_v42, 0.0 }
 0x152   : > { %v872_v47 = vpop.f32.mrb[28].mxu0  ;;  %v1000_v48 = vpop.f32.mrb[28].mxu1 }
 0x153   : > { %v1970_v49 = vpack.c.bf16 %v1226_v45, %v1225_v43  ;;  %v2050_v50 = vpack.c.bf16 %v1258_v46, %v1257_v44  ;;  %v1092_v51 = vmul.f32 %v2520_v17, %v872_v47  ;;  %v1124_v52 = vmul.f32 %v2520_v17, %v1000_v48  ;;  %v874_v53 = vpop.f32.mrb[29].mxu0  ;;  %v1002_v54 = vpop.f32.mrb[29].mxu1 }
 0x154   : > { %v875_v55 = vpop.f32.mrb[30].mxu0  ;;  %v1003_v56 = vpop.f32.mrb[30].mxu1 }
 0x155   : > { %2102 = vst [vmem:[%s2539_s15 + $0x30] sm:$0xff] %v1970_v49   ;;  %2118 = vst [vmem:[%s2539_s15 + $0xb0] sm:$0xff] %v2050_v50   ;;  %v1163_v57 = vadd.f32 %v2525_v19, %v1092_v51  ;;  %v1195_v58 = vadd.f32 %v2525_v19, %v1124_v52  ;;  %v1093_v59 = vmul.f32 %v2520_v17, %v875_v55  ;;  %v877_v61 = vpop.f32.mrb[31].mxu0  ;;  %v1005_v62 = vpop.f32.mrb[31].mxu1 }
 0x156   : > { %v1125_v60 = vmul.f32 %v2520_v17, %v1003_v56 }
 0x157   : > { %v1164_v63 = vadd.f32 %v2525_v19, %v1093_v59  ;;  %v1227_v1 = vmax.f32 %v1163_v57, 0.0  ;;  %v1259_v2 = vmax.f32 %v1195_v58, 0.0 }
 0x158   : > { %v1196_v0 = vadd.f32 %v2525_v19, %v1125_v60 }
 0x159   : > { %v1228_v3 = vmax.f32 %v1164_v63, 0.0 }
 0x15a   : > { %v1260_v4 = vmax.f32 %v1196_v0, 0.0  ;;  %v880_v5 = vpop.f32.mrb[32].mxu0  ;;  %v1008_v6 = vpop.f32.mrb[32].mxu1 }
 0x15b   : > { %v1975_v7 = vpack.c.bf16 %v1228_v3, %v1227_v1  ;;  %v1094_v9 = vmul.f32 %v2520_v17, %v880_v5  ;;  %v1126_v10 = vmul.f32 %v2520_v17, %v1008_v6  ;;  %v882_v11 = vpop.f32.mrb[33].mxu0  ;;  %v1010_v12 = vpop.f32.mrb[33].mxu1 }
 0x15c   : > { %v2055_v8 = vpack.c.bf16 %v1260_v4, %v1259_v2  ;;  %v883_v13 = vpop.f32.mrb[34].mxu0  ;;  %v1011_v14 = vpop.f32.mrb[34].mxu1 }
 0x15d   : > { %2103 = vst [vmem:[%s2539_s15 + $0x38] sm:$0xff] %v1975_v7   ;;  %v1165_v15 = vadd.f32 %v2525_v19, %v1094_v9  ;;  %v1197_v16 = vadd.f32 %v2525_v19, %v1126_v10  ;;  %v1095_v18 = vmul.f32 %v2520_v17, %v883_v13  ;;  %v1127_v20 = vmul.f32 %v2520_v17, %v1011_v14  ;;  %v885_v21 = vpop.f32.mrb[35].mxu0  ;;  %v1013_v22 = vpop.f32.mrb[35].mxu1 }
 0x15e   : > { %2119 = vst [vmem:[%s2539_s15 + $0xb8] sm:$0xff] %v2055_v8  }
 0x15f   : > { %v1166_v23 = vadd.f32 %v2525_v19, %v1095_v18  ;;  %v1198_v24 = vadd.f32 %v2525_v19, %v1127_v20  ;;  %v1229_v25 = vmax.f32 %v1165_v15, 0.0  ;;  %v1261_v26 = vmax.f32 %v1197_v16, 0.0 }
 0x161   : > { %v1230_v27 = vmax.f32 %v1166_v23, 0.0  ;;  %v1262_v28 = vmax.f32 %v1198_v24, 0.0 }
 0x162   : > { %v888_v29 = vpop.f32.mrb[36].mxu0  ;;  %v1016_v30 = vpop.f32.mrb[36].mxu1 }
 0x163   : > { %v1980_v31 = vpack.c.bf16 %v1230_v27, %v1229_v25  ;;  %v2060_v32 = vpack.c.bf16 %v1262_v28, %v1261_v26  ;;  %v1096_v33 = vmul.f32 %v2520_v17, %v888_v29  ;;  %v1128_v34 = vmul.f32 %v2520_v17, %v1016_v30  ;;  %v890_v35 = vpop.f32.mrb[37].mxu0  ;;  %v1018_v36 = vpop.f32.mrb[37].mxu1 }
 0x164   : > { %v891_v37 = vpop.f32.mrb[38].mxu0  ;;  %v1019_v38 = vpop.f32.mrb[38].mxu1 }
 0x165   : > { %2104 = vst [vmem:[%s2539_s15 + $0x40] sm:$0xff] %v1980_v31   ;;  %2120 = vst [vmem:[%s2539_s15 + $0xc0] sm:$0xff] %v2060_v32   ;;  %v1167_v39 = vadd.f32 %v2525_v19, %v1096_v33  ;;  %v1199_v40 = vadd.f32 %v2525_v19, %v1128_v34  ;;  %v1097_v41 = vmul.f32 %v2520_v17, %v891_v37  ;;  %v893_v43 = vpop.f32.mrb[39].mxu0  ;;  %v1021_v44 = vpop.f32.mrb[39].mxu1 }
 0x166   : > { %v1129_v42 = vmul.f32 %v2520_v17, %v1019_v38 }
 0x167   : > { %v1168_v45 = vadd.f32 %v2525_v19, %v1097_v41  ;;  %v1231_v47 = vmax.f32 %v1167_v39, 0.0  ;;  %v1263_v48 = vmax.f32 %v1199_v40, 0.0 }
 0x168   : > { %v1200_v46 = vadd.f32 %v2525_v19, %v1129_v42 }
 0x169   : > { %v1232_v49 = vmax.f32 %v1168_v45, 0.0 }
 0x16a   : > { %v1264_v50 = vmax.f32 %v1200_v46, 0.0  ;;  %v896_v51 = vpop.f32.mrb[40].mxu0  ;;  %v1024_v52 = vpop.f32.mrb[40].mxu1 }
 0x16b   : > { %v1985_v53 = vpack.c.bf16 %v1232_v49, %v1231_v47  ;;  %v1098_v55 = vmul.f32 %v2520_v17, %v896_v51  ;;  %v1130_v56 = vmul.f32 %v2520_v17, %v1024_v52  ;;  %v898_v57 = vpop.f32.mrb[41].mxu0  ;;  %v1026_v58 = vpop.f32.mrb[41].mxu1 }
 0x16c   : > { %v2065_v54 = vpack.c.bf16 %v1264_v50, %v1263_v48  ;;  %v899_v59 = vpop.f32.mrb[42].mxu0  ;;  %v1027_v60 = vpop.f32.mrb[42].mxu1 }
 0x16d   : > { %2105 = vst [vmem:[%s2539_s15 + $0x48] sm:$0xff] %v1985_v53   ;;  %v1169_v61 = vadd.f32 %v2525_v19, %v1098_v55  ;;  %v1201_v62 = vadd.f32 %v2525_v19, %v1130_v56  ;;  %v1099_v63 = vmul.f32 %v2520_v17, %v899_v59  ;;  %v1131_v0 = vmul.f32 %v2520_v17, %v1027_v60  ;;  %v901_v1 = vpop.f32.mrb[43].mxu0  ;;  %v1029_v2 = vpop.f32.mrb[43].mxu1 }
 0x16e   : > { %2121 = vst [vmem:[%s2539_s15 + $0xc8] sm:$0xff] %v2065_v54  }
 0x16f   : > { %v1170_v3 = vadd.f32 %v2525_v19, %v1099_v63  ;;  %v1202_v4 = vadd.f32 %v2525_v19, %v1131_v0  ;;  %v1233_v5 = vmax.f32 %v1169_v61, 0.0  ;;  %v1265_v6 = vmax.f32 %v1201_v62, 0.0 }
 0x171   : > { %v1234_v7 = vmax.f32 %v1170_v3, 0.0  ;;  %v1266_v8 = vmax.f32 %v1202_v4, 0.0 }
 0x172   : > { %v904_v9 = vpop.f32.mrb[44].mxu0  ;;  %v1032_v10 = vpop.f32.mrb[44].mxu1 }
 0x173   : > { %v1990_v11 = vpack.c.bf16 %v1234_v7, %v1233_v5  ;;  %v2070_v12 = vpack.c.bf16 %v1266_v8, %v1265_v6  ;;  %v1100_v13 = vmul.f32 %v2520_v17, %v904_v9  ;;  %v1132_v14 = vmul.f32 %v2520_v17, %v1032_v10  ;;  %v906_v15 = vpop.f32.mrb[45].mxu0  ;;  %v1034_v16 = vpop.f32.mrb[45].mxu1 }
 0x174   : > { %v907_v18 = vpop.f32.mrb[46].mxu0  ;;  %v1035_v20 = vpop.f32.mrb[46].mxu1 }
 0x175   : > { %2106 = vst [vmem:[%s2539_s15 + $0x50] sm:$0xff] %v1990_v11   ;;  %2122 = vst [vmem:[%s2539_s15 + $0xd0] sm:$0xff] %v2070_v12   ;;  %v1171_v21 = vadd.f32 %v2525_v19, %v1100_v13  ;;  %v1203_v22 = vadd.f32 %v2525_v19, %v1132_v14  ;;  %v1101_v23 = vmul.f32 %v2520_v17, %v907_v18  ;;  %v909_v25 = vpop.f32.mrb[47].mxu0  ;;  %v1037_v26 = vpop.f32.mrb[47].mxu1 }
 0x176   : > { %v1133_v24 = vmul.f32 %v2520_v17, %v1035_v20 }
 0x177   : > { %v1172_v27 = vadd.f32 %v2525_v19, %v1101_v23  ;;  %v1235_v29 = vmax.f32 %v1171_v21, 0.0  ;;  %v1267_v30 = vmax.f32 %v1203_v22, 0.0 }
 0x178   : > { %v1204_v28 = vadd.f32 %v2525_v19, %v1133_v24 }
 0x179   : > { %v1236_v31 = vmax.f32 %v1172_v27, 0.0 }
 0x17a   : > { %v1268_v32 = vmax.f32 %v1204_v28, 0.0  ;;  %v912_v33 = vpop.f32.mrb[48].mxu0  ;;  %v1040_v34 = vpop.f32.mrb[48].mxu1 }
 0x17b   : > { %v1995_v35 = vpack.c.bf16 %v1236_v31, %v1235_v29  ;;  %v1102_v37 = vmul.f32 %v2520_v17, %v912_v33  ;;  %v1134_v38 = vmul.f32 %v2520_v17, %v1040_v34  ;;  %v914_v39 = vpop.f32.mrb[49].mxu0  ;;  %v1042_v40 = vpop.f32.mrb[49].mxu1 }
 0x17c   : > { %v2075_v36 = vpack.c.bf16 %v1268_v32, %v1267_v30  ;;  %v915_v41 = vpop.f32.mrb[50].mxu0  ;;  %v1043_v42 = vpop.f32.mrb[50].mxu1 }
 0x17d   : > { %2107 = vst [vmem:[%s2539_s15 + $0x58] sm:$0xff] %v1995_v35   ;;  %v1173_v43 = vadd.f32 %v2525_v19, %v1102_v37  ;;  %v1205_v44 = vadd.f32 %v2525_v19, %v1134_v38  ;;  %v1103_v45 = vmul.f32 %v2520_v17, %v915_v41  ;;  %v1135_v46 = vmul.f32 %v2520_v17, %v1043_v42  ;;  %v917_v47 = vpop.f32.mrb[51].mxu0  ;;  %v1045_v48 = vpop.f32.mrb[51].mxu1 }
 0x17e   : > { %2123 = vst [vmem:[%s2539_s15 + $0xd8] sm:$0xff] %v2075_v36  }
 0x17f   : > { %v1174_v49 = vadd.f32 %v2525_v19, %v1103_v45  ;;  %v1206_v50 = vadd.f32 %v2525_v19, %v1135_v46  ;;  %v1237_v51 = vmax.f32 %v1173_v43, 0.0  ;;  %v1269_v52 = vmax.f32 %v1205_v44, 0.0 }
 0x181   : > { %v1238_v53 = vmax.f32 %v1174_v49, 0.0  ;;  %v1270_v54 = vmax.f32 %v1206_v50, 0.0 }
 0x182   : > { %v920_v55 = vpop.f32.mrb[52].mxu0  ;;  %v1048_v56 = vpop.f32.mrb[52].mxu1 }
 0x183   : > { %v2000_v57 = vpack.c.bf16 %v1238_v53, %v1237_v51  ;;  %v2080_v58 = vpack.c.bf16 %v1270_v54, %v1269_v52  ;;  %v1104_v59 = vmul.f32 %v2520_v17, %v920_v55  ;;  %v1136_v60 = vmul.f32 %v2520_v17, %v1048_v56  ;;  %v922_v61 = vpop.f32.mrb[53].mxu0  ;;  %v1050_v62 = vpop.f32.mrb[53].mxu1 }
 0x184   : > { %v923_v63 = vpop.f32.mrb[54].mxu0  ;;  %v1051_v0 = vpop.f32.mrb[54].mxu1 }
 0x185   : > { %2108 = vst [vmem:[%s2539_s15 + $0x60] sm:$0xff] %v2000_v57   ;;  %2124 = vst [vmem:[%s2539_s15 + $0xe0] sm:$0xff] %v2080_v58   ;;  %v1175_v1 = vadd.f32 %v2525_v19, %v1104_v59  ;;  %v1207_v2 = vadd.f32 %v2525_v19, %v1136_v60  ;;  %v1105_v3 = vmul.f32 %v2520_v17, %v923_v63  ;;  %v925_v5 = vpop.f32.mrb[55].mxu0  ;;  %v1053_v6 = vpop.f32.mrb[55].mxu1 }
 0x186   : > { %v1137_v4 = vmul.f32 %v2520_v17, %v1051_v0 }
 0x187   : > { %v1176_v7 = vadd.f32 %v2525_v19, %v1105_v3  ;;  %v1239_v9 = vmax.f32 %v1175_v1, 0.0  ;;  %v1271_v10 = vmax.f32 %v1207_v2, 0.0 }
 0x188   : > { %v1208_v8 = vadd.f32 %v2525_v19, %v1137_v4 }
 0x189   : > { %v1240_v11 = vmax.f32 %v1176_v7, 0.0 }
 0x18a   : > { %v1272_v12 = vmax.f32 %v1208_v8, 0.0  ;;  %v928_v13 = vpop.f32.mrb[56].mxu0  ;;  %v1056_v14 = vpop.f32.mrb[56].mxu1 }
 0x18b   : > { %v2005_v15 = vpack.c.bf16 %v1240_v11, %v1239_v9  ;;  %v1106_v18 = vmul.f32 %v2520_v17, %v928_v13  ;;  %v1138_v20 = vmul.f32 %v2520_v17, %v1056_v14  ;;  %v930_v21 = vpop.f32.mrb[57].mxu0  ;;  %v1058_v22 = vpop.f32.mrb[57].mxu1 }
 0x18c   : > { %v2085_v16 = vpack.c.bf16 %v1272_v12, %v1271_v10  ;;  %v931_v23 = vpop.f32.mrb[58].mxu0  ;;  %v1059_v24 = vpop.f32.mrb[58].mxu1 }
 0x18d   : > { %2109 = vst [vmem:[%s2539_s15 + $0x68] sm:$0xff] %v2005_v15   ;;  %v1177_v25 = vadd.f32 %v2525_v19, %v1106_v18  ;;  %v1209_v26 = vadd.f32 %v2525_v19, %v1138_v20  ;;  %v1107_v27 = vmul.f32 %v2520_v17, %v931_v23  ;;  %v1139_v28 = vmul.f32 %v2520_v17, %v1059_v24  ;;  %v933_v29 = vpop.f32.mrb[59].mxu0  ;;  %v1061_v30 = vpop.f32.mrb[59].mxu1 }
 0x18e   : > { %2125 = vst [vmem:[%s2539_s15 + $0xe8] sm:$0xff] %v2085_v16  }
 0x18f   : > { %v1178_v31 = vadd.f32 %v2525_v19, %v1107_v27  ;;  %v1210_v32 = vadd.f32 %v2525_v19, %v1139_v28  ;;  %v1241_v33 = vmax.f32 %v1177_v25, 0.0  ;;  %v1273_v34 = vmax.f32 %v1209_v26, 0.0 }
 0x191   : > { %v1242_v35 = vmax.f32 %v1178_v31, 0.0  ;;  %v1274_v36 = vmax.f32 %v1210_v32, 0.0 }
 0x192   : > { %v936_v37 = vpop.f32.mrb[60].mxu0  ;;  %v1064_v38 = vpop.f32.mrb[60].mxu1 }
 0x193   : > { %v2010_v39 = vpack.c.bf16 %v1242_v35, %v1241_v33  ;;  %v2090_v40 = vpack.c.bf16 %v1274_v36, %v1273_v34  ;;  %v1108_v41 = vmul.f32 %v2520_v17, %v936_v37  ;;  %v1140_v42 = vmul.f32 %v2520_v17, %v1064_v38  ;;  %v938_v43 = vpop.f32.mrb[61].mxu0  ;;  %v1066_v44 = vpop.f32.mrb[61].mxu1 }
 0x194   : > { %v939_v45 = vpop.f32.mrb[62].mxu0  ;;  %v1067_v46 = vpop.f32.mrb[62].mxu1 }
 0x195   : > { %2110 = vst [vmem:[%s2539_s15 + $0x70] sm:$0xff] %v2010_v39   ;;  %2126 = vst [vmem:[%s2539_s15 + $0xf0] sm:$0xff] %v2090_v40   ;;  %v1179_v47 = vadd.f32 %v2525_v19, %v1108_v41  ;;  %v1211_v48 = vadd.f32 %v2525_v19, %v1140_v42  ;;  %v1109_v49 = vmul.f32 %v2520_v17, %v939_v45  ;;  %v941_v51 = vpop.f32.mrb[63].mxu0  ;;  %v1069_v52 = vpop.f32.mrb[63].mxu1 }
 0x196   : > { %v1141_v50 = vmul.f32 %v2520_v17, %v1067_v46 }
 0x197   : > { %v1180_v53 = vadd.f32 %v2525_v19, %v1109_v49  ;;  %v1243_v55 = vmax.f32 %v1179_v47, 0.0  ;;  %v1275_v56 = vmax.f32 %v1211_v48, 0.0 }
 0x198   : > { %v1212_v54 = vadd.f32 %v2525_v19, %v1141_v50 }
 0x199   : > { %v1244_v57 = vmax.f32 %v1180_v53, 0.0 }
 0x19a   : > { %v1276_v58 = vmax.f32 %v1212_v54, 0.0 }
 0x19b   : > { %v2015_v59 = vpack.c.bf16 %v1244_v57, %v1243_v55 }
 0x19c   : > { %v2095_v60 = vpack.c.bf16 %v1276_v58, %v1275_v56 }
 0x19d   : > { %2111 = vst [vmem:[%s2539_s15 + $0x78] sm:$0xff] %v2015_v59  }
 0x19e   : > { %2127 = vst [vmem:[%s2539_s15 + $0xf8] sm:$0xff] %v2095_v60  }
 0x19f PF: > { %s14_s17 = sadd.s32 1, %s2319_s17   ;;  %s2707_s15 = smov %s2315_s16 }
 0x1a0   : > { %p11_p5 = scmp.ge.s32.totalorder %s14_s17, 5   ;;  %s2708_s16 = smov %s2710_s18 }
 0x1a2   :  { %13 = sbr.rel (!%p11_p5) target bundleno = 2 (0x2), region = 75 }

// kernel: _lambda_.62
= control target key start
LH: loop header
LB: loop body
LE: loop exit
PB: predicated region body
PF: predicated region fallthrough
CT: control target
= control target key end

     0   :  { %vm100_vm0 = vcmask 846848   ;;  %s283_s0 = inlined_call_operand.vmem [shape: bf16[32,104], index: 0, kind: input, shape index: {}]   ;;  %s284_s1 = inlined_call_operand.vmem [shape: bf16[32,104], index: 1, kind: input, shape index: {}]   ;;  %s285_s2 = inlined_call_operand.vmem [shape: bf16[32,104], index: 2, kind: input, shape index: {}]   ;;  %s286_s3 = inlined_call_operand.vmem [shape: bf16[32,104], index: 3, kind: input, shape index: {}]   ;;  %s287_s4 = inlined_call_operand.vmem [shape: bf16[32,104], index: 4, kind: input, shape index: {}]   ;;  %s288_s5 = inlined_call_operand.vmem [shape: bf16[32,104], index: 5, kind: input, shape index: {}]   ;;  %s289_s6 = inlined_call_operand.vmem [shape: bf16[32,104], index: 6, kind: input, shape index: {}]   ;;  %s290_s7 = inlined_call_operand.vmem [shape: bf16[32,104], index: 7, kind: input, shape index: {}]   ;;  %s291_s8 = inlined_call_operand.vmem [shape: bf16[32,104], index: 8, kind: input, shape index: {}]   ;;  %s292_s9 = inlined_call_operand.vmem [shape: bf16[32,104], index: 9, kind: output, shape index: {}]  }
   0x1   :  { %v32_v0 = vld [vmem:[%s283_s0] sm:$0xf]  ;;  %v33_v6 = vld [vmem:[%s283_s0 + $0x4] sm:$0xf]  ;;  %v34_v15 = vld [vmem:[%s283_s0 + $0x8] sm:$0xf] }
   0x2   :  { %v36_v1 = vld [vmem:[%s284_s1] sm:$0xf]  ;;  %v37_v7 = vld [vmem:[%s284_s1 + $0x4] sm:$0xf]  ;;  %v38_v16 = vld [vmem:[%s284_s1 + $0x8] sm:$0xf] }
   0x3   :  { %v44_v2 = vld [vmem:[%s285_s2] sm:$0xf]  ;;  %v40_v3 = vmax.bf16 %v36_v1, %v32_v0  ;;  %v45_v8 = vld [vmem:[%s285_s2 + $0x4] sm:$0xf]  ;;  %v41_v10 = vmax.bf16 %v37_v7, %v33_v6  ;;  %v46_v17 = vld [vmem:[%s285_s2 + $0x8] sm:$0xf]  ;;  %v42_v20 = vmax.bf16 %v38_v16, %v34_v15 }
   0x4   :  { %v52_v4 = vld [vmem:[%s286_s3] sm:$0xf]  ;;  %v53_v13 = vld [vmem:[%s286_s3 + $0x4] sm:$0xf]  ;;  %v54_v24 = vld [vmem:[%s286_s3 + $0x8] sm:$0xf] }
   0x5   :  { %v48_v5 = vmax.bf16 %v44_v2, %v40_v3  ;;  %v60_v9 = vld [vmem:[%s287_s4] sm:$0xf]  ;;  %v49_v14 = vmax.bf16 %v45_v8, %v41_v10  ;;  %v61_v19 = vld [vmem:[%s287_s4 + $0x4] sm:$0xf]  ;;  %v50_v26 = vmax.bf16 %v46_v17, %v42_v20  ;;  %v35_v27 = vld [vmem:[%s283_s0 + $0xc] sm:$0xf] }
   0x6   :  { %v68_v12 = vld [vmem:[%s288_s5] sm:$0xf]  ;;  %v69_v23 = vld [vmem:[%s288_s5 + $0x4] sm:$0xf]  ;;  %v39_v28 = vld [vmem:[%s284_s1 + $0xc] sm:$0xf] }
   0x7   :  { %v56_v11 = vmax.bf16 %v52_v4, %v48_v5  ;;  %v76_v21 = vld [vmem:[%s289_s6] sm:$0xf]  ;;  %v57_v22 = vmax.bf16 %v53_v13, %v49_v14  ;;  %v47_v29 = vld [vmem:[%s285_s2 + $0xc] sm:$0xf]  ;;  %v62_v32 = vld [vmem:[%s287_s4 + $0x8] sm:$0xf]  ;;  %v43_v33 = vmax.bf16 %v39_v28, %v35_v27  ;;  %v58_v36 = vmax.bf16 %v54_v24, %v50_v26 }
   0x8   :  { %v84_v30 = vld [vmem:[%s290_s7] sm:$0xf]  ;;  %v77_v35 = vld [vmem:[%s289_s6 + $0x4] sm:$0xf]  ;;  %v55_v37 = vld [vmem:[%s286_s3 + $0xc] sm:$0xf] }
   0x9   :  { %v64_v18 = vmax.bf16 %v60_v9, %v56_v11  ;;  %v65_v31 = vmax.bf16 %v61_v19, %v57_v22  ;;  %v92_v38 = vld [vmem:[%s291_s8] sm:$0xf]  ;;  %v70_v40 = vld [vmem:[%s288_s5 + $0x8] sm:$0xf]  ;;  %v51_v41 = vmax.bf16 %v47_v29, %v43_v33  ;;  %v85_v43 = vld [vmem:[%s290_s7 + $0x4] sm:$0xf]  ;;  %v66_v44 = vmax.bf16 %v62_v32, %v58_v36 }
   0xa   :  { %v63_v45 = vld [vmem:[%s287_s4 + $0xc] sm:$0xf]  ;;  %v78_v47 = vld [vmem:[%s289_s6 + $0x8] sm:$0xf]  ;;  %v93_v50 = vld [vmem:[%s291_s8 + $0x4] sm:$0xf] }
   0xb   :  { %v72_v25 = vmax.bf16 %v68_v12, %v64_v18  ;;  %v73_v39 = vmax.bf16 %v69_v23, %v65_v31  ;;  %v59_v48 = vmax.bf16 %v55_v37, %v51_v41  ;;  %v74_v51 = vmax.bf16 %v70_v40, %v66_v44  ;;  %v71_v52 = vld [vmem:[%s288_s5 + $0xc] sm:$0xf]  ;;  %v86_v54 = vld [vmem:[%s290_s7 + $0x8] sm:$0xf] }
   0xc   :  { %v79_v57 = vld [vmem:[%s289_s6 + $0xc] sm:$0xf]  ;;  %v94_v59 = vld [vmem:[%s291_s8 + $0x8] sm:$0xf] }
   0xd   :  { %v80_v34 = vmax.bf16 %v76_v21, %v72_v25  ;;  %v81_v46 = vmax.bf16 %v77_v35, %v73_v39  ;;  %v67_v55 = vmax.bf16 %v63_v45, %v59_v48  ;;  %v82_v56 = vmax.bf16 %v78_v47, %v74_v51  ;;  %v87_v62 = vld [vmem:[%s290_s7 + $0xc] sm:$0xf] }
   0xe   :  { %v95_v1 = vld [vmem:[%s291_s8 + $0xc] sm:$0xf] }
   0xf   :  { %v88_v42 = vmax.bf16 %v84_v30, %v80_v34  ;;  %v89_v53 = vmax.bf16 %v85_v43, %v81_v46  ;;  %v75_v60 = vmax.bf16 %v71_v52, %v67_v55  ;;  %v90_v61 = vmax.bf16 %v86_v54, %v82_v56 }
  0x11   :  { %v96_v49 = vmax.bf16 %v92_v38, %v88_v42  ;;  %v97_v58 = vmax.bf16 %v93_v50, %v89_v53  ;;  %v83_v63 = vmax.bf16 %v79_v57, %v75_v60  ;;  %v98_v0 = vmax.bf16 %v94_v59, %v90_v61 }
  0x13   :  { %101 = vst.msk [vmem:[%s292_s9] sm:$0xf] %vm100_vm0, %v96_v49  ;;  %102 = vst.msk [vmem:[%s292_s9 + $0x4] sm:$0xf] %vm100_vm0, %v97_v58  ;;  %v91_v2 = vmax.bf16 %v87_v62, %v83_v63 }
  0x14   :  { %103 = vst.msk [vmem:[%s292_s9 + $0x8] sm:$0xf] %vm100_vm0, %v98_v0 }
  0x15   :  { %v99_v3 = vmax.bf16 %v95_v1, %v91_v2 }
  0x17   :  { %104 = vst.msk [vmem:[%s292_s9 + $0xc] sm:$0xf] %vm100_vm0, %v99_v3 }

// kernel: _lambda_.63
= control target key start
LH: loop header
LB: loop body
LE: loop exit
PB: predicated region body
PF: predicated region fallthrough
CT: control target
= control target key end

     0   :  { %s1482_s1 = inlined_call_operand.vmem [shape: bf16[128,128], index: 1, kind: input, shape index: {}]   ;;  %s1483_s0 = inlined_call_operand.vmem [shape: bf16[344,128], index: 0, kind: input, shape index: {}]   ;;  %s1484_s2 = inlined_call_operand.vmem [shape: f32[1,128], index: 2, kind: input, shape index: {}]   ;;  %s1485_s3 = inlined_call_operand.vmem [shape: f32[1,128], index: 3, kind: input, shape index: {}]   ;;  %s1486_s4 = inlined_call_operand.vmem [shape: bf16[344,128], index: 4, kind: output, shape index: {}]  }
   0x1   :  { %v1175_v0 = vld [vmem:[%s1482_s1] sm:$0xff]   ;;  %v1176_v1 = vld [vmem:[%s1482_s1 + $0x8] sm:$0xff]   ;;  %v1177_v2 = vld [vmem:[%s1482_s1 + $0x10] sm:$0xff]  }
   0x2   :  { %1099 = vmatprep.subr.bf16.mxu0 %v1175_v0  ;;  %1159 = vmatprep.subr.bf16.mxu1 %v1175_v0  ;;  %v1178_v3 = vld [vmem:[%s1482_s1 + $0x18] sm:$0xff]   ;;  %v1183_v4 = vld [vmem:[%s1483_s0] sm:$0xff]   ;;  %v1180_v7 = vld [vmem:[%s1482_s1 + $0x28] sm:$0xff]  }
   0x3   :  { %1100 = vmatpush3.bf16.msra.mxu0 %v1175_v0  ;;  %1167 = vmatpush3.bf16.msra.mxu1 %v1175_v0  ;;  %v1185_v5 = vld [vmem:[%s1483_s0 + $0x60] sm:$0xff]   ;;  %v1181_v8 = vld [vmem:[%s1482_s1 + $0x30] sm:$0xff]   ;;  %v1182_v9 = vld [vmem:[%s1482_s1 + $0x38] sm:$0xff]  }
   0x4   :  { %1101 = vmatprep.subr.bf16.mxu0 %v1176_v1  ;;  %1160 = vmatprep.subr.bf16.mxu1 %v1176_v1  ;;  %v1179_v6 = vld [vmem:[%s1482_s1 + $0x20] sm:$0xff]   ;;  %v1184_v10 = vld [vmem:[%s1483_s0 + $0x8] sm:$0xff]   ;;  %v1187_v12 = vld [vmem:[%s1483_s0 + $0x10] sm:$0xff]  }
   0x5   :  { %1115 = vmatprep.mubr.bf16.mxu0 %v1183_v4  ;;  %1139 = vmatprep.mubr.bf16.mxu1 %v1185_v5  ;;  %v1186_v11 = vld [vmem:[%s1483_s0 + $0x68] sm:$0xff]   ;;  %v1189_v13 = vld [vmem:[%s1483_s0 + $0x70] sm:$0xff]   ;;  %v1188_v14 = vld [vmem:[%s1483_s0 + $0x18] sm:$0xff]  }
   0x6   :  { %v1190_v15 = vld [vmem:[%s1483_s0 + $0x78] sm:$0xff]   ;;  %v1191_v16 = vld [vmem:[%s1483_s0 + $0x20] sm:$0xff]   ;;  %v1192_v18 = vld [vmem:[%s1483_s0 + $0x28] sm:$0xff]  }
   0x7   :  { %1102 = vmatpush3.bf16.msra.mxu0 %v1176_v1  ;;  %1168 = vmatpush3.bf16.msra.mxu1 %v1176_v1  ;;  %v1193_v17 = vld [vmem:[%s1483_s0 + $0x80] sm:$0xff]   ;;  %v1194_v19 = vld [vmem:[%s1483_s0 + $0x88] sm:$0xff]   ;;  %v1195_v20 = vld [vmem:[%s1483_s0 + $0x30] sm:$0xff]  }
   0x8   :  { %1103 = vmatprep.subr.bf16.mxu0 %v1177_v2  ;;  %1161 = vmatprep.subr.bf16.mxu1 %v1177_v2  ;;  %v1197_v21 = vld [vmem:[%s1483_s0 + $0x90] sm:$0xff]   ;;  %v1196_v22 = vld [vmem:[%s1483_s0 + $0x38] sm:$0xff]   ;;  %v1199_v24 = vld [vmem:[%s1483_s0 + $0x40] sm:$0xff]  }
   0x9   :  { %v1198_v23 = vld [vmem:[%s1483_s0 + $0x98] sm:$0xff]   ;;  %v1201_v25 = vld [vmem:[%s1483_s0 + $0xa0] sm:$0xff]   ;;  %v1200_v26 = vld [vmem:[%s1483_s0 + $0x48] sm:$0xff]  }
   0xa   :  { %v1202_v27 = vld [vmem:[%s1483_s0 + $0xa8] ss:$0 sps:$4 sm:$0xff]   ;;  %v1203_v28 = vld [vmem:[%s1483_s0 + $0x50] sm:$0xff]   ;;  %v1204_v29 = vld [vmem:[%s1483_s0 + $0x58] sm:$0xff]  }
   0xb   :  { %1104 = vmatpush3.bf16.msra.mxu0 %v1177_v2  ;;  %1169 = vmatpush3.bf16.msra.mxu1 %v1177_v2  ;;  %v1323_v30 = vld [vmem:[%s1484_s2] ss:$0 sm:$0xff] }
   0xc   :  { %1105 = vmatprep.subr.bf16.mxu0 %v1178_v3  ;;  %1162 = vmatprep.subr.bf16.mxu1 %v1178_v3  ;;  %v1328_v32 = vld [vmem:[%s1485_s3] ss:$0 sm:$0xff] }
   0xf   :  { %1106 = vmatpush3.bf16.msra.mxu0 %v1178_v3  ;;  %1170 = vmatpush3.bf16.msra.mxu1 %v1178_v3 }
  0x10   :  { %1107 = vmatprep.subr.bf16.mxu0 %v1179_v6  ;;  %1163 = vmatprep.subr.bf16.mxu1 %v1179_v6 }
  0x13   :  { %1108 = vmatpush3.bf16.msra.mxu0 %v1179_v6  ;;  %1171 = vmatpush3.bf16.msra.mxu1 %v1179_v6 }
  0x14   :  { %1109 = vmatprep.subr.bf16.mxu0 %v1180_v7  ;;  %1164 = vmatprep.subr.bf16.mxu1 %v1180_v7 }
  0x17   :  { %1110 = vmatpush3.bf16.msra.mxu0 %v1180_v7  ;;  %1172 = vmatpush3.bf16.msra.mxu1 %v1180_v7 }
  0x18   :  { %1111 = vmatprep.subr.bf16.mxu0 %v1181_v8  ;;  %1165 = vmatprep.subr.bf16.mxu1 %v1181_v8 }
  0x1b   :  { %1112 = vmatpush3.bf16.msra.mxu0 %v1181_v8  ;;  %1173 = vmatpush3.bf16.msra.mxu1 %v1181_v8 }
  0x1c   :  { %1113 = vmatprep.subr.bf16.mxu0 %v1182_v9  ;;  %1166 = vmatprep.subr.bf16.mxu1 %v1182_v9 }
  0x1f   :  { %1114 = vmatpush3.bf16.msra.mxu0 %v1182_v9  ;;  %1174 = vmatpush3.bf16.msra.mxu1 %v1182_v9 }
  0x22   :  { %1116 = vmatmul.mubr.bf16.vlgmr.msra.gmra.mrb[0].mxu0 %v1184_v10  ;;  %1140 = vmatmul.mubr.bf16.vlgmr.msra.gmra.mrb[0].mxu1 %v1186_v11 }
  0x23   :  { %1119 = vmatprep.mubr.bf16.mxu0 %v1187_v12  ;;  %1143 = vmatprep.mubr.bf16.mxu1 %v1189_v13 }
  0x2a   :  { %1120 = vmatmul.mubr.bf16.gmra.mrb[4].mxu0 %v1188_v14  ;;  %1144 = vmatmul.mubr.bf16.gmra.mrb[4].mxu1 %v1190_v15 }
  0x2b   :  { %1123 = vmatprep.mubr.bf16.mxu0 %v1191_v16  ;;  %1147 = vmatprep.mubr.bf16.mxu1 %v1193_v17 }
  0x32   :  { %1124 = vmatmul.mubr.bf16.gmra.mrb[8].mxu0 %v1192_v18  ;;  %1148 = vmatmul.mubr.bf16.gmra.mrb[8].mxu1 %v1194_v19 }
  0x33   :  { %1127 = vmatprep.mubr.bf16.mxu0 %v1195_v20  ;;  %1151 = vmatprep.mubr.bf16.mxu1 %v1197_v21 }
  0x3a   :  { %1128 = vmatmul.mubr.bf16.gmra.mrb[12].mxu0 %v1196_v22  ;;  %1152 = vmatmul.mubr.bf16.gmra.mrb[12].mxu1 %v1198_v23 }
  0x3b   :  { %1131 = vmatprep.mubr.bf16.mxu0 %v1199_v24  ;;  %1155 = vmatprep.mubr.bf16.mxu1 %v1201_v25 }
  0x42   :  { %1132 = vmatmul.mubr.bf16.gmra.mrb[16].mxu0 %v1200_v26  ;;  %1156 = vmatmul.mubr.bf16.gmra.mrb[16].mxu1 %v1202_v27 }
  0x43   :  { %1135 = vmatprep.mubr.bf16.mxu0 %v1203_v28 }
  0x4a   :  { %1136 = vmatmul.mubr.bf16.gmra.mrb[20].mxu0 %v1204_v29 }
  0xf5   :  { %v1117_v31 = vpop.f32.mrb[0].mxu0  ;;  %v1141_v33 = vpop.f32.mrb[0].mxu1 }
  0xf6   :  { %v472_v34 = vmul.f32 %v1117_v31, %v1323_v30  ;;  %v289_v35 = vpop.f32.mrb[1].mxu0  ;;  %v496_v36 = vmul.f32 %v1141_v33, %v1323_v30  ;;  %v385_v37 = vpop.f32.mrb[1].mxu1 }
  0xf7   :  { %v470_v38 = vmul.f32 %v1323_v30, %v289_v35  ;;  %v1118_v39 = vpop.f32.mrb[2].mxu0  ;;  %v494_v40 = vmul.f32 %v1323_v30, %v385_v37  ;;  %v1142_v41 = vpop.f32.mrb[2].mxu1 }
  0xf8   :  { %v522_v42 = vadd.f32 %v1328_v32, %v472_v34  ;;  %v473_v43 = vmul.f32 %v1118_v39, %v1323_v30  ;;  %v292_v44 = vpop.f32.mrb[3].mxu0  ;;  %v546_v45 = vadd.f32 %v1328_v32, %v496_v36  ;;  %v497_v46 = vmul.f32 %v1142_v41, %v1323_v30  ;;  %v388_v47 = vpop.f32.mrb[3].mxu1 }
  0xf9   :  { %v520_v48 = vadd.f32 %v1328_v32, %v470_v38  ;;  %v471_v49 = vmul.f32 %v1323_v30, %v292_v44  ;;  %v544_v50 = vadd.f32 %v1328_v32, %v494_v40  ;;  %v495_v51 = vmul.f32 %v1323_v30, %v388_v47 }
  0xfa   :  { %v523_v52 = vadd.f32 %v1328_v32, %v473_v43  ;;  %v589_v53 = vmax.f32 %v546_v45, 0.0  ;;  %v547_v54 = vadd.f32 %v1328_v32, %v497_v46  ;;  %v565_v58 = vmax.f32 %v522_v42, 0.0 }
  0xfb   :  { %v521_v55 = vadd.f32 %v1328_v32, %v471_v49  ;;  %v587_v56 = vmax.f32 %v544_v50, 0.0  ;;  %v545_v57 = vadd.f32 %v1328_v32, %v495_v51  ;;  %v563_v61 = vmax.f32 %v520_v48, 0.0 }
  0xfc   :  { %v566_v59 = vmax.f32 %v523_v52, 0.0  ;;  %v590_v60 = vmax.f32 %v547_v54, 0.0 }
  0xfd   :  { %v564_v62 = vmax.f32 %v521_v55, 0.0  ;;  %v1121_v63 = vpop.f32.mrb[4].mxu0  ;;  %v588_v0 = vmax.f32 %v545_v57, 0.0  ;;  %v1145_v1 = vpop.f32.mrb[4].mxu1 }
  0xfe   :  { %v952_v2 = vpack.c.bf16 %v566_v59, %v565_v58  ;;  %v1012_v3 = vpack.c.bf16 %v590_v60, %v589_v53  ;;  %v476_v4 = vmul.f32 %v1121_v63, %v1323_v30  ;;  %v305_v5 = vpop.f32.mrb[5].mxu0  ;;  %v500_v6 = vmul.f32 %v1145_v1, %v1323_v30  ;;  %v401_v7 = vpop.f32.mrb[5].mxu1 }
  0xff   :  { %v947_v8 = vpack.c.bf16 %v564_v62, %v563_v61  ;;  %v1007_v9 = vpack.c.bf16 %v588_v0, %v587_v56  ;;  %v474_v10 = vmul.f32 %v1323_v30, %v305_v5  ;;  %v1122_v11 = vpop.f32.mrb[6].mxu0  ;;  %v498_v12 = vmul.f32 %v1323_v30, %v401_v7  ;;  %v1146_v13 = vpop.f32.mrb[6].mxu1 }
 0x100   :  { %1049 = vst [vmem:[%s1486_s4 + $0x8] sm:$0xff] %v952_v2   ;;  %1061 = vst [vmem:[%s1486_s4 + $0x68] sm:$0xff] %v1012_v3   ;;  %v526_v14 = vadd.f32 %v1328_v32, %v476_v4  ;;  %v477_v15 = vmul.f32 %v1122_v11, %v1323_v30  ;;  %v308_v16 = vpop.f32.mrb[7].mxu0  ;;  %v550_v17 = vadd.f32 %v1328_v32, %v500_v6  ;;  %v404_v19 = vpop.f32.mrb[7].mxu1 }
 0x101   :  { %v501_v18 = vmul.f32 %v1146_v13, %v1323_v30  ;;  %948 = vst [vmem:[%s1486_s4] sm:$0xff] %v947_v8   ;;  %1060 = vst [vmem:[%s1486_s4 + $0x60] sm:$0xff] %v1007_v9   ;;  %v524_v20 = vadd.f32 %v1328_v32, %v474_v10  ;;  %v475_v21 = vmul.f32 %v1323_v30, %v308_v16 }
 0x102   :  { %v548_v22 = vadd.f32 %v1328_v32, %v498_v12  ;;  %v499_v23 = vmul.f32 %v1323_v30, %v404_v19  ;;  %v527_v24 = vadd.f32 %v1328_v32, %v477_v15  ;;  %v593_v25 = vmax.f32 %v550_v17, 0.0 }
 0x103   :  { %v551_v26 = vadd.f32 %v1328_v32, %v501_v18  ;;  %v525_v27 = vadd.f32 %v1328_v32, %v475_v21  ;;  %v569_v31 = vmax.f32 %v526_v14, 0.0  ;;  %v567_v35 = vmax.f32 %v524_v20, 0.0 }
 0x104   :  { %v591_v28 = vmax.f32 %v548_v22, 0.0  ;;  %v549_v29 = vadd.f32 %v1328_v32, %v499_v23  ;;  %v570_v33 = vmax.f32 %v527_v24, 0.0 }
 0x105   :  { %v594_v34 = vmax.f32 %v551_v26, 0.0  ;;  %v568_v36 = vmax.f32 %v525_v27, 0.0  ;;  %v1125_v37 = vpop.f32.mrb[8].mxu0  ;;  %v1149_v39 = vpop.f32.mrb[8].mxu1 }
 0x106   :  { %v592_v38 = vmax.f32 %v549_v29, 0.0  ;;  %v962_v40 = vpack.c.bf16 %v570_v33, %v569_v31  ;;  %v480_v42 = vmul.f32 %v1125_v37, %v1323_v30  ;;  %v321_v43 = vpop.f32.mrb[9].mxu0  ;;  %v504_v44 = vmul.f32 %v1149_v39, %v1323_v30  ;;  %v417_v45 = vpop.f32.mrb[9].mxu1 }
 0x107   :  { %v1022_v41 = vpack.c.bf16 %v594_v34, %v593_v25  ;;  %v957_v46 = vpack.c.bf16 %v568_v36, %v567_v35  ;;  %v478_v48 = vmul.f32 %v1323_v30, %v321_v43  ;;  %v1126_v49 = vpop.f32.mrb[10].mxu0  ;;  %v502_v50 = vmul.f32 %v1323_v30, %v417_v45  ;;  %v1150_v51 = vpop.f32.mrb[10].mxu1 }
 0x108   :  { %v1017_v47 = vpack.c.bf16 %v592_v38, %v591_v28  ;;  %1051 = vst [vmem:[%s1486_s4 + $0x18] sm:$0xff] %v962_v40   ;;  %v530_v52 = vadd.f32 %v1328_v32, %v480_v42  ;;  %v481_v53 = vmul.f32 %v1126_v49, %v1323_v30  ;;  %v324_v54 = vpop.f32.mrb[11].mxu0  ;;  %v554_v55 = vadd.f32 %v1328_v32, %v504_v44  ;;  %v420_v57 = vpop.f32.mrb[11].mxu1 }
 0x109   :  { %1063 = vst [vmem:[%s1486_s4 + $0x78] sm:$0xff] %v1022_v41   ;;  %v505_v56 = vmul.f32 %v1150_v51, %v1323_v30  ;;  %1050 = vst [vmem:[%s1486_s4 + $0x10] sm:$0xff] %v957_v46   ;;  %v528_v58 = vadd.f32 %v1328_v32, %v478_v48  ;;  %v479_v59 = vmul.f32 %v1323_v30, %v324_v54 }
 0x10a   :  { %1062 = vst [vmem:[%s1486_s4 + $0x70] sm:$0xff] %v1017_v47   ;;  %v552_v60 = vadd.f32 %v1328_v32, %v502_v50  ;;  %v503_v61 = vmul.f32 %v1323_v30, %v420_v57  ;;  %v531_v62 = vadd.f32 %v1328_v32, %v481_v53  ;;  %v597_v63 = vmax.f32 %v554_v55, 0.0 }
 0x10b   :  { %v555_v0 = vadd.f32 %v1328_v32, %v505_v56  ;;  %v529_v1 = vadd.f32 %v1328_v32, %v479_v59  ;;  %v573_v4 = vmax.f32 %v530_v52, 0.0  ;;  %v571_v7 = vmax.f32 %v528_v58, 0.0 }
 0x10c   :  { %v595_v2 = vmax.f32 %v552_v60, 0.0  ;;  %v553_v3 = vadd.f32 %v1328_v32, %v503_v61  ;;  %v574_v5 = vmax.f32 %v531_v62, 0.0 }
 0x10d   :  { %v598_v6 = vmax.f32 %v555_v0, 0.0  ;;  %v572_v8 = vmax.f32 %v529_v1, 0.0  ;;  %v1129_v9 = vpop.f32.mrb[12].mxu0  ;;  %v1153_v11 = vpop.f32.mrb[12].mxu1 }
 0x10e   :  { %v596_v10 = vmax.f32 %v553_v3, 0.0  ;;  %v972_v12 = vpack.c.bf16 %v574_v5, %v573_v4  ;;  %v484_v14 = vmul.f32 %v1129_v9, %v1323_v30  ;;  %v337_v15 = vpop.f32.mrb[13].mxu0  ;;  %v508_v16 = vmul.f32 %v1153_v11, %v1323_v30  ;;  %v433_v17 = vpop.f32.mrb[13].mxu1 }
 0x10f   :  { %v1032_v13 = vpack.c.bf16 %v598_v6, %v597_v63  ;;  %v967_v18 = vpack.c.bf16 %v572_v8, %v571_v7  ;;  %v482_v20 = vmul.f32 %v1323_v30, %v337_v15  ;;  %v1130_v21 = vpop.f32.mrb[14].mxu0  ;;  %v506_v22 = vmul.f32 %v1323_v30, %v433_v17  ;;  %v1154_v23 = vpop.f32.mrb[14].mxu1 }
 0x110   :  { %v1027_v19 = vpack.c.bf16 %v596_v10, %v595_v2  ;;  %1053 = vst [vmem:[%s1486_s4 + $0x28] sm:$0xff] %v972_v12   ;;  %v534_v24 = vadd.f32 %v1328_v32, %v484_v14  ;;  %v485_v25 = vmul.f32 %v1130_v21, %v1323_v30  ;;  %v340_v26 = vpop.f32.mrb[15].mxu0  ;;  %v558_v27 = vadd.f32 %v1328_v32, %v508_v16  ;;  %v436_v29 = vpop.f32.mrb[15].mxu1 }
 0x111   :  { %1065 = vst [vmem:[%s1486_s4 + $0x88] sm:$0xff] %v1032_v13   ;;  %v509_v28 = vmul.f32 %v1154_v23, %v1323_v30  ;;  %1052 = vst [vmem:[%s1486_s4 + $0x20] sm:$0xff] %v967_v18   ;;  %v532_v31 = vadd.f32 %v1328_v32, %v482_v20  ;;  %v483_v33 = vmul.f32 %v1323_v30, %v340_v26 }
 0x112   :  { %1064 = vst [vmem:[%s1486_s4 + $0x80] sm:$0xff] %v1027_v19   ;;  %v556_v34 = vadd.f32 %v1328_v32, %v506_v22  ;;  %v507_v35 = vmul.f32 %v1323_v30, %v436_v29  ;;  %v535_v36 = vadd.f32 %v1328_v32, %v485_v25  ;;  %v601_v37 = vmax.f32 %v558_v27, 0.0 }
 0x113   :  { %v559_v38 = vadd.f32 %v1328_v32, %v509_v28  ;;  %v533_v39 = vadd.f32 %v1328_v32, %v483_v33  ;;  %v577_v42 = vmax.f32 %v534_v24, 0.0  ;;  %v575_v45 = vmax.f32 %v532_v31, 0.0 }
 0x114   :  { %v599_v40 = vmax.f32 %v556_v34, 0.0  ;;  %v557_v41 = vadd.f32 %v1328_v32, %v507_v35  ;;  %v578_v43 = vmax.f32 %v535_v36, 0.0 }
 0x115   :  { %v602_v44 = vmax.f32 %v559_v38, 0.0  ;;  %v576_v46 = vmax.f32 %v533_v39, 0.0  ;;  %v1133_v47 = vpop.f32.mrb[16].mxu0  ;;  %v1157_v49 = vpop.f32.mrb[16].mxu1 }
 0x116   :  { %v600_v48 = vmax.f32 %v557_v41, 0.0  ;;  %v982_v50 = vpack.c.bf16 %v578_v43, %v577_v42  ;;  %v488_v52 = vmul.f32 %v1133_v47, %v1323_v30  ;;  %v353_v53 = vpop.f32.mrb[17].mxu0  ;;  %v512_v54 = vmul.f32 %v1157_v49, %v1323_v30  ;;  %v449_v55 = vpop.f32.mrb[17].mxu1 }
 0x117   :  { %v1042_v51 = vpack.c.bf16 %v602_v44, %v601_v37  ;;  %v977_v56 = vpack.c.bf16 %v576_v46, %v575_v45  ;;  %v486_v58 = vmul.f32 %v1323_v30, %v353_v53  ;;  %v1134_v59 = vpop.f32.mrb[18].mxu0  ;;  %v510_v60 = vmul.f32 %v1323_v30, %v449_v55  ;;  %v1158_v61 = vpop.f32.mrb[18].mxu1 }
 0x118   :  { %v1037_v57 = vpack.c.bf16 %v600_v48, %v599_v40  ;;  %1055 = vst [vmem:[%s1486_s4 + $0x38] sm:$0xff] %v982_v50   ;;  %v538_v62 = vadd.f32 %v1328_v32, %v488_v52  ;;  %v489_v63 = vmul.f32 %v1134_v59, %v1323_v30  ;;  %v356_v0 = vpop.f32.mrb[19].mxu0  ;;  %v562_v1 = vadd.f32 %v1328_v32, %v512_v54  ;;  %v452_v2 = vpop.f32.mrb[19].mxu1 }
 0x119   :  { %1067 = vst [vmem:[%s1486_s4 + $0x98] sm:$0xff] %v1042_v51   ;;  %1054 = vst [vmem:[%s1486_s4 + $0x30] sm:$0xff] %v977_v56   ;;  %v536_v3 = vadd.f32 %v1328_v32, %v486_v58  ;;  %v487_v4 = vmul.f32 %v1323_v30, %v356_v0  ;;  %v560_v5 = vadd.f32 %v1328_v32, %v510_v60 }
 0x11a   :  { %1066 = vst [vmem:[%s1486_s4 + $0x90] sm:$0xff] %v1037_v57   ;;  %v511_v6 = vmul.f32 %v1323_v30, %v452_v2  ;;  %v539_v7 = vadd.f32 %v1328_v32, %v489_v63  ;;  %v605_v8 = vmax.f32 %v562_v1, 0.0  ;;  %v581_v12 = vmax.f32 %v538_v62, 0.0 }
 0x11b   :  { %v537_v9 = vadd.f32 %v1328_v32, %v487_v4  ;;  %v603_v10 = vmax.f32 %v560_v5, 0.0  ;;  %v579_v15 = vmax.f32 %v536_v3, 0.0 }
 0x11c   :  { %v561_v11 = vadd.f32 %v1328_v32, %v511_v6  ;;  %v582_v13 = vmax.f32 %v539_v7, 0.0  ;;  %v943_v14 = vpack.c.bf16 %v605_v8, %v605_v8 }
 0x11d   :  { %v580_v16 = vmax.f32 %v537_v9, 0.0  ;;  %v1137_v17 = vpop.f32.mrb[20].mxu0 }
 0x11e   :  { %v604_v18 = vmax.f32 %v561_v11, 0.0  ;;  %v992_v19 = vpack.c.bf16 %v582_v13, %v581_v12  ;;  %821 = vst [vmem:[%s1486_s4 + $0xa8] sm:$0xf] %v943_v14  ;;  %v492_v20 = vmul.f32 %v1137_v17, %v1323_v30  ;;  %v369_v21 = vpop.f32.mrb[21].mxu0 }
 0x11f   :  { %v987_v22 = vpack.c.bf16 %v580_v16, %v579_v15  ;;  %v490_v24 = vmul.f32 %v1323_v30, %v369_v21  ;;  %v1138_v25 = vpop.f32.mrb[22].mxu0 }
 0x120   :  { %v1047_v23 = vpack.c.bf16 %v604_v18, %v603_v10  ;;  %1057 = vst [vmem:[%s1486_s4 + $0x48] sm:$0xff] %v992_v19   ;;  %v542_v26 = vadd.f32 %v1328_v32, %v492_v20  ;;  %v493_v27 = vmul.f32 %v1138_v25, %v1323_v30  ;;  %v372_v28 = vpop.f32.mrb[23].mxu0 }
 0x121   :  { %1056 = vst [vmem:[%s1486_s4 + $0x40] sm:$0xff] %v987_v22   ;;  %v540_v29 = vadd.f32 %v1328_v32, %v490_v24  ;;  %v491_v31 = vmul.f32 %v1323_v30, %v372_v28 }
 0x122   :  { %1068 = vst [vmem:[%s1486_s4 + $0xa0] sm:$0xff] %v1047_v23   ;;  %v543_v33 = vadd.f32 %v1328_v32, %v493_v27  ;;  %v585_v35 = vmax.f32 %v542_v26, 0.0 }
 0x123   :  { %v541_v34 = vadd.f32 %v1328_v32, %v491_v31  ;;  %v583_v37 = vmax.f32 %v540_v29, 0.0 }
 0x124   :  { %v586_v36 = vmax.f32 %v543_v33, 0.0 }
 0x125   :  { %v584_v38 = vmax.f32 %v541_v34, 0.0 }
 0x126   :  { %v1002_v39 = vpack.c.bf16 %v586_v36, %v585_v35 }
 0x127   :  { %v997_v40 = vpack.c.bf16 %v584_v38, %v583_v37 }
 0x128   :  { %1059 = vst [vmem:[%s1486_s4 + $0x58] sm:$0xff] %v1002_v39  }
 0x129   :  { %1058 = vst [vmem:[%s1486_s4 + $0x50] sm:$0xff] %v997_v40  }

// kernel: _lambda_.65
= control target key start
LH: loop header
LB: loop body
LE: loop exit
PB: predicated region body
PF: predicated region fallthrough
CT: control target
= control target key end

     0   :  { %s1439_s1 = inlined_call_operand.vmem [shape: bf16[128,128], index: 1, kind: input, shape index: {}]   ;;  %s1440_s0 = inlined_call_operand.vmem [shape: bf16[344,128], index: 0, kind: input, shape index: {}]   ;;  %s1441_s2 = inlined_call_operand.vmem [shape: f32[1,128], index: 2, kind: input, shape index: {}]   ;;  %s1442_s3 = inlined_call_operand.vmem [shape: f32[1,128], index: 3, kind: input, shape index: {}]   ;;  %s1443_s4 = inlined_call_operand.vmem [shape: bf16[344,128], index: 4, kind: output, shape index: {}]  }
   0x1   :  { %v1132_v0 = vld [vmem:[%s1439_s1] sm:$0xff]   ;;  %v1133_v1 = vld [vmem:[%s1439_s1 + $0x8] sm:$0xff]   ;;  %v1134_v2 = vld [vmem:[%s1439_s1 + $0x10] sm:$0xff]  }
   0x2   :  { %1056 = vmatprep.subr.bf16.mxu0 %v1132_v0  ;;  %1116 = vmatprep.subr.bf16.mxu1 %v1132_v0  ;;  %v1135_v3 = vld [vmem:[%s1439_s1 + $0x18] sm:$0xff]   ;;  %v1140_v4 = vld [vmem:[%s1440_s0] sm:$0xff]   ;;  %v1137_v7 = vld [vmem:[%s1439_s1 + $0x28] sm:$0xff]  }
   0x3   :  { %1057 = vmatpush3.bf16.msra.mxu0 %v1132_v0  ;;  %1124 = vmatpush3.bf16.msra.mxu1 %v1132_v0  ;;  %v1142_v5 = vld [vmem:[%s1440_s0 + $0x60] sm:$0xff]   ;;  %v1138_v8 = vld [vmem:[%s1439_s1 + $0x30] sm:$0xff]   ;;  %v1139_v9 = vld [vmem:[%s1439_s1 + $0x38] sm:$0xff]  }
   0x4   :  { %1058 = vmatprep.subr.bf16.mxu0 %v1133_v1  ;;  %1117 = vmatprep.subr.bf16.mxu1 %v1133_v1  ;;  %v1136_v6 = vld [vmem:[%s1439_s1 + $0x20] sm:$0xff]   ;;  %v1141_v10 = vld [vmem:[%s1440_s0 + $0x8] sm:$0xff]   ;;  %v1144_v12 = vld [vmem:[%s1440_s0 + $0x10] sm:$0xff]  }
   0x5   :  { %1072 = vmatprep.mubr.bf16.mxu0 %v1140_v4  ;;  %1096 = vmatprep.mubr.bf16.mxu1 %v1142_v5  ;;  %v1143_v11 = vld [vmem:[%s1440_s0 + $0x68] sm:$0xff]   ;;  %v1146_v13 = vld [vmem:[%s1440_s0 + $0x70] sm:$0xff]   ;;  %v1145_v14 = vld [vmem:[%s1440_s0 + $0x18] sm:$0xff]  }
   0x6   :  { %v1147_v15 = vld [vmem:[%s1440_s0 + $0x78] sm:$0xff]   ;;  %v1148_v16 = vld [vmem:[%s1440_s0 + $0x20] sm:$0xff]   ;;  %v1149_v18 = vld [vmem:[%s1440_s0 + $0x28] sm:$0xff]  }
   0x7   :  { %1059 = vmatpush3.bf16.msra.mxu0 %v1133_v1  ;;  %1125 = vmatpush3.bf16.msra.mxu1 %v1133_v1  ;;  %v1150_v17 = vld [vmem:[%s1440_s0 + $0x80] sm:$0xff]   ;;  %v1151_v19 = vld [vmem:[%s1440_s0 + $0x88] sm:$0xff]   ;;  %v1152_v20 = vld [vmem:[%s1440_s0 + $0x30] sm:$0xff]  }
   0x8   :  { %1060 = vmatprep.subr.bf16.mxu0 %v1134_v2  ;;  %1118 = vmatprep.subr.bf16.mxu1 %v1134_v2  ;;  %v1154_v21 = vld [vmem:[%s1440_s0 + $0x90] sm:$0xff]   ;;  %v1153_v22 = vld [vmem:[%s1440_s0 + $0x38] sm:$0xff]   ;;  %v1156_v24 = vld [vmem:[%s1440_s0 + $0x40] sm:$0xff]  }
   0x9   :  { %v1155_v23 = vld [vmem:[%s1440_s0 + $0x98] sm:$0xff]   ;;  %v1158_v25 = vld [vmem:[%s1440_s0 + $0xa0] sm:$0xff]   ;;  %v1157_v26 = vld [vmem:[%s1440_s0 + $0x48] sm:$0xff]  }
   0xa   :  { %v1159_v27 = vld [vmem:[%s1440_s0 + $0xa8] ss:$0 sps:$4 sm:$0xff]   ;;  %v1160_v28 = vld [vmem:[%s1440_s0 + $0x50] sm:$0xff]   ;;  %v1161_v29 = vld [vmem:[%s1440_s0 + $0x58] sm:$0xff]  }
   0xb   :  { %1061 = vmatpush3.bf16.msra.mxu0 %v1134_v2  ;;  %1126 = vmatpush3.bf16.msra.mxu1 %v1134_v2  ;;  %v1280_v30 = vld [vmem:[%s1441_s2] ss:$0 sm:$0xff] }
   0xc   :  { %1062 = vmatprep.subr.bf16.mxu0 %v1135_v3  ;;  %1119 = vmatprep.subr.bf16.mxu1 %v1135_v3  ;;  %v1287_v37 = vld [vmem:[%s1442_s3] ss:$0 sm:$0xff] }
   0xf   :  { %1063 = vmatpush3.bf16.msra.mxu0 %v1135_v3  ;;  %1127 = vmatpush3.bf16.msra.mxu1 %v1135_v3 }
  0x10   :  { %1064 = vmatprep.subr.bf16.mxu0 %v1136_v6  ;;  %1120 = vmatprep.subr.bf16.mxu1 %v1136_v6 }
  0x13   :  { %1065 = vmatpush3.bf16.msra.mxu0 %v1136_v6  ;;  %1128 = vmatpush3.bf16.msra.mxu1 %v1136_v6 }
  0x14   :  { %1066 = vmatprep.subr.bf16.mxu0 %v1137_v7  ;;  %1121 = vmatprep.subr.bf16.mxu1 %v1137_v7 }
  0x17   :  { %1067 = vmatpush3.bf16.msra.mxu0 %v1137_v7  ;;  %1129 = vmatpush3.bf16.msra.mxu1 %v1137_v7 }
  0x18   :  { %1068 = vmatprep.subr.bf16.mxu0 %v1138_v8  ;;  %1122 = vmatprep.subr.bf16.mxu1 %v1138_v8 }
  0x1b   :  { %1069 = vmatpush3.bf16.msra.mxu0 %v1138_v8  ;;  %1130 = vmatpush3.bf16.msra.mxu1 %v1138_v8 }
  0x1c   :  { %1070 = vmatprep.subr.bf16.mxu0 %v1139_v9  ;;  %1123 = vmatprep.subr.bf16.mxu1 %v1139_v9 }
  0x1f   :  { %1071 = vmatpush3.bf16.msra.mxu0 %v1139_v9  ;;  %1131 = vmatpush3.bf16.msra.mxu1 %v1139_v9 }
  0x22   :  { %1073 = vmatmul.mubr.bf16.vlgmr.msra.gmra.mrb[0].mxu0 %v1141_v10  ;;  %1097 = vmatmul.mubr.bf16.vlgmr.msra.gmra.mrb[0].mxu1 %v1143_v11 }
  0x23   :  { %1076 = vmatprep.mubr.bf16.mxu0 %v1144_v12  ;;  %1100 = vmatprep.mubr.bf16.mxu1 %v1146_v13 }
  0x2a   :  { %1077 = vmatmul.mubr.bf16.gmra.mrb[4].mxu0 %v1145_v14  ;;  %1101 = vmatmul.mubr.bf16.gmra.mrb[4].mxu1 %v1147_v15 }
  0x2b   :  { %1080 = vmatprep.mubr.bf16.mxu0 %v1148_v16  ;;  %1104 = vmatprep.mubr.bf16.mxu1 %v1150_v17 }
  0x32   :  { %1081 = vmatmul.mubr.bf16.gmra.mrb[8].mxu0 %v1149_v18  ;;  %1105 = vmatmul.mubr.bf16.gmra.mrb[8].mxu1 %v1151_v19 }
  0x33   :  { %1084 = vmatprep.mubr.bf16.mxu0 %v1152_v20  ;;  %1108 = vmatprep.mubr.bf16.mxu1 %v1154_v21 }
  0x3a   :  { %1085 = vmatmul.mubr.bf16.gmra.mrb[12].mxu0 %v1153_v22  ;;  %1109 = vmatmul.mubr.bf16.gmra.mrb[12].mxu1 %v1155_v23 }
  0x3b   :  { %1088 = vmatprep.mubr.bf16.mxu0 %v1156_v24  ;;  %1112 = vmatprep.mubr.bf16.mxu1 %v1158_v25 }
  0x42   :  { %1089 = vmatmul.mubr.bf16.gmra.mrb[16].mxu0 %v1157_v26  ;;  %1113 = vmatmul.mubr.bf16.gmra.mrb[16].mxu1 %v1159_v27 }
  0x43   :  { %1092 = vmatprep.mubr.bf16.mxu0 %v1160_v28 }
  0x4a   :  { %1093 = vmatmul.mubr.bf16.gmra.mrb[20].mxu0 %v1161_v29 }
  0xf5   :  { %v1074_v31 = vpop.f32.mrb[0].mxu0  ;;  %v1098_v32 = vpop.f32.mrb[0].mxu1 }
  0xf6   :  { %v472_v33 = vmul.f32 %v1074_v31, %v1280_v30  ;;  %v289_v34 = vpop.f32.mrb[1].mxu0  ;;  %v496_v35 = vmul.f32 %v1098_v32, %v1280_v30  ;;  %v385_v36 = vpop.f32.mrb[1].mxu1 }
  0xf7   :  { %v470_v38 = vmul.f32 %v1280_v30, %v289_v34  ;;  %v1075_v39 = vpop.f32.mrb[2].mxu0  ;;  %v494_v40 = vmul.f32 %v1280_v30, %v385_v36  ;;  %v1099_v41 = vpop.f32.mrb[2].mxu1 }
  0xf8   :  { %v473_v42 = vmul.f32 %v1075_v39, %v1280_v30  ;;  %v292_v43 = vpop.f32.mrb[3].mxu0  ;;  %v546_v44 = vadd.f32 %v1287_v37, %v496_v35  ;;  %v497_v45 = vmul.f32 %v1099_v41, %v1280_v30  ;;  %v388_v46 = vpop.f32.mrb[3].mxu1  ;;  %v522_v50 = vadd.f32 %v1287_v37, %v472_v33 }
  0xf9   :  { %v471_v47 = vmul.f32 %v1280_v30, %v292_v43  ;;  %v544_v48 = vadd.f32 %v1287_v37, %v494_v40  ;;  %v495_v49 = vmul.f32 %v1280_v30, %v388_v46  ;;  %v520_v53 = vadd.f32 %v1287_v37, %v470_v38 }
  0xfa   :  { %v523_v51 = vadd.f32 %v1287_v37, %v473_v42  ;;  %v547_v52 = vadd.f32 %v1287_v37, %v497_v45 }
  0xfb   :  { %v521_v54 = vadd.f32 %v1287_v37, %v471_v47  ;;  %v545_v55 = vadd.f32 %v1287_v37, %v495_v49 }
  0xfc   :  { %v909_v56 = vpack.c.bf16 %v523_v51, %v522_v50  ;;  %v969_v57 = vpack.c.bf16 %v547_v52, %v546_v44 }
  0xfd   :  { %v904_v58 = vpack.c.bf16 %v521_v54, %v520_v53  ;;  %v1078_v59 = vpop.f32.mrb[4].mxu0  ;;  %v964_v60 = vpack.c.bf16 %v545_v55, %v544_v48  ;;  %v1102_v61 = vpop.f32.mrb[4].mxu1 }
  0xfe   :  { %1006 = vst [vmem:[%s1443_s4 + $0x8] sm:$0xff] %v909_v56   ;;  %1018 = vst [vmem:[%s1443_s4 + $0x68] sm:$0xff] %v969_v57   ;;  %v476_v62 = vmul.f32 %v1078_v59, %v1280_v30  ;;  %v305_v63 = vpop.f32.mrb[5].mxu0  ;;  %v500_v0 = vmul.f32 %v1102_v61, %v1280_v30  ;;  %v401_v1 = vpop.f32.mrb[5].mxu1 }
  0xff   :  { %905 = vst [vmem:[%s1443_s4] sm:$0xff] %v904_v58   ;;  %1017 = vst [vmem:[%s1443_s4 + $0x60] sm:$0xff] %v964_v60   ;;  %v474_v2 = vmul.f32 %v1280_v30, %v305_v63  ;;  %v1079_v3 = vpop.f32.mrb[6].mxu0  ;;  %v498_v4 = vmul.f32 %v1280_v30, %v401_v1  ;;  %v1103_v5 = vpop.f32.mrb[6].mxu1 }
 0x100   :  { %v477_v6 = vmul.f32 %v1079_v3, %v1280_v30  ;;  %v308_v7 = vpop.f32.mrb[7].mxu0  ;;  %v550_v8 = vadd.f32 %v1287_v37, %v500_v0  ;;  %v501_v9 = vmul.f32 %v1103_v5, %v1280_v30  ;;  %v404_v10 = vpop.f32.mrb[7].mxu1  ;;  %v526_v14 = vadd.f32 %v1287_v37, %v476_v62 }
 0x101   :  { %v475_v11 = vmul.f32 %v1280_v30, %v308_v7  ;;  %v548_v12 = vadd.f32 %v1287_v37, %v498_v4  ;;  %v499_v13 = vmul.f32 %v1280_v30, %v404_v10  ;;  %v524_v17 = vadd.f32 %v1287_v37, %v474_v2 }
 0x102   :  { %v527_v15 = vadd.f32 %v1287_v37, %v477_v6  ;;  %v551_v16 = vadd.f32 %v1287_v37, %v501_v9 }
 0x103   :  { %v525_v18 = vadd.f32 %v1287_v37, %v475_v11  ;;  %v549_v19 = vadd.f32 %v1287_v37, %v499_v13 }
 0x104   :  { %v919_v20 = vpack.c.bf16 %v527_v15, %v526_v14  ;;  %v979_v21 = vpack.c.bf16 %v551_v16, %v550_v8 }
 0x105   :  { %v914_v22 = vpack.c.bf16 %v525_v18, %v524_v17  ;;  %v1082_v23 = vpop.f32.mrb[8].mxu0  ;;  %v974_v24 = vpack.c.bf16 %v549_v19, %v548_v12  ;;  %v1106_v25 = vpop.f32.mrb[8].mxu1 }
 0x106   :  { %1008 = vst [vmem:[%s1443_s4 + $0x18] sm:$0xff] %v919_v20   ;;  %1020 = vst [vmem:[%s1443_s4 + $0x78] sm:$0xff] %v979_v21   ;;  %v480_v26 = vmul.f32 %v1082_v23, %v1280_v30  ;;  %v321_v27 = vpop.f32.mrb[9].mxu0  ;;  %v504_v28 = vmul.f32 %v1106_v25, %v1280_v30  ;;  %v417_v29 = vpop.f32.mrb[9].mxu1 }
 0x107   :  { %1007 = vst [vmem:[%s1443_s4 + $0x10] sm:$0xff] %v914_v22   ;;  %1019 = vst [vmem:[%s1443_s4 + $0x70] sm:$0xff] %v974_v24   ;;  %v478_v31 = vmul.f32 %v1280_v30, %v321_v27  ;;  %v1083_v32 = vpop.f32.mrb[10].mxu0  ;;  %v502_v33 = vmul.f32 %v1280_v30, %v417_v29  ;;  %v1107_v34 = vpop.f32.mrb[10].mxu1 }
 0x108   :  { %v481_v35 = vmul.f32 %v1083_v32, %v1280_v30  ;;  %v324_v36 = vpop.f32.mrb[11].mxu0  ;;  %v554_v38 = vadd.f32 %v1287_v37, %v504_v28  ;;  %v505_v39 = vmul.f32 %v1107_v34, %v1280_v30  ;;  %v420_v40 = vpop.f32.mrb[11].mxu1  ;;  %v530_v44 = vadd.f32 %v1287_v37, %v480_v26 }
 0x109   :  { %v479_v41 = vmul.f32 %v1280_v30, %v324_v36  ;;  %v552_v42 = vadd.f32 %v1287_v37, %v502_v33  ;;  %v503_v43 = vmul.f32 %v1280_v30, %v420_v40  ;;  %v528_v47 = vadd.f32 %v1287_v37, %v478_v31 }
 0x10a   :  { %v531_v45 = vadd.f32 %v1287_v37, %v481_v35  ;;  %v555_v46 = vadd.f32 %v1287_v37, %v505_v39 }
 0x10b   :  { %v529_v48 = vadd.f32 %v1287_v37, %v479_v41  ;;  %v553_v49 = vadd.f32 %v1287_v37, %v503_v43 }
 0x10c   :  { %v929_v50 = vpack.c.bf16 %v531_v45, %v530_v44  ;;  %v989_v51 = vpack.c.bf16 %v555_v46, %v554_v38 }
 0x10d   :  { %v924_v52 = vpack.c.bf16 %v529_v48, %v528_v47  ;;  %v1086_v53 = vpop.f32.mrb[12].mxu0  ;;  %v984_v54 = vpack.c.bf16 %v553_v49, %v552_v42  ;;  %v1110_v55 = vpop.f32.mrb[12].mxu1 }
 0x10e   :  { %1010 = vst [vmem:[%s1443_s4 + $0x28] sm:$0xff] %v929_v50   ;;  %1022 = vst [vmem:[%s1443_s4 + $0x88] sm:$0xff] %v989_v51   ;;  %v484_v56 = vmul.f32 %v1086_v53, %v1280_v30  ;;  %v337_v57 = vpop.f32.mrb[13].mxu0  ;;  %v508_v58 = vmul.f32 %v1110_v55, %v1280_v30  ;;  %v433_v59 = vpop.f32.mrb[13].mxu1 }
 0x10f   :  { %1009 = vst [vmem:[%s1443_s4 + $0x20] sm:$0xff] %v924_v52   ;;  %1021 = vst [vmem:[%s1443_s4 + $0x80] sm:$0xff] %v984_v54   ;;  %v482_v60 = vmul.f32 %v1280_v30, %v337_v57  ;;  %v1087_v61 = vpop.f32.mrb[14].mxu0  ;;  %v506_v62 = vmul.f32 %v1280_v30, %v433_v59  ;;  %v1111_v63 = vpop.f32.mrb[14].mxu1 }
 0x110   :  { %v485_v0 = vmul.f32 %v1087_v61, %v1280_v30  ;;  %v340_v1 = vpop.f32.mrb[15].mxu0  ;;  %v558_v2 = vadd.f32 %v1287_v37, %v508_v58  ;;  %v509_v3 = vmul.f32 %v1111_v63, %v1280_v30  ;;  %v436_v4 = vpop.f32.mrb[15].mxu1  ;;  %v534_v8 = vadd.f32 %v1287_v37, %v484_v56 }
 0x111   :  { %v483_v5 = vmul.f32 %v1280_v30, %v340_v1  ;;  %v556_v6 = vadd.f32 %v1287_v37, %v506_v62  ;;  %v507_v7 = vmul.f32 %v1280_v30, %v436_v4  ;;  %v532_v11 = vadd.f32 %v1287_v37, %v482_v60 }
 0x112   :  { %v535_v9 = vadd.f32 %v1287_v37, %v485_v0  ;;  %v559_v10 = vadd.f32 %v1287_v37, %v509_v3 }
 0x113   :  { %v533_v12 = vadd.f32 %v1287_v37, %v483_v5  ;;  %v557_v13 = vadd.f32 %v1287_v37, %v507_v7 }
 0x114   :  { %v939_v14 = vpack.c.bf16 %v535_v9, %v534_v8  ;;  %v999_v15 = vpack.c.bf16 %v559_v10, %v558_v2 }
 0x115   :  { %v934_v16 = vpack.c.bf16 %v533_v12, %v532_v11  ;;  %v1090_v17 = vpop.f32.mrb[16].mxu0  ;;  %v994_v18 = vpack.c.bf16 %v557_v13, %v556_v6  ;;  %v1114_v19 = vpop.f32.mrb[16].mxu1 }
 0x116   :  { %1012 = vst [vmem:[%s1443_s4 + $0x38] sm:$0xff] %v939_v14   ;;  %1024 = vst [vmem:[%s1443_s4 + $0x98] sm:$0xff] %v999_v15   ;;  %v488_v20 = vmul.f32 %v1090_v17, %v1280_v30  ;;  %v353_v21 = vpop.f32.mrb[17].mxu0  ;;  %v512_v22 = vmul.f32 %v1114_v19, %v1280_v30  ;;  %v449_v23 = vpop.f32.mrb[17].mxu1 }
 0x117   :  { %1011 = vst [vmem:[%s1443_s4 + $0x30] sm:$0xff] %v934_v16   ;;  %1023 = vst [vmem:[%s1443_s4 + $0x90] sm:$0xff] %v994_v18   ;;  %v486_v24 = vmul.f32 %v1280_v30, %v353_v21  ;;  %v1091_v25 = vpop.f32.mrb[18].mxu0  ;;  %v510_v26 = vmul.f32 %v1280_v30, %v449_v23  ;;  %v1115_v27 = vpop.f32.mrb[18].mxu1 }
 0x118   :  { %v489_v28 = vmul.f32 %v1091_v25, %v1280_v30  ;;  %v356_v29 = vpop.f32.mrb[19].mxu0  ;;  %v562_v31 = vadd.f32 %v1287_v37, %v512_v22  ;;  %v452_v32 = vpop.f32.mrb[19].mxu1  ;;  %v538_v36 = vadd.f32 %v1287_v37, %v488_v20 }
 0x119   :  { %v487_v33 = vmul.f32 %v1280_v30, %v356_v29  ;;  %v560_v34 = vadd.f32 %v1287_v37, %v510_v26  ;;  %v511_v35 = vmul.f32 %v1280_v30, %v452_v32  ;;  %v536_v40 = vadd.f32 %v1287_v37, %v486_v24 }
 0x11a   :  { %v539_v38 = vadd.f32 %v1287_v37, %v489_v28  ;;  %v900_v39 = vpack.c.bf16 %v562_v31, %v562_v31 }
 0x11b   :  { %v537_v41 = vadd.f32 %v1287_v37, %v487_v33  ;;  %v561_v42 = vadd.f32 %v1287_v37, %v511_v35 }
 0x11c   :  { %v949_v43 = vpack.c.bf16 %v539_v38, %v538_v36  ;;  %778 = vst [vmem:[%s1443_s4 + $0xa8] sm:$0xf] %v900_v39 }
 0x11d   :  { %v944_v44 = vpack.c.bf16 %v537_v41, %v536_v40  ;;  %v1094_v45 = vpop.f32.mrb[20].mxu0  ;;  %v1004_v46 = vpack.c.bf16 %v561_v42, %v560_v34 }
 0x11e   :  { %1014 = vst [vmem:[%s1443_s4 + $0x48] sm:$0xff] %v949_v43   ;;  %v492_v47 = vmul.f32 %v1094_v45, %v1280_v30  ;;  %v369_v48 = vpop.f32.mrb[21].mxu0 }
 0x11f   :  { %1013 = vst [vmem:[%s1443_s4 + $0x40] sm:$0xff] %v944_v44   ;;  %1025 = vst [vmem:[%s1443_s4 + $0xa0] sm:$0xff] %v1004_v46   ;;  %v490_v49 = vmul.f32 %v1280_v30, %v369_v48  ;;  %v1095_v50 = vpop.f32.mrb[22].mxu0 }
 0x120   :  { %v493_v51 = vmul.f32 %v1095_v50, %v1280_v30  ;;  %v372_v52 = vpop.f32.mrb[23].mxu0  ;;  %v542_v54 = vadd.f32 %v1287_v37, %v492_v47 }
 0x121   :  { %v491_v53 = vmul.f32 %v1280_v30, %v372_v52  ;;  %v540_v56 = vadd.f32 %v1287_v37, %v490_v49 }
 0x122   :  { %v543_v55 = vadd.f32 %v1287_v37, %v493_v51 }
 0x123   :  { %v541_v57 = vadd.f32 %v1287_v37, %v491_v53 }
 0x124   :  { %v959_v58 = vpack.c.bf16 %v543_v55, %v542_v54 }
 0x125   :  { %v954_v59 = vpack.c.bf16 %v541_v57, %v540_v56 }
 0x126   :  { %1016 = vst [vmem:[%s1443_s4 + $0x58] sm:$0xff] %v959_v58  }
 0x127   :  { %1015 = vst [vmem:[%s1443_s4 + $0x50] sm:$0xff] %v954_v59  }

// kernel: _lambda_.66
= control target key start
LH: loop header
LB: loop body
LE: loop exit
PB: predicated region body
PF: predicated region fallthrough
CT: control target
= control target key end

     0   :  { %s1960_s1 = inlined_call_operand.vmem [shape: bf16[128,128], index: 1, kind: input, shape index: {}]   ;;  %s1961_s0 = inlined_call_operand.vmem [shape: bf16[344,128], index: 0, kind: input, shape index: {}]   ;;  %s1962_s4 = inlined_call_operand.vmem [shape: bf16[344,128], index: 4, kind: input, shape index: {}]   ;;  %s1963_s2 = inlined_call_operand.vmem [shape: f32[1,128], index: 2, kind: input, shape index: {}]   ;;  %s1964_s3 = inlined_call_operand.vmem [shape: f32[1,128], index: 3, kind: input, shape index: {}]   ;;  %s1965_s5 = inlined_call_operand.vmem [shape: bf16[344,128], index: 5, kind: output, shape index: {}]  }
   0x1   :  { %v1411_v0 = vld [vmem:[%s1960_s1] sm:$0xff]   ;;  %v1412_v1 = vld [vmem:[%s1960_s1 + $0x8] sm:$0xff]   ;;  %v1413_v2 = vld [vmem:[%s1960_s1 + $0x10] sm:$0xff]  }
   0x2   :  { %1335 = vmatprep.subr.bf16.mxu0 %v1411_v0  ;;  %1395 = vmatprep.subr.bf16.mxu1 %v1411_v0  ;;  %v1414_v3 = vld [vmem:[%s1960_s1 + $0x18] sm:$0xff]   ;;  %v1419_v4 = vld [vmem:[%s1961_s0] sm:$0xff]   ;;  %v1416_v7 = vld [vmem:[%s1960_s1 + $0x28] sm:$0xff]  }
   0x3   :  { %1336 = vmatpush3.bf16.msra.mxu0 %v1411_v0  ;;  %1403 = vmatpush3.bf16.msra.mxu1 %v1411_v0  ;;  %v1421_v5 = vld [vmem:[%s1961_s0 + $0x60] sm:$0xff]   ;;  %v1417_v8 = vld [vmem:[%s1960_s1 + $0x30] sm:$0xff]   ;;  %v1418_v9 = vld [vmem:[%s1960_s1 + $0x38] sm:$0xff]  }
   0x4   :  { %1337 = vmatprep.subr.bf16.mxu0 %v1412_v1  ;;  %1396 = vmatprep.subr.bf16.mxu1 %v1412_v1  ;;  %v1415_v6 = vld [vmem:[%s1960_s1 + $0x20] sm:$0xff]   ;;  %v1420_v10 = vld [vmem:[%s1961_s0 + $0x8] sm:$0xff]   ;;  %v1423_v12 = vld [vmem:[%s1961_s0 + $0x10] sm:$0xff]  }
   0x5   :  { %1351 = vmatprep.mubr.bf16.mxu0 %v1419_v4  ;;  %1375 = vmatprep.mubr.bf16.mxu1 %v1421_v5  ;;  %v1422_v11 = vld [vmem:[%s1961_s0 + $0x68] sm:$0xff]   ;;  %v1425_v13 = vld [vmem:[%s1961_s0 + $0x70] sm:$0xff]   ;;  %v1424_v14 = vld [vmem:[%s1961_s0 + $0x18] sm:$0xff]  }
   0x6   :  { %v1426_v15 = vld [vmem:[%s1961_s0 + $0x78] sm:$0xff]   ;;  %v1427_v16 = vld [vmem:[%s1961_s0 + $0x20] sm:$0xff]   ;;  %v1428_v18 = vld [vmem:[%s1961_s0 + $0x28] sm:$0xff]  }
   0x7   :  { %1338 = vmatpush3.bf16.msra.mxu0 %v1412_v1  ;;  %1404 = vmatpush3.bf16.msra.mxu1 %v1412_v1  ;;  %v1429_v17 = vld [vmem:[%s1961_s0 + $0x80] sm:$0xff]   ;;  %v1430_v19 = vld [vmem:[%s1961_s0 + $0x88] sm:$0xff]   ;;  %v1431_v20 = vld [vmem:[%s1961_s0 + $0x30] sm:$0xff]  }
   0x8   :  { %1339 = vmatprep.subr.bf16.mxu0 %v1413_v2  ;;  %1397 = vmatprep.subr.bf16.mxu1 %v1413_v2  ;;  %v1433_v21 = vld [vmem:[%s1961_s0 + $0x90] sm:$0xff]   ;;  %v1432_v22 = vld [vmem:[%s1961_s0 + $0x38] sm:$0xff]   ;;  %v1435_v24 = vld [vmem:[%s1961_s0 + $0x40] sm:$0xff]  }
   0x9   :  { %v1434_v23 = vld [vmem:[%s1961_s0 + $0x98] sm:$0xff]   ;;  %v1437_v25 = vld [vmem:[%s1961_s0 + $0xa0] sm:$0xff]   ;;  %v1436_v26 = vld [vmem:[%s1961_s0 + $0x48] sm:$0xff]  }
   0xa   :  { %v1438_v27 = vld [vmem:[%s1961_s0 + $0xa8] ss:$0 sps:$4 sm:$0xff]   ;;  %v1439_v28 = vld [vmem:[%s1961_s0 + $0x50] sm:$0xff]   ;;  %v1440_v29 = vld [vmem:[%s1961_s0 + $0x58] sm:$0xff]  }
   0xb   :  { %1340 = vmatpush3.bf16.msra.mxu0 %v1413_v2  ;;  %1405 = vmatpush3.bf16.msra.mxu1 %v1413_v2  ;;  %v1564_v30 = vld [vmem:[%s1962_s4 + $0x8] sm:$0xff]   ;;  %v1569_v31 = vld [vmem:[%s1962_s4] sm:$0xff]   ;;  %v1584_v34 = vld [vmem:[%s1962_s4 + $0x18] sm:$0xff]  }
   0xc   :  { %1341 = vmatprep.subr.bf16.mxu0 %v1414_v3  ;;  %1398 = vmatprep.subr.bf16.mxu1 %v1414_v3  ;;  %v1574_v32 = vld [vmem:[%s1962_s4 + $0x68] sm:$0xff]   ;;  %v1579_v33 = vld [vmem:[%s1962_s4 + $0x60] sm:$0xff]   ;;  %v1589_v35 = vld [vmem:[%s1962_s4 + $0x10] sm:$0xff]   ;;  %v1082_v36 = vunpack.c.l.bf16 %v1564_v30  ;;  %v1078_v37 = vunpack.c.l.bf16 %v1569_v31  ;;  %v1083_v40 = vunpack.c.h.bf16 %v1564_v30  ;;  %v1079_v41 = vunpack.c.h.bf16 %v1569_v31 }
   0xd   :  { %v1596_v38 = vld [vmem:[%s1962_s4 + $0x78] sm:$0xff]   ;;  %v1601_v39 = vld [vmem:[%s1962_s4 + $0x70] sm:$0xff]   ;;  %v1130_v42 = vunpack.c.l.bf16 %v1574_v32  ;;  %v1126_v43 = vunpack.c.l.bf16 %v1579_v33  ;;  %v1610_v44 = vld [vmem:[%s1962_s4 + $0x28] sm:$0xff]   ;;  %v1131_v46 = vunpack.c.h.bf16 %v1574_v32  ;;  %v1090_v47 = vunpack.c.l.bf16 %v1584_v34 }
   0xe   :  { %v1615_v45 = vld [vmem:[%s1962_s4 + $0x20] sm:$0xff]   ;;  %v1127_v48 = vunpack.c.h.bf16 %v1579_v33  ;;  %v1086_v49 = vunpack.c.l.bf16 %v1589_v35  ;;  %v1624_v50 = vld [vmem:[%s1962_s4 + $0x88] sm:$0xff]   ;;  %v1091_v52 = vunpack.c.h.bf16 %v1584_v34  ;;  %v1087_v53 = vunpack.c.h.bf16 %v1589_v35  ;;  %v1638_v56 = vld [vmem:[%s1962_s4 + $0x38] sm:$0xff]  }
   0xf   :  { %1342 = vmatpush3.bf16.msra.mxu0 %v1414_v3  ;;  %1406 = vmatpush3.bf16.msra.mxu1 %v1414_v3  ;;  %v1629_v51 = vld [vmem:[%s1962_s4 + $0x80] sm:$0xff]   ;;  %v1138_v54 = vunpack.c.l.bf16 %v1596_v38  ;;  %v1134_v55 = vunpack.c.l.bf16 %v1601_v39  ;;  %v1643_v57 = vld [vmem:[%s1962_s4 + $0x30] sm:$0xff]   ;;  %v1139_v58 = vunpack.c.h.bf16 %v1596_v38  ;;  %v1098_v59 = vunpack.c.l.bf16 %v1610_v44  ;;  %v1652_v62 = vld [vmem:[%s1962_s4 + $0x98] sm:$0xff]  }
  0x10   :  { %1343 = vmatprep.subr.bf16.mxu0 %v1415_v6  ;;  %1399 = vmatprep.subr.bf16.mxu1 %v1415_v6  ;;  %v1135_v60 = vunpack.c.h.bf16 %v1601_v39  ;;  %v1094_v61 = vunpack.c.l.bf16 %v1615_v45  ;;  %v1657_v63 = vld [vmem:[%s1962_s4 + $0x90] sm:$0xff]   ;;  %v1099_v0 = vunpack.c.h.bf16 %v1610_v44  ;;  %v1095_v1 = vunpack.c.h.bf16 %v1615_v45  ;;  %v1666_v4 = vld [vmem:[%s1962_s4 + $0x48] sm:$0xff]   ;;  %v1671_v5 = vld [vmem:[%s1962_s4 + $0x40] sm:$0xff]  }
  0x11   :  { %v1146_v2 = vunpack.c.l.bf16 %v1624_v50  ;;  %v1142_v3 = vunpack.c.l.bf16 %v1629_v51 }
  0x13   :  { %1344 = vmatpush3.bf16.msra.mxu0 %v1415_v6  ;;  %1407 = vmatpush3.bf16.msra.mxu1 %v1415_v6  ;;  %v1147_v6 = vunpack.c.h.bf16 %v1624_v50 }
  0x14   :  { %1345 = vmatprep.subr.bf16.mxu0 %v1416_v7  ;;  %1400 = vmatprep.subr.bf16.mxu1 %v1416_v7 }
  0x17   :  { %1346 = vmatpush3.bf16.msra.mxu0 %v1416_v7  ;;  %1408 = vmatpush3.bf16.msra.mxu1 %v1416_v7 }
  0x18   :  { %1347 = vmatprep.subr.bf16.mxu0 %v1417_v8  ;;  %1401 = vmatprep.subr.bf16.mxu1 %v1417_v8 }
  0x1b   :  { %1348 = vmatpush3.bf16.msra.mxu0 %v1417_v8  ;;  %1409 = vmatpush3.bf16.msra.mxu1 %v1417_v8 }
  0x1c   :  { %1349 = vmatprep.subr.bf16.mxu0 %v1418_v9  ;;  %1402 = vmatprep.subr.bf16.mxu1 %v1418_v9 }
  0x1f   :  { %1350 = vmatpush3.bf16.msra.mxu0 %v1418_v9  ;;  %1410 = vmatpush3.bf16.msra.mxu1 %v1418_v9 }
  0x22   :  { %1352 = vmatmul.mubr.bf16.vlgmr.msra.gmra.mrb[0].mxu0 %v1420_v10  ;;  %1376 = vmatmul.mubr.bf16.vlgmr.msra.gmra.mrb[0].mxu1 %v1422_v11  ;;  %v1680_v10 = vld [vmem:[%s1962_s4 + $0xa8] sm:$0xf]  ;;  %v1685_v11 = vld [vmem:[%s1962_s4 + $0xa0] sm:$0xff]  }
  0x23   :  { %1355 = vmatprep.mubr.bf16.mxu0 %v1423_v12  ;;  %1379 = vmatprep.mubr.bf16.mxu1 %v1425_v13  ;;  %v1690_v12 = vld [vmem:[%s1963_s2] ss:$0 sm:$0xff] }
  0x2a   :  { %1356 = vmatmul.mubr.bf16.gmra.mrb[4].mxu0 %v1424_v14  ;;  %1380 = vmatmul.mubr.bf16.gmra.mrb[4].mxu1 %v1426_v15 }
  0x2b   :  { %1359 = vmatprep.mubr.bf16.mxu0 %v1427_v16  ;;  %1383 = vmatprep.mubr.bf16.mxu1 %v1429_v17  ;;  %v1699_v17 = vld [vmem:[%s1962_s4 + $0x58] sm:$0xff]  }
  0x32   :  { %1360 = vmatmul.mubr.bf16.gmra.mrb[8].mxu0 %v1428_v18  ;;  %1384 = vmatmul.mubr.bf16.gmra.mrb[8].mxu1 %v1430_v19 }
  0x33   :  { %1363 = vmatprep.mubr.bf16.mxu0 %v1431_v20  ;;  %1387 = vmatprep.mubr.bf16.mxu1 %v1433_v21 }
  0x3a   :  { %1364 = vmatmul.mubr.bf16.gmra.mrb[12].mxu0 %v1432_v22  ;;  %1388 = vmatmul.mubr.bf16.gmra.mrb[12].mxu1 %v1434_v23  ;;  %v1708_v22 = vld [vmem:[%s1962_s4 + $0x50] sm:$0xff]  }
  0x3b   :  { %1367 = vmatprep.mubr.bf16.mxu0 %v1435_v24  ;;  %1391 = vmatprep.mubr.bf16.mxu1 %v1437_v25  ;;  %v1713_v24 = vld [vmem:[%s1964_s3] ss:$0 sm:$0xff] }
  0x42   :  { %1368 = vmatmul.mubr.bf16.gmra.mrb[16].mxu0 %v1436_v26  ;;  %1392 = vmatmul.mubr.bf16.gmra.mrb[16].mxu1 %v1438_v27 }
  0x43   :  { %1371 = vmatprep.mubr.bf16.mxu0 %v1439_v28 }
  0x4a   :  { %1372 = vmatmul.mubr.bf16.gmra.mrb[20].mxu0 %v1440_v29 }
  0xf5   :  { %v1353_v23 = vpop.f32.mrb[0].mxu0  ;;  %v1377_v25 = vpop.f32.mrb[0].mxu1 }
  0xf6   :  { %v475_v21 = vmul.f32 %v1353_v23, %v1690_v12  ;;  %v292_v20 = vpop.f32.mrb[1].mxu0  ;;  %v499_v19 = vmul.f32 %v1377_v25, %v1690_v12  ;;  %v388_v18 = vpop.f32.mrb[1].mxu1 }
  0xf7   :  { %v473_v14 = vmul.f32 %v1690_v12, %v292_v20  ;;  %v1354_v13 = vpop.f32.mrb[2].mxu0  ;;  %v497_v26 = vmul.f32 %v1690_v12, %v388_v18  ;;  %v1378_v27 = vpop.f32.mrb[2].mxu1 }
  0xf8   :  { %v525_v23 = vadd.f32 %v1713_v24, %v475_v21  ;;  %v476_v9 = vmul.f32 %v1354_v13, %v1690_v12  ;;  %v295_v25 = vpop.f32.mrb[3].mxu0  ;;  %v549_v7 = vadd.f32 %v1713_v24, %v499_v19  ;;  %v500_v16 = vmul.f32 %v1378_v27, %v1690_v12  ;;  %v391_v15 = vpop.f32.mrb[3].mxu1 }
  0xf9   :  { %v523_v20 = vadd.f32 %v1713_v24, %v473_v14  ;;  %v474_v8 = vmul.f32 %v1690_v12, %v295_v25  ;;  %v547_v18 = vadd.f32 %v1713_v24, %v497_v26  ;;  %v498_v28 = vmul.f32 %v1690_v12, %v391_v15 }
  0xfa   :  { %v654_v29 = vadd.f32 %v1082_v36, %v525_v23  ;;  %v526_v21 = vadd.f32 %v1713_v24, %v476_v9  ;;  %v678_v13 = vadd.f32 %v1130_v42, %v549_v7  ;;  %v550_v19 = vadd.f32 %v1713_v24, %v500_v16 }
  0xfb   :  { %v652_v27 = vadd.f32 %v1078_v37, %v523_v20  ;;  %v524_v14 = vadd.f32 %v1713_v24, %v474_v8  ;;  %v676_v26 = vadd.f32 %v1126_v43, %v547_v18  ;;  %v548_v15 = vadd.f32 %v1713_v24, %v498_v28 }
  0xfc   :  { %v697_v25 = vmax.f32 %v654_v29, 0.0  ;;  %v655_v36 = vadd.f32 %v1083_v40, %v526_v21  ;;  %v721_v9 = vmax.f32 %v678_v13, 0.0  ;;  %v679_v42 = vadd.f32 %v1131_v46, %v550_v19 }
  0xfd   :  { %v695_v7 = vmax.f32 %v652_v27, 0.0  ;;  %v653_v16 = vadd.f32 %v1079_v41, %v524_v14  ;;  %v719_v37 = vmax.f32 %v676_v26, 0.0  ;;  %v1357_v23 = vpop.f32.mrb[4].mxu0  ;;  %v677_v8 = vadd.f32 %v1127_v48, %v548_v15  ;;  %v1381_v43 = vpop.f32.mrb[4].mxu1 }
  0xfe   :  { %v698_v20 = vmax.f32 %v655_v36, 0.0  ;;  %v722_v28 = vmax.f32 %v679_v42, 0.0  ;;  %v479_v29 = vmul.f32 %v1357_v23, %v1690_v12  ;;  %v308_v30 = vpop.f32.mrb[5].mxu0  ;;  %v503_v40 = vmul.f32 %v1381_v43, %v1690_v12  ;;  %v404_v18 = vpop.f32.mrb[5].mxu1 }
  0xff   :  { %v696_v32 = vmax.f32 %v653_v16, 0.0  ;;  %v720_v46 = vmax.f32 %v677_v8, 0.0  ;;  %v477_v21 = vmul.f32 %v1690_v12, %v308_v30  ;;  %v1358_v31 = vpop.f32.mrb[6].mxu0  ;;  %v501_v41 = vmul.f32 %v1690_v12, %v404_v18  ;;  %v1382_v13 = vpop.f32.mrb[6].mxu1 }
 0x100   :  { %v1168_v19 = vpack.c.bf16 %v698_v20, %v697_v25  ;;  %v1228_v33 = vpack.c.bf16 %v722_v28, %v721_v9  ;;  %v529_v48 = vadd.f32 %v1713_v24, %v479_v29  ;;  %v480_v27 = vmul.f32 %v1358_v31, %v1690_v12  ;;  %v311_v14 = vpop.f32.mrb[7].mxu0  ;;  %v407_v26 = vpop.f32.mrb[7].mxu1 }
 0x101   :  { %v1163_v15 = vpack.c.bf16 %v696_v32, %v695_v7  ;;  %v1223_v36 = vpack.c.bf16 %v720_v46, %v719_v37  ;;  %v527_v42 = vadd.f32 %v1713_v24, %v477_v21  ;;  %v478_v16 = vmul.f32 %v1690_v12, %v311_v14 }
 0x102   :  { %1285 = vst [vmem:[%s1965_s5 + $0x8] sm:$0xff] %v1168_v19   ;;  %1297 = vst [vmem:[%s1965_s5 + $0x68] sm:$0xff] %v1228_v33   ;;  %v658_v25 = vadd.f32 %v1090_v47, %v529_v48  ;;  %v530_v9 = vadd.f32 %v1713_v24, %v480_v27  ;;  %v553_v7 = vadd.f32 %v1713_v24, %v503_v40 }
 0x103   :  { %v551_v37 = vadd.f32 %v1713_v24, %v501_v41  ;;  %1164 = vst [vmem:[%s1965_s5] sm:$0xff] %v1163_v15   ;;  %1296 = vst [vmem:[%s1965_s5 + $0x60] sm:$0xff] %v1223_v36   ;;  %v656_v23 = vadd.f32 %v1086_v49, %v527_v42  ;;  %v528_v8 = vadd.f32 %v1713_v24, %v478_v16 }
 0x104   :  { %v504_v47 = vmul.f32 %v1382_v13, %v1690_v12  ;;  %v502_v43 = vmul.f32 %v1690_v12, %v407_v26  ;;  %v701_v20 = vmax.f32 %v658_v25, 0.0  ;;  %v659_v28 = vadd.f32 %v1091_v52, %v530_v9 }
 0x105   :  { %v682_v29 = vadd.f32 %v1138_v54, %v553_v7  ;;  %v680_v30 = vadd.f32 %v1134_v55, %v551_v37  ;;  %v699_v40 = vmax.f32 %v656_v23, 0.0  ;;  %v657_v49 = vadd.f32 %v1087_v53, %v528_v8  ;;  %v1361_v32 = vpop.f32.mrb[8].mxu0  ;;  %v1385_v21 = vpop.f32.mrb[8].mxu1 }
 0x106   :  { %v554_v18 = vadd.f32 %v1713_v24, %v504_v47  ;;  %v552_v46 = vadd.f32 %v1713_v24, %v502_v43  ;;  %v702_v31 = vmax.f32 %v659_v28, 0.0  ;;  %v483_v52 = vmul.f32 %v1361_v32, %v1690_v12  ;;  %v324_v13 = vpop.f32.mrb[9].mxu0  ;;  %v420_v54 = vpop.f32.mrb[9].mxu1 }
 0x107   :  { %v725_v41 = vmax.f32 %v682_v29, 0.0  ;;  %v723_v34 = vmax.f32 %v680_v30, 0.0  ;;  %v700_v19 = vmax.f32 %v657_v49, 0.0  ;;  %v481_v53 = vmul.f32 %v1690_v12, %v324_v13  ;;  %v1362_v33 = vpop.f32.mrb[10].mxu0  ;;  %v1386_v48 = vpop.f32.mrb[10].mxu1 }
 0x108   :  { %v683_v55 = vadd.f32 %v1139_v58, %v554_v18  ;;  %v681_v35 = vadd.f32 %v1135_v60, %v552_v46  ;;  %v1178_v27 = vpack.c.bf16 %v702_v31, %v701_v20  ;;  %v533_v14 = vadd.f32 %v1713_v24, %v483_v52  ;;  %v327_v15 = vpop.f32.mrb[11].mxu0  ;;  %v423_v42 = vpop.f32.mrb[11].mxu1 }
 0x109   :  { %v484_v26 = vmul.f32 %v1362_v33, %v1690_v12  ;;  %v507_v36 = vmul.f32 %v1385_v21, %v1690_v12  ;;  %v1173_v16 = vpack.c.bf16 %v700_v19, %v699_v40  ;;  %v531_v58 = vadd.f32 %v1713_v24, %v481_v53 }
 0x10a   :  { %v726_v25 = vmax.f32 %v683_v55, 0.0  ;;  %v724_v38 = vmax.f32 %v681_v35, 0.0  ;;  %1287 = vst [vmem:[%s1965_s5 + $0x18] sm:$0xff] %v1178_v27   ;;  %v662_v39 = vadd.f32 %v1098_v59, %v533_v14  ;;  %v482_v9 = vmul.f32 %v1690_v12, %v327_v15 }
 0x10b   :  { %v534_v60 = vadd.f32 %v1713_v24, %v484_v26  ;;  %v557_v7 = vadd.f32 %v1713_v24, %v507_v36  ;;  %1286 = vst [vmem:[%s1965_s5 + $0x10] sm:$0xff] %v1173_v16   ;;  %v660_v8 = vadd.f32 %v1094_v61, %v531_v58  ;;  %v505_v47 = vmul.f32 %v1690_v12, %v420_v54 }
 0x10c   :  { %v1238_v37 = vpack.c.bf16 %v726_v25, %v725_v41  ;;  %v1233_v23 = vpack.c.bf16 %v724_v38, %v723_v34  ;;  %v705_v43 = vmax.f32 %v662_v39, 0.0  ;;  %v532_v20 = vadd.f32 %v1713_v24, %v482_v9 }
 0x10d   :  { %v663_v59 = vadd.f32 %v1099_v0, %v534_v60  ;;  %v686_v28 = vadd.f32 %v1146_v2, %v557_v7  ;;  %v703_v61 = vmax.f32 %v660_v8, 0.0  ;;  %v555_v29 = vadd.f32 %v1713_v24, %v505_v47  ;;  %v1365_v44 = vpop.f32.mrb[12].mxu0  ;;  %v1389_v40 = vpop.f32.mrb[12].mxu1 }
 0x10e   :  { %1299 = vst [vmem:[%s1965_s5 + $0x78] sm:$0xff] %v1238_v37   ;;  %1298 = vst [vmem:[%s1965_s5 + $0x70] sm:$0xff] %v1233_v23   ;;  %v508_v30 = vmul.f32 %v1386_v48, %v1690_v12  ;;  %v506_v0 = vmul.f32 %v1690_v12, %v423_v42  ;;  %v661_v2 = vadd.f32 %v1095_v1, %v532_v20  ;;  %v340_v46 = vpop.f32.mrb[13].mxu0  ;;  %v436_v21 = vpop.f32.mrb[13].mxu1  ;;  %v1966_v48 = vunpack.c.h.bf16 %v1629_v51 }
 0x10f   :  { %v706_v49 = vmax.f32 %v663_v59, 0.0  ;;  %v729_v18 = vmax.f32 %v686_v28, 0.0  ;;  %v487_v32 = vmul.f32 %v1365_v44, %v1690_v12  ;;  %v684_v31 = vadd.f32 %v1142_v3, %v555_v29  ;;  %v1366_v13 = vpop.f32.mrb[14].mxu0  ;;  %v1390_v54 = vpop.f32.mrb[14].mxu1 }
 0x110   :  { %v558_v41 = vadd.f32 %v1713_v24, %v508_v30  ;;  %v556_v34 = vadd.f32 %v1713_v24, %v506_v0  ;;  %v485_v52 = vmul.f32 %v1690_v12, %v340_v46  ;;  %v704_v55 = vmax.f32 %v661_v2, 0.0  ;;  %v343_v35 = vpop.f32.mrb[15].mxu0  ;;  %v439_v53 = vpop.f32.mrb[15].mxu1 }
 0x111   :  { %v1188_v19 = vpack.c.bf16 %v706_v49, %v705_v43  ;;  %v537_v45 = vadd.f32 %v1713_v24, %v487_v32  ;;  %v488_v1 = vmul.f32 %v1366_v13, %v1690_v12  ;;  %v727_v33 = vmax.f32 %v684_v31, 0.0 }
 0x112   :  { %v687_v3 = vadd.f32 %v1147_v6, %v558_v41  ;;  %v685_v27 = vadd.f32 %v1966_v48, %v556_v34  ;;  %v535_v14 = vadd.f32 %v1713_v24, %v485_v52  ;;  %v1183_v26 = vpack.c.bf16 %v704_v55, %v703_v61 }
 0x113   :  { %1289 = vst [vmem:[%s1965_s5 + $0x28] sm:$0xff] %v1188_v19   ;;  %v1967_v15 = vunpack.c.l.bf16 %v1638_v56  ;;  %v538_v42 = vadd.f32 %v1713_v24, %v488_v1  ;;  %v486_v16 = vmul.f32 %v1690_v12, %v343_v35  ;;  %v1968_v6 = vunpack.c.l.bf16 %v1643_v57 }
 0x114   :  { %v730_v25 = vmax.f32 %v687_v3, 0.0  ;;  %v728_v50 = vmax.f32 %v685_v27, 0.0  ;;  %v511_v38 = vmul.f32 %v1389_v40, %v1690_v12  ;;  %1288 = vst [vmem:[%s1965_s5 + $0x20] sm:$0xff] %v1183_v26   ;;  %v1969_v39 = vunpack.c.h.bf16 %v1638_v56 }
 0x115   :  { %v666_v36 = vadd.f32 %v1967_v15, %v537_v45  ;;  %v664_v51 = vadd.f32 %v1968_v6, %v535_v14  ;;  %v536_v9 = vadd.f32 %v1713_v24, %v486_v16  ;;  %v509_v7 = vmul.f32 %v1690_v12, %v436_v21  ;;  %v1369_v43 = vpop.f32.mrb[16].mxu0  ;;  %v1393_v59 = vpop.f32.mrb[16].mxu1 }
 0x116   :  { %v667_v60 = vadd.f32 %v1969_v39, %v538_v42  ;;  %v1248_v37 = vpack.c.bf16 %v730_v25, %v729_v18  ;;  %v1243_v23 = vpack.c.bf16 %v728_v50, %v727_v33  ;;  %v561_v47 = vadd.f32 %v1713_v24, %v511_v38  ;;  %v356_v30 = vpop.f32.mrb[17].mxu0  ;;  %v452_v44 = vpop.f32.mrb[17].mxu1 }
 0x117   :  { %v709_v58 = vmax.f32 %v666_v36, 0.0  ;;  %v707_v8 = vmax.f32 %v664_v51, 0.0  ;;  %v1970_v28 = vunpack.c.h.bf16 %v1643_v57  ;;  %v559_v29 = vadd.f32 %v1713_v24, %v509_v7  ;;  %v1370_v18 = vpop.f32.mrb[18].mxu0  ;;  %v1394_v32 = vpop.f32.mrb[18].mxu1 }
 0x118   :  { %v710_v20 = vmax.f32 %v667_v60, 0.0  ;;  %v512_v56 = vmul.f32 %v1390_v54, %v1690_v12  ;;  %1301 = vst [vmem:[%s1965_s5 + $0x88] sm:$0xff] %v1248_v37   ;;  %1300 = vst [vmem:[%s1965_s5 + $0x80] sm:$0xff] %v1243_v23   ;;  %v1971_v0 = vunpack.c.l.bf16 %v1652_v62  ;;  %v491_v57 = vmul.f32 %v1369_v43, %v1690_v12  ;;  %v359_v52 = vpop.f32.mrb[19].mxu0  ;;  %v455_v13 = vpop.f32.mrb[19].mxu1 }
 0x119   :  { %v665_v61 = vadd.f32 %v1970_v28, %v536_v9  ;;  %v510_v49 = vmul.f32 %v1690_v12, %v439_v53  ;;  %v489_v2 = vmul.f32 %v1690_v12, %v356_v30  ;;  %v1972_v31 = vunpack.c.l.bf16 %v1657_v63 }
 0x11a   :  { %v690_v40 = vadd.f32 %v1971_v0, %v561_v47  ;;  %v1198_v46 = vpack.c.bf16 %v710_v20, %v709_v58  ;;  %v562_v34 = vadd.f32 %v1713_v24, %v512_v56  ;;  %v541_v19 = vadd.f32 %v1713_v24, %v491_v57 }
 0x11b   :  { %v708_v21 = vmax.f32 %v665_v61, 0.0  ;;  %v688_v41 = vadd.f32 %v1972_v31, %v559_v29  ;;  %v560_v55 = vadd.f32 %v1713_v24, %v510_v49  ;;  %v539_v45 = vadd.f32 %v1713_v24, %v489_v2 }
 0x11c   :  { %v733_v54 = vmax.f32 %v690_v40, 0.0  ;;  %1291 = vst [vmem:[%s1965_s5 + $0x38] sm:$0xff] %v1198_v46   ;;  %v1973_v53 = vunpack.c.h.bf16 %v1652_v62  ;;  %v492_v3 = vmul.f32 %v1370_v18, %v1690_v12  ;;  %v1974_v48 = vunpack.c.l.bf16 %v1666_v4 }
 0x11d   :  { %v1193_v1 = vpack.c.bf16 %v708_v21, %v707_v8  ;;  %v731_v35 = vmax.f32 %v688_v41, 0.0  ;;  %v1975_v14 = vunpack.c.h.bf16 %v1657_v63  ;;  %v1976_v15 = vunpack.c.l.bf16 %v1671_v5  ;;  %v1373_v58 = vpop.f32.mrb[20].mxu0 }
 0x11e   :  { %v691_v33 = vadd.f32 %v1973_v53, %v562_v34  ;;  %v670_v27 = vadd.f32 %v1974_v48, %v541_v19  ;;  %v490_v42 = vmul.f32 %v1690_v12, %v359_v52  ;;  %v542_v62 = vadd.f32 %v1713_v24, %v492_v3  ;;  %v372_v23 = vpop.f32.mrb[21].mxu0 }
 0x11f   :  { %v689_v26 = vadd.f32 %v1975_v14, %v560_v55  ;;  %v668_v36 = vadd.f32 %v1976_v15, %v539_v45  ;;  %1290 = vst [vmem:[%s1965_s5 + $0x30] sm:$0xff] %v1193_v1   ;;  %v515_v25 = vmul.f32 %v1393_v59, %v1690_v12  ;;  %v513_v50 = vmul.f32 %v1690_v12, %v452_v44  ;;  %v1374_v28 = vpop.f32.mrb[22].mxu0 }
 0x120   :  { %v734_v16 = vmax.f32 %v691_v33, 0.0  ;;  %v713_v6 = vmax.f32 %v670_v27, 0.0  ;;  %v540_v38 = vadd.f32 %v1713_v24, %v490_v42  ;;  %v1977_v60 = vunpack.c.h.bf16 %v1666_v4 }
 0x121   :  { %v732_v51 = vmax.f32 %v689_v26, 0.0  ;;  %v711_v63 = vmax.f32 %v668_v36, 0.0  ;;  %v565_v7 = vadd.f32 %v1713_v24, %v515_v25  ;;  %v563_v37 = vadd.f32 %v1713_v24, %v513_v50 }
 0x122   :  { %v1258_v39 = vpack.c.bf16 %v734_v16, %v733_v54  ;;  %v671_v9 = vadd.f32 %v1977_v60, %v542_v62  ;;  %v1978_v47 = vunpack.c.h.bf16 %v1671_v5  ;;  %v495_v59 = vmul.f32 %v1373_v58, %v1690_v12  ;;  %v375_v5 = vpop.f32.mrb[23].mxu0 }
 0x123   :  { %v1253_v8 = vpack.c.bf16 %v732_v51, %v731_v35  ;;  %v514_v20 = vmul.f32 %v1690_v12, %v455_v13  ;;  %v1979_v61 = vunpack.c.l.bf16 %v1680_v10  ;;  %v1980_v56 = vunpack.c.l.bf16 %v1685_v11 }
 0x124   :  { %v669_v43 = vadd.f32 %v1978_v47, %v540_v38  ;;  %1303 = vst [vmem:[%s1965_s5 + $0x98] sm:$0xff] %v1258_v39   ;;  %v714_v4 = vmax.f32 %v671_v9, 0.0  ;;  %v493_v44 = vmul.f32 %v1690_v12, %v372_v23  ;;  %v545_v40 = vadd.f32 %v1713_v24, %v495_v59 }
 0x125   :  { %v694_v29 = vadd.f32 %v1979_v61, %v565_v7  ;;  %v692_v30 = vadd.f32 %v1980_v56, %v563_v37  ;;  %1302 = vst [vmem:[%s1965_s5 + $0x90] sm:$0xff] %v1253_v8   ;;  %v564_v57 = vadd.f32 %v1713_v24, %v514_v20  ;;  %v496_v49 = vmul.f32 %v1374_v28, %v1690_v12 }
 0x126   :  { %v712_v0 = vmax.f32 %v669_v43, 0.0  ;;  %v1208_v2 = vpack.c.bf16 %v714_v4, %v713_v6  ;;  %v543_v32 = vadd.f32 %v1713_v24, %v493_v44  ;;  %v1981_v21 = vunpack.c.l.bf16 %v1699_v17 }
 0x127   :  { %v737_v10 = vmax.f32 %v694_v29, 0.0  ;;  %v735_v18 = vmax.f32 %v692_v30, 0.0  ;;  %v1982_v41 = vunpack.c.h.bf16 %v1685_v11  ;;  %v546_v52 = vadd.f32 %v1713_v24, %v496_v49 }
 0x128   :  { %v1203_v46 = vpack.c.bf16 %v712_v0, %v711_v63  ;;  %v674_v31 = vadd.f32 %v1981_v21, %v545_v40  ;;  %1293 = vst [vmem:[%s1965_s5 + $0x48] sm:$0xff] %v1208_v2   ;;  %v494_v54 = vmul.f32 %v1690_v12, %v375_v5  ;;  %v1119_v19 = vunpack.c.h.bf16 %v1708_v22 }
 0x129   :  { %v693_v34 = vadd.f32 %v1982_v41, %v564_v57  ;;  %v1075_v13 = vpack.c.bf16 %v737_v10, %v737_v10  ;;  %v1983_v45 = vunpack.c.h.bf16 %v1699_v17  ;;  %v1984_v1 = vunpack.c.l.bf16 %v1708_v22 }
 0x12a   :  { %1292 = vst [vmem:[%s1965_s5 + $0x40] sm:$0xff] %v1203_v46   ;;  %v544_v53 = vadd.f32 %v1713_v24, %v494_v54  ;;  %v717_v12 = vmax.f32 %v674_v31, 0.0 }
 0x12b   :  { %v736_v55 = vmax.f32 %v693_v34, 0.0  ;;  %v675_v11 = vadd.f32 %v1983_v45, %v546_v52  ;;  %953 = vst [vmem:[%s1965_s5 + $0xa8] sm:$0xf] %v1075_v13  ;;  %v672_v35 = vadd.f32 %v1984_v1, %v543_v32 }
 0x12c   :  { %v673_v48 = vadd.f32 %v1119_v19, %v544_v53 }
 0x12d   :  { %v1263_v33 = vpack.c.bf16 %v736_v55, %v735_v18  ;;  %v718_v3 = vmax.f32 %v675_v11, 0.0  ;;  %v715_v17 = vmax.f32 %v672_v35, 0.0 }
 0x12e   :  { %v716_v14 = vmax.f32 %v673_v48, 0.0 }
 0x12f   :  { %1304 = vst [vmem:[%s1965_s5 + $0xa0] sm:$0xff] %v1263_v33   ;;  %v1218_v27 = vpack.c.bf16 %v718_v3, %v717_v12 }
 0x130   :  { %v1213_v26 = vpack.c.bf16 %v716_v14, %v715_v17 }
 0x131   :  { %1295 = vst [vmem:[%s1965_s5 + $0x58] sm:$0xff] %v1218_v27  }
 0x132   :  { %1294 = vst [vmem:[%s1965_s5 + $0x50] sm:$0xff] %v1213_v26  }

// kernel: _lambda_.74
= control target key start
LH: loop header
LB: loop body
LE: loop exit
PB: predicated region body
PF: predicated region fallthrough
CT: control target
= control target key end

     0   :  { %s809_s1 = inlined_call_operand.vmem [shape: bf16[256,128], index: 1, kind: input, shape index: {}]   ;;  %s810_s0 = inlined_call_operand.vmem [shape: bf16[104,256], index: 0, kind: input, shape index: {}]   ;;  %s811_s2 = inlined_call_operand.vmem [shape: f32[1,128], index: 2, kind: input, shape index: {}]   ;;  %s812_s3 = inlined_call_operand.vmem [shape: f32[1,128], index: 3, kind: input, shape index: {}]   ;;  %s813_s4 = inlined_call_operand.vmem [shape: bf16[104,128], index: 4, kind: output, shape index: {}]  }
   0x1   :  { %v604_v0 = vld [vmem:[%s809_s1 + $0x40] sm:$0xff]   ;;  %v606_v2 = vld [vmem:[%s809_s1 + $0x48] sm:$0xff]   ;;  %v608_v4 = vld [vmem:[%s809_s1 + $0x50] sm:$0xff]  }
   0x2   :  { %v605_v1 = vld [vmem:[%s809_s1] sm:$0xff]   ;;  %530 = vmatprep.subr.bf16.mxu0 %v604_v0  ;;  %588 = vmatprep.subr.bf16.mxu1 %v604_v0  ;;  %v607_v3 = vld [vmem:[%s809_s1 + $0x8] sm:$0xff]   ;;  %v609_v5 = vld [vmem:[%s809_s1 + $0x10] sm:$0xff]  }
   0x3   :  { %531 = vmatpush3.bf16.msra.mxu0 %v605_v1  ;;  %596 = vmatpush3.bf16.msra.mxu1 %v605_v1  ;;  %v610_v6 = vld [vmem:[%s809_s1 + $0x58] sm:$0xff]   ;;  %v612_v8 = vld [vmem:[%s809_s1 + $0x60] sm:$0xff]   ;;  %v614_v10 = vld [vmem:[%s809_s1 + $0x68] sm:$0xff]  }
   0x4   :  { %532 = vmatprep.subr.bf16.mxu0 %v606_v2  ;;  %589 = vmatprep.subr.bf16.mxu1 %v606_v2  ;;  %v611_v7 = vld [vmem:[%s809_s1 + $0x18] sm:$0xff]   ;;  %v613_v9 = vld [vmem:[%s809_s1 + $0x20] sm:$0xff]   ;;  %v615_v13 = vld [vmem:[%s809_s1 + $0x28] sm:$0xff]  }
   0x5   :  { %v622_v11 = vld [vmem:[%s810_s0 + $0x4] ss:$8 sps:$4 sm:$0xff]   ;;  %v616_v14 = vld [vmem:[%s809_s1 + $0x70] sm:$0xff]   ;;  %v618_v16 = vld [vmem:[%s809_s1 + $0x78] sm:$0xff]  }
   0x6   :  { %v625_v12 = vld [vmem:[%s810_s0 + $0x44] ss:$8 sps:$4 sm:$0xff]   ;;  %258 = vmatprep.mubr.bf16.mxu0 %v622_v11  ;;  %v617_v15 = vld [vmem:[%s809_s1 + $0x30] sm:$0xff]   ;;  %v619_v17 = vld [vmem:[%s809_s1 + $0x38] sm:$0xff]  }
   0x7   :  { %533 = vmatpush3.bf16.msra.mxu0 %v607_v3  ;;  %597 = vmatpush3.bf16.msra.mxu1 %v607_v3  ;;  %v620_v18 = vld [vmem:[%s810_s0] ss:$8 sps:$4 sm:$0xff]   ;;  %v626_v20 = vld [vmem:[%s810_s0 + $0x14] ss:$8 sps:$4 sm:$0xff]   ;;  %v628_v23 = vld [vmem:[%s810_s0 + $0x10] ss:$8 sps:$4 sm:$0xff]  }
   0x8   :  { %534 = vmatprep.subr.bf16.mxu0 %v608_v4  ;;  %590 = vmatprep.subr.bf16.mxu1 %v608_v4  ;;  %v623_v19 = vld [vmem:[%s810_s0 + $0x40] ss:$8 sps:$4 sm:$0xff]   ;;  %v629_v21 = vld [vmem:[%s810_s0 + $0x54] ss:$8 sps:$4 sm:$0xff]   ;;  %v633_v24 = vld [vmem:[%s810_s0 + $0x50] ss:$8 sps:$4 sm:$0xff]  }
   0x9   :  { %290 = vmatprep.mubr.bf16.mxu1 %v625_v12  ;;  %v30_v22 = vld [vmem:[%s810_s0 + $0x60] sm:$0xff]  ;;  %v636_v29 = vld [vmem:[%s810_s0 + $0x34] ss:$8 sps:$4 sm:$0xff]   ;;  %v639_v30 = vld [vmem:[%s810_s0 + $0x30] ss:$8 sps:$4 sm:$0xff]  }
   0xa   :  { %v631_v25 = vld [vmem:[%s810_s0 + $0x24] ss:$8 sps:$4 sm:$0xff]   ;;  %v450_v26 = vcombine.high %v30_v22, %v30_v22  ;;  %v634_v27 = vld [vmem:[%s810_s0 + $0x20] ss:$8 sps:$4 sm:$0xff]   ;;  %v449_v28 = vcombine.low %v30_v22, %v30_v22 }
   0xb   :  { %535 = vmatpush3.bf16.msra.mxu0 %v609_v5  ;;  %598 = vmatpush3.bf16.msra.mxu1 %v609_v5  ;;  %v755_v34 = vld [vmem:[%s811_s2] ss:$0 sm:$0xff] }
   0xc   :  { %536 = vmatprep.subr.bf16.mxu0 %v610_v6  ;;  %591 = vmatprep.subr.bf16.mxu1 %v610_v6  ;;  %v760_v40 = vld [vmem:[%s812_s3] ss:$0 sm:$0xff] }
   0xf   :  { %537 = vmatpush3.bf16.msra.mxu0 %v611_v7  ;;  %599 = vmatpush3.bf16.msra.mxu1 %v611_v7 }
  0x10   :  { %538 = vmatprep.subr.bf16.mxu0 %v612_v8  ;;  %592 = vmatprep.subr.bf16.mxu1 %v612_v8 }
  0x13   :  { %539 = vmatpush3.bf16.msra.mxu0 %v613_v9  ;;  %600 = vmatpush3.bf16.msra.mxu1 %v613_v9 }
  0x14   :  { %540 = vmatprep.subr.bf16.mxu0 %v614_v10  ;;  %593 = vmatprep.subr.bf16.mxu1 %v614_v10 }
  0x17   :  { %541 = vmatpush3.bf16.msra.mxu0 %v615_v13  ;;  %601 = vmatpush3.bf16.msra.mxu1 %v615_v13 }
  0x18   :  { %542 = vmatprep.subr.bf16.mxu0 %v616_v14  ;;  %594 = vmatprep.subr.bf16.mxu1 %v616_v14 }
  0x1b   :  { %543 = vmatpush3.bf16.msra.mxu0 %v617_v15  ;;  %602 = vmatpush3.bf16.msra.mxu1 %v617_v15 }
  0x1c   :  { %544 = vmatprep.subr.bf16.mxu0 %v618_v16  ;;  %595 = vmatprep.subr.bf16.mxu1 %v618_v16 }
  0x1f   :  { %545 = vmatpush3.bf16.msra.mxu0 %v619_v17  ;;  %603 = vmatpush3.bf16.msra.mxu1 %v619_v17 }
  0x22   :  { %259 = vmatmul.mubr.bf16.vlgmr.msra.gmra.mrb[0].mxu0 %v620_v18  ;;  %291 = vmatmul.mubr.bf16.vlgmr.msra.gmra.mrb[0].mxu1 %v623_v19 }
  0x23   :  { %266 = vmatprep.mubr.bf16.mxu0 %v626_v20  ;;  %298 = vmatprep.mubr.bf16.mxu1 %v629_v21 }
  0x2a   :  { %267 = vmatmul.mubr.bf16.gmra.mrb[4].mxu0 %v628_v23  ;;  %299 = vmatmul.mubr.bf16.gmra.mrb[4].mxu1 %v633_v24 }
  0x2b   :  { %274 = vmatprep.mubr.bf16.mxu0 %v631_v25  ;;  %306 = vmatprep.mubr.bf16.mxu1 %v450_v26 }
  0x32   :  { %275 = vmatmul.mubr.bf16.gmra.mrb[8].mxu0 %v634_v27  ;;  %307 = vmatmul.mubr.bf16.gmra.mrb[8].mxu1 %v449_v28 }
  0x33   :  { %282 = vmatprep.mubr.bf16.mxu0 %v636_v29 }
  0x3a   :  { %283 = vmatmul.mubr.bf16.gmra.mrb[12].mxu0 %v639_v30 }
  0xf5   :  { %v546_v31 = vpop.f32.mrb[0].mxu0  ;;  %v570_v32 = vpop.f32.mrb[0].mxu1 }
  0xf6   :  { %v547_v33 = vpop.f32.mrb[1].mxu0  ;;  %v571_v35 = vpop.f32.mrb[1].mxu1 }
  0xf7   :  { %v548_v36 = vadd.f32 %v547_v33, %v546_v31  ;;  %v549_v37 = vpop.f32.mrb[2].mxu0  ;;  %v572_v38 = vadd.f32 %v571_v35, %v570_v32  ;;  %v573_v39 = vpop.f32.mrb[2].mxu1 }
  0xf8   :  { %v550_v41 = vpop.f32.mrb[3].mxu0  ;;  %v574_v42 = vpop.f32.mrb[3].mxu1 }
  0xf9   :  { %v321_v43 = vmul.f32 %v548_v36, %v755_v34  ;;  %v551_v44 = vadd.f32 %v550_v41, %v549_v37  ;;  %v329_v45 = vmul.f32 %v572_v38, %v755_v34  ;;  %v575_v46 = vadd.f32 %v574_v42, %v573_v39 }
  0xfb   :  { %v341_v47 = vadd.f32 %v760_v40, %v321_v43  ;;  %v322_v48 = vmul.f32 %v551_v44, %v755_v34  ;;  %v349_v49 = vadd.f32 %v760_v40, %v329_v45  ;;  %v330_v50 = vmul.f32 %v575_v46, %v755_v34 }
  0xfd   :  { %v342_v51 = vadd.f32 %v760_v40, %v322_v48  ;;  %v552_v52 = vpop.f32.mrb[4].mxu0  ;;  %v362_v53 = vmax.f32 %v349_v49, 0.0  ;;  %v350_v54 = vadd.f32 %v760_v40, %v330_v50  ;;  %v576_v55 = vpop.f32.mrb[4].mxu1  ;;  %v354_v56 = vmax.f32 %v341_v47, 0.0 }
  0xfe   :  { %v553_v57 = vpop.f32.mrb[5].mxu0  ;;  %v577_v58 = vpop.f32.mrb[5].mxu1 }
  0xff   :  { %v355_v59 = vmax.f32 %v342_v51, 0.0  ;;  %v554_v60 = vadd.f32 %v553_v57, %v552_v52  ;;  %v555_v61 = vpop.f32.mrb[6].mxu0  ;;  %v363_v62 = vmax.f32 %v350_v54, 0.0  ;;  %v578_v63 = vadd.f32 %v577_v58, %v576_v55  ;;  %v579_v0 = vpop.f32.mrb[6].mxu1 }
 0x100   :  { %v556_v1 = vpop.f32.mrb[7].mxu0  ;;  %v580_v2 = vpop.f32.mrb[7].mxu1 }
 0x101   :  { %v498_v3 = vpack.c.bf16 %v355_v59, %v354_v56  ;;  %v323_v4 = vmul.f32 %v554_v60, %v755_v34  ;;  %v518_v5 = vpack.c.bf16 %v363_v62, %v362_v53  ;;  %v557_v6 = vadd.f32 %v556_v1, %v555_v61 }
 0x102   :  { %v331_v7 = vmul.f32 %v578_v63, %v755_v34  ;;  %v581_v8 = vadd.f32 %v580_v2, %v579_v0 }
 0x103   :  { %499 = vst [vmem:[%s813_s4] sm:$0xff] %v498_v3   ;;  %v343_v9 = vadd.f32 %v760_v40, %v323_v4  ;;  %528 = vst [vmem:[%s813_s4 + $0x20] sm:$0xff] %v518_v5   ;;  %v324_v10 = vmul.f32 %v557_v6, %v755_v34 }
 0x104   :  { %v351_v11 = vadd.f32 %v760_v40, %v331_v7  ;;  %v332_v12 = vmul.f32 %v581_v8, %v755_v34 }
 0x105   :  { %v344_v13 = vadd.f32 %v760_v40, %v324_v10  ;;  %v558_v14 = vpop.f32.mrb[8].mxu0  ;;  %v582_v15 = vpop.f32.mrb[8].mxu1  ;;  %v356_v20 = vmax.f32 %v343_v9, 0.0 }
 0x106   :  { %v364_v16 = vmax.f32 %v351_v11, 0.0  ;;  %v559_v17 = vpop.f32.mrb[9].mxu0  ;;  %v352_v18 = vadd.f32 %v760_v40, %v332_v12  ;;  %v583_v19 = vpop.f32.mrb[9].mxu1 }
 0x107   :  { %v357_v21 = vmax.f32 %v344_v13, 0.0  ;;  %v560_v22 = vadd.f32 %v559_v17, %v558_v14  ;;  %v561_v23 = vpop.f32.mrb[10].mxu0  ;;  %v584_v24 = vadd.f32 %v583_v19, %v582_v15  ;;  %v585_v25 = vpop.f32.mrb[10].mxu1 }
 0x108   :  { %v365_v26 = vmax.f32 %v352_v18, 0.0  ;;  %v562_v27 = vpop.f32.mrb[11].mxu0  ;;  %v586_v28 = vpop.f32.mrb[11].mxu1 }
 0x109   :  { %v503_v29 = vpack.c.bf16 %v357_v21, %v356_v20  ;;  %v325_v30 = vmul.f32 %v560_v22, %v755_v34  ;;  %v563_v31 = vadd.f32 %v562_v27, %v561_v23  ;;  %v333_v32 = vmul.f32 %v584_v24, %v755_v34 }
 0x10a   :  { %v523_v33 = vpack.c.bf16 %v365_v26, %v364_v16 }
 0x10b   :  { %525 = vst [vmem:[%s813_s4 + $0x8] sm:$0xff] %v503_v29   ;;  %v345_v35 = vadd.f32 %v760_v40, %v325_v30  ;;  %v326_v36 = vmul.f32 %v563_v31, %v755_v34  ;;  %v353_v37 = vadd.f32 %v760_v40, %v333_v32 }
 0x10c   :  { %529 = vst [vmem:[%s813_s4 + $0x28] sm:$0xff] %v523_v33  }
 0x10d   :  { %v346_v38 = vadd.f32 %v760_v40, %v326_v36  ;;  %v564_v39 = vpop.f32.mrb[12].mxu0  ;;  %v366_v41 = vmax.f32 %v353_v37, 0.0  ;;  %v358_v43 = vmax.f32 %v345_v35, 0.0 }
 0x10e   :  { %v565_v42 = vpop.f32.mrb[13].mxu0 }
 0x10f   :  { %v359_v44 = vmax.f32 %v346_v38, 0.0  ;;  %v494_v45 = vpack.c.bf16 %v366_v41, %v366_v41  ;;  %v566_v46 = vadd.f32 %v565_v42, %v564_v39  ;;  %v567_v47 = vpop.f32.mrb[14].mxu0 }
 0x110   :  { %v568_v48 = vpop.f32.mrb[15].mxu0 }
 0x111   :  { %v508_v49 = vpack.c.bf16 %v359_v44, %v358_v43  ;;  %432 = vst [vmem:[%s813_s4 + $0x30] sm:$0xf] %v494_v45  ;;  %v327_v50 = vmul.f32 %v566_v46, %v755_v34  ;;  %v569_v51 = vadd.f32 %v568_v48, %v567_v47 }
 0x113   :  { %526 = vst [vmem:[%s813_s4 + $0x10] sm:$0xff] %v508_v49   ;;  %v347_v52 = vadd.f32 %v760_v40, %v327_v50  ;;  %v328_v53 = vmul.f32 %v569_v51, %v755_v34 }
 0x115   :  { %v348_v54 = vadd.f32 %v760_v40, %v328_v53  ;;  %v360_v55 = vmax.f32 %v347_v52, 0.0 }
 0x117   :  { %v361_v56 = vmax.f32 %v348_v54, 0.0 }
 0x119   :  { %v513_v57 = vpack.c.bf16 %v361_v56, %v360_v55 }
 0x11b   :  { %527 = vst [vmem:[%s813_s4 + $0x18] sm:$0xff] %v513_v57  }

// kernel: _lambda_.75
= control target key start
LH: loop header
LB: loop body
LE: loop exit
PB: predicated region body
PF: predicated region fallthrough
CT: control target
= control target key end

     0   :  { %v503_v0 = vmov 0.0   ;;  %vm504_vm0 = vmmov 0   ;;  %s624_s1 = inlined_call_operand.vmem [shape: bf16[128,128], index: 1, kind: input, shape index: {}]   ;;  %s625_s0 = inlined_call_operand.vmem [shape: bf16[104,128], index: 0, kind: input, shape index: {}]   ;;  %s626_s2 = inlined_call_operand.vmem [shape: f32[1,128], index: 2, kind: input, shape index: {}]   ;;  %s627_s3 = inlined_call_operand.vmem [shape: f32[1,128], index: 3, kind: input, shape index: {}]   ;;  %s628_s4 = inlined_call_operand.vmem [shape: bf16[104,128], index: 4, kind: output, shape index: {}]  }
   0x1   :  { %426 = vmatprep.subr.bf16.mxu0 %v503_v0  ;;  %v488_v1 = vld [vmem:[%s624_s1] sm:$0xff]   ;;  %470 = vmatprep.subr.bf16.mxu1 %v503_v0  ;;  %v489_v2 = vld [vmem:[%s624_s1 + $0x8] sm:$0xff]   ;;  %v490_v3 = vld [vmem:[%s624_s1 + $0x10] sm:$0xff]  }
   0x2   :  { %442 = vmatprep.mubr.msk.bf16.mxu0 %vm504_vm0, %v503_v0  ;;  %458 = vmatprep.mubr.msk.bf16.mxu1 %vm504_vm0, %v503_v0  ;;  %v491_v4 = vld [vmem:[%s624_s1 + $0x18] sm:$0xff]   ;;  %v492_v5 = vld [vmem:[%s624_s1 + $0x20] sm:$0xff]   ;;  %v493_v6 = vld [vmem:[%s624_s1 + $0x28] sm:$0xff]  }
   0x3   :  { %427 = vmatpush3.bf16.msra.mxu0 %v488_v1  ;;  %478 = vmatpush3.bf16.msra.mxu1 %v488_v1  ;;  %v494_v7 = vld [vmem:[%s624_s1 + $0x30] sm:$0xff]   ;;  %v495_v8 = vld [vmem:[%s624_s1 + $0x38] sm:$0xff]   ;;  %v496_v9 = vld [vmem:[%s625_s0] sm:$0xff]  }
   0x4   :  { %428 = vmatprep.subr.bf16.mxu0 %v503_v0  ;;  %471 = vmatprep.subr.bf16.mxu1 %v503_v0  ;;  %v497_v10 = vld [vmem:[%s625_s0 + $0x20] sm:$0xff]   ;;  %v498_v11 = vld [vmem:[%s625_s0 + $0x8] sm:$0xff]   ;;  %v500_v13 = vld [vmem:[%s625_s0 + $0x10] sm:$0xff]  }
   0x5   :  { %v499_v12 = vld [vmem:[%s625_s0 + $0x28] sm:$0xff]   ;;  %v501_v14 = vld [vmem:[%s625_s0 + $0x30] ss:$0 sps:$4 sm:$0xff]   ;;  %v502_v15 = vld [vmem:[%s625_s0 + $0x18] sm:$0xff]  }
   0x6   :  { %v585_v16 = vld [vmem:[%s626_s2] ss:$0 sm:$0xff] }
   0x7   :  { %429 = vmatpush3.bf16.msra.mxu0 %v489_v2  ;;  %479 = vmatpush3.bf16.msra.mxu1 %v489_v2  ;;  %v349_v23 = vld [vmem:[%s627_s3] ss:$0 sm:$0xff] }
   0x8   :  { %430 = vmatprep.subr.bf16.mxu0 %v503_v0  ;;  %472 = vmatprep.subr.bf16.mxu1 %v503_v0 }
   0xb   :  { %431 = vmatpush3.bf16.msra.mxu0 %v490_v3  ;;  %480 = vmatpush3.bf16.msra.mxu1 %v490_v3 }
   0xc   :  { %432 = vmatprep.subr.bf16.mxu0 %v503_v0  ;;  %473 = vmatprep.subr.bf16.mxu1 %v503_v0 }
   0xf   :  { %433 = vmatpush3.bf16.msra.mxu0 %v491_v4  ;;  %481 = vmatpush3.bf16.msra.mxu1 %v491_v4 }
  0x10   :  { %434 = vmatprep.subr.bf16.mxu0 %v503_v0  ;;  %474 = vmatprep.subr.bf16.mxu1 %v503_v0 }
  0x13   :  { %435 = vmatpush3.bf16.msra.mxu0 %v492_v5  ;;  %482 = vmatpush3.bf16.msra.mxu1 %v492_v5 }
  0x14   :  { %436 = vmatprep.subr.bf16.mxu0 %v503_v0  ;;  %475 = vmatprep.subr.bf16.mxu1 %v503_v0 }
  0x17   :  { %437 = vmatpush3.bf16.msra.mxu0 %v493_v6  ;;  %483 = vmatpush3.bf16.msra.mxu1 %v493_v6 }
  0x18   :  { %438 = vmatprep.subr.bf16.mxu0 %v503_v0  ;;  %476 = vmatprep.subr.bf16.mxu1 %v503_v0 }
  0x1b   :  { %439 = vmatpush3.bf16.msra.mxu0 %v494_v7  ;;  %484 = vmatpush3.bf16.msra.mxu1 %v494_v7 }
  0x1c   :  { %440 = vmatprep.subr.bf16.mxu0 %v503_v0  ;;  %477 = vmatprep.subr.bf16.mxu1 %v503_v0 }
  0x1f   :  { %441 = vmatpush3.bf16.msra.mxu0 %v495_v8  ;;  %485 = vmatpush3.bf16.msra.mxu1 %v495_v8 }
  0x22   :  { %443 = vmatmul.mubr.bf16.vlgmr.msra.gmra.mrb[0].mxu0 %v496_v9  ;;  %459 = vmatmul.mubr.bf16.vlgmr.msra.gmra.mrb[0].mxu1 %v497_v10 }
  0x23   :  { %446 = vmatprep.mubr.msk.bf16.mxu0 %vm504_vm0, %v503_v0  ;;  %462 = vmatprep.mubr.msk.bf16.mxu1 %vm504_vm0, %v503_v0 }
  0x2a   :  { %447 = vmatmul.mubr.bf16.gmra.mrb[4].mxu0 %v498_v11  ;;  %463 = vmatmul.mubr.bf16.gmra.mrb[4].mxu1 %v499_v12 }
  0x2b   :  { %450 = vmatprep.mubr.msk.bf16.mxu0 %vm504_vm0, %v503_v0  ;;  %466 = vmatprep.mubr.msk.bf16.mxu1 %vm504_vm0, %v503_v0 }
  0x32   :  { %451 = vmatmul.mubr.bf16.gmra.mrb[8].mxu0 %v500_v13  ;;  %467 = vmatmul.mubr.bf16.gmra.mrb[8].mxu1 %v501_v14 }
  0x33   :  { %454 = vmatprep.mubr.msk.bf16.mxu0 %vm504_vm0, %v503_v0 }
  0x3a   :  { %455 = vmatmul.mubr.bf16.gmra.mrb[12].mxu0 %v502_v15 }
  0xf5   :  { %v169_v17 = vpop.f32.mrb[0].mxu0  ;;  %v201_v18 = vpop.f32.mrb[0].mxu1 }
  0xf6   :  { %v230_v19 = vmul.f32 %v585_v16, %v169_v17  ;;  %v444_v20 = vpop.f32.mrb[1].mxu0  ;;  %v238_v21 = vmul.f32 %v585_v16, %v201_v18  ;;  %v460_v22 = vpop.f32.mrb[1].mxu1 }
  0xf7   :  { %v172_v24 = vpop.f32.mrb[2].mxu0  ;;  %v204_v25 = vpop.f32.mrb[2].mxu1 }
  0xf8   :  { %v231_v26 = vmul.f32 %v585_v16, %v172_v24  ;;  %v445_v27 = vpop.f32.mrb[3].mxu0  ;;  %v258_v28 = vadd.f32 %v349_v23, %v238_v21  ;;  %v239_v29 = vmul.f32 %v585_v16, %v204_v25  ;;  %v461_v30 = vpop.f32.mrb[3].mxu1  ;;  %v250_v31 = vadd.f32 %v349_v23, %v230_v19 }
  0xfa   :  { %v251_v32 = vadd.f32 %v349_v23, %v231_v26  ;;  %v259_v33 = vadd.f32 %v349_v23, %v239_v29 }
  0xfc   :  { %v379_v34 = vpack.c.bf16 %v251_v32, %v250_v31  ;;  %v399_v35 = vpack.c.bf16 %v259_v33, %v258_v28 }
  0xfd   :  { %v177_v36 = vpop.f32.mrb[4].mxu0  ;;  %v209_v37 = vpop.f32.mrb[4].mxu1 }
  0xfe   :  { %380 = vst [vmem:[%s628_s4] sm:$0xff] %v379_v34   ;;  %v232_v38 = vmul.f32 %v585_v16, %v177_v36  ;;  %v448_v39 = vpop.f32.mrb[5].mxu0  ;;  %409 = vst [vmem:[%s628_s4 + $0x20] sm:$0xff] %v399_v35   ;;  %v240_v40 = vmul.f32 %v585_v16, %v209_v37  ;;  %v464_v41 = vpop.f32.mrb[5].mxu1 }
  0xff   :  { %v180_v42 = vpop.f32.mrb[6].mxu0  ;;  %v212_v43 = vpop.f32.mrb[6].mxu1 }
 0x100   :  { %v233_v44 = vmul.f32 %v585_v16, %v180_v42  ;;  %v449_v45 = vpop.f32.mrb[7].mxu0  ;;  %v260_v46 = vadd.f32 %v349_v23, %v240_v40  ;;  %v241_v47 = vmul.f32 %v585_v16, %v212_v43  ;;  %v465_v48 = vpop.f32.mrb[7].mxu1  ;;  %v252_v49 = vadd.f32 %v349_v23, %v232_v38 }
 0x102   :  { %v253_v50 = vadd.f32 %v349_v23, %v233_v44  ;;  %v261_v51 = vadd.f32 %v349_v23, %v241_v47 }
 0x104   :  { %v384_v52 = vpack.c.bf16 %v253_v50, %v252_v49  ;;  %v404_v53 = vpack.c.bf16 %v261_v51, %v260_v46 }
 0x105   :  { %v185_v54 = vpop.f32.mrb[8].mxu0  ;;  %v217_v55 = vpop.f32.mrb[8].mxu1 }
 0x106   :  { %406 = vst [vmem:[%s628_s4 + $0x8] sm:$0xff] %v384_v52   ;;  %v234_v56 = vmul.f32 %v585_v16, %v185_v54  ;;  %v452_v57 = vpop.f32.mrb[9].mxu0  ;;  %410 = vst [vmem:[%s628_s4 + $0x28] sm:$0xff] %v404_v53   ;;  %v242_v58 = vmul.f32 %v585_v16, %v217_v55  ;;  %v468_v59 = vpop.f32.mrb[9].mxu1 }
 0x107   :  { %v188_v60 = vpop.f32.mrb[10].mxu0  ;;  %v220_v61 = vpop.f32.mrb[10].mxu1 }
 0x108   :  { %v235_v62 = vmul.f32 %v585_v16, %v188_v60  ;;  %v453_v63 = vpop.f32.mrb[11].mxu0  ;;  %v262_v0 = vadd.f32 %v349_v23, %v242_v58  ;;  %v469_v1 = vpop.f32.mrb[11].mxu1  ;;  %v254_v2 = vadd.f32 %v349_v23, %v234_v56 }
 0x10a   :  { %v255_v3 = vadd.f32 %v349_v23, %v235_v62  ;;  %v375_v4 = vpack.c.bf16 %v262_v0, %v262_v0 }
 0x10c   :  { %v389_v5 = vpack.c.bf16 %v255_v3, %v254_v2  ;;  %328 = vst [vmem:[%s628_s4 + $0x30] sm:$0xf] %v375_v4 }
 0x10d   :  { %v193_v6 = vpop.f32.mrb[12].mxu0 }
 0x10e   :  { %407 = vst [vmem:[%s628_s4 + $0x10] sm:$0xff] %v389_v5   ;;  %v236_v7 = vmul.f32 %v585_v16, %v193_v6  ;;  %v456_v8 = vpop.f32.mrb[13].mxu0 }
 0x10f   :  { %v196_v9 = vpop.f32.mrb[14].mxu0 }
 0x110   :  { %v237_v10 = vmul.f32 %v585_v16, %v196_v9  ;;  %v457_v11 = vpop.f32.mrb[15].mxu0  ;;  %v256_v12 = vadd.f32 %v349_v23, %v236_v7 }
 0x112   :  { %v257_v13 = vadd.f32 %v349_v23, %v237_v10 }
 0x114   :  { %v394_v14 = vpack.c.bf16 %v257_v13, %v256_v12 }
 0x116   :  { %408 = vst [vmem:[%s628_s4 + $0x18] sm:$0xff] %v394_v14  }

// kernel: _lambda_.76
= control target key start
LH: loop header
LB: loop body
LE: loop exit
PB: predicated region body
PF: predicated region fallthrough
CT: control target
= control target key end

     0   :  { %v587_v0 = vmov 0.0   ;;  %vm588_vm0 = vmmov 0   ;;  %s749_s1 = inlined_call_operand.vmem [shape: bf16[128,128], index: 1, kind: input, shape index: {}]   ;;  %s750_s0 = inlined_call_operand.vmem [shape: bf16[104,128], index: 0, kind: input, shape index: {}]   ;;  %s751_s2 = inlined_call_operand.vmem [shape: f32[1,128], index: 2, kind: input, shape index: {}]   ;;  %s752_s4 = inlined_call_operand.vmem [shape: bf16[104,128], index: 4, kind: input, shape index: {}]   ;;  %s753_s3 = inlined_call_operand.vmem [shape: f32[1,128], index: 3, kind: input, shape index: {}]   ;;  %s754_s5 = inlined_call_operand.vmem [shape: bf16[104,128], index: 5, kind: output, shape index: {}]  }
   0x1   :  { %510 = vmatprep.subr.bf16.mxu0 %v587_v0  ;;  %v572_v1 = vld [vmem:[%s749_s1] sm:$0xff]   ;;  %554 = vmatprep.subr.bf16.mxu1 %v587_v0  ;;  %v573_v2 = vld [vmem:[%s749_s1 + $0x8] sm:$0xff]   ;;  %v574_v3 = vld [vmem:[%s749_s1 + $0x10] sm:$0xff]  }
   0x2   :  { %526 = vmatprep.mubr.msk.bf16.mxu0 %vm588_vm0, %v587_v0  ;;  %542 = vmatprep.mubr.msk.bf16.mxu1 %vm588_vm0, %v587_v0  ;;  %v575_v4 = vld [vmem:[%s749_s1 + $0x18] sm:$0xff]   ;;  %v576_v5 = vld [vmem:[%s749_s1 + $0x20] sm:$0xff]   ;;  %v577_v6 = vld [vmem:[%s749_s1 + $0x28] sm:$0xff]  }
   0x3   :  { %511 = vmatpush3.bf16.msra.mxu0 %v572_v1  ;;  %562 = vmatpush3.bf16.msra.mxu1 %v572_v1  ;;  %v578_v7 = vld [vmem:[%s749_s1 + $0x30] sm:$0xff]   ;;  %v579_v8 = vld [vmem:[%s749_s1 + $0x38] sm:$0xff]   ;;  %v580_v9 = vld [vmem:[%s750_s0] sm:$0xff]  }
   0x4   :  { %512 = vmatprep.subr.bf16.mxu0 %v587_v0  ;;  %555 = vmatprep.subr.bf16.mxu1 %v587_v0  ;;  %v581_v10 = vld [vmem:[%s750_s0 + $0x20] sm:$0xff]   ;;  %v582_v11 = vld [vmem:[%s750_s0 + $0x8] sm:$0xff]   ;;  %v584_v13 = vld [vmem:[%s750_s0 + $0x10] sm:$0xff]  }
   0x5   :  { %v583_v12 = vld [vmem:[%s750_s0 + $0x28] sm:$0xff]   ;;  %v585_v14 = vld [vmem:[%s750_s0 + $0x30] ss:$0 sps:$4 sm:$0xff]   ;;  %v586_v15 = vld [vmem:[%s750_s0 + $0x18] sm:$0xff]  }
   0x6   :  { %v674_v16 = vld [vmem:[%s751_s2] ss:$0 sm:$0xff]  ;;  %v485_v41 = vld [vmem:[%s752_s4 + $0x8] sm:$0xff]  }
   0x7   :  { %513 = vmatpush3.bf16.msra.mxu0 %v573_v2  ;;  %563 = vmatpush3.bf16.msra.mxu1 %v573_v2  ;;  %v432_v17 = vld [vmem:[%s752_s4] sm:$0xff]   ;;  %v489_v46 = vld [vmem:[%s752_s4 + $0x28] sm:$0xff]   ;;  %v437_v49 = vunpack.c.l.bf16 %v485_v41  ;;  %v438_v58 = vunpack.c.h.bf16 %v485_v41  ;;  %v487_v41 = vld [vmem:[%s752_s4 + $0x18] sm:$0xff]  }
   0x8   :  { %514 = vmatprep.subr.bf16.mxu0 %v587_v0  ;;  %556 = vmatprep.subr.bf16.mxu1 %v587_v0  ;;  %v488_v18 = vld [vmem:[%s752_s4 + $0x20] sm:$0xff]   ;;  %v433_v23 = vunpack.c.l.bf16 %v432_v17  ;;  %v434_v29 = vunpack.c.h.bf16 %v432_v17  ;;  %v453_v59 = vunpack.c.l.bf16 %v489_v46 }
   0x9   :  { %v685_v20 = vld [vmem:[%s753_s3] ss:$0 sm:$0xff]  ;;  %v449_v26 = vunpack.c.l.bf16 %v488_v18  ;;  %v450_v31 = vunpack.c.h.bf16 %v488_v18 }
   0xb   :  { %515 = vmatpush3.bf16.msra.mxu0 %v574_v3  ;;  %564 = vmatpush3.bf16.msra.mxu1 %v574_v3 }
   0xc   :  { %516 = vmatprep.subr.bf16.mxu0 %v587_v0  ;;  %557 = vmatprep.subr.bf16.mxu1 %v587_v0 }
   0xf   :  { %517 = vmatpush3.bf16.msra.mxu0 %v575_v4  ;;  %565 = vmatpush3.bf16.msra.mxu1 %v575_v4 }
  0x10   :  { %518 = vmatprep.subr.bf16.mxu0 %v587_v0  ;;  %558 = vmatprep.subr.bf16.mxu1 %v587_v0 }
  0x13   :  { %519 = vmatpush3.bf16.msra.mxu0 %v576_v5  ;;  %566 = vmatpush3.bf16.msra.mxu1 %v576_v5  ;;  %v454_v5 = vunpack.c.h.bf16 %v489_v46 }
  0x14   :  { %520 = vmatprep.subr.bf16.mxu0 %v587_v0  ;;  %559 = vmatprep.subr.bf16.mxu1 %v587_v0 }
  0x17   :  { %521 = vmatpush3.bf16.msra.mxu0 %v577_v6  ;;  %567 = vmatpush3.bf16.msra.mxu1 %v577_v6 }
  0x18   :  { %522 = vmatprep.subr.bf16.mxu0 %v587_v0  ;;  %560 = vmatprep.subr.bf16.mxu1 %v587_v0 }
  0x1b   :  { %523 = vmatpush3.bf16.msra.mxu0 %v578_v7  ;;  %568 = vmatpush3.bf16.msra.mxu1 %v578_v7 }
  0x1c   :  { %524 = vmatprep.subr.bf16.mxu0 %v587_v0  ;;  %561 = vmatprep.subr.bf16.mxu1 %v587_v0 }
  0x1f   :  { %525 = vmatpush3.bf16.msra.mxu0 %v579_v8  ;;  %569 = vmatpush3.bf16.msra.mxu1 %v579_v8  ;;  %v486_v8 = vld [vmem:[%s752_s4 + $0x10] sm:$0xff]  }
  0x22   :  { %527 = vmatmul.mubr.bf16.vlgmr.msra.gmra.mrb[0].mxu0 %v580_v9  ;;  %543 = vmatmul.mubr.bf16.vlgmr.msra.gmra.mrb[0].mxu1 %v581_v10  ;;  %v278_v9 = vld [vmem:[%s752_s4 + $0x30] sm:$0xf] }
  0x23   :  { %530 = vmatprep.mubr.msk.bf16.mxu0 %vm588_vm0, %v587_v0  ;;  %546 = vmatprep.mubr.msk.bf16.mxu1 %vm588_vm0, %v587_v0 }
  0x2a   :  { %531 = vmatmul.mubr.bf16.gmra.mrb[4].mxu0 %v582_v11  ;;  %547 = vmatmul.mubr.bf16.gmra.mrb[4].mxu1 %v583_v12 }
  0x2b   :  { %534 = vmatprep.mubr.msk.bf16.mxu0 %vm588_vm0, %v587_v0  ;;  %550 = vmatprep.mubr.msk.bf16.mxu1 %vm588_vm0, %v587_v0 }
  0x32   :  { %535 = vmatmul.mubr.bf16.gmra.mrb[8].mxu0 %v584_v13  ;;  %551 = vmatmul.mubr.bf16.gmra.mrb[8].mxu1 %v585_v14 }
  0x33   :  { %538 = vmatprep.mubr.msk.bf16.mxu0 %vm588_vm0, %v587_v0 }
  0x3a   :  { %539 = vmatmul.mubr.bf16.gmra.mrb[12].mxu0 %v586_v15  ;;  %v441_v15 = vunpack.c.l.bf16 %v486_v8 }
  0xf5   :  { %v172_v19 = vpop.f32.mrb[0].mxu0  ;;  %v204_v21 = vpop.f32.mrb[0].mxu1 }
  0xf6   :  { %v233_v22 = vmul.f32 %v674_v16, %v172_v19  ;;  %v528_v24 = vpop.f32.mrb[1].mxu0  ;;  %v241_v25 = vmul.f32 %v674_v16, %v204_v21  ;;  %v544_v27 = vpop.f32.mrb[1].mxu1  ;;  %v291_v19 = vunpack.c.l.bf16 %v278_v9 }
  0xf7   :  { %v175_v28 = vpop.f32.mrb[2].mxu0  ;;  %v207_v30 = vpop.f32.mrb[2].mxu1 }
  0xf8   :  { %v253_v32 = vadd.f32 %v685_v20, %v233_v22  ;;  %v234_v33 = vmul.f32 %v674_v16, %v175_v28  ;;  %v529_v34 = vpop.f32.mrb[3].mxu0  ;;  %v261_v35 = vadd.f32 %v685_v20, %v241_v25  ;;  %v242_v36 = vmul.f32 %v674_v16, %v207_v30  ;;  %v545_v37 = vpop.f32.mrb[3].mxu1 }
  0xfa   :  { %v292_v38 = vadd.f32 %v433_v23, %v253_v32  ;;  %v254_v39 = vadd.f32 %v685_v20, %v234_v33  ;;  %v300_v40 = vadd.f32 %v449_v26, %v261_v35  ;;  %v262_v42 = vadd.f32 %v685_v20, %v242_v36 }
  0xfc   :  { %v293_v43 = vadd.f32 %v434_v29, %v254_v39  ;;  %v313_v44 = vmax.f32 %v300_v40, 0.0  ;;  %v301_v45 = vadd.f32 %v450_v31, %v262_v42  ;;  %v305_v47 = vmax.f32 %v292_v38, 0.0 }
  0xfd   :  { %v180_v48 = vpop.f32.mrb[4].mxu0  ;;  %v212_v50 = vpop.f32.mrb[4].mxu1  ;;  %v442_v29 = vunpack.c.h.bf16 %v486_v8 }
  0xfe   :  { %v306_v51 = vmax.f32 %v293_v43, 0.0  ;;  %v235_v52 = vmul.f32 %v674_v16, %v180_v48  ;;  %v532_v53 = vpop.f32.mrb[5].mxu0  ;;  %v314_v54 = vmax.f32 %v301_v45, 0.0  ;;  %v243_v55 = vmul.f32 %v674_v16, %v212_v50  ;;  %v548_v56 = vpop.f32.mrb[5].mxu1 }
  0xff   :  { %v183_v57 = vpop.f32.mrb[6].mxu0  ;;  %v215_v60 = vpop.f32.mrb[6].mxu1  ;;  %v445_v45 = vunpack.c.l.bf16 %v487_v41 }
 0x100   :  { %v458_v61 = vpack.c.bf16 %v306_v51, %v305_v47  ;;  %v255_v62 = vadd.f32 %v685_v20, %v235_v52  ;;  %v478_v63 = vpack.c.bf16 %v314_v54, %v313_v44  ;;  %v236_v0 = vmul.f32 %v674_v16, %v183_v57  ;;  %v533_v1 = vpop.f32.mrb[7].mxu0  ;;  %v549_v2 = vpop.f32.mrb[7].mxu1 }
 0x101   :  { %v263_v3 = vadd.f32 %v685_v20, %v243_v55  ;;  %v244_v4 = vmul.f32 %v674_v16, %v215_v60  ;;  %v446_v55 = vunpack.c.h.bf16 %v487_v41 }
 0x102   :  { %459 = vst [vmem:[%s754_s5] sm:$0xff] %v458_v61   ;;  %v294_v6 = vadd.f32 %v437_v49, %v255_v62  ;;  %493 = vst [vmem:[%s754_s5 + $0x20] sm:$0xff] %v478_v63   ;;  %v256_v7 = vadd.f32 %v685_v20, %v236_v0 }
 0x103   :  { %v302_v10 = vadd.f32 %v453_v59, %v263_v3  ;;  %v264_v11 = vadd.f32 %v685_v20, %v244_v4 }
 0x104   :  { %v295_v12 = vadd.f32 %v438_v58, %v256_v7  ;;  %v307_v21 = vmax.f32 %v294_v6, 0.0 }
 0x105   :  { %v315_v13 = vmax.f32 %v302_v10, 0.0  ;;  %v188_v14 = vpop.f32.mrb[8].mxu0  ;;  %v303_v17 = vadd.f32 %v454_v5, %v264_v11  ;;  %v220_v18 = vpop.f32.mrb[8].mxu1 }
 0x106   :  { %v308_v22 = vmax.f32 %v295_v12, 0.0  ;;  %v237_v23 = vmul.f32 %v674_v16, %v188_v14  ;;  %v536_v24 = vpop.f32.mrb[9].mxu0  ;;  %v245_v25 = vmul.f32 %v674_v16, %v220_v18  ;;  %v552_v26 = vpop.f32.mrb[9].mxu1 }
 0x107   :  { %v316_v27 = vmax.f32 %v303_v17, 0.0  ;;  %v191_v28 = vpop.f32.mrb[10].mxu0  ;;  %v223_v30 = vpop.f32.mrb[10].mxu1 }
 0x108   :  { %v463_v31 = vpack.c.bf16 %v308_v22, %v307_v21  ;;  %v257_v32 = vadd.f32 %v685_v20, %v237_v23  ;;  %v238_v33 = vmul.f32 %v674_v16, %v191_v28  ;;  %v537_v34 = vpop.f32.mrb[11].mxu0  ;;  %v265_v35 = vadd.f32 %v685_v20, %v245_v25  ;;  %v553_v36 = vpop.f32.mrb[11].mxu1 }
 0x109   :  { %v483_v37 = vpack.c.bf16 %v316_v27, %v315_v13 }
 0x10a   :  { %490 = vst [vmem:[%s754_s5 + $0x8] sm:$0xff] %v463_v31   ;;  %v296_v38 = vadd.f32 %v441_v15, %v257_v32  ;;  %v258_v39 = vadd.f32 %v685_v20, %v238_v33  ;;  %v304_v40 = vadd.f32 %v291_v19, %v265_v35 }
 0x10b   :  { %494 = vst [vmem:[%s754_s5 + $0x28] sm:$0xff] %v483_v37  }
 0x10c   :  { %v297_v42 = vadd.f32 %v442_v29, %v258_v39  ;;  %v317_v43 = vmax.f32 %v304_v40, 0.0  ;;  %v309_v46 = vmax.f32 %v296_v38, 0.0 }
 0x10d   :  { %v196_v44 = vpop.f32.mrb[12].mxu0 }
 0x10e   :  { %v310_v47 = vmax.f32 %v297_v42, 0.0  ;;  %v430_v48 = vpack.c.bf16 %v317_v43, %v317_v43  ;;  %v239_v49 = vmul.f32 %v674_v16, %v196_v44  ;;  %v540_v50 = vpop.f32.mrb[13].mxu0 }
 0x10f   :  { %v199_v51 = vpop.f32.mrb[14].mxu0 }
 0x110   :  { %v468_v52 = vpack.c.bf16 %v310_v47, %v309_v46  ;;  %383 = vst [vmem:[%s754_s5 + $0x30] sm:$0xf] %v430_v48  ;;  %v259_v53 = vadd.f32 %v685_v20, %v239_v49  ;;  %v240_v54 = vmul.f32 %v674_v16, %v199_v51  ;;  %v541_v56 = vpop.f32.mrb[15].mxu0 }
 0x112   :  { %491 = vst [vmem:[%s754_s5 + $0x10] sm:$0xff] %v468_v52   ;;  %v298_v57 = vadd.f32 %v445_v45, %v259_v53  ;;  %v260_v58 = vadd.f32 %v685_v20, %v240_v54 }
 0x114   :  { %v299_v59 = vadd.f32 %v446_v55, %v260_v58  ;;  %v311_v60 = vmax.f32 %v298_v57, 0.0 }
 0x116   :  { %v312_v61 = vmax.f32 %v299_v59, 0.0 }
 0x118   :  { %v473_v62 = vpack.c.bf16 %v312_v61, %v311_v60 }
 0x11a   :  { %492 = vst [vmem:[%s754_s5 + $0x18] sm:$0xff] %v473_v62  }

// kernel: _lambda_.77
= control target key start
LH: loop header
LB: loop body
LE: loop exit
PB: predicated region body
PF: predicated region fallthrough
CT: control target
= control target key end

     0   :  { %v516_v0 = vmov 0.0   ;;  %vm517_vm0 = vmmov 0   ;;  %s652_s1 = inlined_call_operand.vmem [shape: bf16[128,128], index: 1, kind: input, shape index: {}]   ;;  %s653_s0 = inlined_call_operand.vmem [shape: bf16[104,128], index: 0, kind: input, shape index: {}]   ;;  %s654_s2 = inlined_call_operand.vmem [shape: f32[1,128], index: 2, kind: input, shape index: {}]   ;;  %s655_s3 = inlined_call_operand.vmem [shape: f32[1,128], index: 3, kind: input, shape index: {}]   ;;  %s656_s4 = inlined_call_operand.vmem [shape: bf16[104,128], index: 4, kind: output, shape index: {}]  }
   0x1   :  { %439 = vmatprep.subr.bf16.mxu0 %v516_v0  ;;  %v501_v1 = vld [vmem:[%s652_s1] sm:$0xff]   ;;  %483 = vmatprep.subr.bf16.mxu1 %v516_v0  ;;  %v502_v2 = vld [vmem:[%s652_s1 + $0x8] sm:$0xff]   ;;  %v503_v3 = vld [vmem:[%s652_s1 + $0x10] sm:$0xff]  }
   0x2   :  { %455 = vmatprep.mubr.msk.bf16.mxu0 %vm517_vm0, %v516_v0  ;;  %471 = vmatprep.mubr.msk.bf16.mxu1 %vm517_vm0, %v516_v0  ;;  %v504_v4 = vld [vmem:[%s652_s1 + $0x18] sm:$0xff]   ;;  %v505_v5 = vld [vmem:[%s652_s1 + $0x20] sm:$0xff]   ;;  %v506_v6 = vld [vmem:[%s652_s1 + $0x28] sm:$0xff]  }
   0x3   :  { %440 = vmatpush3.bf16.msra.mxu0 %v501_v1  ;;  %491 = vmatpush3.bf16.msra.mxu1 %v501_v1  ;;  %v507_v7 = vld [vmem:[%s652_s1 + $0x30] sm:$0xff]   ;;  %v508_v8 = vld [vmem:[%s652_s1 + $0x38] sm:$0xff]   ;;  %v509_v9 = vld [vmem:[%s653_s0] sm:$0xff]  }
   0x4   :  { %441 = vmatprep.subr.bf16.mxu0 %v516_v0  ;;  %484 = vmatprep.subr.bf16.mxu1 %v516_v0  ;;  %v510_v10 = vld [vmem:[%s653_s0 + $0x20] sm:$0xff]   ;;  %v511_v11 = vld [vmem:[%s653_s0 + $0x8] sm:$0xff]   ;;  %v513_v13 = vld [vmem:[%s653_s0 + $0x10] sm:$0xff]  }
   0x5   :  { %v512_v12 = vld [vmem:[%s653_s0 + $0x28] sm:$0xff]   ;;  %v514_v14 = vld [vmem:[%s653_s0 + $0x30] ss:$0 sps:$4 sm:$0xff]   ;;  %v515_v15 = vld [vmem:[%s653_s0 + $0x18] sm:$0xff]  }
   0x6   :  { %v598_v16 = vld [vmem:[%s654_s2] ss:$0 sm:$0xff] }
   0x7   :  { %442 = vmatpush3.bf16.msra.mxu0 %v502_v2  ;;  %492 = vmatpush3.bf16.msra.mxu1 %v502_v2  ;;  %v603_v18 = vld [vmem:[%s655_s3] ss:$0 sm:$0xff] }
   0x8   :  { %443 = vmatprep.subr.bf16.mxu0 %v516_v0  ;;  %485 = vmatprep.subr.bf16.mxu1 %v516_v0 }
   0xb   :  { %444 = vmatpush3.bf16.msra.mxu0 %v503_v3  ;;  %493 = vmatpush3.bf16.msra.mxu1 %v503_v3 }
   0xc   :  { %445 = vmatprep.subr.bf16.mxu0 %v516_v0  ;;  %486 = vmatprep.subr.bf16.mxu1 %v516_v0 }
   0xf   :  { %446 = vmatpush3.bf16.msra.mxu0 %v504_v4  ;;  %494 = vmatpush3.bf16.msra.mxu1 %v504_v4 }
  0x10   :  { %447 = vmatprep.subr.bf16.mxu0 %v516_v0  ;;  %487 = vmatprep.subr.bf16.mxu1 %v516_v0 }
  0x13   :  { %448 = vmatpush3.bf16.msra.mxu0 %v505_v5  ;;  %495 = vmatpush3.bf16.msra.mxu1 %v505_v5 }
  0x14   :  { %449 = vmatprep.subr.bf16.mxu0 %v516_v0  ;;  %488 = vmatprep.subr.bf16.mxu1 %v516_v0 }
  0x17   :  { %450 = vmatpush3.bf16.msra.mxu0 %v506_v6  ;;  %496 = vmatpush3.bf16.msra.mxu1 %v506_v6 }
  0x18   :  { %451 = vmatprep.subr.bf16.mxu0 %v516_v0  ;;  %489 = vmatprep.subr.bf16.mxu1 %v516_v0 }
  0x1b   :  { %452 = vmatpush3.bf16.msra.mxu0 %v507_v7  ;;  %497 = vmatpush3.bf16.msra.mxu1 %v507_v7 }
  0x1c   :  { %453 = vmatprep.subr.bf16.mxu0 %v516_v0  ;;  %490 = vmatprep.subr.bf16.mxu1 %v516_v0 }
  0x1f   :  { %454 = vmatpush3.bf16.msra.mxu0 %v508_v8  ;;  %498 = vmatpush3.bf16.msra.mxu1 %v508_v8 }
  0x22   :  { %456 = vmatmul.mubr.bf16.vlgmr.msra.gmra.mrb[0].mxu0 %v509_v9  ;;  %472 = vmatmul.mubr.bf16.vlgmr.msra.gmra.mrb[0].mxu1 %v510_v10 }
  0x23   :  { %459 = vmatprep.mubr.msk.bf16.mxu0 %vm517_vm0, %v516_v0  ;;  %475 = vmatprep.mubr.msk.bf16.mxu1 %vm517_vm0, %v516_v0 }
  0x2a   :  { %460 = vmatmul.mubr.bf16.gmra.mrb[4].mxu0 %v511_v11  ;;  %476 = vmatmul.mubr.bf16.gmra.mrb[4].mxu1 %v512_v12 }
  0x2b   :  { %463 = vmatprep.mubr.msk.bf16.mxu0 %vm517_vm0, %v516_v0  ;;  %479 = vmatprep.mubr.msk.bf16.mxu1 %vm517_vm0, %v516_v0 }
  0x32   :  { %464 = vmatmul.mubr.bf16.gmra.mrb[8].mxu0 %v513_v13  ;;  %480 = vmatmul.mubr.bf16.gmra.mrb[8].mxu1 %v514_v14 }
  0x33   :  { %467 = vmatprep.mubr.msk.bf16.mxu0 %vm517_vm0, %v516_v0 }
  0x3a   :  { %468 = vmatmul.mubr.bf16.gmra.mrb[12].mxu0 %v515_v15 }
  0xf5   :  { %v169_v17 = vpop.f32.mrb[0].mxu0  ;;  %v201_v19 = vpop.f32.mrb[0].mxu1 }
  0xf6   :  { %v230_v20 = vmul.f32 %v598_v16, %v169_v17  ;;  %v457_v21 = vpop.f32.mrb[1].mxu0  ;;  %v238_v22 = vmul.f32 %v598_v16, %v201_v19  ;;  %v473_v23 = vpop.f32.mrb[1].mxu1 }
  0xf7   :  { %v172_v24 = vpop.f32.mrb[2].mxu0  ;;  %v204_v25 = vpop.f32.mrb[2].mxu1 }
  0xf8   :  { %v250_v26 = vadd.f32 %v603_v18, %v230_v20  ;;  %v231_v27 = vmul.f32 %v598_v16, %v172_v24  ;;  %v458_v28 = vpop.f32.mrb[3].mxu0  ;;  %v258_v29 = vadd.f32 %v603_v18, %v238_v22  ;;  %v239_v30 = vmul.f32 %v598_v16, %v204_v25  ;;  %v474_v31 = vpop.f32.mrb[3].mxu1 }
  0xfa   :  { %v251_v32 = vadd.f32 %v603_v18, %v231_v27  ;;  %v271_v33 = vmax.f32 %v258_v29, 0.0  ;;  %v259_v34 = vadd.f32 %v603_v18, %v239_v30  ;;  %v263_v35 = vmax.f32 %v250_v26, 0.0 }
  0xfc   :  { %v264_v36 = vmax.f32 %v251_v32, 0.0  ;;  %v272_v37 = vmax.f32 %v259_v34, 0.0 }
  0xfd   :  { %v177_v38 = vpop.f32.mrb[4].mxu0  ;;  %v209_v39 = vpop.f32.mrb[4].mxu1 }
  0xfe   :  { %v392_v40 = vpack.c.bf16 %v264_v36, %v263_v35  ;;  %v232_v41 = vmul.f32 %v598_v16, %v177_v38  ;;  %v461_v42 = vpop.f32.mrb[5].mxu0  ;;  %v412_v43 = vpack.c.bf16 %v272_v37, %v271_v33  ;;  %v240_v44 = vmul.f32 %v598_v16, %v209_v39  ;;  %v477_v45 = vpop.f32.mrb[5].mxu1 }
  0xff   :  { %v180_v46 = vpop.f32.mrb[6].mxu0  ;;  %v212_v47 = vpop.f32.mrb[6].mxu1 }
 0x100   :  { %393 = vst [vmem:[%s656_s4] sm:$0xff] %v392_v40   ;;  %v252_v48 = vadd.f32 %v603_v18, %v232_v41  ;;  %422 = vst [vmem:[%s656_s4 + $0x20] sm:$0xff] %v412_v43   ;;  %v233_v49 = vmul.f32 %v598_v16, %v180_v46  ;;  %v462_v50 = vpop.f32.mrb[7].mxu0  ;;  %v260_v51 = vadd.f32 %v603_v18, %v240_v44  ;;  %v478_v53 = vpop.f32.mrb[7].mxu1 }
 0x101   :  { %v241_v52 = vmul.f32 %v598_v16, %v212_v47 }
 0x102   :  { %v253_v54 = vadd.f32 %v603_v18, %v233_v49  ;;  %v273_v55 = vmax.f32 %v260_v51, 0.0  ;;  %v265_v57 = vmax.f32 %v252_v48, 0.0 }
 0x103   :  { %v261_v56 = vadd.f32 %v603_v18, %v241_v52 }
 0x104   :  { %v266_v58 = vmax.f32 %v253_v54, 0.0 }
 0x105   :  { %v274_v59 = vmax.f32 %v261_v56, 0.0  ;;  %v185_v60 = vpop.f32.mrb[8].mxu0  ;;  %v217_v61 = vpop.f32.mrb[8].mxu1 }
 0x106   :  { %v397_v62 = vpack.c.bf16 %v266_v58, %v265_v57  ;;  %v234_v63 = vmul.f32 %v598_v16, %v185_v60  ;;  %v465_v0 = vpop.f32.mrb[9].mxu0  ;;  %v242_v2 = vmul.f32 %v598_v16, %v217_v61  ;;  %v481_v3 = vpop.f32.mrb[9].mxu1 }
 0x107   :  { %v417_v1 = vpack.c.bf16 %v274_v59, %v273_v55  ;;  %v188_v4 = vpop.f32.mrb[10].mxu0  ;;  %v220_v5 = vpop.f32.mrb[10].mxu1 }
 0x108   :  { %419 = vst [vmem:[%s656_s4 + $0x8] sm:$0xff] %v397_v62   ;;  %v254_v6 = vadd.f32 %v603_v18, %v234_v63  ;;  %v235_v7 = vmul.f32 %v598_v16, %v188_v4  ;;  %v466_v8 = vpop.f32.mrb[11].mxu0  ;;  %v262_v9 = vadd.f32 %v603_v18, %v242_v2  ;;  %v482_v10 = vpop.f32.mrb[11].mxu1 }
 0x109   :  { %423 = vst [vmem:[%s656_s4 + $0x28] sm:$0xff] %v417_v1  }
 0x10a   :  { %v255_v11 = vadd.f32 %v603_v18, %v235_v7  ;;  %v275_v12 = vmax.f32 %v262_v9, 0.0  ;;  %v267_v13 = vmax.f32 %v254_v6, 0.0 }
 0x10c   :  { %v268_v14 = vmax.f32 %v255_v11, 0.0  ;;  %v388_v15 = vpack.c.bf16 %v275_v12, %v275_v12 }
 0x10d   :  { %v193_v17 = vpop.f32.mrb[12].mxu0 }
 0x10e   :  { %v402_v19 = vpack.c.bf16 %v268_v14, %v267_v13  ;;  %341 = vst [vmem:[%s656_s4 + $0x30] sm:$0xf] %v388_v15  ;;  %v236_v20 = vmul.f32 %v598_v16, %v193_v17  ;;  %v469_v21 = vpop.f32.mrb[13].mxu0 }
 0x10f   :  { %v196_v22 = vpop.f32.mrb[14].mxu0 }
 0x110   :  { %420 = vst [vmem:[%s656_s4 + $0x10] sm:$0xff] %v402_v19   ;;  %v256_v23 = vadd.f32 %v603_v18, %v236_v20  ;;  %v237_v24 = vmul.f32 %v598_v16, %v196_v22  ;;  %v470_v25 = vpop.f32.mrb[15].mxu0 }
 0x112   :  { %v257_v26 = vadd.f32 %v603_v18, %v237_v24  ;;  %v269_v27 = vmax.f32 %v256_v23, 0.0 }
 0x114   :  { %v270_v28 = vmax.f32 %v257_v26, 0.0 }
 0x116   :  { %v407_v29 = vpack.c.bf16 %v270_v28, %v269_v27 }
 0x118   :  { %421 = vst [vmem:[%s656_s4 + $0x18] sm:$0xff] %v407_v29  }

// kernel: _lambda_.87
= control target key start
LH: loop header
LB: loop body
LE: loop exit
PB: predicated region body
PF: predicated region fallthrough
CT: control target
= control target key end

     0   :  { %v920_v1 = vmov 0.0   ;;  %vm921_vm0 = vmmov 0   ;;  %s1158_s1 = inlined_call_operand.vmem [shape: bf16[384,128], index: 1, kind: input, shape index: {}]   ;;  %s1159_s0 = inlined_call_operand.vmem [shape: bf16[104,384], index: 0, kind: input, shape index: {}]   ;;  %s1160_s2 = inlined_call_operand.vmem [shape: f32[1,128], index: 2, kind: input, shape index: {}]   ;;  %s1161_s3 = inlined_call_operand.vmem [shape: f32[1,128], index: 3, kind: input, shape index: {}]   ;;  %s1162_s4 = inlined_call_operand.vmem [shape: bf16[104,128], index: 4, kind: output, shape index: {}]  }
   0x1   :  { %v869_v0 = vld [vmem:[%s1158_s1 + $0x40] sm:$0xff]   ;;  %823 = vmatprep.subr.bf16.mxu1 %v920_v1  ;;  %839 = vmatprep.mubr.msk.bf16.mxu1 %vm921_vm0, %v920_v1  ;;  %v872_v4 = vld [vmem:[%s1158_s1 + $0x48] sm:$0xff]   ;;  %v875_v7 = vld [vmem:[%s1158_s1 + $0x50] sm:$0xff]  }
   0x2   :  { %v870_v2 = vld [vmem:[%s1158_s1] sm:$0xff]   ;;  %750 = vmatprep.subr.bf16.mxu0 %v869_v0  ;;  %v873_v5 = vld [vmem:[%s1158_s1 + $0x8] sm:$0xff]   ;;  %v876_v8 = vld [vmem:[%s1158_s1 + $0x10] sm:$0xff]  }
   0x3   :  { %v871_v3 = vld [vmem:[%s1158_s1 + $0x80] sm:$0xff]   ;;  %751 = vmatpush3.bf16.msra.mxu0 %v870_v2  ;;  %v874_v6 = vld [vmem:[%s1158_s1 + $0x88] sm:$0xff]   ;;  %v877_v9 = vld [vmem:[%s1158_s1 + $0x90] sm:$0xff]  }
   0x4   :  { %824 = vmatpush3.bf16.msra.mxu1 %v871_v3  ;;  %752 = vmatprep.subr.bf16.mxu0 %v872_v4  ;;  %v878_v10 = vld [vmem:[%s1158_s1 + $0x58] sm:$0xff]   ;;  %v881_v13 = vld [vmem:[%s1158_s1 + $0x60] sm:$0xff]   ;;  %v884_v16 = vld [vmem:[%s1158_s1 + $0x68] sm:$0xff]  }
   0x5   :  { %825 = vmatprep.subr.bf16.mxu1 %v920_v1  ;;  %v879_v11 = vld [vmem:[%s1158_s1 + $0x18] sm:$0xff]   ;;  %v882_v14 = vld [vmem:[%s1158_s1 + $0x20] sm:$0xff]   ;;  %v885_v17 = vld [vmem:[%s1158_s1 + $0x28] sm:$0xff]  }
   0x6   :  { %v880_v12 = vld [vmem:[%s1158_s1 + $0x98] sm:$0xff]   ;;  %v883_v15 = vld [vmem:[%s1158_s1 + $0xa0] sm:$0xff]   ;;  %v886_v18 = vld [vmem:[%s1158_s1 + $0xa8] sm:$0xff]  }
   0x7   :  { %753 = vmatpush3.bf16.msra.mxu0 %v873_v5  ;;  %v887_v19 = vld [vmem:[%s1158_s1 + $0x70] sm:$0xff]   ;;  %v890_v22 = vld [vmem:[%s1158_s1 + $0x78] sm:$0xff]   ;;  %v893_v26 = vld [vmem:[%s1159_s0] ss:$12 sps:$4 sm:$0xff]  }
   0x8   :  { %826 = vmatpush3.bf16.msra.mxu1 %v874_v6  ;;  %754 = vmatprep.subr.bf16.mxu0 %v875_v7  ;;  %v888_v20 = vld [vmem:[%s1158_s1 + $0x30] sm:$0xff]   ;;  %v891_v24 = vld [vmem:[%s1158_s1 + $0x38] sm:$0xff]   ;;  %v900_v30 = vld [vmem:[%s1159_s0 + $0x20] ss:$12 sps:$4 sm:$0xff]  }
   0x9   :  { %827 = vmatprep.subr.bf16.mxu1 %v920_v1  ;;  %v889_v21 = vld [vmem:[%s1158_s1 + $0xb0] sm:$0xff]   ;;  %v892_v25 = vld [vmem:[%s1158_s1 + $0xb8] sm:$0xff]   ;;  %v911_v38 = vld [vmem:[%s1159_s0 + $0x60] ss:$12 sps:$4 sm:$0xff]  }
   0xa   :  { %v895_v23 = vld [vmem:[%s1159_s0 + $0x4] ss:$12 sps:$4 sm:$0xff]   ;;  %v896_v27 = vld [vmem:[%s1159_s0 + $0x8] ss:$12 sps:$4 sm:$0xff]   ;;  %v905_v34 = vld [vmem:[%s1159_s0 + $0x4c] ss:$12 sps:$4 sm:$0xff]  }
   0xb   :  { %755 = vmatpush3.bf16.msra.mxu0 %v876_v8  ;;  %375 = vmatprep.mubr.bf16.mxu0 %v895_v23  ;;  %v897_v28 = vld [vmem:[%s1159_s0 + $0x1c] ss:$12 sps:$4 sm:$0xff]   ;;  %v899_v29 = vld [vmem:[%s1159_s0 + $0x18] ss:$12 sps:$4 sm:$0xff]   ;;  %v901_v31 = vld [vmem:[%s1159_s0 + $0x34] ss:$12 sps:$4 sm:$0xff]  }
   0xc   :  { %828 = vmatpush3.bf16.msra.mxu1 %v877_v9  ;;  %756 = vmatprep.subr.bf16.mxu0 %v878_v10  ;;  %v903_v32 = vld [vmem:[%s1159_s0 + $0x30] ss:$12 sps:$4 sm:$0xff]   ;;  %v904_v33 = vld [vmem:[%s1159_s0 + $0x38] ss:$12 sps:$4 sm:$0xff]   ;;  %v907_v35 = vld [vmem:[%s1159_s0 + $0x48] ss:$12 sps:$4 sm:$0xff]  }
   0xd   :  { %829 = vmatprep.subr.bf16.mxu1 %v920_v1  ;;  %v908_v36 = vld [vmem:[%s1159_s0 + $0x50] ss:$12 sps:$4 sm:$0xff]   ;;  %v912_v39 = vld [vmem:[%s1159_s0 + $0x68] ss:$12 sps:$4 sm:$0xff]   ;;  %v915_v42 = vld [vmem:[%s1159_s0 + $0x78] ss:$12 sps:$4 sm:$0xff]  }
   0xe   :  { %v909_v37 = vld [vmem:[%s1159_s0 + $0x64] ss:$12 sps:$4 sm:$0xff]   ;;  %v913_v40 = vld [vmem:[%s1159_s0 + $0x7c] ss:$12 sps:$4 sm:$0xff]   ;;  %v916_v43 = vld [vmem:[%s1159_s0 + $0x80] ss:$12 sps:$4 sm:$0xff]  }
   0xf   :  { %757 = vmatpush3.bf16.msra.mxu0 %v879_v11  ;;  %v42_v41 = vld [vmem:[%s1159_s0 + $0x90] sm:$0xff]  ;;  %v919_v46 = vld [vmem:[%s1159_s0 + $0x98] ss:$0 sps:$4 sm:$0xff]   ;;  %v1104_v53 = vld [vmem:[%s1160_s2] ss:$0 sm:$0xff] }
  0x10   :  { %830 = vmatpush3.bf16.msra.mxu1 %v880_v12  ;;  %758 = vmatprep.subr.bf16.mxu0 %v881_v13  ;;  %v661_v44 = vcombine.high %v42_v41, %v42_v41  ;;  %v660_v45 = vcombine.low %v42_v41, %v42_v41  ;;  %v1109_v59 = vld [vmem:[%s1161_s3] ss:$0 sm:$0xff] }
  0x11   :  { %831 = vmatprep.subr.bf16.mxu1 %v920_v1 }
  0x13   :  { %759 = vmatpush3.bf16.msra.mxu0 %v882_v14 }
  0x14   :  { %832 = vmatpush3.bf16.msra.mxu1 %v883_v15  ;;  %760 = vmatprep.subr.bf16.mxu0 %v884_v16 }
  0x15   :  { %833 = vmatprep.subr.bf16.mxu1 %v920_v1 }
  0x17   :  { %761 = vmatpush3.bf16.msra.mxu0 %v885_v17 }
  0x18   :  { %834 = vmatpush3.bf16.msra.mxu1 %v886_v18  ;;  %762 = vmatprep.subr.bf16.mxu0 %v887_v19 }
  0x19   :  { %835 = vmatprep.subr.bf16.mxu1 %v920_v1 }
  0x1b   :  { %763 = vmatpush3.bf16.msra.mxu0 %v888_v20 }
  0x1c   :  { %836 = vmatpush3.bf16.msra.mxu1 %v889_v21  ;;  %764 = vmatprep.subr.bf16.mxu0 %v890_v22 }
  0x1d   :  { %837 = vmatprep.subr.bf16.mxu1 %v920_v1 }
  0x1f   :  { %765 = vmatpush3.bf16.msra.mxu0 %v891_v24 }
  0x20   :  { %838 = vmatpush3.bf16.msra.mxu1 %v892_v25 }
  0x22   :  { %376 = vmatmul.mubr.bf16.vlgmr.msra.gmra.mrb[0].mxu0 %v893_v26 }
  0x23   :  { %840 = vmatmul.mubr.bf16.vlgmr.msra.gmra.mrb[0].mxu1 %v896_v27  ;;  %383 = vmatprep.mubr.bf16.mxu0 %v897_v28 }
  0x24   :  { %843 = vmatprep.mubr.msk.bf16.mxu1 %vm921_vm0, %v920_v1 }
  0x2a   :  { %384 = vmatmul.mubr.bf16.gmra.mrb[4].mxu0 %v899_v29 }
  0x2b   :  { %844 = vmatmul.mubr.bf16.gmra.mrb[4].mxu1 %v900_v30  ;;  %391 = vmatprep.mubr.bf16.mxu0 %v901_v31 }
  0x2c   :  { %847 = vmatprep.mubr.msk.bf16.mxu1 %vm921_vm0, %v920_v1 }
  0x32   :  { %392 = vmatmul.mubr.bf16.gmra.mrb[8].mxu0 %v903_v32 }
  0x33   :  { %848 = vmatmul.mubr.bf16.gmra.mrb[8].mxu1 %v904_v33  ;;  %399 = vmatprep.mubr.bf16.mxu0 %v905_v34 }
  0x34   :  { %851 = vmatprep.mubr.msk.bf16.mxu1 %vm921_vm0, %v920_v1 }
  0x3a   :  { %400 = vmatmul.mubr.bf16.gmra.mrb[12].mxu0 %v907_v35 }
  0x3b   :  { %852 = vmatmul.mubr.bf16.gmra.mrb[12].mxu1 %v908_v36  ;;  %407 = vmatprep.mubr.bf16.mxu0 %v909_v37 }
  0x3c   :  { %855 = vmatprep.mubr.msk.bf16.mxu1 %vm921_vm0, %v920_v1 }
  0x42   :  { %408 = vmatmul.mubr.bf16.gmra.mrb[16].mxu0 %v911_v38 }
  0x43   :  { %856 = vmatmul.mubr.bf16.gmra.mrb[16].mxu1 %v912_v39  ;;  %415 = vmatprep.mubr.bf16.mxu0 %v913_v40 }
  0x44   :  { %859 = vmatprep.mubr.msk.bf16.mxu1 %vm921_vm0, %v920_v1 }
  0x4a   :  { %416 = vmatmul.mubr.bf16.gmra.mrb[20].mxu0 %v915_v42 }
  0x4b   :  { %860 = vmatmul.mubr.bf16.gmra.mrb[20].mxu1 %v916_v43  ;;  %423 = vmatprep.mubr.bf16.mxu0 %v661_v44 }
  0x4c   :  { %863 = vmatprep.mubr.msk.bf16.mxu1 %vm921_vm0, %v920_v1 }
  0x52   :  { %424 = vmatmul.mubr.bf16.gmra.mrb[24].mxu0 %v660_v45 }
  0x53   :  { %864 = vmatmul.mubr.bf16.gmra.mrb[24].mxu1 %v919_v46 }
  0xf5   :  { %v766_v47 = vpop.f32.mrb[0].mxu0 }
  0xf6   :  { %v465_v48 = vpop.f32.mrb[0].mxu1  ;;  %v767_v49 = vpop.f32.mrb[1].mxu0 }
  0xf7   :  { %v768_v50 = vadd.f32 %v767_v49, %v766_v47  ;;  %v841_v51 = vpop.f32.mrb[1].mxu1  ;;  %v769_v52 = vpop.f32.mrb[2].mxu0 }
  0xf8   :  { %v468_v54 = vpop.f32.mrb[2].mxu1  ;;  %v770_v55 = vpop.f32.mrb[3].mxu0 }
  0xf9   :  { %v466_v56 = vadd.f32 %v768_v50, %v465_v48  ;;  %v771_v57 = vadd.f32 %v770_v55, %v769_v52  ;;  %v842_v58 = vpop.f32.mrb[3].mxu1 }
  0xfb   :  { %v526_v60 = vmul.f32 %v1104_v53, %v466_v56  ;;  %v469_v61 = vadd.f32 %v771_v57, %v468_v54 }
  0xfd   :  { %v546_v62 = vadd.f32 %v1109_v59, %v526_v60  ;;  %v527_v63 = vmul.f32 %v1104_v53, %v469_v61  ;;  %v772_v0 = vpop.f32.mrb[4].mxu0 }
  0xfe   :  { %v473_v1 = vpop.f32.mrb[4].mxu1  ;;  %v773_v2 = vpop.f32.mrb[5].mxu0 }
  0xff   :  { %v547_v3 = vadd.f32 %v1109_v59, %v527_v63  ;;  %v774_v4 = vadd.f32 %v773_v2, %v772_v0  ;;  %v845_v5 = vpop.f32.mrb[5].mxu1  ;;  %v775_v6 = vpop.f32.mrb[6].mxu0  ;;  %v559_v9 = vmax.f32 %v546_v62, 0.0 }
 0x100   :  { %v476_v7 = vpop.f32.mrb[6].mxu1  ;;  %v776_v8 = vpop.f32.mrb[7].mxu0 }
 0x101   :  { %v560_v10 = vmax.f32 %v547_v3, 0.0  ;;  %v474_v11 = vadd.f32 %v774_v4, %v473_v1  ;;  %v777_v12 = vadd.f32 %v776_v8, %v775_v6  ;;  %v846_v13 = vpop.f32.mrb[7].mxu1 }
 0x103   :  { %v718_v14 = vpack.c.bf16 %v560_v10, %v559_v9  ;;  %v528_v15 = vmul.f32 %v1104_v53, %v474_v11  ;;  %v477_v16 = vadd.f32 %v777_v12, %v476_v7 }
 0x105   :  { %719 = vst [vmem:[%s1162_s4] sm:$0xff] %v718_v14   ;;  %v548_v17 = vadd.f32 %v1109_v59, %v528_v15  ;;  %v529_v18 = vmul.f32 %v1104_v53, %v477_v16  ;;  %v778_v19 = vpop.f32.mrb[8].mxu0 }
 0x106   :  { %v481_v20 = vpop.f32.mrb[8].mxu1  ;;  %v779_v21 = vpop.f32.mrb[9].mxu0 }
 0x107   :  { %v549_v22 = vadd.f32 %v1109_v59, %v529_v18  ;;  %v780_v23 = vadd.f32 %v779_v21, %v778_v19  ;;  %v849_v24 = vpop.f32.mrb[9].mxu1  ;;  %v781_v25 = vpop.f32.mrb[10].mxu0  ;;  %v561_v28 = vmax.f32 %v548_v17, 0.0 }
 0x108   :  { %v484_v26 = vpop.f32.mrb[10].mxu1  ;;  %v782_v27 = vpop.f32.mrb[11].mxu0 }
 0x109   :  { %v562_v29 = vmax.f32 %v549_v22, 0.0  ;;  %v482_v30 = vadd.f32 %v780_v23, %v481_v20  ;;  %v783_v31 = vadd.f32 %v782_v27, %v781_v25  ;;  %v850_v32 = vpop.f32.mrb[11].mxu1 }
 0x10b   :  { %v723_v33 = vpack.c.bf16 %v562_v29, %v561_v28  ;;  %v530_v34 = vmul.f32 %v1104_v53, %v482_v30  ;;  %v485_v35 = vadd.f32 %v783_v31, %v484_v26 }
 0x10d   :  { %745 = vst [vmem:[%s1162_s4 + $0x8] sm:$0xff] %v723_v33   ;;  %v550_v36 = vadd.f32 %v1109_v59, %v530_v34  ;;  %v531_v37 = vmul.f32 %v1104_v53, %v485_v35  ;;  %v784_v38 = vpop.f32.mrb[12].mxu0 }
 0x10e   :  { %v489_v39 = vpop.f32.mrb[12].mxu1  ;;  %v785_v40 = vpop.f32.mrb[13].mxu0 }
 0x10f   :  { %v551_v41 = vadd.f32 %v1109_v59, %v531_v37  ;;  %v786_v42 = vadd.f32 %v785_v40, %v784_v38  ;;  %v853_v43 = vpop.f32.mrb[13].mxu1  ;;  %v787_v44 = vpop.f32.mrb[14].mxu0  ;;  %v563_v47 = vmax.f32 %v550_v36, 0.0 }
 0x110   :  { %v492_v45 = vpop.f32.mrb[14].mxu1  ;;  %v788_v46 = vpop.f32.mrb[15].mxu0 }
 0x111   :  { %v564_v48 = vmax.f32 %v551_v41, 0.0  ;;  %v490_v49 = vadd.f32 %v786_v42, %v489_v39  ;;  %v789_v50 = vadd.f32 %v788_v46, %v787_v44  ;;  %v854_v51 = vpop.f32.mrb[15].mxu1 }
 0x113   :  { %v728_v52 = vpack.c.bf16 %v564_v48, %v563_v47  ;;  %v532_v54 = vmul.f32 %v1104_v53, %v490_v49  ;;  %v493_v55 = vadd.f32 %v789_v50, %v492_v45 }
 0x115   :  { %746 = vst [vmem:[%s1162_s4 + $0x10] sm:$0xff] %v728_v52   ;;  %v552_v56 = vadd.f32 %v1109_v59, %v532_v54  ;;  %v533_v57 = vmul.f32 %v1104_v53, %v493_v55  ;;  %v790_v58 = vpop.f32.mrb[16].mxu0 }
 0x116   :  { %v497_v60 = vpop.f32.mrb[16].mxu1  ;;  %v791_v61 = vpop.f32.mrb[17].mxu0 }
 0x117   :  { %v553_v62 = vadd.f32 %v1109_v59, %v533_v57  ;;  %v792_v63 = vadd.f32 %v791_v61, %v790_v58  ;;  %v857_v0 = vpop.f32.mrb[17].mxu1  ;;  %v793_v1 = vpop.f32.mrb[18].mxu0  ;;  %v565_v4 = vmax.f32 %v552_v56, 0.0 }
 0x118   :  { %v500_v2 = vpop.f32.mrb[18].mxu1  ;;  %v794_v3 = vpop.f32.mrb[19].mxu0 }
 0x119   :  { %v566_v5 = vmax.f32 %v553_v62, 0.0  ;;  %v498_v6 = vadd.f32 %v792_v63, %v497_v60  ;;  %v795_v7 = vadd.f32 %v794_v3, %v793_v1  ;;  %v858_v8 = vpop.f32.mrb[19].mxu1 }
 0x11b   :  { %v733_v9 = vpack.c.bf16 %v566_v5, %v565_v4  ;;  %v534_v10 = vmul.f32 %v1104_v53, %v498_v6  ;;  %v501_v11 = vadd.f32 %v795_v7, %v500_v2 }
 0x11d   :  { %747 = vst [vmem:[%s1162_s4 + $0x18] sm:$0xff] %v733_v9   ;;  %v554_v12 = vadd.f32 %v1109_v59, %v534_v10  ;;  %v535_v13 = vmul.f32 %v1104_v53, %v501_v11  ;;  %v796_v14 = vpop.f32.mrb[20].mxu0 }
 0x11e   :  { %v505_v15 = vpop.f32.mrb[20].mxu1  ;;  %v797_v16 = vpop.f32.mrb[21].mxu0 }
 0x11f   :  { %v555_v17 = vadd.f32 %v1109_v59, %v535_v13  ;;  %v798_v18 = vadd.f32 %v797_v16, %v796_v14  ;;  %v861_v19 = vpop.f32.mrb[21].mxu1  ;;  %v799_v20 = vpop.f32.mrb[22].mxu0  ;;  %v567_v23 = vmax.f32 %v554_v12, 0.0 }
 0x120   :  { %v508_v21 = vpop.f32.mrb[22].mxu1  ;;  %v800_v22 = vpop.f32.mrb[23].mxu0 }
 0x121   :  { %v568_v24 = vmax.f32 %v555_v17, 0.0  ;;  %v506_v25 = vadd.f32 %v798_v18, %v505_v15  ;;  %v801_v26 = vadd.f32 %v800_v22, %v799_v20  ;;  %v862_v27 = vpop.f32.mrb[23].mxu1 }
 0x123   :  { %v738_v28 = vpack.c.bf16 %v568_v24, %v567_v23  ;;  %v536_v29 = vmul.f32 %v1104_v53, %v506_v25  ;;  %v509_v30 = vadd.f32 %v801_v26, %v508_v21 }
 0x125   :  { %748 = vst [vmem:[%s1162_s4 + $0x20] sm:$0xff] %v738_v28   ;;  %v556_v31 = vadd.f32 %v1109_v59, %v536_v29  ;;  %v537_v32 = vmul.f32 %v1104_v53, %v509_v30  ;;  %v802_v33 = vpop.f32.mrb[24].mxu0 }
 0x126   :  { %v513_v34 = vpop.f32.mrb[24].mxu1  ;;  %v803_v35 = vpop.f32.mrb[25].mxu0 }
 0x127   :  { %v557_v36 = vadd.f32 %v1109_v59, %v537_v32  ;;  %v804_v37 = vadd.f32 %v803_v35, %v802_v33  ;;  %v865_v38 = vpop.f32.mrb[25].mxu1  ;;  %v805_v39 = vpop.f32.mrb[26].mxu0  ;;  %v569_v42 = vmax.f32 %v556_v31, 0.0 }
 0x128   :  { %v516_v40 = vpop.f32.mrb[26].mxu1  ;;  %v806_v41 = vpop.f32.mrb[27].mxu0 }
 0x129   :  { %v570_v43 = vmax.f32 %v557_v36, 0.0  ;;  %v514_v44 = vadd.f32 %v804_v37, %v513_v34  ;;  %v866_v45 = vpop.f32.mrb[27].mxu1 }
 0x12b   :  { %v743_v46 = vpack.c.bf16 %v570_v43, %v569_v42  ;;  %v538_v47 = vmul.f32 %v1104_v53, %v514_v44 }
 0x12d   :  { %749 = vst [vmem:[%s1162_s4 + $0x28] sm:$0xff] %v743_v46   ;;  %v558_v48 = vadd.f32 %v1109_v59, %v538_v47 }
 0x12f   :  { %v571_v49 = vmax.f32 %v558_v48, 0.0 }
 0x131   :  { %v714_v50 = vpack.c.bf16 %v571_v49, %v571_v49 }
 0x133   :  { %637 = vst [vmem:[%s1162_s4 + $0x30] sm:$0xf] %v714_v50 }

// kernel: _lambda_.106
= control target key start
LH: loop header
LB: loop body
LE: loop exit
PB: predicated region body
PF: predicated region fallthrough
CT: control target
= control target key end

     0   :  { %v1356_v24 = vmov 0.0   ;;  %vm1357_vm0 = vmmov 0   ;;  %s1708_s1 = inlined_call_operand.vmem [shape: bf16[640,128], index: 1, kind: input, shape index: {}]   ;;  %s1709_s0 = inlined_call_operand.vmem [shape: bf16[104,640], index: 0, kind: input, shape index: {}]   ;;  %s1710_s2 = inlined_call_operand.vmem [shape: f32[1,128], index: 2, kind: input, shape index: {}]   ;;  %s1711_s3 = inlined_call_operand.vmem [shape: f32[1,128], index: 3, kind: input, shape index: {}]   ;;  %s1712_s4 = inlined_call_operand.vmem [shape: bf16[104,128], index: 4, kind: output, shape index: {}]  }
   0x1   :  { %v1269_v0 = vld [vmem:[%s1708_s1 + $0x40] sm:$0xff]   ;;  %v1271_v2 = vld [vmem:[%s1708_s1 + $0x48] sm:$0xff]   ;;  %v1273_v4 = vld [vmem:[%s1708_s1 + $0x50] sm:$0xff]  }
   0x2   :  { %v1270_v1 = vld [vmem:[%s1708_s1] sm:$0xff]   ;;  %1251 = vmatprep.subr.bf16.mxu1 %v1269_v0  ;;  %1076 = vmatprep.subr.bf16.mxu0 %v1269_v0  ;;  %v1272_v3 = vld [vmem:[%s1708_s1 + $0x8] sm:$0xff]   ;;  %v1274_v5 = vld [vmem:[%s1708_s1 + $0x10] sm:$0xff]  }
   0x3   :  { %1259 = vmatpush3.bf16.msra.mxu1 %v1270_v1  ;;  %1077 = vmatpush3.bf16.msra.mxu0 %v1270_v1  ;;  %v1275_v6 = vld [vmem:[%s1708_s1 + $0x58] sm:$0xff]   ;;  %v1277_v8 = vld [vmem:[%s1708_s1 + $0x60] sm:$0xff]   ;;  %v1279_v10 = vld [vmem:[%s1708_s1 + $0x68] sm:$0xff]  }
   0x4   :  { %1252 = vmatprep.subr.bf16.mxu1 %v1271_v2  ;;  %1078 = vmatprep.subr.bf16.mxu0 %v1271_v2  ;;  %v1276_v7 = vld [vmem:[%s1708_s1 + $0x18] sm:$0xff]   ;;  %v1278_v9 = vld [vmem:[%s1708_s1 + $0x20] sm:$0xff]   ;;  %v1280_v12 = vld [vmem:[%s1708_s1 + $0x28] sm:$0xff]  }
   0x5   :  { %v1287_v11 = vld [vmem:[%s1709_s0 + $0xa4] ss:$20 sps:$4 sm:$0xff]   ;;  %v1281_v14 = vld [vmem:[%s1708_s1 + $0x70] sm:$0xff]   ;;  %v1294_v23 = vld [vmem:[%s1708_s1 + $0xc8] sm:$0xff]  }
   0x6   :  { %v1291_v13 = vld [vmem:[%s1709_s0 + $0x4] ss:$20 sps:$4 sm:$0xff]   ;;  %615 = vmatprep.mubr.bf16.mxu1 %v1287_v11  ;;  %v1282_v15 = vld [vmem:[%s1708_s1 + $0x30] sm:$0xff]   ;;  %v1298_v25 = vld [vmem:[%s1709_s0 + $0x2c] ss:$20 sps:$4 sm:$0xff]  }
   0x7   :  { %1260 = vmatpush3.bf16.msra.mxu1 %v1272_v3  ;;  %1079 = vmatpush3.bf16.msra.mxu0 %v1272_v3  ;;  %v1283_v16 = vld [vmem:[%s1708_s1 + $0x78] sm:$0xff]   ;;  %v1288_v18 = vld [vmem:[%s1708_s1 + $0xc0] sm:$0xff]   ;;  %v1295_v27 = vld [vmem:[%s1708_s1 + $0x88] sm:$0xff]  }
   0x8   :  { %1253 = vmatprep.subr.bf16.mxu1 %v1273_v4  ;;  %1080 = vmatprep.subr.bf16.mxu0 %v1273_v4  ;;  %v1284_v17 = vld [vmem:[%s1708_s1 + $0x38] sm:$0xff]   ;;  %v1285_v19 = vld [vmem:[%s1709_s0 + $0xa0] ss:$20 sps:$4 sm:$0xff]   ;;  %v1296_v28 = vld [vmem:[%s1708_s1 + $0x108] sm:$0xff]  }
   0x9   :  { %583 = vmatprep.mubr.bf16.mxu0 %v1291_v13  ;;  %v1289_v20 = vld [vmem:[%s1709_s0] ss:$20 sps:$4 sm:$0xff]   ;;  %v1301_v31 = vld [vmem:[%s1709_s0 + $0x28] ss:$20 sps:$4 sm:$0xff]   ;;  %v1313_v42 = vld [vmem:[%s1709_s0 + $0x50] ss:$20 sps:$4 sm:$0xff]  }
   0xa   :  { %v1292_v21 = vld [vmem:[%s1708_s1 + $0x80] sm:$0xff]   ;;  %v1297_v29 = vld [vmem:[%s1708_s1 + $0xd0] sm:$0xff]   ;;  %v1306_v32 = vld [vmem:[%s1709_s0 + $0xc8] ss:$20 sps:$4 sm:$0xff]  }
   0xb   :  { %1261 = vmatpush3.bf16.msra.mxu1 %v1274_v5  ;;  %1081 = vmatpush3.bf16.msra.mxu0 %v1274_v5  ;;  %v1293_v22 = vld [vmem:[%s1708_s1 + $0x100] sm:$0xff]   ;;  %v1300_v30 = vld [vmem:[%s1708_s1 + $0x90] sm:$0xff]   ;;  %v1305_v35 = vld [vmem:[%s1708_s1 + $0xd8] sm:$0xff]  }
   0xc   :  { %1254 = vmatprep.subr.bf16.mxu1 %v1275_v6  ;;  %1082 = vmatprep.subr.bf16.mxu0 %v1275_v6  ;;  %v1303_v26 = vld [vmem:[%s1709_s0 + $0xcc] ss:$20 sps:$4 sm:$0xff]   ;;  %v54_v33 = vld [vmem:[%s1709_s0 + $0xf0] sm:$0xff]  ;;  %v1307_v38 = vld [vmem:[%s1708_s1 + $0x98] sm:$0xff]  }
   0xd   :  { %v1302_v34 = vld [vmem:[%s1708_s1 + $0x110] sm:$0xff]   ;;  %v969_v37 = vcombine.high %v54_v33, %v54_v33  ;;  %v1308_v39 = vld [vmem:[%s1708_s1 + $0x118] sm:$0xff]   ;;  %v1309_v40 = vld [vmem:[%s1708_s1 + $0xe0] sm:$0xff]   ;;  %v968_v43 = vcombine.low %v54_v33, %v54_v33 }
   0xe   :  { %v1310_v36 = vld [vmem:[%s1709_s0 + $0x54] ss:$20 sps:$4 sm:$0xff]   ;;  %v1312_v41 = vld [vmem:[%s1708_s1 + $0xa0] sm:$0xff]   ;;  %v1321_v46 = vld [vmem:[%s1709_s0 + $0x7c] ss:$20 sps:$4 sm:$0xff]  }
   0xf   :  { %1262 = vmatpush3.bf16.msra.mxu1 %v1276_v7  ;;  %1083 = vmatpush3.bf16.msra.mxu0 %v1276_v7  ;;  %v1314_v44 = vld [vmem:[%s1708_s1 + $0x120] sm:$0xff]   ;;  %v1316_v45 = vld [vmem:[%s1708_s1 + $0xe8] sm:$0xff]   ;;  %v1320_v50 = vld [vmem:[%s1708_s1 + $0xf0] sm:$0xff]  }
  0x10   :  { %1255 = vmatprep.subr.bf16.mxu1 %v1277_v8  ;;  %1084 = vmatprep.subr.bf16.mxu0 %v1277_v8  ;;  %v1330_v47 = vld [vmem:[%s1709_s0 + $0xc] ss:$20 sps:$4 sm:$0xff]   ;;  %v1323_v51 = vld [vmem:[%s1708_s1 + $0xb0] sm:$0xff]   ;;  %v1326_v54 = vld [vmem:[%s1708_s1 + $0xf8] sm:$0xff]  }
  0x11   :  { %v1318_v48 = vld [vmem:[%s1708_s1 + $0xa8] sm:$0xff]   ;;  %v1325_v53 = vld [vmem:[%s1708_s1 + $0x130] sm:$0xff]   ;;  %v1327_v55 = vld [vmem:[%s1708_s1 + $0xb8] sm:$0xff]  }
  0x12   :  { %v1319_v49 = vld [vmem:[%s1708_s1 + $0x128] sm:$0xff]   ;;  %v1331_v56 = vld [vmem:[%s1708_s1 + $0x138] sm:$0xff]   ;;  %v1332_v58 = vld [vmem:[%s1709_s0 + $0x10] ss:$20 sps:$4 sm:$0xff]  }
  0x13   :  { %1263 = vmatpush3.bf16.msra.mxu1 %v1278_v9  ;;  %1085 = vmatpush3.bf16.msra.mxu0 %v1278_v9  ;;  %v1324_v52 = vld [vmem:[%s1709_s0 + $0x78] ss:$20 sps:$4 sm:$0xff]   ;;  %v1328_v57 = vld [vmem:[%s1709_s0 + $0x8] ss:$20 sps:$4 sm:$0xff]   ;;  %v1335_v60 = vld [vmem:[%s1709_s0 + $0x30] ss:$20 sps:$4 sm:$0xff]  }
  0x14   :  { %1256 = vmatprep.subr.bf16.mxu1 %v1279_v10  ;;  %1086 = vmatprep.subr.bf16.mxu0 %v1279_v10  ;;  %v1333_v59 = vld [vmem:[%s1709_s0 + $0x34] ss:$20 sps:$4 sm:$0xff]   ;;  %v1336_v61 = vld [vmem:[%s1709_s0 + $0x38] ss:$20 sps:$4 sm:$0xff]   ;;  %v1337_v62 = vld [vmem:[%s1709_s0 + $0x5c] ss:$20 sps:$4 sm:$0xff]  }
  0x15   :  { %v1339_v63 = vld [vmem:[%s1709_s0 + $0x58] ss:$20 sps:$4 sm:$0xff]   ;;  %v1340_v0 = vld [vmem:[%s1709_s0 + $0x60] ss:$20 sps:$4 sm:$0xff]   ;;  %v1344_v3 = vld [vmem:[%s1709_s0 + $0x88] ss:$20 sps:$4 sm:$0xff]  }
  0x16   :  { %v1341_v1 = vld [vmem:[%s1709_s0 + $0x84] ss:$20 sps:$4 sm:$0xff]   ;;  %v1343_v2 = vld [vmem:[%s1709_s0 + $0x80] ss:$20 sps:$4 sm:$0xff]   ;;  %v1347_v5 = vld [vmem:[%s1709_s0 + $0xa8] ss:$20 sps:$4 sm:$0xff]  }
  0x17   :  { %1264 = vmatpush3.bf16.msra.mxu1 %v1280_v12  ;;  %1087 = vmatpush3.bf16.msra.mxu0 %v1280_v12  ;;  %v1345_v4 = vld [vmem:[%s1709_s0 + $0xac] ss:$20 sps:$4 sm:$0xff]   ;;  %v1348_v6 = vld [vmem:[%s1709_s0 + $0xb0] ss:$20 sps:$4 sm:$0xff]   ;;  %v1349_v7 = vld [vmem:[%s1709_s0 + $0xd4] ss:$20 sps:$4 sm:$0xff]  }
  0x18   :  { %1257 = vmatprep.subr.bf16.mxu1 %v1281_v14  ;;  %1088 = vmatprep.subr.bf16.mxu0 %v1281_v14  ;;  %v55_v8 = vld [vmem:[%s1709_s0 + $0xf8] sm:$0xff]  ;;  %v1351_v9 = vld [vmem:[%s1709_s0 + $0xd0] ss:$20 sps:$4 sm:$0xff]   ;;  %v1355_v13 = vld [vmem:[%s1709_s0 + $0x100] ss:$0 sps:$4 sm:$0xff]  }
  0x19   :  { %v1352_v10 = vld [vmem:[%s1709_s0 + $0xd8] ss:$20 sps:$4 sm:$0xff]   ;;  %v971_v11 = vcombine.high %v55_v8, %v55_v8  ;;  %v970_v12 = vcombine.low %v55_v8, %v55_v8 }
  0x1b   :  { %1265 = vmatpush3.bf16.msra.mxu1 %v1282_v15  ;;  %1089 = vmatpush3.bf16.msra.mxu0 %v1282_v15 }
  0x1c   :  { %1258 = vmatprep.subr.bf16.mxu1 %v1283_v16  ;;  %1090 = vmatprep.subr.bf16.mxu0 %v1283_v16 }
  0x1f   :  { %1266 = vmatpush3.bf16.msra.mxu1 %v1284_v17  ;;  %1091 = vmatpush3.bf16.msra.mxu0 %v1284_v17 }
  0x20   :  { %1134 = vmatprep.subr.bf16.mxu1 %v1288_v18  ;;  %1207 = vmatprep.subr.bf16.mxu0 %v1356_v24 }
  0x22   :  { %616 = vmatmul.mubr.bf16.vlgmr.msra.gmra.mrb[0].mxu1 %v1285_v19  ;;  %584 = vmatmul.mubr.bf16.vlgmr.msra.gmra.mrb[0].mxu0 %v1289_v20 }
  0x23   :  { %1135 = vmatpush3.bf16.msra.mxu1 %v1292_v21  ;;  %1208 = vmatpush3.bf16.msra.mxu0 %v1293_v22 }
  0x24   :  { %1136 = vmatprep.subr.bf16.mxu1 %v1294_v23  ;;  %1209 = vmatprep.subr.bf16.mxu0 %v1356_v24 }
  0x25   :  { %591 = vmatprep.mubr.bf16.mxu0 %v1298_v25  ;;  %623 = vmatprep.mubr.bf16.mxu1 %v1303_v26 }
  0x27   :  { %1137 = vmatpush3.bf16.msra.mxu1 %v1295_v27  ;;  %1210 = vmatpush3.bf16.msra.mxu0 %v1296_v28 }
  0x28   :  { %1138 = vmatprep.subr.bf16.mxu1 %v1297_v29  ;;  %1211 = vmatprep.subr.bf16.mxu0 %v1356_v24 }
  0x2a   :  { %592 = vmatmul.mubr.bf16.gmra.mrb[4].mxu0 %v1301_v31  ;;  %624 = vmatmul.mubr.bf16.gmra.mrb[4].mxu1 %v1306_v32 }
  0x2b   :  { %1139 = vmatpush3.bf16.msra.mxu1 %v1300_v30  ;;  %1212 = vmatpush3.bf16.msra.mxu0 %v1302_v34 }
  0x2c   :  { %1140 = vmatprep.subr.bf16.mxu1 %v1305_v35  ;;  %1213 = vmatprep.subr.bf16.mxu0 %v1356_v24 }
  0x2d   :  { %599 = vmatprep.mubr.bf16.mxu0 %v1310_v36  ;;  %631 = vmatprep.mubr.bf16.mxu1 %v969_v37 }
  0x2f   :  { %1141 = vmatpush3.bf16.msra.mxu1 %v1307_v38  ;;  %1214 = vmatpush3.bf16.msra.mxu0 %v1308_v39 }
  0x30   :  { %1142 = vmatprep.subr.bf16.mxu1 %v1309_v40  ;;  %1215 = vmatprep.subr.bf16.mxu0 %v1356_v24 }
  0x32   :  { %600 = vmatmul.mubr.bf16.gmra.mrb[8].mxu0 %v1313_v42  ;;  %632 = vmatmul.mubr.bf16.gmra.mrb[8].mxu1 %v968_v43 }
  0x33   :  { %1143 = vmatpush3.bf16.msra.mxu1 %v1312_v41  ;;  %1216 = vmatpush3.bf16.msra.mxu0 %v1314_v44 }
  0x34   :  { %1144 = vmatprep.subr.bf16.mxu1 %v1316_v45  ;;  %1217 = vmatprep.subr.bf16.mxu0 %v1356_v24 }
  0x35   :  { %607 = vmatprep.mubr.bf16.mxu0 %v1321_v46  ;;  %671 = vmatprep.mubr.bf16.mxu1 %v1330_v47 }
  0x37   :  { %1145 = vmatpush3.bf16.msra.mxu1 %v1318_v48  ;;  %1218 = vmatpush3.bf16.msra.mxu0 %v1319_v49 }
  0x38   :  { %1146 = vmatprep.subr.bf16.mxu1 %v1320_v50  ;;  %1219 = vmatprep.subr.bf16.mxu0 %v1356_v24 }
  0x3a   :  { %608 = vmatmul.mubr.bf16.gmra.mrb[12].mxu0 %v1324_v52 }
  0x3b   :  { %1147 = vmatpush3.bf16.msra.mxu1 %v1323_v51  ;;  %1220 = vmatpush3.bf16.msra.mxu0 %v1325_v53 }
  0x3c   :  { %1148 = vmatprep.subr.bf16.mxu1 %v1326_v54  ;;  %1221 = vmatprep.subr.bf16.mxu0 %v1356_v24 }
  0x3d   :  { %1223 = vmatprep.mubr.msk.bf16.mxu0 %vm1357_vm0, %v1356_v24 }
  0x3f   :  { %1149 = vmatpush3.bf16.msra.mxu1 %v1327_v55  ;;  %1222 = vmatpush3.bf16.msra.mxu0 %v1331_v56 }
  0x42   :  { %672 = vmatmul.mubr.bf16.vlgmr.msra.gmra.mrb[12].mxu1 %v1328_v57  ;;  %1224 = vmatmul.mubr.bf16.vlgmr.msra.gmra.mrb[16].mxu0 %v1332_v58 }
  0x43   :  { %679 = vmatprep.mubr.bf16.mxu1 %v1333_v59  ;;  %1227 = vmatprep.mubr.msk.bf16.mxu0 %vm1357_vm0, %v1356_v24 }
  0x4a   :  { %680 = vmatmul.mubr.bf16.gmra.mrb[16].mxu1 %v1335_v60  ;;  %1228 = vmatmul.mubr.bf16.gmra.mrb[20].mxu0 %v1336_v61 }
  0x4b   :  { %687 = vmatprep.mubr.bf16.mxu1 %v1337_v62  ;;  %1231 = vmatprep.mubr.msk.bf16.mxu0 %vm1357_vm0, %v1356_v24 }
  0x52   :  { %688 = vmatmul.mubr.bf16.gmra.mrb[20].mxu1 %v1339_v63  ;;  %1232 = vmatmul.mubr.bf16.gmra.mrb[24].mxu0 %v1340_v0 }
  0x53   :  { %695 = vmatprep.mubr.bf16.mxu1 %v1341_v1  ;;  %1235 = vmatprep.mubr.msk.bf16.mxu0 %vm1357_vm0, %v1356_v24 }
  0x5a   :  { %696 = vmatmul.mubr.bf16.gmra.mrb[24].mxu1 %v1343_v2  ;;  %1236 = vmatmul.mubr.bf16.gmra.mrb[28].mxu0 %v1344_v3  ;;  %v1645_v2 = vld [vmem:[%s1710_s2] ss:$0 sm:$0xff] }
  0x5b   :  { %703 = vmatprep.mubr.bf16.mxu1 %v1345_v4  ;;  %1239 = vmatprep.mubr.msk.bf16.mxu0 %vm1357_vm0, %v1356_v24 }
  0x62   :  { %704 = vmatmul.mubr.bf16.gmra.mrb[28].mxu1 %v1347_v5  ;;  %1240 = vmatmul.mubr.bf16.gmra.mrb[32].mxu0 %v1348_v6  ;;  %v1650_v5 = vld [vmem:[%s1711_s3] ss:$0 sm:$0xff] }
  0x63   :  { %711 = vmatprep.mubr.bf16.mxu1 %v1349_v7  ;;  %1243 = vmatprep.mubr.msk.bf16.mxu0 %vm1357_vm0, %v1356_v24 }
  0x6a   :  { %712 = vmatmul.mubr.bf16.gmra.mrb[32].mxu1 %v1351_v9  ;;  %1244 = vmatmul.mubr.bf16.gmra.mrb[36].mxu0 %v1352_v10 }
  0x6b   :  { %719 = vmatprep.mubr.bf16.mxu1 %v971_v11  ;;  %1247 = vmatprep.mubr.msk.bf16.mxu0 %vm1357_vm0, %v1356_v24 }
  0x72   :  { %720 = vmatmul.mubr.bf16.gmra.mrb[36].mxu1 %v970_v12  ;;  %1248 = vmatmul.mubr.bf16.gmra.mrb[40].mxu0 %v1355_v13 }
  0xf5   :  { %v1116_v14 = vpop.f32.mrb[0].mxu1  ;;  %v1092_v15 = vpop.f32.mrb[0].mxu0 }
  0xf6   :  { %v1117_v16 = vpop.f32.mrb[1].mxu1  ;;  %v1093_v17 = vpop.f32.mrb[1].mxu0 }
  0xf7   :  { %v1624_v18 = vadd.f32 %v1117_v16, %v1116_v14  ;;  %v1119_v19 = vpop.f32.mrb[2].mxu1  ;;  %v1094_v20 = vadd.f32 %v1093_v17, %v1092_v15  ;;  %v1095_v21 = vpop.f32.mrb[2].mxu0 }
  0xf8   :  { %v1120_v22 = vpop.f32.mrb[3].mxu1  ;;  %v1096_v23 = vpop.f32.mrb[3].mxu0 }
  0xf9   :  { %v1626_v25 = vadd.f32 %v1120_v22, %v1119_v19  ;;  %v1097_v24 = vadd.f32 %v1096_v23, %v1095_v21 }
  0xfd   :  { %v1098_v26 = vpop.f32.mrb[4].mxu0  ;;  %v1122_v27 = vpop.f32.mrb[4].mxu1 }
  0xfe   :  { %v1099_v28 = vpop.f32.mrb[5].mxu0  ;;  %v1123_v29 = vpop.f32.mrb[5].mxu1 }
  0xff   :  { %v1100_v30 = vadd.f32 %v1099_v28, %v1098_v26  ;;  %v1101_v31 = vpop.f32.mrb[6].mxu0  ;;  %v1628_v32 = vadd.f32 %v1123_v29, %v1122_v27  ;;  %v1125_v33 = vpop.f32.mrb[6].mxu1 }
 0x100   :  { %v1102_v34 = vpop.f32.mrb[7].mxu0  ;;  %v1126_v35 = vpop.f32.mrb[7].mxu1 }
 0x101   :  { %v1103_v36 = vadd.f32 %v1102_v34, %v1101_v31  ;;  %v1630_v37 = vadd.f32 %v1126_v35, %v1125_v33 }
 0x105   :  { %v1104_v38 = vpop.f32.mrb[8].mxu0  ;;  %v1128_v39 = vpop.f32.mrb[8].mxu1 }
 0x106   :  { %v1105_v40 = vpop.f32.mrb[9].mxu0  ;;  %v1129_v41 = vpop.f32.mrb[9].mxu1 }
 0x107   :  { %v1632_v42 = vadd.f32 %v1105_v40, %v1104_v38  ;;  %v1107_v43 = vpop.f32.mrb[10].mxu0  ;;  %v1634_v44 = vadd.f32 %v1129_v41, %v1128_v39  ;;  %v1131_v45 = vpop.f32.mrb[10].mxu1 }
 0x108   :  { %v1108_v46 = vpop.f32.mrb[11].mxu0  ;;  %v1132_v47 = vpop.f32.mrb[11].mxu1 }
 0x109   :  { %v1636_v48 = vadd.f32 %v1108_v46, %v1107_v43 }
 0x10d   :  { %v1110_v49 = vpop.f32.mrb[12].mxu0 }
 0x10e   :  { %v1111_v50 = vpop.f32.mrb[13].mxu0 }
 0x10f   :  { %v1638_v51 = vadd.f32 %v1111_v50, %v1110_v49  ;;  %v1113_v52 = vpop.f32.mrb[14].mxu0 }
 0x110   :  { %v1114_v53 = vpop.f32.mrb[15].mxu0 }
 0x111   :  { %v1640_v54 = vadd.f32 %v1114_v53, %v1113_v52 }
 0x115   :  { %v1150_v55 = vpop.f32.mrb[12].mxu1  ;;  %v761_v56 = vpop.f32.mrb[16].mxu0 }
 0x116   :  { %v1151_v57 = vpop.f32.mrb[13].mxu1  ;;  %v1225_v58 = vpop.f32.mrb[17].mxu0 }
 0x117   :  { %v1152_v59 = vadd.f32 %v1151_v57, %v1150_v55  ;;  %v1153_v60 = vpop.f32.mrb[14].mxu1  ;;  %v764_v61 = vpop.f32.mrb[18].mxu0 }
 0x118   :  { %v1154_v62 = vpop.f32.mrb[15].mxu1  ;;  %v1226_v63 = vpop.f32.mrb[19].mxu0 }
 0x119   :  { %v674_v0 = vadd.f32 %v1152_v59, %v1094_v20  ;;  %v1155_v1 = vadd.f32 %v1154_v62, %v1153_v60 }
 0x11b   :  { %v762_v3 = vadd.f32 %v761_v56, %v674_v0  ;;  %v677_v4 = vadd.f32 %v1155_v1, %v1097_v24 }
 0x11d   :  { %v822_v6 = vmul.f32 %v1645_v2, %v762_v3  ;;  %v765_v7 = vadd.f32 %v764_v61, %v677_v4  ;;  %v1156_v8 = vpop.f32.mrb[16].mxu1  ;;  %v769_v9 = vpop.f32.mrb[20].mxu0 }
 0x11e   :  { %v1157_v10 = vpop.f32.mrb[17].mxu1  ;;  %v1229_v11 = vpop.f32.mrb[21].mxu0 }
 0x11f   :  { %v842_v12 = vadd.f32 %v1650_v5, %v822_v6  ;;  %v823_v13 = vmul.f32 %v1645_v2, %v765_v7  ;;  %v1158_v14 = vadd.f32 %v1157_v10, %v1156_v8  ;;  %v1159_v15 = vpop.f32.mrb[18].mxu1  ;;  %v772_v16 = vpop.f32.mrb[22].mxu0 }
 0x120   :  { %v1160_v17 = vpop.f32.mrb[19].mxu1  ;;  %v1230_v19 = vpop.f32.mrb[23].mxu0 }
 0x121   :  { %v843_v20 = vadd.f32 %v1650_v5, %v823_v13  ;;  %v682_v21 = vadd.f32 %v1158_v14, %v1100_v30  ;;  %v1161_v22 = vadd.f32 %v1160_v17, %v1159_v15  ;;  %v855_v23 = vmax.f32 %v842_v12, 0.0 }
 0x123   :  { %v856_v24 = vmax.f32 %v843_v20, 0.0  ;;  %v770_v26 = vadd.f32 %v769_v9, %v682_v21  ;;  %v685_v27 = vadd.f32 %v1161_v22, %v1103_v36 }
 0x125   :  { %v1044_v28 = vpack.c.bf16 %v856_v24, %v855_v23  ;;  %v824_v29 = vmul.f32 %v1645_v2, %v770_v26  ;;  %v773_v31 = vadd.f32 %v772_v16, %v685_v27  ;;  %v1162_v33 = vpop.f32.mrb[20].mxu1  ;;  %v777_v34 = vpop.f32.mrb[24].mxu0 }
 0x126   :  { %v1163_v35 = vpop.f32.mrb[21].mxu1  ;;  %v1233_v38 = vpop.f32.mrb[25].mxu0 }
 0x127   :  { %1045 = vst [vmem:[%s1712_s4] sm:$0xff] %v1044_v28   ;;  %v844_v39 = vadd.f32 %v1650_v5, %v824_v29  ;;  %v825_v30 = vmul.f32 %v1645_v2, %v773_v31  ;;  %v1164_v40 = vadd.f32 %v1163_v35, %v1162_v33  ;;  %v1165_v41 = vpop.f32.mrb[22].mxu1  ;;  %v780_v43 = vpop.f32.mrb[26].mxu0 }
 0x128   :  { %v1166_v36 = vpop.f32.mrb[23].mxu1  ;;  %v1234_v45 = vpop.f32.mrb[27].mxu0 }
 0x129   :  { %v845_v46 = vadd.f32 %v1650_v5, %v825_v30  ;;  %v690_v47 = vadd.f32 %v1164_v40, %v1632_v42  ;;  %v1167_v49 = vadd.f32 %v1166_v36, %v1165_v41  ;;  %v857_v50 = vmax.f32 %v844_v39, 0.0 }
 0x12b   :  { %v858_v52 = vmax.f32 %v845_v46, 0.0  ;;  %v778_v53 = vadd.f32 %v777_v34, %v690_v47  ;;  %v693_v55 = vadd.f32 %v1167_v49, %v1636_v48 }
 0x12d   :  { %v1049_v56 = vpack.c.bf16 %v858_v52, %v857_v50  ;;  %v826_v57 = vmul.f32 %v1645_v2, %v778_v53  ;;  %v781_v58 = vadd.f32 %v780_v43, %v693_v55  ;;  %v1168_v59 = vpop.f32.mrb[24].mxu1  ;;  %v785_v60 = vpop.f32.mrb[28].mxu0 }
 0x12e   :  { %v1169_v61 = vpop.f32.mrb[25].mxu1  ;;  %v1237_v62 = vpop.f32.mrb[29].mxu0 }
 0x12f   :  { %1071 = vst [vmem:[%s1712_s4 + $0x8] sm:$0xff] %v1049_v56   ;;  %v846_v42 = vadd.f32 %v1650_v5, %v826_v57  ;;  %v827_v63 = vmul.f32 %v1645_v2, %v781_v58  ;;  %v1170_v0 = vadd.f32 %v1169_v61, %v1168_v59  ;;  %v1171_v1 = vpop.f32.mrb[26].mxu1  ;;  %v788_v3 = vpop.f32.mrb[30].mxu0 }
 0x130   :  { %v1172_v48 = vpop.f32.mrb[27].mxu1  ;;  %v1238_v4 = vpop.f32.mrb[31].mxu0 }
 0x131   :  { %v847_v6 = vadd.f32 %v1650_v5, %v827_v63  ;;  %v698_v7 = vadd.f32 %v1170_v0, %v1638_v51  ;;  %v1173_v8 = vadd.f32 %v1172_v48, %v1171_v1  ;;  %v859_v9 = vmax.f32 %v846_v42, 0.0 }
 0x133   :  { %v860_v10 = vmax.f32 %v847_v6, 0.0  ;;  %v786_v11 = vadd.f32 %v785_v60, %v698_v7  ;;  %v701_v12 = vadd.f32 %v1173_v8, %v1640_v54 }
 0x135   :  { %v1054_v13 = vpack.c.bf16 %v860_v10, %v859_v9  ;;  %v828_v14 = vmul.f32 %v1645_v2, %v786_v11  ;;  %v789_v15 = vadd.f32 %v788_v3, %v701_v12  ;;  %v1174_v16 = vpop.f32.mrb[28].mxu1  ;;  %v793_v17 = vpop.f32.mrb[32].mxu0 }
 0x136   :  { %v1175_v19 = vpop.f32.mrb[29].mxu1  ;;  %v1241_v20 = vpop.f32.mrb[33].mxu0 }
 0x137   :  { %1072 = vst [vmem:[%s1712_s4 + $0x10] sm:$0xff] %v1054_v13   ;;  %v848_v51 = vadd.f32 %v1650_v5, %v828_v14  ;;  %v829_v21 = vmul.f32 %v1645_v2, %v789_v15  ;;  %v1176_v22 = vadd.f32 %v1175_v19, %v1174_v16  ;;  %v1177_v23 = vpop.f32.mrb[30].mxu1  ;;  %v796_v24 = vpop.f32.mrb[34].mxu0 }
 0x138   :  { %v1178_v54 = vpop.f32.mrb[31].mxu1  ;;  %v1242_v26 = vpop.f32.mrb[35].mxu0 }
 0x139   :  { %v849_v27 = vadd.f32 %v1650_v5, %v829_v21  ;;  %v706_v28 = vadd.f32 %v1176_v22, %v1624_v18  ;;  %v1179_v29 = vadd.f32 %v1178_v54, %v1177_v23  ;;  %v861_v31 = vmax.f32 %v848_v51, 0.0 }
 0x13b   :  { %v862_v33 = vmax.f32 %v849_v27, 0.0  ;;  %v794_v34 = vadd.f32 %v793_v17, %v706_v28  ;;  %v709_v35 = vadd.f32 %v1179_v29, %v1626_v25 }
 0x13d   :  { %v1059_v38 = vpack.c.bf16 %v862_v33, %v861_v31  ;;  %v830_v39 = vmul.f32 %v1645_v2, %v794_v34  ;;  %v797_v30 = vadd.f32 %v796_v24, %v709_v35  ;;  %v1180_v40 = vpop.f32.mrb[32].mxu1  ;;  %v801_v41 = vpop.f32.mrb[36].mxu0 }
 0x13e   :  { %v1181_v43 = vpop.f32.mrb[33].mxu1  ;;  %v1245_v36 = vpop.f32.mrb[37].mxu0 }
 0x13f   :  { %1073 = vst [vmem:[%s1712_s4 + $0x18] sm:$0xff] %v1059_v38   ;;  %v850_v18 = vadd.f32 %v1650_v5, %v830_v39  ;;  %v831_v45 = vmul.f32 %v1645_v2, %v797_v30  ;;  %v1182_v46 = vadd.f32 %v1181_v43, %v1180_v40  ;;  %v1183_v47 = vpop.f32.mrb[34].mxu1  ;;  %v804_v49 = vpop.f32.mrb[38].mxu0 }
 0x140   :  { %v1184_v25 = vpop.f32.mrb[35].mxu1  ;;  %v1246_v50 = vpop.f32.mrb[39].mxu0 }
 0x141   :  { %v851_v52 = vadd.f32 %v1650_v5, %v831_v45  ;;  %v714_v53 = vadd.f32 %v1182_v46, %v1628_v32  ;;  %v1185_v55 = vadd.f32 %v1184_v25, %v1183_v47  ;;  %v863_v56 = vmax.f32 %v850_v18, 0.0 }
 0x143   :  { %v864_v57 = vmax.f32 %v851_v52, 0.0  ;;  %v802_v58 = vadd.f32 %v801_v41, %v714_v53  ;;  %v717_v59 = vadd.f32 %v1185_v55, %v1630_v37 }
 0x145   :  { %v1064_v60 = vpack.c.bf16 %v864_v57, %v863_v56  ;;  %v832_v61 = vmul.f32 %v1645_v2, %v802_v58  ;;  %v805_v62 = vadd.f32 %v804_v49, %v717_v59  ;;  %v1186_v42 = vpop.f32.mrb[36].mxu1  ;;  %v809_v63 = vpop.f32.mrb[40].mxu0 }
 0x146   :  { %v1187_v0 = vpop.f32.mrb[37].mxu1  ;;  %v1249_v1 = vpop.f32.mrb[41].mxu0 }
 0x147   :  { %1074 = vst [vmem:[%s1712_s4 + $0x20] sm:$0xff] %v1064_v60   ;;  %v852_v32 = vadd.f32 %v1650_v5, %v832_v61  ;;  %v833_v3 = vmul.f32 %v1645_v2, %v805_v62  ;;  %v1188_v48 = vadd.f32 %v1187_v0, %v1186_v42  ;;  %v1189_v4 = vpop.f32.mrb[38].mxu1  ;;  %v812_v6 = vpop.f32.mrb[42].mxu0 }
 0x148   :  { %v1190_v37 = vpop.f32.mrb[39].mxu1  ;;  %v1250_v7 = vpop.f32.mrb[43].mxu0 }
 0x149   :  { %v853_v8 = vadd.f32 %v1650_v5, %v833_v3  ;;  %v722_v9 = vadd.f32 %v1188_v48, %v1634_v44  ;;  %v865_v10 = vmax.f32 %v852_v32, 0.0 }
 0x14b   :  { %v866_v11 = vmax.f32 %v853_v8, 0.0  ;;  %v810_v12 = vadd.f32 %v809_v63, %v722_v9 }
 0x14d   :  { %v1069_v13 = vpack.c.bf16 %v866_v11, %v865_v10  ;;  %v834_v14 = vmul.f32 %v1645_v2, %v810_v12 }
 0x14f   :  { %1075 = vst [vmem:[%s1712_s4 + $0x28] sm:$0xff] %v1069_v13   ;;  %v854_v15 = vadd.f32 %v1650_v5, %v834_v14 }
 0x151   :  { %v867_v16 = vmax.f32 %v854_v15, 0.0 }
 0x153   :  { %v1040_v17 = vpack.c.bf16 %v867_v16, %v867_v16 }
 0x155   :  { %933 = vst [vmem:[%s1712_s4 + $0x30] sm:$0xf] %v1040_v17 }

// kernel: _lambda_.107
= control target key start
LH: loop header
LB: loop body
LE: loop exit
PB: predicated region body
PF: predicated region fallthrough
CT: control target
= control target key end

     0   :  { %v538_v1 = vmov 0   ;;  %v270_v24 = vlaneseq  ;;  %s745_s1 = inlined_call_operand.vmem [shape: bf16[128,256], index: 1, kind: input, shape index: {}]   ;;  %s746_s0 = inlined_call_operand.vmem [shape: bf16[104,128], index: 0, kind: input, shape index: {}]   ;;  %s747_s2 = inlined_call_operand.vmem [shape: f32[1,256], index: 2, kind: input, shape index: {}]   ;;  %s748_s3 = inlined_call_operand.vmem [shape: f32[1,256], index: 3, kind: input, shape index: {}]   ;;  %s749_s4 = inlined_call_operand.vmem [shape: bf16[104,256], index: 4, kind: output, shape index: {}]  }
   0x1   :  { %v507_v0 = vld [vmem:[%s745_s1 + $0x4] ss:$8 sps:$4 sm:$0xff]   ;;  %199 = vmatprep.mubr.bf16.mxu0 %v538_v1  ;;  %239 = vmatprep.mubr.bf16.mxu1 %v538_v1  ;;  %v509_v2 = vld [vmem:[%s745_s1] ss:$8 sps:$4 sm:$0xff]   ;;  %v510_v3 = vld [vmem:[%s745_s1 + $0x14] ss:$8 sps:$4 sm:$0xff]  }
   0x2   :  { %167 = vmatprep.subr.bf16.mxu0 %v507_v0  ;;  %490 = vmatprep.subr.bf16.mxu1 %v507_v0  ;;  %v512_v4 = vld [vmem:[%s745_s1 + $0x10] ss:$8 sps:$4 sm:$0xff]   ;;  %v513_v5 = vld [vmem:[%s745_s1 + $0x24] ss:$8 sps:$4 sm:$0xff]   ;;  %v515_v6 = vld [vmem:[%s745_s1 + $0x20] ss:$8 sps:$4 sm:$0xff]  }
   0x3   :  { %168 = vmatpush1.bf16.msra.mxu0 %v509_v2  ;;  %498 = vmatpush1.bf16.msra.mxu1 %v509_v2  ;;  %v516_v7 = vld [vmem:[%s745_s1 + $0x34] ss:$8 sps:$4 sm:$0xff]   ;;  %v518_v8 = vld [vmem:[%s745_s1 + $0x30] ss:$8 sps:$4 sm:$0xff]   ;;  %v519_v9 = vld [vmem:[%s745_s1 + $0x44] ss:$8 sps:$4 sm:$0xff]  }
   0x4   :  { %169 = vmatprep.subr.bf16.mxu0 %v510_v3  ;;  %491 = vmatprep.subr.bf16.mxu1 %v510_v3  ;;  %v521_v10 = vld [vmem:[%s745_s1 + $0x40] ss:$8 sps:$4 sm:$0xff]   ;;  %v522_v11 = vld [vmem:[%s745_s1 + $0x54] ss:$8 sps:$4 sm:$0xff]   ;;  %v524_v12 = vld [vmem:[%s745_s1 + $0x50] ss:$8 sps:$4 sm:$0xff]  }
   0x5   :  { %v525_v13 = vld [vmem:[%s745_s1 + $0x64] ss:$8 sps:$4 sm:$0xff]   ;;  %v527_v14 = vld [vmem:[%s745_s1 + $0x60] ss:$8 sps:$4 sm:$0xff]   ;;  %v528_v15 = vld [vmem:[%s745_s1 + $0x74] ss:$8 sps:$4 sm:$0xff]  }
   0x6   :  { %v530_v16 = vld [vmem:[%s745_s1 + $0x70] ss:$8 sps:$4 sm:$0xff]   ;;  %v531_v17 = vld [vmem:[%s746_s0] sm:$0xff]   ;;  %v533_v19 = vld [vmem:[%s746_s0 + $0x8] sm:$0xff]   ;;  %v271_v25 = vshrl.u32 %v270_v24, 7 }
   0x7   :  { %170 = vmatpush1.bf16.msra.mxu0 %v512_v4  ;;  %499 = vmatpush1.bf16.msra.mxu1 %v512_v4  ;;  %v532_v18 = vld [vmem:[%s746_s0 + $0x20] sm:$0xff]   ;;  %v534_v20 = vld [vmem:[%s746_s0 + $0x28] sm:$0xff]   ;;  %v535_v21 = vld [vmem:[%s746_s0 + $0x10] sm:$0xff]  }
   0x8   :  { %171 = vmatprep.subr.bf16.mxu0 %v513_v5  ;;  %492 = vmatprep.subr.bf16.mxu1 %v513_v5  ;;  %v536_v22 = vld [vmem:[%s746_s0 + $0x30] ss:$0 sps:$4 sm:$0xff]   ;;  %v537_v23 = vld [vmem:[%s746_s0 + $0x18] sm:$0xff]   ;;  %v272_v26 = vsub.s32 0, %v271_v25  ;;  %v268_v27 = vld [vmem:[%s747_s2] sm:$0x3] }
   0x9   :  { %v276_v28 = vsub.s32 1, %v271_v25  ;;  %v306_v29 = vld [vmem:[%s748_s3] sm:$0x3] }
   0xa   :  { %v646_v30 = vrot.slane %v268_v27, %v272_v26  ;;  %v650_v32 = vrot.slane %v306_v29, %v272_v26 }
   0xb   :  { %172 = vmatpush1.bf16.msra.mxu0 %v515_v6  ;;  %500 = vmatpush1.bf16.msra.mxu1 %v515_v6  ;;  %v648_v31 = vrot.slane %v268_v27, %v276_v28  ;;  %v652_v34 = vrot.slane %v306_v29, %v276_v28 }
   0xc   :  { %173 = vmatprep.subr.bf16.mxu0 %v516_v7  ;;  %493 = vmatprep.subr.bf16.mxu1 %v516_v7 }
   0xf   :  { %174 = vmatpush1.bf16.msra.mxu0 %v518_v8  ;;  %501 = vmatpush1.bf16.msra.mxu1 %v518_v8 }
  0x10   :  { %175 = vmatprep.subr.bf16.mxu0 %v519_v9  ;;  %494 = vmatprep.subr.bf16.mxu1 %v519_v9 }
  0x13   :  { %176 = vmatpush1.bf16.msra.mxu0 %v521_v10  ;;  %502 = vmatpush1.bf16.msra.mxu1 %v521_v10 }
  0x14   :  { %177 = vmatprep.subr.bf16.mxu0 %v522_v11  ;;  %495 = vmatprep.subr.bf16.mxu1 %v522_v11 }
  0x17   :  { %178 = vmatpush1.bf16.msra.mxu0 %v524_v12  ;;  %503 = vmatpush1.bf16.msra.mxu1 %v524_v12 }
  0x18   :  { %179 = vmatprep.subr.bf16.mxu0 %v525_v13  ;;  %496 = vmatprep.subr.bf16.mxu1 %v525_v13 }
  0x1b   :  { %180 = vmatpush1.bf16.msra.mxu0 %v527_v14  ;;  %504 = vmatpush1.bf16.msra.mxu1 %v527_v14 }
  0x1c   :  { %181 = vmatprep.subr.bf16.mxu0 %v528_v15  ;;  %497 = vmatprep.subr.bf16.mxu1 %v528_v15 }
  0x1f   :  { %182 = vmatpush1.bf16.msra.mxu0 %v530_v16  ;;  %505 = vmatpush1.bf16.msra.mxu1 %v530_v16 }
  0x22   :  { %200 = vmatmul.mubr.bf16.vlgmr.msra.gmra.mrb[0].mxu0 %v531_v17  ;;  %240 = vmatmul.mubr.bf16.vlgmr.msra.gmra.mrb[0].mxu1 %v532_v18 }
  0x23   :  { %209 = vmatprep.mubr.bf16.mxu0 %v538_v1  ;;  %249 = vmatprep.mubr.bf16.mxu1 %v538_v1 }
  0x2a   :  { %210 = vmatmul.mubr.bf16.gmra.mrb[4].mxu0 %v533_v19  ;;  %250 = vmatmul.mubr.bf16.gmra.mrb[4].mxu1 %v534_v20 }
  0x2b   :  { %219 = vmatprep.mubr.bf16.mxu0 %v538_v1  ;;  %259 = vmatprep.mubr.bf16.mxu1 %v538_v1 }
  0x32   :  { %220 = vmatmul.mubr.bf16.gmra.mrb[8].mxu0 %v535_v21  ;;  %260 = vmatmul.mubr.bf16.gmra.mrb[8].mxu1 %v536_v22 }
  0x33   :  { %229 = vmatprep.mubr.bf16.mxu0 %v538_v1 }
  0x3a   :  { %230 = vmatmul.mubr.bf16.gmra.mrb[12].mxu0 %v537_v23 }
  0xf5   :  { %v201_v33 = vpop.f32.mrb[0].mxu0  ;;  %v241_v35 = vpop.f32.mrb[0].mxu1 }
  0xf6   :  { %v280_v36 = vmul.f32 %v646_v30, %v201_v33  ;;  %v203_v37 = vpop.f32.mrb[1].mxu0  ;;  %v296_v38 = vmul.f32 %v646_v30, %v241_v35  ;;  %v243_v39 = vpop.f32.mrb[1].mxu1 }
  0xf7   :  { %v281_v40 = vmul.f32 %v648_v31, %v203_v37  ;;  %v205_v41 = vpop.f32.mrb[2].mxu0  ;;  %v297_v42 = vmul.f32 %v648_v31, %v243_v39  ;;  %v245_v43 = vpop.f32.mrb[2].mxu1 }
  0xf8   :  { %v318_v44 = vadd.f32 %v650_v32, %v280_v36  ;;  %v282_v45 = vmul.f32 %v646_v30, %v205_v41  ;;  %v207_v46 = vpop.f32.mrb[3].mxu0  ;;  %v334_v47 = vadd.f32 %v650_v32, %v296_v38  ;;  %v298_v48 = vmul.f32 %v646_v30, %v245_v43  ;;  %v247_v49 = vpop.f32.mrb[3].mxu1 }
  0xf9   :  { %v319_v50 = vadd.f32 %v652_v34, %v281_v40  ;;  %v283_v51 = vmul.f32 %v648_v31, %v207_v46  ;;  %v335_v52 = vadd.f32 %v652_v34, %v297_v42  ;;  %v299_v53 = vmul.f32 %v648_v31, %v247_v49 }
  0xfa   :  { %v320_v54 = vadd.f32 %v650_v32, %v282_v45  ;;  %v336_v55 = vadd.f32 %v650_v32, %v298_v48 }
  0xfb   :  { %v477_v56 = vpack.c.bf16 %v319_v50, %v318_v44  ;;  %v321_v57 = vadd.f32 %v652_v34, %v283_v51  ;;  %v485_v58 = vpack.c.bf16 %v335_v52, %v334_v47  ;;  %v337_v59 = vadd.f32 %v652_v34, %v299_v53 }
  0xfd   :  { %424 = vst [vmem:[%s749_s4] sm:$0xff] %v477_v56  ;;  %v478_v60 = vpack.c.bf16 %v321_v57, %v320_v54  ;;  %v211_v61 = vpop.f32.mrb[4].mxu0  ;;  %432 = vst [vmem:[%s749_s4 + $0x40] sm:$0xff] %v485_v58  ;;  %v486_v62 = vpack.c.bf16 %v337_v59, %v336_v55  ;;  %v251_v63 = vpop.f32.mrb[4].mxu1 }
  0xfe   :  { %v284_v0 = vmul.f32 %v646_v30, %v211_v61  ;;  %v213_v1 = vpop.f32.mrb[5].mxu0  ;;  %v300_v2 = vmul.f32 %v646_v30, %v251_v63  ;;  %v253_v3 = vpop.f32.mrb[5].mxu1 }
  0xff   :  { %425 = vst [vmem:[%s749_s4 + $0x8] sm:$0xff] %v478_v60  ;;  %v285_v4 = vmul.f32 %v648_v31, %v213_v1  ;;  %v215_v5 = vpop.f32.mrb[6].mxu0  ;;  %433 = vst [vmem:[%s749_s4 + $0x48] sm:$0xff] %v486_v62  ;;  %v301_v6 = vmul.f32 %v648_v31, %v253_v3  ;;  %v255_v7 = vpop.f32.mrb[6].mxu1 }
 0x100   :  { %v322_v8 = vadd.f32 %v650_v32, %v284_v0  ;;  %v286_v9 = vmul.f32 %v646_v30, %v215_v5  ;;  %v217_v10 = vpop.f32.mrb[7].mxu0  ;;  %v338_v11 = vadd.f32 %v650_v32, %v300_v2  ;;  %v302_v12 = vmul.f32 %v646_v30, %v255_v7  ;;  %v257_v13 = vpop.f32.mrb[7].mxu1 }
 0x101   :  { %v323_v14 = vadd.f32 %v652_v34, %v285_v4  ;;  %v287_v15 = vmul.f32 %v648_v31, %v217_v10  ;;  %v339_v16 = vadd.f32 %v652_v34, %v301_v6  ;;  %v303_v17 = vmul.f32 %v648_v31, %v257_v13 }
 0x102   :  { %v324_v18 = vadd.f32 %v650_v32, %v286_v9  ;;  %v340_v19 = vadd.f32 %v650_v32, %v302_v12 }
 0x103   :  { %v479_v20 = vpack.c.bf16 %v323_v14, %v322_v8  ;;  %v325_v21 = vadd.f32 %v652_v34, %v287_v15  ;;  %v487_v22 = vpack.c.bf16 %v339_v16, %v338_v11  ;;  %v341_v23 = vadd.f32 %v652_v34, %v303_v17 }
 0x105   :  { %426 = vst [vmem:[%s749_s4 + $0x10] sm:$0xff] %v479_v20  ;;  %v480_v24 = vpack.c.bf16 %v325_v21, %v324_v18  ;;  %v221_v25 = vpop.f32.mrb[8].mxu0  ;;  %434 = vst [vmem:[%s749_s4 + $0x50] sm:$0xff] %v487_v22  ;;  %v488_v26 = vpack.c.bf16 %v341_v23, %v340_v19  ;;  %v261_v27 = vpop.f32.mrb[8].mxu1 }
 0x106   :  { %v288_v28 = vmul.f32 %v646_v30, %v221_v25  ;;  %v223_v29 = vpop.f32.mrb[9].mxu0  ;;  %v304_v33 = vmul.f32 %v646_v30, %v261_v27  ;;  %v263_v35 = vpop.f32.mrb[9].mxu1 }
 0x107   :  { %427 = vst [vmem:[%s749_s4 + $0x18] sm:$0xff] %v480_v24  ;;  %v289_v36 = vmul.f32 %v648_v31, %v223_v29  ;;  %v225_v37 = vpop.f32.mrb[10].mxu0  ;;  %435 = vst [vmem:[%s749_s4 + $0x58] sm:$0xff] %v488_v26  ;;  %v305_v38 = vmul.f32 %v648_v31, %v263_v35  ;;  %v265_v39 = vpop.f32.mrb[10].mxu1 }
 0x108   :  { %v326_v40 = vadd.f32 %v650_v32, %v288_v28  ;;  %v290_v41 = vmul.f32 %v646_v30, %v225_v37  ;;  %v227_v42 = vpop.f32.mrb[11].mxu0  ;;  %v342_v43 = vadd.f32 %v650_v32, %v304_v33  ;;  %v266_v44 = vpop.f32.mrb[11].mxu1 }
 0x109   :  { %v327_v45 = vadd.f32 %v652_v34, %v289_v36  ;;  %v291_v46 = vmul.f32 %v648_v31, %v227_v42  ;;  %v343_v47 = vadd.f32 %v652_v34, %v305_v38 }
 0x10a   :  { %v328_v48 = vadd.f32 %v650_v32, %v290_v41 }
 0x10b   :  { %v481_v49 = vpack.c.bf16 %v327_v45, %v326_v40  ;;  %v329_v50 = vadd.f32 %v652_v34, %v291_v46  ;;  %v489_v51 = vpack.c.bf16 %v343_v47, %v342_v43 }
 0x10d   :  { %428 = vst [vmem:[%s749_s4 + $0x20] sm:$0xff] %v481_v49  ;;  %v482_v52 = vpack.c.bf16 %v329_v50, %v328_v48  ;;  %v231_v53 = vpop.f32.mrb[12].mxu0  ;;  %436 = vst [vmem:[%s749_s4 + $0x60] sm:$0xff] %v489_v51 }
 0x10e   :  { %v292_v54 = vmul.f32 %v646_v30, %v231_v53  ;;  %v233_v55 = vpop.f32.mrb[13].mxu0 }
 0x10f   :  { %429 = vst [vmem:[%s749_s4 + $0x28] sm:$0xff] %v482_v52  ;;  %v293_v56 = vmul.f32 %v648_v31, %v233_v55  ;;  %v235_v57 = vpop.f32.mrb[14].mxu0 }
 0x110   :  { %v330_v58 = vadd.f32 %v650_v32, %v292_v54  ;;  %v294_v59 = vmul.f32 %v646_v30, %v235_v57  ;;  %v237_v60 = vpop.f32.mrb[15].mxu0 }
 0x111   :  { %v331_v61 = vadd.f32 %v652_v34, %v293_v56  ;;  %v295_v62 = vmul.f32 %v648_v31, %v237_v60 }
 0x112   :  { %v332_v63 = vadd.f32 %v650_v32, %v294_v59 }
 0x113   :  { %v483_v0 = vpack.c.bf16 %v331_v61, %v330_v58  ;;  %v333_v1 = vadd.f32 %v652_v34, %v295_v62 }
 0x115   :  { %430 = vst [vmem:[%s749_s4 + $0x30] sm:$0xff] %v483_v0  ;;  %v484_v2 = vpack.c.bf16 %v333_v1, %v332_v63 }
 0x117   :  { %431 = vst [vmem:[%s749_s4 + $0x38] sm:$0xff] %v484_v2 }

// kernel: _lambda_.108
= control target key start
LH: loop header
LB: loop body
LE: loop exit
PB: predicated region body
PF: predicated region fallthrough
CT: control target
= control target key end

     0   :  { %v632_v1 = vmov 0   ;;  %v273_v24 = vlaneseq  ;;  %s947_s1 = inlined_call_operand.vmem [shape: bf16[128,256], index: 1, kind: input, shape index: {}]   ;;  %s948_s0 = inlined_call_operand.vmem [shape: bf16[104,128], index: 0, kind: input, shape index: {}]   ;;  %s949_s2 = inlined_call_operand.vmem [shape: f32[1,256], index: 2, kind: input, shape index: {}]   ;;  %s950_s3 = inlined_call_operand.vmem [shape: f32[1,256], index: 3, kind: input, shape index: {}]   ;;  %s951_s4 = inlined_call_operand.vmem [shape: bf16[104,256], index: 4, kind: input, shape index: {}]   ;;  %s952_s5 = inlined_call_operand.vmem [shape: bf16[104,256], index: 5, kind: output, shape index: {}]  }
   0x1   :  { %v601_v0 = vld [vmem:[%s947_s1 + $0x4] ss:$8 sps:$4 sm:$0xff]   ;;  %202 = vmatprep.mubr.bf16.mxu0 %v632_v1  ;;  %242 = vmatprep.mubr.bf16.mxu1 %v632_v1  ;;  %v603_v2 = vld [vmem:[%s947_s1] ss:$8 sps:$4 sm:$0xff]   ;;  %v604_v3 = vld [vmem:[%s947_s1 + $0x14] ss:$8 sps:$4 sm:$0xff]  }
   0x2   :  { %170 = vmatprep.subr.bf16.mxu0 %v601_v0  ;;  %584 = vmatprep.subr.bf16.mxu1 %v601_v0  ;;  %v606_v4 = vld [vmem:[%s947_s1 + $0x10] ss:$8 sps:$4 sm:$0xff]   ;;  %v607_v5 = vld [vmem:[%s947_s1 + $0x24] ss:$8 sps:$4 sm:$0xff]   ;;  %v609_v6 = vld [vmem:[%s947_s1 + $0x20] ss:$8 sps:$4 sm:$0xff]  }
   0x3   :  { %171 = vmatpush1.bf16.msra.mxu0 %v603_v2  ;;  %592 = vmatpush1.bf16.msra.mxu1 %v603_v2  ;;  %v610_v7 = vld [vmem:[%s947_s1 + $0x34] ss:$8 sps:$4 sm:$0xff]   ;;  %v612_v8 = vld [vmem:[%s947_s1 + $0x30] ss:$8 sps:$4 sm:$0xff]   ;;  %v613_v9 = vld [vmem:[%s947_s1 + $0x44] ss:$8 sps:$4 sm:$0xff]  }
   0x4   :  { %172 = vmatprep.subr.bf16.mxu0 %v604_v3  ;;  %585 = vmatprep.subr.bf16.mxu1 %v604_v3  ;;  %v615_v10 = vld [vmem:[%s947_s1 + $0x40] ss:$8 sps:$4 sm:$0xff]   ;;  %v616_v11 = vld [vmem:[%s947_s1 + $0x54] ss:$8 sps:$4 sm:$0xff]   ;;  %v618_v12 = vld [vmem:[%s947_s1 + $0x50] ss:$8 sps:$4 sm:$0xff]  }
   0x5   :  { %v619_v13 = vld [vmem:[%s947_s1 + $0x64] ss:$8 sps:$4 sm:$0xff]   ;;  %v621_v14 = vld [vmem:[%s947_s1 + $0x60] ss:$8 sps:$4 sm:$0xff]   ;;  %v622_v15 = vld [vmem:[%s947_s1 + $0x74] ss:$8 sps:$4 sm:$0xff]  }
   0x6   :  { %v624_v16 = vld [vmem:[%s947_s1 + $0x70] ss:$8 sps:$4 sm:$0xff]   ;;  %v625_v17 = vld [vmem:[%s948_s0] sm:$0xff]   ;;  %v627_v19 = vld [vmem:[%s948_s0 + $0x8] sm:$0xff]   ;;  %v274_v25 = vshrl.u32 %v273_v24, 7 }
   0x7   :  { %173 = vmatpush1.bf16.msra.mxu0 %v606_v4  ;;  %593 = vmatpush1.bf16.msra.mxu1 %v606_v4  ;;  %v626_v18 = vld [vmem:[%s948_s0 + $0x20] sm:$0xff]   ;;  %v628_v20 = vld [vmem:[%s948_s0 + $0x28] sm:$0xff]   ;;  %v629_v21 = vld [vmem:[%s948_s0 + $0x10] sm:$0xff]  }
   0x8   :  { %174 = vmatprep.subr.bf16.mxu0 %v607_v5  ;;  %586 = vmatprep.subr.bf16.mxu1 %v607_v5  ;;  %v630_v22 = vld [vmem:[%s948_s0 + $0x30] ss:$0 sps:$4 sm:$0xff]   ;;  %v631_v23 = vld [vmem:[%s948_s0 + $0x18] sm:$0xff]   ;;  %v275_v26 = vsub.s32 0, %v274_v25  ;;  %v279_v27 = vsub.s32 1, %v274_v25  ;;  %v347_v30 = vld [vmem:[%s951_s4] sm:$0xff] }
   0x9   :  { %v271_v28 = vld [vmem:[%s949_s2] sm:$0x3]  ;;  %v751_v31 = vld [vmem:[%s951_s4 + $0x8] sm:$0xff]  ;;  %v756_v32 = vld [vmem:[%s951_s4 + $0x10] sm:$0xff]  ;;  %v360_v39 = vunpack.c.l.bf16 %v347_v30  ;;  %v361_v41 = vunpack.c.h.bf16 %v347_v30 }
   0xa   :  { %v309_v29 = vld [vmem:[%s950_s3] sm:$0x3]  ;;  %v758_v33 = vrot.slane %v271_v28, %v275_v26  ;;  %v760_v34 = vrot.slane %v271_v28, %v279_v27  ;;  %v768_v36 = vld [vmem:[%s951_s4 + $0x48] sm:$0xff]  ;;  %v773_v37 = vld [vmem:[%s951_s4 + $0x18] sm:$0xff]  ;;  %v362_v43 = vunpack.c.l.bf16 %v751_v31  ;;  %v363_v44 = vunpack.c.h.bf16 %v751_v31 }
   0xb   :  { %175 = vmatpush1.bf16.msra.mxu0 %v609_v6  ;;  %594 = vmatpush1.bf16.msra.mxu1 %v609_v6  ;;  %v355_v35 = vld [vmem:[%s951_s4 + $0x40] sm:$0xff]  ;;  %v775_v38 = vrot.slane %v309_v29, %v275_v26  ;;  %v777_v40 = vrot.slane %v309_v29, %v279_v27  ;;  %v364_v45 = vunpack.c.l.bf16 %v756_v32  ;;  %v365_v46 = vunpack.c.h.bf16 %v756_v32  ;;  %v791_v47 = vld [vmem:[%s951_s4 + $0x50] sm:$0xff]  ;;  %v796_v48 = vld [vmem:[%s951_s4 + $0x58] sm:$0xff] }
   0xc   :  { %176 = vmatprep.subr.bf16.mxu0 %v610_v7  ;;  %587 = vmatprep.subr.bf16.mxu1 %v610_v7  ;;  %v782_v42 = vld [vmem:[%s951_s4 + $0x20] sm:$0xff]  ;;  %v801_v49 = vld [vmem:[%s951_s4 + $0x28] sm:$0xff]  ;;  %v376_v50 = vunpack.c.l.bf16 %v355_v35  ;;  %v377_v51 = vunpack.c.h.bf16 %v355_v35  ;;  %v378_v52 = vunpack.c.l.bf16 %v768_v36  ;;  %v366_v53 = vunpack.c.l.bf16 %v773_v37 }
   0xd   :  { %v379_v54 = vunpack.c.h.bf16 %v768_v36  ;;  %v367_v55 = vunpack.c.h.bf16 %v773_v37  ;;  %v368_v56 = vunpack.c.l.bf16 %v782_v42  ;;  %v369_v57 = vunpack.c.h.bf16 %v782_v42  ;;  %v812_v58 = vld [vmem:[%s951_s4 + $0x60] sm:$0xff] }
   0xe   :  { %v380_v61 = vunpack.c.l.bf16 %v791_v47  ;;  %v381_v62 = vunpack.c.h.bf16 %v791_v47  ;;  %v382_v63 = vunpack.c.l.bf16 %v796_v48  ;;  %v370_v0 = vunpack.c.l.bf16 %v801_v49 }
   0xf   :  { %177 = vmatpush1.bf16.msra.mxu0 %v612_v8  ;;  %595 = vmatpush1.bf16.msra.mxu1 %v612_v8  ;;  %v383_v5 = vunpack.c.h.bf16 %v796_v48  ;;  %v371_v6 = vunpack.c.h.bf16 %v801_v49 }
  0x10   :  { %178 = vmatprep.subr.bf16.mxu0 %v613_v9  ;;  %588 = vmatprep.subr.bf16.mxu1 %v613_v9 }
  0x13   :  { %179 = vmatpush1.bf16.msra.mxu0 %v615_v10  ;;  %596 = vmatpush1.bf16.msra.mxu1 %v615_v10 }
  0x14   :  { %180 = vmatprep.subr.bf16.mxu0 %v616_v11  ;;  %589 = vmatprep.subr.bf16.mxu1 %v616_v11  ;;  %v384_v11 = vunpack.c.l.bf16 %v812_v58 }
  0x17   :  { %181 = vmatpush1.bf16.msra.mxu0 %v618_v12  ;;  %597 = vmatpush1.bf16.msra.mxu1 %v618_v12  ;;  %v385_v12 = vunpack.c.h.bf16 %v812_v58 }
  0x18   :  { %182 = vmatprep.subr.bf16.mxu0 %v619_v13  ;;  %590 = vmatprep.subr.bf16.mxu1 %v619_v13 }
  0x1b   :  { %183 = vmatpush1.bf16.msra.mxu0 %v621_v14  ;;  %598 = vmatpush1.bf16.msra.mxu1 %v621_v14 }
  0x1c   :  { %184 = vmatprep.subr.bf16.mxu0 %v622_v15  ;;  %591 = vmatprep.subr.bf16.mxu1 %v622_v15 }
  0x1f   :  { %185 = vmatpush1.bf16.msra.mxu0 %v624_v16  ;;  %599 = vmatpush1.bf16.msra.mxu1 %v624_v16 }
  0x22   :  { %203 = vmatmul.mubr.bf16.vlgmr.msra.gmra.mrb[0].mxu0 %v625_v17  ;;  %243 = vmatmul.mubr.bf16.vlgmr.msra.gmra.mrb[0].mxu1 %v626_v18 }
  0x23   :  { %212 = vmatprep.mubr.bf16.mxu0 %v632_v1  ;;  %252 = vmatprep.mubr.bf16.mxu1 %v632_v1 }
  0x2a   :  { %213 = vmatmul.mubr.bf16.gmra.mrb[4].mxu0 %v627_v19  ;;  %253 = vmatmul.mubr.bf16.gmra.mrb[4].mxu1 %v628_v20 }
  0x2b   :  { %222 = vmatprep.mubr.bf16.mxu0 %v632_v1  ;;  %262 = vmatprep.mubr.bf16.mxu1 %v632_v1 }
  0x32   :  { %223 = vmatmul.mubr.bf16.gmra.mrb[8].mxu0 %v629_v21  ;;  %263 = vmatmul.mubr.bf16.gmra.mrb[8].mxu1 %v630_v22 }
  0x33   :  { %232 = vmatprep.mubr.bf16.mxu0 %v632_v1 }
  0x3a   :  { %233 = vmatmul.mubr.bf16.gmra.mrb[12].mxu0 %v631_v23 }
  0xf5   :  { %v204_v59 = vpop.f32.mrb[0].mxu0  ;;  %v244_v60 = vpop.f32.mrb[0].mxu1 }
  0xf6   :  { %v283_v1 = vmul.f32 %v758_v33, %v204_v59  ;;  %v206_v2 = vpop.f32.mrb[1].mxu0  ;;  %v299_v3 = vmul.f32 %v758_v33, %v244_v60  ;;  %v246_v4 = vpop.f32.mrb[1].mxu1 }
  0xf7   :  { %v284_v7 = vmul.f32 %v760_v34, %v206_v2  ;;  %v208_v8 = vpop.f32.mrb[2].mxu0  ;;  %v300_v9 = vmul.f32 %v760_v34, %v246_v4  ;;  %v248_v10 = vpop.f32.mrb[2].mxu1 }
  0xf8   :  { %v321_v13 = vadd.f32 %v775_v38, %v283_v1  ;;  %v285_v14 = vmul.f32 %v758_v33, %v208_v8  ;;  %v210_v15 = vpop.f32.mrb[3].mxu0  ;;  %v337_v16 = vadd.f32 %v775_v38, %v299_v3  ;;  %v301_v17 = vmul.f32 %v758_v33, %v248_v10  ;;  %v250_v18 = vpop.f32.mrb[3].mxu1 }
  0xf9   :  { %v322_v19 = vadd.f32 %v777_v40, %v284_v7  ;;  %v286_v20 = vmul.f32 %v760_v34, %v210_v15  ;;  %v338_v21 = vadd.f32 %v777_v40, %v300_v9  ;;  %v302_v22 = vmul.f32 %v760_v34, %v250_v18 }
  0xfa   :  { %v386_v23 = vadd.f32 %v360_v39, %v321_v13  ;;  %v323_v24 = vadd.f32 %v775_v38, %v285_v14  ;;  %v402_v25 = vadd.f32 %v376_v50, %v337_v16  ;;  %v339_v26 = vadd.f32 %v775_v38, %v301_v17 }
  0xfb   :  { %v387_v27 = vadd.f32 %v361_v41, %v322_v19  ;;  %v324_v28 = vadd.f32 %v777_v40, %v286_v20  ;;  %v403_v29 = vadd.f32 %v377_v51, %v338_v21  ;;  %v340_v30 = vadd.f32 %v777_v40, %v302_v22 }
  0xfc   :  { %v412_v31 = vmax.f32 %v386_v23, 0.0  ;;  %v388_v35 = vadd.f32 %v362_v43, %v323_v24  ;;  %v428_v36 = vmax.f32 %v402_v25, 0.0  ;;  %v404_v59 = vadd.f32 %v378_v52, %v339_v26 }
  0xfd   :  { %v413_v60 = vmax.f32 %v387_v27, 0.0  ;;  %v389_v1 = vadd.f32 %v363_v44, %v324_v28  ;;  %v214_v2 = vpop.f32.mrb[4].mxu0  ;;  %v429_v3 = vmax.f32 %v403_v29, 0.0  ;;  %v405_v39 = vadd.f32 %v379_v54, %v340_v30  ;;  %v254_v4 = vpop.f32.mrb[4].mxu1 }
  0xfe   :  { %v414_v7 = vmax.f32 %v388_v35, 0.0  ;;  %v287_v50 = vmul.f32 %v758_v33, %v214_v2  ;;  %v216_v8 = vpop.f32.mrb[5].mxu0  ;;  %v430_v41 = vmax.f32 %v404_v59, 0.0  ;;  %v303_v9 = vmul.f32 %v758_v33, %v254_v4  ;;  %v256_v51 = vpop.f32.mrb[5].mxu1 }
  0xff   :  { %v571_v10 = vpack.c.bf16 %v413_v60, %v412_v31  ;;  %v415_v13 = vmax.f32 %v389_v1, 0.0  ;;  %v579_v14 = vpack.c.bf16 %v429_v3, %v428_v36  ;;  %v288_v43 = vmul.f32 %v760_v34, %v216_v8  ;;  %v218_v52 = vpop.f32.mrb[6].mxu0  ;;  %v258_v15 = vpop.f32.mrb[6].mxu1 }
 0x100   :  { %v325_v44 = vadd.f32 %v775_v38, %v287_v50  ;;  %v289_v54 = vmul.f32 %v758_v33, %v218_v52  ;;  %v431_v16 = vmax.f32 %v405_v39, 0.0  ;;  %v220_v17 = vpop.f32.mrb[7].mxu0  ;;  %v341_v18 = vadd.f32 %v775_v38, %v303_v9  ;;  %v260_v19 = vpop.f32.mrb[7].mxu1 }
 0x101   :  { %518 = vst [vmem:[%s952_s5] sm:$0xff] %v571_v10  ;;  %v572_v20 = vpack.c.bf16 %v415_v13, %v414_v7  ;;  %526 = vst [vmem:[%s952_s5 + $0x40] sm:$0xff] %v579_v14  ;;  %v326_v21 = vadd.f32 %v777_v40, %v288_v43  ;;  %v290_v22 = vmul.f32 %v760_v34, %v220_v17 }
 0x102   :  { %v304_v23 = vmul.f32 %v760_v34, %v256_v51  ;;  %v390_v24 = vadd.f32 %v364_v45, %v325_v44  ;;  %v327_v25 = vadd.f32 %v775_v38, %v289_v54  ;;  %v580_v26 = vpack.c.bf16 %v431_v16, %v430_v41 }
 0x103   :  { %v406_v27 = vadd.f32 %v380_v61, %v341_v18  ;;  %519 = vst [vmem:[%s952_s5 + $0x8] sm:$0xff] %v572_v20  ;;  %v391_v28 = vadd.f32 %v365_v46, %v326_v21  ;;  %v328_v29 = vadd.f32 %v777_v40, %v290_v22  ;;  %v305_v31 = vmul.f32 %v758_v33, %v258_v15 }
 0x104   :  { %v342_v30 = vadd.f32 %v777_v40, %v304_v23  ;;  %v416_v45 = vmax.f32 %v390_v24, 0.0  ;;  %v392_v35 = vadd.f32 %v366_v53, %v327_v25  ;;  %527 = vst [vmem:[%s952_s5 + $0x48] sm:$0xff] %v580_v26  ;;  %v306_v36 = vmul.f32 %v760_v34, %v260_v19 }
 0x105   :  { %v432_v61 = vmax.f32 %v406_v27, 0.0  ;;  %v417_v59 = vmax.f32 %v391_v28, 0.0  ;;  %v393_v32 = vadd.f32 %v367_v55, %v328_v29  ;;  %v224_v46 = vpop.f32.mrb[8].mxu0  ;;  %v343_v1 = vadd.f32 %v775_v38, %v305_v31  ;;  %v264_v2 = vpop.f32.mrb[8].mxu1  ;;  %v354_v27 = vld [vmem:[%s951_s4 + $0x38] sm:$0xff] }
 0x106   :  { %v407_v60 = vadd.f32 %v381_v62, %v342_v30  ;;  %v418_v3 = vmax.f32 %v392_v35, 0.0  ;;  %v291_v53 = vmul.f32 %v758_v33, %v224_v46  ;;  %v226_v39 = vpop.f32.mrb[9].mxu0  ;;  %v344_v4 = vadd.f32 %v777_v40, %v306_v36  ;;  %v266_v50 = vpop.f32.mrb[9].mxu1 }
 0x107   :  { %v307_v7 = vmul.f32 %v758_v33, %v264_v2  ;;  %v573_v8 = vpack.c.bf16 %v417_v59, %v416_v45  ;;  %v419_v41 = vmax.f32 %v393_v32, 0.0  ;;  %v292_v55 = vmul.f32 %v760_v34, %v226_v39  ;;  %v228_v9 = vpop.f32.mrb[10].mxu0  ;;  %v268_v47 = vpop.f32.mrb[10].mxu1 }
 0x108   :  { %v433_v37 = vmax.f32 %v407_v60, 0.0  ;;  %v329_v62 = vadd.f32 %v775_v38, %v291_v53  ;;  %v408_v51 = vadd.f32 %v382_v63, %v343_v1  ;;  %v293_v10 = vmul.f32 %v758_v33, %v228_v9  ;;  %v230_v14 = vpop.f32.mrb[11].mxu0  ;;  %v269_v43 = vpop.f32.mrb[11].mxu1 }
 0x109   :  { %v409_v13 = vadd.f32 %v383_v5, %v344_v4  ;;  %520 = vst [vmem:[%s952_s5 + $0x10] sm:$0xff] %v573_v8  ;;  %v574_v52 = vpack.c.bf16 %v419_v41, %v418_v3  ;;  %v330_v44 = vadd.f32 %v777_v40, %v292_v55  ;;  %v294_v54 = vmul.f32 %v760_v34, %v230_v14 }
 0x10a   :  { %v581_v15 = vpack.c.bf16 %v433_v37, %v432_v61  ;;  %v394_v63 = vadd.f32 %v368_v56, %v329_v62  ;;  %v434_v16 = vmax.f32 %v408_v51, 0.0  ;;  %v331_v17 = vadd.f32 %v775_v38, %v293_v10  ;;  %v353_v56 = vld [vmem:[%s951_s4 + $0x30] sm:$0xff] }
 0x10b   :  { %v435_v48 = vmax.f32 %v409_v13, 0.0  ;;  %521 = vst [vmem:[%s952_s5 + $0x18] sm:$0xff] %v574_v52  ;;  %v395_v5 = vadd.f32 %v369_v57, %v330_v44  ;;  %v332_v18 = vadd.f32 %v777_v40, %v294_v54  ;;  %v345_v19 = vadd.f32 %v775_v38, %v307_v7 }
 0x10c   :  { %528 = vst [vmem:[%s952_s5 + $0x50] sm:$0xff] %v581_v15  ;;  %v308_v20 = vmul.f32 %v760_v34, %v266_v50  ;;  %v420_v21 = vmax.f32 %v394_v63, 0.0  ;;  %v396_v22 = vadd.f32 %v370_v0, %v331_v17  ;;  %v372_v29 = vunpack.c.l.bf16 %v353_v56 }
 0x10d   :  { %v582_v23 = vpack.c.bf16 %v435_v48, %v434_v16  ;;  %v421_v24 = vmax.f32 %v395_v5, 0.0  ;;  %v397_v42 = vadd.f32 %v371_v6, %v332_v18  ;;  %v410_v57 = vadd.f32 %v384_v11, %v345_v19  ;;  %v234_v25 = vpop.f32.mrb[12].mxu0 }
 0x10e   :  { %v346_v26 = vadd.f32 %v777_v40, %v308_v20  ;;  %v422_v28 = vmax.f32 %v396_v22, 0.0  ;;  %v295_v0 = vmul.f32 %v758_v33, %v234_v25  ;;  %v236_v49 = vpop.f32.mrb[13].mxu0  ;;  %v373_v6 = vunpack.c.h.bf16 %v353_v56 }
 0x10f   :  { %529 = vst [vmem:[%s952_s5 + $0x58] sm:$0xff] %v582_v23  ;;  %v575_v30 = vpack.c.bf16 %v421_v24, %v420_v21  ;;  %v423_v31 = vmax.f32 %v397_v42, 0.0  ;;  %v436_v11 = vmax.f32 %v410_v57, 0.0  ;;  %v238_v35 = vpop.f32.mrb[14].mxu0  ;;  %v296_v36 = vmul.f32 %v760_v34, %v236_v49 }
 0x110   :  { %v411_v45 = vadd.f32 %v385_v12, %v346_v26  ;;  %v333_v61 = vadd.f32 %v775_v38, %v295_v0  ;;  %v297_v59 = vmul.f32 %v758_v33, %v238_v35  ;;  %v374_v32 = vunpack.c.l.bf16 %v354_v27  ;;  %v240_v46 = vpop.f32.mrb[15].mxu0 }
 0x111   :  { %522 = vst [vmem:[%s952_s5 + $0x20] sm:$0xff] %v575_v30  ;;  %v576_v60 = vpack.c.bf16 %v423_v31, %v422_v28  ;;  %v298_v2 = vmul.f32 %v760_v34, %v240_v46  ;;  %v375_v3 = vunpack.c.h.bf16 %v354_v27  ;;  %v334_v12 = vadd.f32 %v777_v40, %v296_v36 }
 0x112   :  { %v437_v1 = vmax.f32 %v411_v45, 0.0  ;;  %v398_v58 = vadd.f32 %v372_v29, %v333_v61  ;;  %v335_v53 = vadd.f32 %v775_v38, %v297_v59 }
 0x113   :  { %523 = vst [vmem:[%s952_s5 + $0x28] sm:$0xff] %v576_v60  ;;  %v336_v39 = vadd.f32 %v777_v40, %v298_v2  ;;  %v399_v7 = vadd.f32 %v373_v6, %v334_v12 }
 0x114   :  { %v583_v33 = vpack.c.bf16 %v437_v1, %v436_v11  ;;  %v424_v4 = vmax.f32 %v398_v58, 0.0  ;;  %v400_v50 = vadd.f32 %v374_v32, %v335_v53 }
 0x115   :  { %v401_v34 = vadd.f32 %v375_v3, %v336_v39  ;;  %v425_v8 = vmax.f32 %v399_v7, 0.0 }
 0x116   :  { %530 = vst [vmem:[%s952_s5 + $0x60] sm:$0xff] %v583_v33  ;;  %v426_v41 = vmax.f32 %v400_v50, 0.0 }
 0x117   :  { %v427_v37 = vmax.f32 %v401_v34, 0.0  ;;  %v577_v55 = vpack.c.bf16 %v425_v8, %v424_v4 }
 0x119   :  { %v578_v38 = vpack.c.bf16 %v427_v37, %v426_v41  ;;  %524 = vst [vmem:[%s952_s5 + $0x30] sm:$0xff] %v577_v55 }
 0x11b   :  { %525 = vst [vmem:[%s952_s5 + $0x38] sm:$0xff] %v578_v38 }

// kernel: _lambda_.115
= control target key start
LH: loop header
LB: loop body
LE: loop exit
PB: predicated region body
PF: predicated region fallthrough
CT: control target
= control target key end

     0   :  { %s910_s21 = smov 0   ;;  %s1101_s0 = inlined_call_operand.vmem [shape: f32[1,49], index: 0, kind: input, shape index: {}]   ;;  %s1102_s1 = inlined_call_operand.vmem [shape: f32[49,1], index: 1, kind: input, shape index: {}]   ;;  %s1103_s2 = inlined_call_operand.vmem [shape: f32[256,64], index: 2, kind: input, shape index: {}]   ;;  %s1104_s3 = inlined_call_operand.vmem [shape: f32[1,64], index: 3, kind: input, shape index: {}]   ;;  %s1105_s4 = inlined_call_operand.vmem [shape: f32[1,64], index: 4, kind: input, shape index: {}]   ;;  %s1106_s5 = inlined_call_operand.vmem [shape: bf16[2,49,256], index: 5, kind: input, shape index: {}]   ;;  %s1107_s6 = inlined_call_operand.vmem [shape: bf16[2,49,64], index: 6, kind: output, shape index: {}]  }
   0x1 LB: > { %s692_s22 = sadd.s32 4294967295, %s871_s21   ;;  %p696_p0 = scmp.ge.s32.totalorder %s871_s21, 1  ;;  %s871_s21 = sphi %s910_s21, %s16_s21  }
   0x2   : > { %p212_p1 = scmp.lt.s32.totalorder %s871_s21, 3 }
   0x4   : > { %p213_p2 = pnand %p696_p0, %p212_p1 }
   0x5   : > { %p242_p3 = scmp.lt.s32.totalorder (!%p213_p2), %s692_s22, 1  ;;  %v873_v0 = vmov (!%p213_p2), 0.0   ;;  %v372_v1 = vld [vmem:[%s1103_s2 + $0x80] sm:$0xff] (!%p213_p2)  ;;  %v373_v2 = vld [vmem:[%s1103_s2 + $0x88] sm:$0xff] (!%p213_p2)  ;;  %v374_v6 = vld [vmem:[%s1103_s2 + $0x90] sm:$0xff] (!%p213_p2)  ;;  %vm278_vm0 = vcmask (!%p213_p2), 1040384  }
   0x6   : > { %216 = sbr.rel (%p213_p2) target bundleno = 703 (0x2bf), region = 44  ;;  %349 = vmatprep.mubr.f32.mxu0 (!%p213_p2), %v873_v0  ;;  %v356_v3 = vld [vmem:[%s1103_s2] sm:$0xff] (!%p213_p2)  ;;  %v804_v4 = vpack.c.bf16 (!%p213_p2), %v373_v2, %v372_v1  ;;  %v357_v5 = vld [vmem:[%s1103_s2 + $0x8] sm:$0xff] (!%p213_p2)  ;;  %v375_v7 = vld [vmem:[%s1103_s2 + $0x98] sm:$0xff] (!%p213_p2)  ;;  %vm274_vm1 = vcmask (!%p213_p2), 400384   ;;  %vm874_vm2 = vmmov (!%p213_p2), 0  }
   0x7   : > { %v806_v8 = vpack.c.bf16 (!%p213_p2), %v357_v5, %v356_v3  ;;  %v808_v9 = vpack.c.bf16 (!%p213_p2), %v375_v7, %v374_v6  ;;  %v358_v10 = vld [vmem:[%s1103_s2 + $0x10] sm:$0xff] (!%p213_p2)  ;;  %v359_v11 = vld [vmem:[%s1103_s2 + $0x18] sm:$0xff] (!%p213_p2)  ;;  %v376_v12 = vld [vmem:[%s1103_s2 + $0xa0] sm:$0xff] (!%p213_p2)  ;;  %vm470_vm3 = vcmask (!%p213_p2), 7168   ;;  %vm631_vm4 = vcmask (!%p213_p2), 516096  }
   0x8   : > { %805 = vmatprep.subr.bf16.mxu1 (!%p213_p2), %v804_v4  ;;  %v377_v13 = vld [vmem:[%s1103_s2 + $0xa8] sm:$0xff] (!%p213_p2)  ;;  %v810_v14 = vpack.c.bf16 (!%p213_p2), %v359_v11, %v358_v10  ;;  %v360_v15 = vld [vmem:[%s1103_s2 + $0x20] sm:$0xff] (!%p213_p2)  ;;  %v378_v18 = vld [vmem:[%s1103_s2 + $0xb0] sm:$0xff] (!%p213_p2)  ;;  %vm632_vm5 = vsmask.f32 (!%p213_p2), 256  ;;  %vm624_vm6 = vcmask (!%p213_p2), 519168  }
   0x9   : > { %807 = vmatpush3.bf16.msra.mxu1 (!%p213_p2), %v806_v8  ;;  %v812_v16 = vpack.c.bf16 (!%p213_p2), %v377_v13, %v376_v12  ;;  %v361_v17 = vld [vmem:[%s1103_s2 + $0x28] sm:$0xff] (!%p213_p2)  ;;  %v379_v19 = vld [vmem:[%s1103_s2 + $0xb8] sm:$0xff] (!%p213_p2)  ;;  %v362_v24 = vld [vmem:[%s1103_s2 + $0x30] sm:$0xff] (!%p213_p2) }
   0xa   : > { %809 = vmatprep.subr.bf16.mxu1 (!%p213_p2), %v808_v9  ;;  %v814_v23 = vpack.c.bf16 (!%p213_p2), %v361_v17, %v360_v15  ;;  %v816_v26 = vpack.c.bf16 (!%p213_p2), %v379_v19, %v378_v18  ;;  %v363_v27 = vld [vmem:[%s1103_s2 + $0x38] sm:$0xff] (!%p213_p2)  ;;  %v380_v29 = vld [vmem:[%s1103_s2 + $0xc0] sm:$0xff] (!%p213_p2)  ;;  %v381_v30 = vld [vmem:[%s1103_s2 + $0xc8] sm:$0xff] (!%p213_p2) }
   0xb   : > { %v818_v32 = vpack.c.bf16 (!%p213_p2), %v363_v27, %v362_v24  ;;  %v820_v34 = vpack.c.bf16 (!%p213_p2), %v381_v30, %v380_v29  ;;  %v364_v35 = vld [vmem:[%s1103_s2 + $0x40] sm:$0xff] (!%p213_p2)  ;;  %v365_v36 = vld [vmem:[%s1103_s2 + $0x48] sm:$0xff] (!%p213_p2)  ;;  %v382_v38 = vld [vmem:[%s1103_s2 + $0xd0] sm:$0xff] (!%p213_p2) }
   0xc   : > { %v383_v39 = vld [vmem:[%s1103_s2 + $0xd8] sm:$0xff] (!%p213_p2)  ;;  %v822_v40 = vpack.c.bf16 (!%p213_p2), %v365_v36, %v364_v35  ;;  %v366_v43 = vld [vmem:[%s1103_s2 + $0x50] sm:$0xff] (!%p213_p2)  ;;  %v384_v45 = vld [vmem:[%s1103_s2 + $0xe0] sm:$0xff] (!%p213_p2) }
   0xd   : > { %s1109_s22 = smov (!%p242_p3, %s692_s22), 1  ;;  %811 = vmatpush3.bf16.msra.mxu1 %v810_v14  ;;  %v824_v42 = vpack.c.bf16 %v383_v39, %v382_v38  ;;  %v367_v44 = vld [vmem:[%s1103_s2 + $0x58] sm:$0xff]  ;;  %v385_v46 = vld [vmem:[%s1103_s2 + $0xe8] sm:$0xff]  ;;  %v273_v47 = vld [vmem:[%s1101_s0] sm:$0x1] }
   0xe   : > { %s844_s17 = smul.u32 56, %s1109_s22  ;;  %813 = vmatprep.subr.bf16.mxu1 %v812_v16  ;;  %v826_v48 = vpack.c.bf16 %v367_v44, %v366_v43  ;;  %v828_v49 = vpack.c.bf16 %v385_v46, %v384_v45  ;;  %v368_v50 = vld [vmem:[%s1103_s2 + $0x60] sm:$0xff]  ;;  %v369_v51 = vld [vmem:[%s1103_s2 + $0x68] sm:$0xff]  ;;  %v386_v52 = vld [vmem:[%s1103_s2 + $0xf0] sm:$0xff] }
   0xf   : > { %v387_v53 = vld [vmem:[%s1103_s2 + $0xf8] sm:$0xff]  ;;  %v830_v54 = vpack.c.bf16 %v369_v51, %v368_v50  ;;  %v370_v56 = vld [vmem:[%s1103_s2 + $0x70] sm:$0xff]  ;;  %v458_v63 = vld [vmem:[%s1104_s3] sm:$0x1]  ;;  %s845_s23 = smul.u32 28, %s1109_s22 }
  0x10   : > { %s246_s26 = scalar_lea.vmem %s1106_s5, %s844_s17  ;;  %v832_v55 = vpack.c.bf16 %v387_v53, %v386_v52  ;;  %v371_v57 = vld [vmem:[%s1103_s2 + $0x78] sm:$0xff]  ;;  %v460_v2 = vld [vmem:[%s1105_s4] sm:$0x1]  ;;  %v469_v7 = vld [vmem:[%s1102_s1 + $0x30] sm:$0x1] }
  0x11   : > { %v856_v20 = vld [vmem:[%s246_s26 + $0x4] ss:$8 sps:$4 sm:$0xff]   ;;  %v858_v21 = vld [vmem:[%s246_s26] ss:$8 sps:$4 sm:$0xff]   ;;  %v859_v22 = vld [vmem:[%s246_s26 + $0x14] ss:$8 sps:$4 sm:$0xff]   ;;  %815 = vmatpush3.bf16.msra.mxu1 %v814_v23  ;;  %v834_v58 = vpack.c.bf16 %v371_v57, %v370_v56  ;;  %s1082_s27 = scalar_lea.vmem %s1107_s6, %s845_s23 }
  0x12   : > { %793 = vmatprep.subr.bf16.mxu0 %v856_v20  ;;  %v861_v25 = vld [vmem:[%s246_s26 + $0x10] ss:$8 sps:$4 sm:$0xff]   ;;  %v862_v28 = vld [vmem:[%s246_s26 + $0x24] ss:$8 sps:$4 sm:$0xff]   ;;  %v864_v33 = vld [vmem:[%s246_s26 + $0x20] ss:$8 sps:$4 sm:$0xff]   ;;  %817 = vmatprep.subr.bf16.mxu1 %v816_v26 }
  0x13   : > { %795 = vmatpush1.bf16.msra.mxu0 %v858_v21  ;;  %v258_v31 = vld [vmem:[%s246_s26 + $0x30] sm:$0x11]  ;;  %v463_v6 = vld [vmem:[%s1102_s1] sm:$0xff]  ;;  %v464_v8 = vld [vmem:[%s1102_s1 + $0x8] sm:$0xff] }
  0x14   : > { %797 = vmatprep.subr.bf16.mxu0 %v859_v22  ;;  %v272_v37 = vunpack.c.h.bf16 %v258_v31  ;;  %v271_v41 = vunpack.c.l.bf16 %v258_v31  ;;  %v465_v9 = vld [vmem:[%s1102_s1 + $0x10] sm:$0xff]  ;;  %v466_v10 = vld [vmem:[%s1102_s1 + $0x18] sm:$0xff]  ;;  %v467_v11 = vld [vmem:[%s1102_s1 + $0x20] sm:$0xff] }
  0x15   : > { %819 = vmatpush3.bf16.msra.mxu1 %v818_v32  ;;  %v468_v12 = vld [vmem:[%s1102_s1 + $0x28] sm:$0xff]  ;;  %vm633_vm7 = vmand %vm631_vm4, %vm632_vm5  ;;  %v634_v14 = vld [vmem:[%s1082_s27 + $0x18] sm:$0x1] }
  0x16   : > { %821 = vmatprep.subr.bf16.mxu1 %v820_v34 }
  0x17   : > { %799 = vmatpush1.bf16.msra.mxu0 %v861_v25 }
  0x18   : > { %801 = vmatprep.subr.bf16.mxu0 %v862_v28 }
  0x19   : > { %823 = vmatpush3.bf16.msra.mxu1 %v822_v40 }
  0x1a   : > { %825 = vmatprep.subr.bf16.mxu1 %v824_v42 }
  0x1b   : > { %803 = vmatpush1.bf16.msra.mxu0 %v864_v33 }
  0x1c   : > { %699 = vmatprep.subr.msk.mxu0 %vm278_vm0, %v272_v37 }
  0x1d   : > { %827 = vmatpush3.bf16.msra.mxu1 %v826_v48 }
  0x1e   : > { %829 = vmatprep.subr.bf16.mxu1 %v828_v49 }
  0x1f   : > { %700 = vmatpush1.msk.msra.mxu0 %vm278_vm0, %v271_v41 }
  0x20   : > { %701 = vmatmul.mubr.msk.f32.vlgmr.msra.gmra.mrb[0].mxu0 %vm274_vm1, %v273_v47  ;;  %769 = vmatprep.subr.mxu0 %v873_v0 }
  0x21   : > { %831 = vmatpush3.bf16.msra.mxu1 %v830_v54  ;;  %771 = vmatprep.mubr.msk.f32.mxu0 %vm874_vm2, %v873_v0 }
  0x22   : > { %833 = vmatprep.subr.bf16.mxu1 %v832_v55 }
  0x25   : > { %835 = vmatpush3.bf16.msra.mxu1 %v834_v58 }
  0x26   : > { %836 = vmatprep.subr.mxu1 %v873_v0 }
  0xf3   : > { %v351_v59 = vpop.f32.mrb[0].mxu0 }
  0xf4   : > { %v353_v60 = vpop.f32.mrb[1].mxu0 }
  0xf5   : > { %452 = vmatprep.mubr.f32.mxu1 %v353_v60 }
  0xf6   : > { %453 = vmatmul.mubr.f32.vlgmr.msra.gmra.mrb[0].mxu1 %v351_v59 }
  0xf7   : > { %789 = vmatprep.mubr.msk.f32.mxu1 %vm874_vm2, %v873_v0 }
 0x1c9   : > { %v758_v61 = vpop.f32.mrb[0].mxu1 }
 0x1ca   : > { %v759_v62 = vpop.f32.mrb[1].mxu1 }
 0x1cb   : > { %v760_v1 = vadd.f32 %v759_v62, %v758_v61 }
 0x1cd   : > { %v459_v3 = vmul.f32 %v760_v1, %v458_v63 }
 0x1cf   : > { %v461_v4 = vadd.f32 %v460_v2, %v459_v3 }
 0x1d1   : > { %v462_v5 = vmax.f32 %v461_v4, 0.0 }
 0x1d3   : > { %770 = vmatpush3.msk.msra.mxu0 %vm278_vm0, %v462_v5  ;;  %837 = vmatpush3.msk.msra.mxu1 %vm278_vm0, %v462_v5 }
 0x1d4   : > { %772 = vmatmul.mubr.msk.f32.vlgmr.msra.gmra.mrb[2].mxu0 %vm470_vm3, %v463_v6  ;;  %790 = vmatmul.mubr.msk.f32.vlgmr.msra.gmra.mrb[2].mxu1 %vm470_vm3, %v469_v7 }
 0x1d5   : > { %774 = vmatprep.mubr.msk.f32.mxu0 %vm874_vm2, %v873_v0 }
 0x1d8   : > { %775 = vmatmul.mubr.msk.f32.gmra.mrb[4].mxu0 %vm470_vm3, %v464_v8 }
 0x1d9   : > { %777 = vmatprep.mubr.msk.f32.mxu0 %vm874_vm2, %v873_v0 }
 0x1dc   : > { %778 = vmatmul.mubr.msk.f32.gmra.mrb[6].mxu0 %vm470_vm3, %v465_v9 }
 0x1dd   : > { %780 = vmatprep.mubr.msk.f32.mxu0 %vm874_vm2, %v873_v0 }
 0x1e0   : > { %781 = vmatmul.mubr.msk.f32.gmra.mrb[8].mxu0 %vm470_vm3, %v466_v10 }
 0x1e1   : > { %783 = vmatprep.mubr.msk.f32.mxu0 %vm874_vm2, %v873_v0 }
 0x1e4   : > { %784 = vmatmul.mubr.msk.f32.gmra.mrb[10].mxu0 %vm470_vm3, %v467_v11 }
 0x1e5   : > { %786 = vmatprep.mubr.msk.f32.mxu0 %vm874_vm2, %v873_v0 }
 0x1e8   : > { %787 = vmatmul.mubr.msk.f32.gmra.mrb[12].mxu0 %vm470_vm3, %v468_v12 }
 0x2a7   : > { %v561_v13 = vpop.f32.mrb[2].mxu0  ;;  %v591_v0 = vpop.f32.mrb[2].mxu1 }
 0x2a8   : > { %v719_v15 = vpack.c.bf16 %v561_v13, %v561_v13  ;;  %v773_v16 = vpop.f32.mrb[3].mxu0  ;;  %v725_v17 = vpack.c.bf16 %v591_v0, %v591_v0  ;;  %v791_v18 = vpop.f32.mrb[3].mxu1 }
 0x2aa   : > { %625 = vst.msk [vmem:[%s1082_s27] sm:$0xf] %vm624_vm6, %v719_v15  ;;  %v635_v19 = vsel %vm633_vm7, %v725_v17, %v634_v14 }
 0x2ab   : > { %v566_v20 = vpop.f32.mrb[4].mxu0  ;;  %636 = vst [vmem:[%s1082_s27 + $0x18] sm:$0x1] %v635_v19 }
 0x2ac   : > { %v720_v21 = vpack.c.bf16 %v566_v20, %v566_v20  ;;  %v776_v22 = vpop.f32.mrb[5].mxu0 }
 0x2ae   : > { %626 = vst.msk [vmem:[%s1082_s27 + $0x4] sm:$0xf] %vm624_vm6, %v720_v21 }
 0x2af   : > { %v571_v23 = vpop.f32.mrb[6].mxu0 }
 0x2b0   : > { %v721_v24 = vpack.c.bf16 %v571_v23, %v571_v23  ;;  %v779_v25 = vpop.f32.mrb[7].mxu0 }
 0x2b2   : > { %627 = vst.msk [vmem:[%s1082_s27 + $0x8] sm:$0xf] %vm624_vm6, %v721_v24 }
 0x2b3   : > { %v576_v26 = vpop.f32.mrb[8].mxu0 }
 0x2b4   : > { %v722_v27 = vpack.c.bf16 %v576_v26, %v576_v26  ;;  %v782_v28 = vpop.f32.mrb[9].mxu0 }
 0x2b6   : > { %628 = vst.msk [vmem:[%s1082_s27 + $0xc] sm:$0xf] %vm624_vm6, %v722_v27 }
 0x2b7   : > { %v581_v29 = vpop.f32.mrb[10].mxu0 }
 0x2b8   : > { %v723_v30 = vpack.c.bf16 %v581_v29, %v581_v29  ;;  %v785_v31 = vpop.f32.mrb[11].mxu0 }
 0x2ba   : > { %629 = vst.msk [vmem:[%s1082_s27 + $0x10] sm:$0xf] %vm624_vm6, %v723_v30 }
 0x2bb   : > { %v586_v32 = vpop.f32.mrb[12].mxu0 }
 0x2bc   : > { %v724_v33 = vpack.c.bf16 %v586_v32, %v586_v32  ;;  %v788_v34 = vpop.f32.mrb[13].mxu0 }
 0x2be   : > { %630 = vst.msk [vmem:[%s1082_s27 + $0x14] sm:$0xf] %vm624_vm6, %v724_v33 }
 0x2bf PF: > { %s16_s21 = sadd.s32 1, %s871_s21  }
 0x2c0   : > { %p13_p4 = scmp.ge.s32.totalorder %s16_s21, 4  }
 0x2c2   :  { %15 = sbr.rel (!%p13_p4) target bundleno = 1 (0x1), region = 74 }

// kernel: _lambda_.116
= control target key start
LH: loop header
LB: loop body
LE: loop exit
PB: predicated region body
PF: predicated region fallthrough
CT: control target
= control target key end

     0   :  { %s925_s21 = smov 0   ;;  %s1114_s0 = inlined_call_operand.vmem [shape: f32[4,49], index: 0, kind: input, shape index: {}]   ;;  %s1115_s1 = inlined_call_operand.vmem [shape: f32[49,4], index: 1, kind: input, shape index: {}]   ;;  %s1116_s2 = inlined_call_operand.vmem [shape: f32[256,64], index: 2, kind: input, shape index: {}]   ;;  %s1117_s3 = inlined_call_operand.vmem [shape: f32[1,64], index: 3, kind: input, shape index: {}]   ;;  %s1118_s4 = inlined_call_operand.vmem [shape: f32[1,64], index: 4, kind: input, shape index: {}]   ;;  %s1119_s5 = inlined_call_operand.vmem [shape: bf16[2,49,256], index: 5, kind: input, shape index: {}]   ;;  %s1120_s6 = inlined_call_operand.vmem [shape: bf16[2,49,64], index: 6, kind: output, shape index: {}]  }
   0x1 LB: > { %s705_s22 = sadd.s32 4294967295, %s886_s21   ;;  %p709_p0 = scmp.ge.s32.totalorder %s886_s21, 1  ;;  %s886_s21 = sphi %s925_s21, %s16_s21  }
   0x2   : > { %p212_p1 = scmp.lt.s32.totalorder %s886_s21, 3 }
   0x4   : > { %p213_p2 = pnand %p709_p0, %p212_p1 }
   0x5   : > { %p242_p3 = scmp.lt.s32.totalorder (!%p213_p2), %s705_s22, 1  ;;  %v888_v0 = vmov (!%p213_p2), 0.0   ;;  %v372_v1 = vld [vmem:[%s1116_s2 + $0x80] sm:$0xff] (!%p213_p2)  ;;  %v373_v2 = vld [vmem:[%s1116_s2 + $0x88] sm:$0xff] (!%p213_p2)  ;;  %v374_v6 = vld [vmem:[%s1116_s2 + $0x90] sm:$0xff] (!%p213_p2)  ;;  %vm278_vm0 = vcmask (!%p213_p2), 1040384  }
   0x6   : > { %216 = sbr.rel (%p213_p2) target bundleno = 703 (0x2bf), region = 44  ;;  %349 = vmatprep.mubr.f32.mxu0 (!%p213_p2), %v888_v0  ;;  %v356_v3 = vld [vmem:[%s1116_s2] sm:$0xff] (!%p213_p2)  ;;  %v819_v4 = vpack.c.bf16 (!%p213_p2), %v373_v2, %v372_v1  ;;  %v357_v5 = vld [vmem:[%s1116_s2 + $0x8] sm:$0xff] (!%p213_p2)  ;;  %v375_v7 = vld [vmem:[%s1116_s2 + $0x98] sm:$0xff] (!%p213_p2)  ;;  %vm274_vm1 = vcmask (!%p213_p2), 400384   ;;  %vm889_vm2 = vmmov (!%p213_p2), 0  }
   0x7   : > { %v821_v8 = vpack.c.bf16 (!%p213_p2), %v357_v5, %v356_v3  ;;  %v823_v9 = vpack.c.bf16 (!%p213_p2), %v375_v7, %v374_v6  ;;  %v358_v10 = vld [vmem:[%s1116_s2 + $0x10] sm:$0xff] (!%p213_p2)  ;;  %v359_v11 = vld [vmem:[%s1116_s2 + $0x18] sm:$0xff] (!%p213_p2)  ;;  %v376_v12 = vld [vmem:[%s1116_s2 + $0xa0] sm:$0xff] (!%p213_p2)  ;;  %vm504_vm3 = vcmask (!%p213_p2), 1043456   ;;  %vm482_vm4 = vcmask (!%p213_p2), 31744  }
   0x8   : > { %820 = vmatprep.subr.bf16.mxu1 (!%p213_p2), %v819_v4  ;;  %v377_v13 = vld [vmem:[%s1116_s2 + $0xa8] sm:$0xff] (!%p213_p2)  ;;  %v825_v14 = vpack.c.bf16 (!%p213_p2), %v359_v11, %v358_v10  ;;  %v360_v15 = vld [vmem:[%s1116_s2 + $0x20] sm:$0xff] (!%p213_p2)  ;;  %v378_v18 = vld [vmem:[%s1116_s2 + $0xb0] sm:$0xff] (!%p213_p2)  ;;  %vm644_vm5 = vcmask (!%p213_p2), 516096   ;;  %vm645_vm6 = vsmask.f32 (!%p213_p2), 256 }
   0x9   : > { %822 = vmatpush3.bf16.msra.mxu1 (!%p213_p2), %v821_v8  ;;  %v827_v16 = vpack.c.bf16 (!%p213_p2), %v377_v13, %v376_v12  ;;  %v361_v17 = vld [vmem:[%s1116_s2 + $0x28] sm:$0xff] (!%p213_p2)  ;;  %v379_v19 = vld [vmem:[%s1116_s2 + $0xb8] sm:$0xff] (!%p213_p2)  ;;  %v362_v24 = vld [vmem:[%s1116_s2 + $0x30] sm:$0xff] (!%p213_p2)  ;;  %vm637_vm7 = vcmask (!%p213_p2), 519168  }
   0xa   : > { %824 = vmatprep.subr.bf16.mxu1 (!%p213_p2), %v823_v9  ;;  %v829_v23 = vpack.c.bf16 (!%p213_p2), %v361_v17, %v360_v15  ;;  %v831_v26 = vpack.c.bf16 (!%p213_p2), %v379_v19, %v378_v18  ;;  %v363_v27 = vld [vmem:[%s1116_s2 + $0x38] sm:$0xff] (!%p213_p2)  ;;  %v380_v29 = vld [vmem:[%s1116_s2 + $0xc0] sm:$0xff] (!%p213_p2)  ;;  %v381_v30 = vld [vmem:[%s1116_s2 + $0xc8] sm:$0xff] (!%p213_p2) }
   0xb   : > { %v833_v32 = vpack.c.bf16 (!%p213_p2), %v363_v27, %v362_v24  ;;  %v835_v34 = vpack.c.bf16 (!%p213_p2), %v381_v30, %v380_v29  ;;  %v364_v35 = vld [vmem:[%s1116_s2 + $0x40] sm:$0xff] (!%p213_p2)  ;;  %v365_v36 = vld [vmem:[%s1116_s2 + $0x48] sm:$0xff] (!%p213_p2)  ;;  %v382_v38 = vld [vmem:[%s1116_s2 + $0xd0] sm:$0xff] (!%p213_p2) }
   0xc   : > { %v383_v39 = vld [vmem:[%s1116_s2 + $0xd8] sm:$0xff] (!%p213_p2)  ;;  %v837_v40 = vpack.c.bf16 (!%p213_p2), %v365_v36, %v364_v35  ;;  %v366_v43 = vld [vmem:[%s1116_s2 + $0x50] sm:$0xff] (!%p213_p2)  ;;  %v384_v45 = vld [vmem:[%s1116_s2 + $0xe0] sm:$0xff] (!%p213_p2) }
   0xd   : > { %s1122_s22 = smov (!%p242_p3, %s705_s22), 1  ;;  %826 = vmatpush3.bf16.msra.mxu1 %v825_v14  ;;  %v839_v42 = vpack.c.bf16 %v383_v39, %v382_v38  ;;  %v367_v44 = vld [vmem:[%s1116_s2 + $0x58] sm:$0xff]  ;;  %v385_v46 = vld [vmem:[%s1116_s2 + $0xe8] sm:$0xff]  ;;  %v273_v47 = vld [vmem:[%s1114_s0] sm:$0xf] }
   0xe   : > { %s859_s17 = smul.u32 56, %s1122_s22  ;;  %828 = vmatprep.subr.bf16.mxu1 %v827_v16  ;;  %v841_v48 = vpack.c.bf16 %v367_v44, %v366_v43  ;;  %v843_v49 = vpack.c.bf16 %v385_v46, %v384_v45  ;;  %v368_v50 = vld [vmem:[%s1116_s2 + $0x60] sm:$0xff]  ;;  %v369_v51 = vld [vmem:[%s1116_s2 + $0x68] sm:$0xff]  ;;  %v386_v52 = vld [vmem:[%s1116_s2 + $0xf0] sm:$0xff] }
   0xf   : > { %v387_v53 = vld [vmem:[%s1116_s2 + $0xf8] sm:$0xff]  ;;  %v845_v54 = vpack.c.bf16 %v369_v51, %v368_v50  ;;  %v370_v56 = vld [vmem:[%s1116_s2 + $0x70] sm:$0xff]  ;;  %v715_v63 = vld [vmem:[%s1117_s3] ss:$0 sm:$0xff]  ;;  %s860_s23 = smul.u32 28, %s1122_s22 }
  0x10   : > { %s246_s26 = scalar_lea.vmem %s1119_s5, %s859_s17  ;;  %v847_v55 = vpack.c.bf16 %v387_v53, %v386_v52  ;;  %v371_v57 = vld [vmem:[%s1116_s2 + $0x78] sm:$0xff]  ;;  %v716_v2 = vld [vmem:[%s1118_s4] ss:$0 sm:$0xff]  ;;  %v481_v7 = vld [vmem:[%s1115_s1 + $0x30] sm:$0x1] }
  0x11   : > { %v871_v20 = vld [vmem:[%s246_s26 + $0x4] ss:$8 sps:$4 sm:$0xff]   ;;  %v873_v21 = vld [vmem:[%s246_s26] ss:$8 sps:$4 sm:$0xff]   ;;  %v874_v22 = vld [vmem:[%s246_s26 + $0x14] ss:$8 sps:$4 sm:$0xff]   ;;  %830 = vmatpush3.bf16.msra.mxu1 %v829_v23  ;;  %v849_v58 = vpack.c.bf16 %v371_v57, %v370_v56  ;;  %s1095_s27 = scalar_lea.vmem %s1120_s6, %s860_s23 }
  0x12   : > { %808 = vmatprep.subr.bf16.mxu0 %v871_v20  ;;  %v876_v25 = vld [vmem:[%s246_s26 + $0x10] ss:$8 sps:$4 sm:$0xff]   ;;  %v877_v28 = vld [vmem:[%s246_s26 + $0x24] ss:$8 sps:$4 sm:$0xff]   ;;  %v879_v33 = vld [vmem:[%s246_s26 + $0x20] ss:$8 sps:$4 sm:$0xff]   ;;  %832 = vmatprep.subr.bf16.mxu1 %v831_v26 }
  0x13   : > { %810 = vmatpush1.bf16.msra.mxu0 %v873_v21  ;;  %v258_v31 = vld [vmem:[%s246_s26 + $0x30] sm:$0x11]  ;;  %v475_v6 = vld [vmem:[%s1115_s1] sm:$0xff]  ;;  %v476_v8 = vld [vmem:[%s1115_s1 + $0x8] sm:$0xff] }
  0x14   : > { %812 = vmatprep.subr.bf16.mxu0 %v874_v22  ;;  %v272_v37 = vunpack.c.h.bf16 %v258_v31  ;;  %v271_v41 = vunpack.c.l.bf16 %v258_v31  ;;  %v477_v9 = vld [vmem:[%s1115_s1 + $0x10] sm:$0xff]  ;;  %v478_v10 = vld [vmem:[%s1115_s1 + $0x18] sm:$0xff]  ;;  %v479_v11 = vld [vmem:[%s1115_s1 + $0x20] sm:$0xff] }
  0x15   : > { %834 = vmatpush3.bf16.msra.mxu1 %v833_v32  ;;  %v480_v12 = vld [vmem:[%s1115_s1 + $0x28] sm:$0xff]  ;;  %vm646_vm8 = vmand %vm644_vm5, %vm645_vm6  ;;  %v647_v14 = vld [vmem:[%s1095_s27 + $0x18] sm:$0x1] }
  0x16   : > { %836 = vmatprep.subr.bf16.mxu1 %v835_v34 }
  0x17   : > { %814 = vmatpush1.bf16.msra.mxu0 %v876_v25 }
  0x18   : > { %816 = vmatprep.subr.bf16.mxu0 %v877_v28 }
  0x19   : > { %838 = vmatpush3.bf16.msra.mxu1 %v837_v40 }
  0x1a   : > { %840 = vmatprep.subr.bf16.mxu1 %v839_v42 }
  0x1b   : > { %818 = vmatpush1.bf16.msra.mxu0 %v879_v33 }
  0x1c   : > { %712 = vmatprep.subr.msk.mxu0 %vm278_vm0, %v272_v37 }
  0x1d   : > { %842 = vmatpush3.bf16.msra.mxu1 %v841_v48 }
  0x1e   : > { %844 = vmatprep.subr.bf16.mxu1 %v843_v49 }
  0x1f   : > { %713 = vmatpush1.msk.msra.mxu0 %vm278_vm0, %v271_v41 }
  0x20   : > { %714 = vmatmul.mubr.msk.f32.vlgmr.msra.gmra.mrb[0].mxu0 %vm274_vm1, %v273_v47  ;;  %784 = vmatprep.subr.mxu0 %v888_v0 }
  0x21   : > { %846 = vmatpush3.bf16.msra.mxu1 %v845_v54  ;;  %786 = vmatprep.mubr.msk.f32.mxu0 %vm889_vm2, %v888_v0 }
  0x22   : > { %848 = vmatprep.subr.bf16.mxu1 %v847_v55 }
  0x25   : > { %850 = vmatpush3.bf16.msra.mxu1 %v849_v58 }
  0x26   : > { %851 = vmatprep.subr.mxu1 %v888_v0 }
  0xf3   : > { %v351_v59 = vpop.f32.mrb[0].mxu0 }
  0xf4   : > { %v353_v60 = vpop.f32.mrb[1].mxu0 }
  0xf5   : > { %452 = vmatprep.mubr.f32.mxu1 %v353_v60 }
  0xf6   : > { %453 = vmatmul.mubr.f32.vlgmr.msra.gmra.mrb[0].mxu1 %v351_v59 }
  0xf7   : > { %804 = vmatprep.mubr.msk.f32.mxu1 %vm889_vm2, %v888_v0 }
 0x1c9   : > { %v773_v61 = vpop.f32.mrb[0].mxu1 }
 0x1ca   : > { %v774_v62 = vpop.f32.mrb[1].mxu1 }
 0x1cb   : > { %v775_v1 = vadd.f32 %v774_v62, %v773_v61 }
 0x1cd   : > { %v465_v3 = vmul.f32 %v775_v1, %v715_v63 }
 0x1cf   : > { %v473_v4 = vadd.f32 %v716_v2, %v465_v3 }
 0x1d1   : > { %v474_v5 = vmax.f32 %v473_v4, 0.0 }
 0x1d3   : > { %785 = vmatpush3.msk.msra.mxu0 %vm504_vm3, %v474_v5  ;;  %852 = vmatpush3.msk.msra.mxu1 %vm504_vm3, %v474_v5 }
 0x1d4   : > { %787 = vmatmul.mubr.msk.f32.vlgmr.msra.gmra.mrb[2].mxu0 %vm482_vm4, %v475_v6  ;;  %805 = vmatmul.mubr.msk.f32.vlgmr.msra.gmra.mrb[2].mxu1 %vm482_vm4, %v481_v7 }
 0x1d5   : > { %789 = vmatprep.mubr.msk.f32.mxu0 %vm889_vm2, %v888_v0 }
 0x1d8   : > { %790 = vmatmul.mubr.msk.f32.gmra.mrb[4].mxu0 %vm482_vm4, %v476_v8 }
 0x1d9   : > { %792 = vmatprep.mubr.msk.f32.mxu0 %vm889_vm2, %v888_v0 }
 0x1dc   : > { %793 = vmatmul.mubr.msk.f32.gmra.mrb[6].mxu0 %vm482_vm4, %v477_v9 }
 0x1dd   : > { %795 = vmatprep.mubr.msk.f32.mxu0 %vm889_vm2, %v888_v0 }
 0x1e0   : > { %796 = vmatmul.mubr.msk.f32.gmra.mrb[8].mxu0 %vm482_vm4, %v478_v10 }
 0x1e1   : > { %798 = vmatprep.mubr.msk.f32.mxu0 %vm889_vm2, %v888_v0 }
 0x1e4   : > { %799 = vmatmul.mubr.msk.f32.gmra.mrb[10].mxu0 %vm482_vm4, %v479_v11 }
 0x1e5   : > { %801 = vmatprep.mubr.msk.f32.mxu0 %vm889_vm2, %v888_v0 }
 0x1e8   : > { %802 = vmatmul.mubr.msk.f32.gmra.mrb[12].mxu0 %vm482_vm4, %v480_v12 }
 0x2a7   : > { %v574_v13 = vpop.f32.mrb[2].mxu0  ;;  %v604_v0 = vpop.f32.mrb[2].mxu1 }
 0x2a8   : > { %v734_v15 = vpack.c.bf16 %v574_v13, %v574_v13  ;;  %v788_v16 = vpop.f32.mrb[3].mxu0  ;;  %v740_v17 = vpack.c.bf16 %v604_v0, %v604_v0  ;;  %v806_v18 = vpop.f32.mrb[3].mxu1 }
 0x2aa   : > { %638 = vst.msk [vmem:[%s1095_s27] sm:$0xf] %vm637_vm7, %v734_v15  ;;  %v648_v19 = vsel %vm646_vm8, %v740_v17, %v647_v14 }
 0x2ab   : > { %v579_v20 = vpop.f32.mrb[4].mxu0  ;;  %649 = vst [vmem:[%s1095_s27 + $0x18] sm:$0x1] %v648_v19 }
 0x2ac   : > { %v735_v21 = vpack.c.bf16 %v579_v20, %v579_v20  ;;  %v791_v22 = vpop.f32.mrb[5].mxu0 }
 0x2ae   : > { %639 = vst.msk [vmem:[%s1095_s27 + $0x4] sm:$0xf] %vm637_vm7, %v735_v21 }
 0x2af   : > { %v584_v23 = vpop.f32.mrb[6].mxu0 }
 0x2b0   : > { %v736_v24 = vpack.c.bf16 %v584_v23, %v584_v23  ;;  %v794_v25 = vpop.f32.mrb[7].mxu0 }
 0x2b2   : > { %640 = vst.msk [vmem:[%s1095_s27 + $0x8] sm:$0xf] %vm637_vm7, %v736_v24 }
 0x2b3   : > { %v589_v26 = vpop.f32.mrb[8].mxu0 }
 0x2b4   : > { %v737_v27 = vpack.c.bf16 %v589_v26, %v589_v26  ;;  %v797_v28 = vpop.f32.mrb[9].mxu0 }
 0x2b6   : > { %641 = vst.msk [vmem:[%s1095_s27 + $0xc] sm:$0xf] %vm637_vm7, %v737_v27 }
 0x2b7   : > { %v594_v29 = vpop.f32.mrb[10].mxu0 }
 0x2b8   : > { %v738_v30 = vpack.c.bf16 %v594_v29, %v594_v29  ;;  %v800_v31 = vpop.f32.mrb[11].mxu0 }
 0x2ba   : > { %642 = vst.msk [vmem:[%s1095_s27 + $0x10] sm:$0xf] %vm637_vm7, %v738_v30 }
 0x2bb   : > { %v599_v32 = vpop.f32.mrb[12].mxu0 }
 0x2bc   : > { %v739_v33 = vpack.c.bf16 %v599_v32, %v599_v32  ;;  %v803_v34 = vpop.f32.mrb[13].mxu0 }
 0x2be   : > { %643 = vst.msk [vmem:[%s1095_s27 + $0x14] sm:$0xf] %vm637_vm7, %v739_v33 }
 0x2bf PF: > { %s16_s21 = sadd.s32 1, %s886_s21  }
 0x2c0   : > { %p13_p4 = scmp.ge.s32.totalorder %s16_s21, 4  }
 0x2c2   :  { %15 = sbr.rel (!%p13_p4) target bundleno = 1 (0x1), region = 74 }

// kernel: _lambda_.117
= control target key start
LH: loop header
LB: loop body
LE: loop exit
PB: predicated region body
PF: predicated region fallthrough
CT: control target
= control target key end

     0   :  { %s957_s21 = smov 0   ;;  %s1151_s0 = inlined_call_operand.vmem [shape: f32[9,49], index: 0, kind: input, shape index: {}]   ;;  %s1152_s1 = inlined_call_operand.vmem [shape: f32[49,9], index: 1, kind: input, shape index: {}]   ;;  %s1153_s2 = inlined_call_operand.vmem [shape: f32[256,64], index: 2, kind: input, shape index: {}]   ;;  %s1154_s3 = inlined_call_operand.vmem [shape: f32[1,64], index: 3, kind: input, shape index: {}]   ;;  %s1155_s4 = inlined_call_operand.vmem [shape: f32[1,64], index: 4, kind: input, shape index: {}]   ;;  %s1156_s5 = inlined_call_operand.vmem [shape: bf16[2,49,256], index: 5, kind: input, shape index: {}]   ;;  %s1157_s6 = inlined_call_operand.vmem [shape: bf16[2,49,64], index: 6, kind: output, shape index: {}]  }
   0x1 LB: > { %s722_s22 = sadd.s32 4294967295, %s916_s21   ;;  %p726_p0 = scmp.ge.s32.totalorder %s916_s21, 1  ;;  %s916_s21 = sphi %s957_s21, %s16_s21  }
   0x2   : > { %p212_p1 = scmp.lt.s32.totalorder %s916_s21, 3 }
   0x4   : > { %p213_p2 = pnand %p726_p0, %p212_p1 }
   0x5   : > { %p242_p3 = scmp.lt.s32.totalorder (!%p213_p2), %s722_s22, 1  ;;  %v382_v0 = vld [vmem:[%s1153_s2 + $0x80] sm:$0xff] (!%p213_p2)  ;;  %v918_v1 = vmov (!%p213_p2), 0.0   ;;  %v383_v2 = vld [vmem:[%s1153_s2 + $0x88] sm:$0xff] (!%p213_p2)  ;;  %v384_v6 = vld [vmem:[%s1153_s2 + $0x90] sm:$0xff] (!%p213_p2)  ;;  %vm282_vm0 = vcmask (!%p213_p2), 1040384  }
   0x6   : > { %216 = sbr.rel (%p213_p2) target bundleno = 711 (0x2c7), region = 44  ;;  %353 = vmatprep.mubr.f32.mxu0 (!%p213_p2), %v918_v1  ;;  %v366_v3 = vld [vmem:[%s1153_s2] sm:$0xff] (!%p213_p2)  ;;  %v843_v4 = vpack.c.bf16 (!%p213_p2), %v383_v2, %v382_v0  ;;  %v367_v5 = vld [vmem:[%s1153_s2 + $0x8] sm:$0xff] (!%p213_p2)  ;;  %v385_v7 = vld [vmem:[%s1153_s2 + $0x98] sm:$0xff] (!%p213_p2)  ;;  %vm275_vm1 = vcmask (!%p213_p2), 400384   ;;  %v919_v0 = vmov (!%p213_p2), 0.0|0.0  }
   0x7   : > { %v845_v8 = vpack.c.bf16 (!%p213_p2), %v367_v5, %v366_v3  ;;  %v847_v9 = vpack.c.bf16 (!%p213_p2), %v385_v7, %v384_v6  ;;  %v368_v10 = vld [vmem:[%s1153_s2 + $0x10] sm:$0xff] (!%p213_p2)  ;;  %v369_v11 = vld [vmem:[%s1153_s2 + $0x18] sm:$0xff] (!%p213_p2)  ;;  %v386_v12 = vld [vmem:[%s1153_s2 + $0xa0] sm:$0xff] (!%p213_p2)  ;;  %vm920_vm2 = vmmov (!%p213_p2), 0   ;;  %vm921_vm3 = vmmov (!%p213_p2), 1  }
   0x8   : > { %844 = vmatprep.subr.bf16.mxu1 (!%p213_p2), %v843_v4  ;;  %v387_v13 = vld [vmem:[%s1153_s2 + $0xa8] sm:$0xff] (!%p213_p2)  ;;  %v849_v14 = vpack.c.bf16 (!%p213_p2), %v369_v11, %v368_v10  ;;  %v370_v15 = vld [vmem:[%s1153_s2 + $0x20] sm:$0xff] (!%p213_p2)  ;;  %v388_v18 = vld [vmem:[%s1153_s2 + $0xb0] sm:$0xff] (!%p213_p2)  ;;  %vm500_vm5 = vcmask (!%p213_p2), 72704   ;;  %vm661_vm6 = vcmask (!%p213_p2), 516096   ;;  %vm654_vm8 = vcmask (!%p213_p2), 519168  }
   0x9   : > { %846 = vmatpush3.bf16.msra.mxu1 (!%p213_p2), %v845_v8  ;;  %v851_v16 = vpack.c.bf16 (!%p213_p2), %v387_v13, %v386_v12  ;;  %v371_v17 = vld [vmem:[%s1153_s2 + $0x28] sm:$0xff] (!%p213_p2)  ;;  %v389_v19 = vld [vmem:[%s1153_s2 + $0xb8] sm:$0xff] (!%p213_p2)  ;;  %v372_v24 = vld [vmem:[%s1153_s2 + $0x30] sm:$0xff] (!%p213_p2)  ;;  %vm662_vm7 = vsmask.f32 (!%p213_p2), 256 }
   0xa   : > { %848 = vmatprep.subr.bf16.mxu1 (!%p213_p2), %v847_v9  ;;  %v853_v23 = vpack.c.bf16 (!%p213_p2), %v371_v17, %v370_v15  ;;  %v855_v26 = vpack.c.bf16 (!%p213_p2), %v389_v19, %v388_v18  ;;  %v373_v27 = vld [vmem:[%s1153_s2 + $0x38] sm:$0xff] (!%p213_p2)  ;;  %v390_v29 = vld [vmem:[%s1153_s2 + $0xc0] sm:$0xff] (!%p213_p2)  ;;  %v391_v30 = vld [vmem:[%s1153_s2 + $0xc8] sm:$0xff] (!%p213_p2) }
   0xb   : > { %v857_v32 = vpack.c.bf16 (!%p213_p2), %v373_v27, %v372_v24  ;;  %v859_v34 = vpack.c.bf16 (!%p213_p2), %v391_v30, %v390_v29  ;;  %v374_v35 = vld [vmem:[%s1153_s2 + $0x40] sm:$0xff] (!%p213_p2)  ;;  %v375_v36 = vld [vmem:[%s1153_s2 + $0x48] sm:$0xff] (!%p213_p2)  ;;  %v392_v38 = vld [vmem:[%s1153_s2 + $0xd0] sm:$0xff] (!%p213_p2) }
   0xc   : > { %v393_v39 = vld [vmem:[%s1153_s2 + $0xd8] sm:$0xff] (!%p213_p2)  ;;  %v861_v40 = vpack.c.bf16 (!%p213_p2), %v375_v36, %v374_v35  ;;  %v376_v43 = vld [vmem:[%s1153_s2 + $0x50] sm:$0xff] (!%p213_p2)  ;;  %v394_v45 = vld [vmem:[%s1153_s2 + $0xe0] sm:$0xff] (!%p213_p2) }
   0xd   : > { %s1159_s22 = smov (!%p242_p3, %s722_s22), 1  ;;  %850 = vmatpush3.bf16.msra.mxu1 %v849_v14  ;;  %v863_v42 = vpack.c.bf16 %v393_v39, %v392_v38  ;;  %v377_v44 = vld [vmem:[%s1153_s2 + $0x58] sm:$0xff]  ;;  %v395_v46 = vld [vmem:[%s1153_s2 + $0xe8] sm:$0xff]  ;;  %v273_v47 = vld [vmem:[%s1151_s0] sm:$0xff] }
   0xe   : > { %s887_s17 = smul.u32 56, %s1159_s22  ;;  %852 = vmatprep.subr.bf16.mxu1 %v851_v16  ;;  %v865_v48 = vpack.c.bf16 %v377_v44, %v376_v43  ;;  %v867_v49 = vpack.c.bf16 %v395_v46, %v394_v45  ;;  %v378_v50 = vld [vmem:[%s1153_s2 + $0x60] sm:$0xff]  ;;  %v379_v51 = vld [vmem:[%s1153_s2 + $0x68] sm:$0xff]  ;;  %v396_v52 = vld [vmem:[%s1153_s2 + $0xf0] sm:$0xff] }
   0xf   : > { %v397_v53 = vld [vmem:[%s1153_s2 + $0xf8] sm:$0xff]  ;;  %v274_v54 = vld [vmem:[%s1151_s0 + $0x8] sm:$0x1]  ;;  %v869_v55 = vpack.c.bf16 %v379_v51, %v378_v50  ;;  %v380_v57 = vld [vmem:[%s1153_s2 + $0x70] sm:$0xff]  ;;  %s888_s25 = smul.u32 28, %s1159_s22 }
  0x10   : > { %s246_s26 = scalar_lea.vmem %s1156_s5, %s887_s17  ;;  %v871_v56 = vpack.c.bf16 %v397_v53, %v396_v52  ;;  %v381_v58 = vld [vmem:[%s1153_s2 + $0x78] sm:$0xff]  ;;  %v733_v4 = vld [vmem:[%s1154_s3] ss:$0 sm:$0xff]  ;;  %vm877_vm4 = vmpackc.low %vm282_vm0, %vm921_vm3 }
  0x11   : > { %v901_v20 = vld [vmem:[%s246_s26 + $0x4] ss:$8 sps:$4 sm:$0xff]   ;;  %v903_v21 = vld [vmem:[%s246_s26] ss:$8 sps:$4 sm:$0xff]   ;;  %v904_v22 = vld [vmem:[%s246_s26 + $0x14] ss:$8 sps:$4 sm:$0xff]   ;;  %854 = vmatpush3.bf16.msra.mxu1 %v853_v23  ;;  %v873_v59 = vpack.c.bf16 %v381_v58, %v380_v57  ;;  %s1132_s28 = scalar_lea.vmem %s1157_s6, %s888_s25 }
  0x12   : > { %832 = vmatprep.subr.bf16.mxu0 %v901_v20  ;;  %v906_v25 = vld [vmem:[%s246_s26 + $0x10] ss:$8 sps:$4 sm:$0xff]   ;;  %v907_v28 = vld [vmem:[%s246_s26 + $0x24] ss:$8 sps:$4 sm:$0xff]   ;;  %v909_v33 = vld [vmem:[%s246_s26 + $0x20] ss:$8 sps:$4 sm:$0xff]   ;;  %856 = vmatprep.subr.bf16.mxu1 %v855_v26 }
  0x13   : > { %834 = vmatpush1.bf16.msra.mxu0 %v903_v21  ;;  %v258_v31 = vld [vmem:[%s246_s26 + $0x30] sm:$0x11]  ;;  %v734_v8 = vld [vmem:[%s1155_s4] ss:$0 sm:$0xff]  ;;  %v494_v19 = vld [vmem:[%s1152_s1 + $0x8] sm:$0xff] }
  0x14   : > { %836 = vmatprep.subr.bf16.mxu0 %v904_v22  ;;  %v272_v37 = vunpack.c.h.bf16 %v258_v31  ;;  %v271_v41 = vunpack.c.l.bf16 %v258_v31  ;;  %v493_v17 = vld [vmem:[%s1152_s1] sm:$0xff]  ;;  %v499_v18 = vld [vmem:[%s1152_s1 + $0x30] sm:$0x1]  ;;  %v496_v21 = vld [vmem:[%s1152_s1 + $0x18] sm:$0xff] }
  0x15   : > { %858 = vmatpush3.bf16.msra.mxu1 %v857_v32  ;;  %v495_v20 = vld [vmem:[%s1152_s1 + $0x10] sm:$0xff]  ;;  %v497_v22 = vld [vmem:[%s1152_s1 + $0x20] sm:$0xff]  ;;  %v498_v23 = vld [vmem:[%s1152_s1 + $0x28] sm:$0xff] }
  0x16   : > { %860 = vmatprep.subr.bf16.mxu1 %v859_v34  ;;  %vm663_vm9 = vmand %vm661_vm6, %vm662_vm7 }
  0x17   : > { %838 = vmatpush1.bf16.msra.mxu0 %v906_v25  ;;  %v664_v25 = vld [vmem:[%s1132_s28 + $0x18] sm:$0x1] }
  0x18   : > { %840 = vmatprep.subr.bf16.mxu0 %v907_v28 }
  0x19   : > { %862 = vmatpush3.bf16.msra.mxu1 %v861_v40 }
  0x1a   : > { %864 = vmatprep.subr.bf16.mxu1 %v863_v42 }
  0x1b   : > { %842 = vmatpush1.bf16.msra.mxu0 %v909_v33 }
  0x1c   : > { %729 = vmatprep.subr.msk.mxu0 %vm282_vm0, %v272_v37 }
  0x1d   : > { %866 = vmatpush3.bf16.msra.mxu1 %v865_v48 }
  0x1e   : > { %868 = vmatprep.subr.bf16.mxu1 %v867_v49 }
  0x1f   : > { %730 = vmatpush1.msk.msra.mxu0 %vm282_vm0, %v271_v41 }
  0x20   : > { %731 = vmatmul.mubr.msk.f32.vlgmr.msra.gmra.mrb[0].mxu0 %vm275_vm1, %v273_v47  ;;  %875 = vmatprep.subr.bf16.mxu0 %v919_v0 }
  0x21   : > { %359 = vmatprep.mubr.f32.mxu0 %v918_v1  ;;  %870 = vmatpush3.bf16.msra.mxu1 %v869_v55 }
  0x22   : > { %872 = vmatprep.subr.bf16.mxu1 %v871_v56 }
  0x24   : > { %732 = vmatmul.mubr.msk.f32.gmra.mrb[2].mxu0 %vm275_vm1, %v274_v54 }
  0x25   : > { %874 = vmatpush3.bf16.msra.mxu1 %v873_v59  ;;  %810 = vmatprep.mubr.msk.f32.mxu0 %vm920_vm2, %v918_v1 }
  0x26   : > { %879 = vmatprep.subr.bf16.mxu1 %v919_v0 }
  0xf3   : > { %v355_v60 = vpop.f32.mrb[0].mxu0 }
  0xf4   : > { %v357_v61 = vpop.f32.mrb[1].mxu0 }
  0xf5   : > { %462 = vmatprep.mubr.f32.mxu1 %v357_v61 }
  0xf6   : > { %463 = vmatmul.mubr.f32.vlgmr.msra.gmra.mrb[0].mxu1 %v355_v60 }
  0xf7   : > { %v361_v62 = vpop.f32.mrb[2].mxu0 }
  0xf8   : > { %v363_v63 = vpop.f32.mrb[3].mxu0 }
  0xf9   : > { %467 = vmatprep.mubr.f32.mxu1 %v363_v63 }
  0xfa   : > { %468 = vmatmul.mubr.f32.gmra.mrb[2].mxu1 %v361_v62 }
  0xfb   : > { %828 = vmatprep.mubr.msk.f32.mxu1 %vm920_vm2, %v918_v1 }
 0x1c9   : > { %v791_v2 = vpop.f32.mrb[0].mxu1 }
 0x1ca   : > { %v792_v3 = vpop.f32.mrb[1].mxu1 }
 0x1cb   : > { %v793_v5 = vadd.f32 %v792_v3, %v791_v2 }
 0x1cd   : > { %v480_v6 = vmul.f32 %v793_v5, %v733_v4  ;;  %v794_v7 = vpop.f32.mrb[2].mxu1 }
 0x1ce   : > { %v795_v9 = vpop.f32.mrb[3].mxu1 }
 0x1cf   : > { %v796_v10 = vadd.f32 %v795_v9, %v794_v7  ;;  %v489_v11 = vadd.f32 %v734_v8, %v480_v6 }
 0x1d1   : > { %v481_v12 = vmul.f32 %v796_v10, %v733_v4  ;;  %v491_v14 = vmax.f32 %v489_v11, 0.0 }
 0x1d3   : > { %v490_v13 = vadd.f32 %v734_v8, %v481_v12 }
 0x1d5   : > { %v492_v15 = vmax.f32 %v490_v13, 0.0 }
 0x1d7   : > { %v876_v16 = vpack.c.bf16 %v492_v15, %v491_v14 }
 0x1d9   : > { %878 = vmatpush3.bf16.msk.msra.mxu0 %vm877_vm4, %v876_v16  ;;  %880 = vmatpush3.bf16.msk.msra.mxu1 %vm877_vm4, %v876_v16 }
 0x1dc   : > { %811 = vmatmul.mubr.msk.f32.vlgmr.msra.gmra.mrb[4].mxu0 %vm500_vm5, %v493_v17  ;;  %829 = vmatmul.mubr.msk.f32.vlgmr.msra.gmra.mrb[4].mxu1 %vm500_vm5, %v499_v18 }
 0x1dd   : > { %813 = vmatprep.mubr.msk.f32.mxu0 %vm920_vm2, %v918_v1 }
 0x1e0   : > { %814 = vmatmul.mubr.msk.f32.gmra.mrb[6].mxu0 %vm500_vm5, %v494_v19 }
 0x1e1   : > { %816 = vmatprep.mubr.msk.f32.mxu0 %vm920_vm2, %v918_v1 }
 0x1e4   : > { %817 = vmatmul.mubr.msk.f32.gmra.mrb[8].mxu0 %vm500_vm5, %v495_v20 }
 0x1e5   : > { %819 = vmatprep.mubr.msk.f32.mxu0 %vm920_vm2, %v918_v1 }
 0x1e8   : > { %820 = vmatmul.mubr.msk.f32.gmra.mrb[10].mxu0 %vm500_vm5, %v496_v21 }
 0x1e9   : > { %822 = vmatprep.mubr.msk.f32.mxu0 %vm920_vm2, %v918_v1 }
 0x1ec   : > { %823 = vmatmul.mubr.msk.f32.gmra.mrb[12].mxu0 %vm500_vm5, %v497_v22 }
 0x1ed   : > { %825 = vmatprep.mubr.msk.f32.mxu0 %vm920_vm2, %v918_v1 }
 0x1f0   : > { %826 = vmatmul.mubr.msk.f32.gmra.mrb[14].mxu0 %vm500_vm5, %v498_v23 }
 0x2af   : > { %v591_v24 = vpop.f32.mrb[4].mxu0  ;;  %v621_v1 = vpop.f32.mrb[4].mxu1 }
 0x2b0   : > { %v752_v26 = vpack.c.bf16 %v591_v24, %v591_v24  ;;  %v812_v27 = vpop.f32.mrb[5].mxu0  ;;  %v758_v28 = vpack.c.bf16 %v621_v1, %v621_v1  ;;  %v830_v29 = vpop.f32.mrb[5].mxu1 }
 0x2b2   : > { %655 = vst.msk [vmem:[%s1132_s28] sm:$0xf] %vm654_vm8, %v752_v26  ;;  %v665_v30 = vsel %vm663_vm9, %v758_v28, %v664_v25 }
 0x2b3   : > { %v596_v31 = vpop.f32.mrb[6].mxu0  ;;  %666 = vst [vmem:[%s1132_s28 + $0x18] sm:$0x1] %v665_v30 }
 0x2b4   : > { %v753_v32 = vpack.c.bf16 %v596_v31, %v596_v31  ;;  %v815_v33 = vpop.f32.mrb[7].mxu0 }
 0x2b6   : > { %656 = vst.msk [vmem:[%s1132_s28 + $0x4] sm:$0xf] %vm654_vm8, %v753_v32 }
 0x2b7   : > { %v601_v34 = vpop.f32.mrb[8].mxu0 }
 0x2b8   : > { %v754_v35 = vpack.c.bf16 %v601_v34, %v601_v34  ;;  %v818_v36 = vpop.f32.mrb[9].mxu0 }
 0x2ba   : > { %657 = vst.msk [vmem:[%s1132_s28 + $0x8] sm:$0xf] %vm654_vm8, %v754_v35 }
 0x2bb   : > { %v606_v37 = vpop.f32.mrb[10].mxu0 }
 0x2bc   : > { %v755_v38 = vpack.c.bf16 %v606_v37, %v606_v37  ;;  %v821_v39 = vpop.f32.mrb[11].mxu0 }
 0x2be   : > { %658 = vst.msk [vmem:[%s1132_s28 + $0xc] sm:$0xf] %vm654_vm8, %v755_v38 }
 0x2bf   : > { %v611_v40 = vpop.f32.mrb[12].mxu0 }
 0x2c0   : > { %v756_v41 = vpack.c.bf16 %v611_v40, %v611_v40  ;;  %v824_v42 = vpop.f32.mrb[13].mxu0 }
 0x2c2   : > { %659 = vst.msk [vmem:[%s1132_s28 + $0x10] sm:$0xf] %vm654_vm8, %v756_v41 }
 0x2c3   : > { %v616_v43 = vpop.f32.mrb[14].mxu0 }
 0x2c4   : > { %v757_v44 = vpack.c.bf16 %v616_v43, %v616_v43  ;;  %v827_v45 = vpop.f32.mrb[15].mxu0 }
 0x2c6   : > { %660 = vst.msk [vmem:[%s1132_s28 + $0x14] sm:$0xf] %vm654_vm8, %v757_v44 }
 0x2c7 PF: > { %s16_s21 = sadd.s32 1, %s916_s21  }
 0x2c8   : > { %p13_p4 = scmp.ge.s32.totalorder %s16_s21, 4  }
 0x2ca   :  { %15 = sbr.rel (!%p13_p4) target bundleno = 1 (0x1), region = 74 }

// kernel: _lambda_.118
= control target key start
LH: loop header
LB: loop body
LE: loop exit
PB: predicated region body
PF: predicated region fallthrough
CT: control target
= control target key end

     0   :  { %s1037_s21 = smov 0   ;;  %s1247_s0 = inlined_call_operand.vmem [shape: f32[36,49], index: 0, kind: input, shape index: {}]   ;;  %s1248_s1 = inlined_call_operand.vmem [shape: f32[49,36], index: 1, kind: input, shape index: {}]   ;;  %s1249_s2 = inlined_call_operand.vmem [shape: f32[256,64], index: 2, kind: input, shape index: {}]   ;;  %s1250_s3 = inlined_call_operand.vmem [shape: f32[1,64], index: 3, kind: input, shape index: {}]   ;;  %s1251_s4 = inlined_call_operand.vmem [shape: f32[1,64], index: 4, kind: input, shape index: {}]   ;;  %s1252_s5 = inlined_call_operand.vmem [shape: bf16[2,49,256], index: 5, kind: input, shape index: {}]   ;;  %s1253_s6 = inlined_call_operand.vmem [shape: bf16[2,49,64], index: 6, kind: output, shape index: {}]  }
   0x1 LB: > { %s777_s22 = sadd.s32 4294967295, %s997_s21   ;;  %p781_p0 = scmp.ge.s32.totalorder %s997_s21, 1  ;;  %s997_s21 = sphi %s1037_s21, %s16_s21  }
   0x2   : > { %p212_p1 = scmp.lt.s32.totalorder %s997_s21, 3 }
   0x4   : > { %p213_p2 = pnand %p781_p0, %p212_p1 }
   0x5   : > { %p242_p3 = scmp.lt.s32.totalorder (!%p213_p2), %s777_s22, 1  ;;  %v999_v0 = vmov (!%p213_p2), 0.0   ;;  %v412_v1 = vld [vmem:[%s1249_s2 + $0x80] sm:$0xff] (!%p213_p2)  ;;  %v413_v2 = vld [vmem:[%s1249_s2 + $0x88] sm:$0xff] (!%p213_p2)  ;;  %v414_v6 = vld [vmem:[%s1249_s2 + $0x90] sm:$0xff] (!%p213_p2)  ;;  %vm294_vm0 = vcmask (!%p213_p2), 1040384  }
   0x6   : > { %216 = sbr.rel (%p213_p2) target bundleno = 721 (0x2d1), region = 44  ;;  %365 = vmatprep.mubr.f32.mxu0 (!%p213_p2), %v999_v0  ;;  %v396_v3 = vld [vmem:[%s1249_s2] sm:$0xff] (!%p213_p2)  ;;  %v919_v4 = vpack.c.bf16 (!%p213_p2), %v413_v2, %v412_v1  ;;  %v397_v5 = vld [vmem:[%s1249_s2 + $0x8] sm:$0xff] (!%p213_p2)  ;;  %v415_v7 = vld [vmem:[%s1249_s2 + $0x98] sm:$0xff] (!%p213_p2)  ;;  %vm278_vm1 = vcmask (!%p213_p2), 400384   ;;  %vm1001_vm2 = vmmov (!%p213_p2), 0  }
   0x7   : > { %v921_v8 = vpack.c.bf16 (!%p213_p2), %v397_v5, %v396_v3  ;;  %v923_v9 = vpack.c.bf16 (!%p213_p2), %v415_v7, %v414_v6  ;;  %v398_v10 = vld [vmem:[%s1249_s2 + $0x10] sm:$0xff] (!%p213_p2)  ;;  %v399_v11 = vld [vmem:[%s1249_s2 + $0x18] sm:$0xff] (!%p213_p2)  ;;  %v416_v12 = vld [vmem:[%s1249_s2 + $0xa0] sm:$0xff] (!%p213_p2)  ;;  %vm576_vm3 = vcmask (!%p213_p2), 1043456   ;;  %vm554_vm4 = vcmask (!%p213_p2), 293888  }
   0x8   : > { %920 = vmatprep.subr.bf16.mxu1 (!%p213_p2), %v919_v4  ;;  %v417_v13 = vld [vmem:[%s1249_s2 + $0xa8] sm:$0xff] (!%p213_p2)  ;;  %v400_v14 = vld [vmem:[%s1249_s2 + $0x20] sm:$0xff] (!%p213_p2)  ;;  %v925_v15 = vpack.c.bf16 (!%p213_p2), %v399_v11, %v398_v10  ;;  %v418_v17 = vld [vmem:[%s1249_s2 + $0xb0] sm:$0xff] (!%p213_p2)  ;;  %v1000_v10 = vmov (!%p213_p2), 0.0|0.0   ;;  %vm716_vm5 = vcmask (!%p213_p2), 516096   ;;  %vm709_vm7 = vcmask (!%p213_p2), 519168  }
   0x9   : > { %922 = vmatpush3.bf16.msra.mxu1 (!%p213_p2), %v921_v8  ;;  %v401_v16 = vld [vmem:[%s1249_s2 + $0x28] sm:$0xff] (!%p213_p2)  ;;  %v419_v18 = vld [vmem:[%s1249_s2 + $0xb8] sm:$0xff] (!%p213_p2)  ;;  %v927_v20 = vpack.c.bf16 (!%p213_p2), %v417_v13, %v416_v12  ;;  %v402_v27 = vld [vmem:[%s1249_s2 + $0x30] sm:$0xff] (!%p213_p2)  ;;  %vm717_vm6 = vsmask.f32 (!%p213_p2), 256 }
   0xa   : > { %924 = vmatprep.subr.bf16.mxu1 (!%p213_p2), %v923_v9  ;;  %v929_v24 = vpack.c.bf16 (!%p213_p2), %v401_v16, %v400_v14  ;;  %v931_v26 = vpack.c.bf16 (!%p213_p2), %v419_v18, %v418_v17  ;;  %v403_v28 = vld [vmem:[%s1249_s2 + $0x38] sm:$0xff] (!%p213_p2)  ;;  %v420_v30 = vld [vmem:[%s1249_s2 + $0xc0] sm:$0xff] (!%p213_p2)  ;;  %v421_v31 = vld [vmem:[%s1249_s2 + $0xc8] sm:$0xff] (!%p213_p2) }
   0xb   : > { %v933_v33 = vpack.c.bf16 (!%p213_p2), %v403_v28, %v402_v27  ;;  %v935_v35 = vpack.c.bf16 (!%p213_p2), %v421_v31, %v420_v30  ;;  %v404_v36 = vld [vmem:[%s1249_s2 + $0x40] sm:$0xff] (!%p213_p2)  ;;  %v405_v37 = vld [vmem:[%s1249_s2 + $0x48] sm:$0xff] (!%p213_p2)  ;;  %v422_v38 = vld [vmem:[%s1249_s2 + $0xd0] sm:$0xff] (!%p213_p2) }
   0xc   : > { %v423_v39 = vld [vmem:[%s1249_s2 + $0xd8] sm:$0xff] (!%p213_p2)  ;;  %v937_v41 = vpack.c.bf16 (!%p213_p2), %v405_v37, %v404_v36  ;;  %v406_v43 = vld [vmem:[%s1249_s2 + $0x50] sm:$0xff] (!%p213_p2)  ;;  %v273_v45 = vld [vmem:[%s1247_s0] sm:$0xff] (!%p213_p2) }
   0xd   : > { %s1255_s22 = smov (!%p242_p3, %s777_s22), 1  ;;  %926 = vmatpush3.bf16.msra.mxu1 %v925_v15  ;;  %v939_v42 = vpack.c.bf16 %v423_v39, %v422_v38  ;;  %v407_v44 = vld [vmem:[%s1249_s2 + $0x58] sm:$0xff]  ;;  %v424_v46 = vld [vmem:[%s1249_s2 + $0xe0] sm:$0xff]  ;;  %v425_v47 = vld [vmem:[%s1249_s2 + $0xe8] sm:$0xff] }
   0xe   : > { %s969_s11 = smul.u32 56, %s1255_s22  ;;  %928 = vmatprep.subr.bf16.mxu1 %v927_v20  ;;  %v941_v48 = vpack.c.bf16 %v407_v44, %v406_v43  ;;  %v943_v49 = vpack.c.bf16 %v425_v47, %v424_v46  ;;  %v408_v50 = vld [vmem:[%s1249_s2 + $0x60] sm:$0xff]  ;;  %v409_v51 = vld [vmem:[%s1249_s2 + $0x68] sm:$0xff]  ;;  %v426_v53 = vld [vmem:[%s1249_s2 + $0xf0] sm:$0xff] }
   0xf   : > { %v274_v52 = vld [vmem:[%s1247_s0 + $0x8] sm:$0xff]  ;;  %v427_v54 = vld [vmem:[%s1249_s2 + $0xf8] sm:$0xff]  ;;  %v945_v55 = vpack.c.bf16 %v409_v51, %v408_v50  ;;  %v275_v57 = vld [vmem:[%s1247_s0 + $0x10] sm:$0xff]  ;;  %s970_s7 = smul.u32 28, %s1255_s22 }
  0x10   : > { %s246_s26 = scalar_lea.vmem %s1252_s5, %s969_s11  ;;  %v947_v56 = vpack.c.bf16 %v427_v54, %v426_v53  ;;  %v276_v58 = vld [vmem:[%s1247_s0 + $0x18] sm:$0xff]  ;;  %v277_v59 = vld [vmem:[%s1247_s0 + $0x20] sm:$0xf]  ;;  %v410_v60 = vld [vmem:[%s1249_s2 + $0x70] sm:$0xff] }
  0x11   : > { %v982_v19 = vld [vmem:[%s246_s26 + $0x4] ss:$8 sps:$4 sm:$0xff]   ;;  %v984_v21 = vld [vmem:[%s246_s26] ss:$8 sps:$4 sm:$0xff]   ;;  %v985_v22 = vld [vmem:[%s246_s26 + $0x14] ss:$8 sps:$4 sm:$0xff]   ;;  %930 = vmatpush3.bf16.msra.mxu1 %v929_v24  ;;  %s1228_s10 = scalar_lea.vmem %s1253_s6, %s970_s7 }
  0x12   : > { %908 = vmatprep.subr.bf16.mxu0 %v982_v19  ;;  %v987_v23 = vld [vmem:[%s246_s26 + $0x10] ss:$8 sps:$4 sm:$0xff]   ;;  %v988_v25 = vld [vmem:[%s246_s26 + $0x24] ss:$8 sps:$4 sm:$0xff]   ;;  %v990_v32 = vld [vmem:[%s246_s26 + $0x20] ss:$8 sps:$4 sm:$0xff]   ;;  %932 = vmatprep.subr.bf16.mxu1 %v931_v26 }
  0x13   : > { %910 = vmatpush1.bf16.msra.mxu0 %v984_v21  ;;  %v258_v29 = vld [vmem:[%s246_s26 + $0x30] sm:$0x11]  ;;  %v411_v61 = vld [vmem:[%s1249_s2 + $0x78] sm:$0xff]  ;;  %v791_v13 = vld [vmem:[%s1250_s3] ss:$0 sm:$0xff] }
  0x14   : > { %912 = vmatprep.subr.bf16.mxu0 %v985_v22  ;;  %v272_v34 = vunpack.c.h.bf16 %v258_v29  ;;  %v271_v40 = vunpack.c.l.bf16 %v258_v29  ;;  %v949_v62 = vpack.c.bf16 %v411_v61, %v410_v60  ;;  %v792_v17 = vld [vmem:[%s1251_s4] ss:$0 sm:$0xff]  ;;  %v553_v46 = vld [vmem:[%s1248_s1 + $0x30] sm:$0x1]  ;;  %v548_v47 = vld [vmem:[%s1248_s1 + $0x8] sm:$0xff] }
  0x15   : > { %934 = vmatpush3.bf16.msra.mxu1 %v933_v33  ;;  %v551_v50 = vld [vmem:[%s1248_s1 + $0x20] sm:$0xff]  ;;  %v552_v51 = vld [vmem:[%s1248_s1 + $0x28] sm:$0xff]  ;;  %vm718_vm8 = vmand %vm716_vm5, %vm717_vm6 }
  0x16   : > { %936 = vmatprep.subr.bf16.mxu1 %v935_v35  ;;  %v719_v53 = vld [vmem:[%s1228_s10 + $0x18] sm:$0x1] }
  0x17   : > { %914 = vmatpush1.bf16.msra.mxu0 %v987_v23 }
  0x18   : > { %916 = vmatprep.subr.bf16.mxu0 %v988_v25 }
  0x19   : > { %938 = vmatpush3.bf16.msra.mxu1 %v937_v41 }
  0x1a   : > { %940 = vmatprep.subr.bf16.mxu1 %v939_v42 }
  0x1b   : > { %918 = vmatpush1.bf16.msra.mxu0 %v990_v32 }
  0x1c   : > { %784 = vmatprep.subr.msk.mxu0 %vm294_vm0, %v272_v34 }
  0x1d   : > { %942 = vmatpush3.bf16.msra.mxu1 %v941_v48  ;;  %v549_v48 = vld [vmem:[%s1248_s1 + $0x10] sm:$0xff] }
  0x1e   : > { %944 = vmatprep.subr.bf16.mxu1 %v943_v49  ;;  %v550_v49 = vld [vmem:[%s1248_s1 + $0x18] sm:$0xff] }
  0x1f   : > { %785 = vmatpush1.msk.msra.mxu0 %vm294_vm0, %v271_v40 }
  0x20   : > { %786 = vmatmul.mubr.msk.f32.vlgmr.msra.gmra.mrb[0].mxu0 %vm278_vm1, %v273_v45  ;;  %951 = vmatprep.subr.bf16.mxu0 %v1000_v10  ;;  %v547_v45 = vld [vmem:[%s1248_s1] sm:$0xff] }
  0x21   : > { %371 = vmatprep.mubr.f32.mxu0 %v999_v0  ;;  %946 = vmatpush3.bf16.msra.mxu1 %v945_v55 }
  0x22   : > { %948 = vmatprep.subr.bf16.mxu1 %v947_v56 }
  0x24   : > { %787 = vmatmul.mubr.msk.f32.gmra.mrb[2].mxu0 %vm278_vm1, %v274_v52 }
  0x25   : > { %377 = vmatprep.mubr.f32.mxu0 %v999_v0  ;;  %950 = vmatpush3.bf16.msra.mxu1 %v949_v62 }
  0x26   : > { %957 = vmatprep.subr.bf16.mxu1 %v1000_v10 }
  0x28   : > { %788 = vmatmul.mubr.msk.f32.gmra.mrb[4].mxu0 %vm278_vm1, %v275_v57 }
  0x29   : > { %383 = vmatprep.mubr.f32.mxu0 %v999_v0 }
  0x2c   : > { %789 = vmatmul.mubr.msk.f32.gmra.mrb[6].mxu0 %vm278_vm1, %v276_v58 }
  0x2d   : > { %389 = vmatprep.mubr.f32.mxu0 %v999_v0 }
  0x30   : > { %790 = vmatmul.mubr.msk.f32.gmra.mrb[8].mxu0 %vm278_vm1, %v277_v59 }
  0x31   : > { %886 = vmatprep.mubr.msk.f32.mxu0 %vm1001_vm2, %v999_v0 }
  0xf3   : > { %v367_v63 = vpop.f32.mrb[0].mxu0 }
  0xf4   : > { %v369_v1 = vpop.f32.mrb[1].mxu0 }
  0xf5   : > { %492 = vmatprep.mubr.f32.mxu1 %v369_v1 }
  0xf6   : > { %493 = vmatmul.mubr.f32.vlgmr.msra.gmra.mrb[0].mxu1 %v367_v63 }
  0xf7   : > { %v373_v2 = vpop.f32.mrb[2].mxu0 }
  0xf8   : > { %v375_v3 = vpop.f32.mrb[3].mxu0 }
  0xf9   : > { %497 = vmatprep.mubr.f32.mxu1 %v375_v3 }
  0xfa   : > { %498 = vmatmul.mubr.f32.gmra.mrb[2].mxu1 %v373_v2 }
  0xfb   : > { %v379_v4 = vpop.f32.mrb[4].mxu0 }
  0xfc   : > { %v381_v5 = vpop.f32.mrb[5].mxu0 }
  0xfd   : > { %502 = vmatprep.mubr.f32.mxu1 %v381_v5 }
  0xfe   : > { %503 = vmatmul.mubr.f32.gmra.mrb[4].mxu1 %v379_v4 }
  0xff   : > { %v385_v6 = vpop.f32.mrb[6].mxu0 }
 0x100   : > { %v387_v7 = vpop.f32.mrb[7].mxu0 }
 0x101   : > { %507 = vmatprep.mubr.f32.mxu1 %v387_v7 }
 0x102   : > { %508 = vmatmul.mubr.f32.gmra.mrb[6].mxu1 %v385_v6 }
 0x103   : > { %v391_v8 = vpop.f32.mrb[8].mxu0 }
 0x104   : > { %v393_v9 = vpop.f32.mrb[9].mxu0 }
 0x105   : > { %512 = vmatprep.mubr.f32.mxu1 %v393_v9 }
 0x106   : > { %513 = vmatmul.mubr.f32.gmra.mrb[8].mxu1 %v391_v8 }
 0x107   : > { %904 = vmatprep.mubr.msk.f32.mxu1 %vm1001_vm2, %v999_v0 }
 0x1c9   : > { %v849_v11 = vpop.f32.mrb[0].mxu1 }
 0x1ca   : > { %v850_v12 = vpop.f32.mrb[1].mxu1 }
 0x1cb   : > { %v851_v14 = vadd.f32 %v850_v12, %v849_v11 }
 0x1cd   : > { %v525_v15 = vmul.f32 %v851_v14, %v791_v13  ;;  %v852_v16 = vpop.f32.mrb[2].mxu1 }
 0x1ce   : > { %v853_v18 = vpop.f32.mrb[3].mxu1 }
 0x1cf   : > { %v854_v19 = vadd.f32 %v853_v18, %v852_v16  ;;  %v537_v20 = vadd.f32 %v792_v17, %v525_v15 }
 0x1d1   : > { %v526_v21 = vmul.f32 %v854_v19, %v791_v13  ;;  %v855_v22 = vpop.f32.mrb[4].mxu1  ;;  %v542_v26 = vmax.f32 %v537_v20, 0.0 }
 0x1d2   : > { %v856_v23 = vpop.f32.mrb[5].mxu1 }
 0x1d3   : > { %v538_v24 = vadd.f32 %v792_v17, %v526_v21  ;;  %v857_v25 = vadd.f32 %v856_v23, %v855_v22 }
 0x1d5   : > { %v543_v27 = vmax.f32 %v538_v24, 0.0  ;;  %v527_v28 = vmul.f32 %v857_v25, %v791_v13  ;;  %v858_v29 = vpop.f32.mrb[6].mxu1 }
 0x1d6   : > { %v859_v30 = vpop.f32.mrb[7].mxu1 }
 0x1d7   : > { %v952_v31 = vpack.c.bf16 %v543_v27, %v542_v26  ;;  %v860_v32 = vadd.f32 %v859_v30, %v858_v29  ;;  %v539_v33 = vadd.f32 %v792_v17, %v527_v28 }
 0x1d9   : > { %v528_v34 = vmul.f32 %v860_v32, %v791_v13  ;;  %953 = vmatpush3.bf16.msra.mxu0 %v952_v31  ;;  %960 = vmatpush3.bf16.msra.mxu1 %v952_v31  ;;  %v861_v35 = vpop.f32.mrb[8].mxu1  ;;  %v544_v39 = vmax.f32 %v539_v33, 0.0 }
 0x1da   : > { %v862_v36 = vpop.f32.mrb[9].mxu1  ;;  %954 = vmatprep.subr.bf16.mxu0 %v1000_v10  ;;  %958 = vmatprep.subr.bf16.mxu1 %v1000_v10 }
 0x1db   : > { %v540_v37 = vadd.f32 %v792_v17, %v528_v34  ;;  %v863_v38 = vadd.f32 %v862_v36, %v861_v35 }
 0x1dd   : > { %v545_v40 = vmax.f32 %v540_v37, 0.0  ;;  %v529_v41 = vmul.f32 %v863_v38, %v791_v13 }
 0x1df   : > { %v955_v42 = vpack.c.bf16 %v545_v40, %v544_v39  ;;  %v541_v43 = vadd.f32 %v792_v17, %v529_v41 }
 0x1e1   : > { %956 = vmatpush3.bf16.msra.mxu0 %v955_v42  ;;  %961 = vmatpush3.bf16.msra.mxu1 %v955_v42  ;;  %v546_v44 = vmax.f32 %v541_v43, 0.0 }
 0x1e2   : > { %884 = vmatprep.subr.mxu0 %v999_v0  ;;  %959 = vmatprep.subr.mxu1 %v999_v0 }
 0x1e5   : > { %885 = vmatpush3.msk.msra.mxu0 %vm576_vm3, %v546_v44  ;;  %962 = vmatpush3.msk.msra.mxu1 %vm576_vm3, %v546_v44 }
 0x1e6   : > { %887 = vmatmul.mubr.msk.f32.vlgmr.msra.gmra.mrb[10].mxu0 %vm554_vm4, %v547_v45  ;;  %905 = vmatmul.mubr.msk.f32.vlgmr.msra.gmra.mrb[10].mxu1 %vm554_vm4, %v553_v46 }
 0x1e7   : > { %889 = vmatprep.mubr.msk.f32.mxu0 %vm1001_vm2, %v999_v0 }
 0x1ea   : > { %890 = vmatmul.mubr.msk.f32.gmra.mrb[12].mxu0 %vm554_vm4, %v548_v47 }
 0x1eb   : > { %892 = vmatprep.mubr.msk.f32.mxu0 %vm1001_vm2, %v999_v0 }
 0x1ee   : > { %893 = vmatmul.mubr.msk.f32.gmra.mrb[14].mxu0 %vm554_vm4, %v549_v48 }
 0x1ef   : > { %895 = vmatprep.mubr.msk.f32.mxu0 %vm1001_vm2, %v999_v0 }
 0x1f2   : > { %896 = vmatmul.mubr.msk.f32.gmra.mrb[16].mxu0 %vm554_vm4, %v550_v49 }
 0x1f3   : > { %898 = vmatprep.mubr.msk.f32.mxu0 %vm1001_vm2, %v999_v0 }
 0x1f6   : > { %899 = vmatmul.mubr.msk.f32.gmra.mrb[18].mxu0 %vm554_vm4, %v551_v50 }
 0x1f7   : > { %901 = vmatprep.mubr.msk.f32.mxu0 %vm1001_vm2, %v999_v0 }
 0x1fa   : > { %902 = vmatmul.mubr.msk.f32.gmra.mrb[20].mxu0 %vm554_vm4, %v552_v51 }
 0x2b9   : > { %v646_v52 = vpop.f32.mrb[10].mxu0  ;;  %v676_v0 = vpop.f32.mrb[10].mxu1 }
 0x2ba   : > { %v810_v54 = vpack.c.bf16 %v646_v52, %v646_v52  ;;  %v888_v55 = vpop.f32.mrb[11].mxu0  ;;  %v816_v56 = vpack.c.bf16 %v676_v0, %v676_v0  ;;  %v906_v57 = vpop.f32.mrb[11].mxu1 }
 0x2bc   : > { %710 = vst.msk [vmem:[%s1228_s10] sm:$0xf] %vm709_vm7, %v810_v54  ;;  %v720_v58 = vsel %vm718_vm8, %v816_v56, %v719_v53 }
 0x2bd   : > { %v651_v59 = vpop.f32.mrb[12].mxu0  ;;  %721 = vst [vmem:[%s1228_s10 + $0x18] sm:$0x1] %v720_v58 }
 0x2be   : > { %v811_v60 = vpack.c.bf16 %v651_v59, %v651_v59  ;;  %v891_v61 = vpop.f32.mrb[13].mxu0 }
 0x2c0   : > { %711 = vst.msk [vmem:[%s1228_s10 + $0x4] sm:$0xf] %vm709_vm7, %v811_v60 }
 0x2c1   : > { %v656_v62 = vpop.f32.mrb[14].mxu0 }
 0x2c2   : > { %v812_v63 = vpack.c.bf16 %v656_v62, %v656_v62  ;;  %v894_v1 = vpop.f32.mrb[15].mxu0 }
 0x2c4   : > { %712 = vst.msk [vmem:[%s1228_s10 + $0x8] sm:$0xf] %vm709_vm7, %v812_v63 }
 0x2c5   : > { %v661_v2 = vpop.f32.mrb[16].mxu0 }
 0x2c6   : > { %v813_v3 = vpack.c.bf16 %v661_v2, %v661_v2  ;;  %v897_v4 = vpop.f32.mrb[17].mxu0 }
 0x2c8   : > { %713 = vst.msk [vmem:[%s1228_s10 + $0xc] sm:$0xf] %vm709_vm7, %v813_v3 }
 0x2c9   : > { %v666_v5 = vpop.f32.mrb[18].mxu0 }
 0x2ca   : > { %v814_v6 = vpack.c.bf16 %v666_v5, %v666_v5  ;;  %v900_v7 = vpop.f32.mrb[19].mxu0 }
 0x2cc   : > { %714 = vst.msk [vmem:[%s1228_s10 + $0x10] sm:$0xf] %vm709_vm7, %v814_v6 }
 0x2cd   : > { %v671_v8 = vpop.f32.mrb[20].mxu0 }
 0x2ce   : > { %v815_v9 = vpack.c.bf16 %v671_v8, %v671_v8  ;;  %v903_v10 = vpop.f32.mrb[21].mxu0 }
 0x2d0   : > { %715 = vst.msk [vmem:[%s1228_s10 + $0x14] sm:$0xf] %vm709_vm7, %v815_v9 }
 0x2d1 PF: > { %s16_s21 = sadd.s32 1, %s997_s21  }
 0x2d2   : > { %p13_p4 = scmp.ge.s32.totalorder %s16_s21, 4  }
 0x2d4   :  { %15 = sbr.rel (!%p13_p4) target bundleno = 1 (0x1), region = 74 }

// kernel: _lambda_.120
= control target key start
LH: loop header
LB: loop body
LE: loop exit
PB: predicated region body
PF: predicated region fallthrough
CT: control target
= control target key end

     0   :  { %v389_v0 = vmov 0.0   ;;  %vm390_vm0 = vmmov 0   ;;  %s543_s1 = inlined_call_operand.vmem [shape: bf16[128,128], index: 1, kind: input, shape index: {}]   ;;  %s544_s0 = inlined_call_operand.vmem [shape: bf16[104,128], index: 0, kind: input, shape index: {}]   ;;  %s545_s2 = inlined_call_operand.vmem [shape: f32[1,128], index: 2, kind: input, shape index: {}]   ;;  %s546_s3 = inlined_call_operand.vmem [shape: f32[1,128], index: 3, kind: input, shape index: {}]   ;;  %s547_s4 = inlined_call_operand.vmem [shape: f32[104,128], index: 4, kind: output, shape index: {}]  }
   0x1   :  { %312 = vmatprep.subr.bf16.mxu0 %v389_v0  ;;  %v374_v1 = vld [vmem:[%s543_s1] sm:$0xff]   ;;  %356 = vmatprep.subr.bf16.mxu1 %v389_v0  ;;  %v375_v2 = vld [vmem:[%s543_s1 + $0x8] sm:$0xff]   ;;  %v376_v3 = vld [vmem:[%s543_s1 + $0x10] sm:$0xff]  }
   0x2   :  { %328 = vmatprep.mubr.msk.bf16.mxu0 %vm390_vm0, %v389_v0  ;;  %344 = vmatprep.mubr.msk.bf16.mxu1 %vm390_vm0, %v389_v0  ;;  %v377_v4 = vld [vmem:[%s543_s1 + $0x18] sm:$0xff]   ;;  %v378_v5 = vld [vmem:[%s543_s1 + $0x20] sm:$0xff]   ;;  %v379_v6 = vld [vmem:[%s543_s1 + $0x28] sm:$0xff]  }
   0x3   :  { %313 = vmatpush3.bf16.msra.mxu0 %v374_v1  ;;  %364 = vmatpush3.bf16.msra.mxu1 %v374_v1  ;;  %v380_v7 = vld [vmem:[%s543_s1 + $0x30] sm:$0xff]   ;;  %v381_v8 = vld [vmem:[%s543_s1 + $0x38] sm:$0xff]   ;;  %v382_v9 = vld [vmem:[%s544_s0] sm:$0xff]  }
   0x4   :  { %314 = vmatprep.subr.bf16.mxu0 %v389_v0  ;;  %357 = vmatprep.subr.bf16.mxu1 %v389_v0  ;;  %v383_v10 = vld [vmem:[%s544_s0 + $0x20] sm:$0xff]   ;;  %v384_v11 = vld [vmem:[%s544_s0 + $0x8] sm:$0xff]   ;;  %v386_v13 = vld [vmem:[%s544_s0 + $0x10] sm:$0xff]  }
   0x5   :  { %v385_v12 = vld [vmem:[%s544_s0 + $0x28] sm:$0xff]   ;;  %v387_v14 = vld [vmem:[%s544_s0 + $0x30] ss:$0 sps:$4 sm:$0xff]   ;;  %v388_v15 = vld [vmem:[%s544_s0 + $0x18] sm:$0xff]  }
   0x6   :  { %v471_v16 = vld [vmem:[%s545_s2] ss:$0 sm:$0xff] }
   0x7   :  { %315 = vmatpush3.bf16.msra.mxu0 %v375_v2  ;;  %365 = vmatpush3.bf16.msra.mxu1 %v375_v2  ;;  %v476_v18 = vld [vmem:[%s546_s3] ss:$0 sm:$0xff] }
   0x8   :  { %316 = vmatprep.subr.bf16.mxu0 %v389_v0  ;;  %358 = vmatprep.subr.bf16.mxu1 %v389_v0 }
   0xb   :  { %317 = vmatpush3.bf16.msra.mxu0 %v376_v3  ;;  %366 = vmatpush3.bf16.msra.mxu1 %v376_v3 }
   0xc   :  { %318 = vmatprep.subr.bf16.mxu0 %v389_v0  ;;  %359 = vmatprep.subr.bf16.mxu1 %v389_v0 }
   0xf   :  { %319 = vmatpush3.bf16.msra.mxu0 %v377_v4  ;;  %367 = vmatpush3.bf16.msra.mxu1 %v377_v4 }
  0x10   :  { %320 = vmatprep.subr.bf16.mxu0 %v389_v0  ;;  %360 = vmatprep.subr.bf16.mxu1 %v389_v0 }
  0x13   :  { %321 = vmatpush3.bf16.msra.mxu0 %v378_v5  ;;  %368 = vmatpush3.bf16.msra.mxu1 %v378_v5 }
  0x14   :  { %322 = vmatprep.subr.bf16.mxu0 %v389_v0  ;;  %361 = vmatprep.subr.bf16.mxu1 %v389_v0 }
  0x17   :  { %323 = vmatpush3.bf16.msra.mxu0 %v379_v6  ;;  %369 = vmatpush3.bf16.msra.mxu1 %v379_v6 }
  0x18   :  { %324 = vmatprep.subr.bf16.mxu0 %v389_v0  ;;  %362 = vmatprep.subr.bf16.mxu1 %v389_v0 }
  0x1b   :  { %325 = vmatpush3.bf16.msra.mxu0 %v380_v7  ;;  %370 = vmatpush3.bf16.msra.mxu1 %v380_v7 }
  0x1c   :  { %326 = vmatprep.subr.bf16.mxu0 %v389_v0  ;;  %363 = vmatprep.subr.bf16.mxu1 %v389_v0 }
  0x1f   :  { %327 = vmatpush3.bf16.msra.mxu0 %v381_v8  ;;  %371 = vmatpush3.bf16.msra.mxu1 %v381_v8 }
  0x22   :  { %329 = vmatmul.mubr.bf16.vlgmr.msra.gmra.mrb[0].mxu0 %v382_v9  ;;  %345 = vmatmul.mubr.bf16.vlgmr.msra.gmra.mrb[0].mxu1 %v383_v10 }
  0x23   :  { %332 = vmatprep.mubr.msk.bf16.mxu0 %vm390_vm0, %v389_v0  ;;  %348 = vmatprep.mubr.msk.bf16.mxu1 %vm390_vm0, %v389_v0 }
  0x2a   :  { %333 = vmatmul.mubr.bf16.gmra.mrb[4].mxu0 %v384_v11  ;;  %349 = vmatmul.mubr.bf16.gmra.mrb[4].mxu1 %v385_v12 }
  0x2b   :  { %336 = vmatprep.mubr.msk.bf16.mxu0 %vm390_vm0, %v389_v0  ;;  %352 = vmatprep.mubr.msk.bf16.mxu1 %vm390_vm0, %v389_v0 }
  0x32   :  { %337 = vmatmul.mubr.bf16.gmra.mrb[8].mxu0 %v386_v13  ;;  %353 = vmatmul.mubr.bf16.gmra.mrb[8].mxu1 %v387_v14 }
  0x33   :  { %340 = vmatprep.mubr.msk.bf16.mxu0 %vm390_vm0, %v389_v0 }
  0x3a   :  { %341 = vmatmul.mubr.bf16.gmra.mrb[12].mxu0 %v388_v15 }
  0xf5   :  { %v169_v17 = vpop.f32.mrb[0].mxu0  ;;  %v201_v19 = vpop.f32.mrb[0].mxu1 }
  0xf6   :  { %v230_v20 = vmul.f32 %v471_v16, %v169_v17  ;;  %v330_v21 = vpop.f32.mrb[1].mxu0  ;;  %v238_v22 = vmul.f32 %v471_v16, %v201_v19  ;;  %v346_v23 = vpop.f32.mrb[1].mxu1 }
  0xf7   :  { %v172_v24 = vpop.f32.mrb[2].mxu0  ;;  %v204_v25 = vpop.f32.mrb[2].mxu1 }
  0xf8   :  { %v250_v26 = vadd.f32 %v476_v18, %v230_v20  ;;  %v231_v27 = vmul.f32 %v471_v16, %v172_v24  ;;  %v331_v28 = vpop.f32.mrb[3].mxu0  ;;  %v258_v29 = vadd.f32 %v476_v18, %v238_v22  ;;  %v239_v30 = vmul.f32 %v471_v16, %v204_v25  ;;  %v347_v31 = vpop.f32.mrb[3].mxu1 }
  0xfa   :  { %263 = vst [vmem:[%s547_s4] sm:$0xff] %v250_v26  ;;  %v251_v32 = vadd.f32 %v476_v18, %v231_v27  ;;  %271 = vst [vmem:[%s547_s4 + $0x40] sm:$0xff] %v258_v29  ;;  %v259_v33 = vadd.f32 %v476_v18, %v239_v30 }
  0xfc   :  { %264 = vst [vmem:[%s547_s4 + $0x8] sm:$0xff] %v251_v32  ;;  %272 = vst [vmem:[%s547_s4 + $0x48] sm:$0xff] %v259_v33 }
  0xfd   :  { %v177_v34 = vpop.f32.mrb[4].mxu0  ;;  %v209_v35 = vpop.f32.mrb[4].mxu1 }
  0xfe   :  { %v232_v36 = vmul.f32 %v471_v16, %v177_v34  ;;  %v334_v37 = vpop.f32.mrb[5].mxu0  ;;  %v240_v38 = vmul.f32 %v471_v16, %v209_v35  ;;  %v350_v39 = vpop.f32.mrb[5].mxu1 }
  0xff   :  { %v180_v40 = vpop.f32.mrb[6].mxu0  ;;  %v212_v41 = vpop.f32.mrb[6].mxu1 }
 0x100   :  { %v252_v42 = vadd.f32 %v476_v18, %v232_v36  ;;  %v233_v43 = vmul.f32 %v471_v16, %v180_v40  ;;  %v335_v44 = vpop.f32.mrb[7].mxu0  ;;  %v260_v45 = vadd.f32 %v476_v18, %v240_v38  ;;  %v241_v46 = vmul.f32 %v471_v16, %v212_v41  ;;  %v351_v47 = vpop.f32.mrb[7].mxu1 }
 0x102   :  { %265 = vst [vmem:[%s547_s4 + $0x10] sm:$0xff] %v252_v42  ;;  %v253_v48 = vadd.f32 %v476_v18, %v233_v43  ;;  %273 = vst [vmem:[%s547_s4 + $0x50] sm:$0xff] %v260_v45  ;;  %v261_v49 = vadd.f32 %v476_v18, %v241_v46 }
 0x104   :  { %266 = vst [vmem:[%s547_s4 + $0x18] sm:$0xff] %v253_v48  ;;  %274 = vst [vmem:[%s547_s4 + $0x58] sm:$0xff] %v261_v49 }
 0x105   :  { %v185_v50 = vpop.f32.mrb[8].mxu0  ;;  %v217_v51 = vpop.f32.mrb[8].mxu1 }
 0x106   :  { %v234_v52 = vmul.f32 %v471_v16, %v185_v50  ;;  %v338_v53 = vpop.f32.mrb[9].mxu0  ;;  %v242_v54 = vmul.f32 %v471_v16, %v217_v51  ;;  %v354_v55 = vpop.f32.mrb[9].mxu1 }
 0x107   :  { %v188_v56 = vpop.f32.mrb[10].mxu0  ;;  %v220_v57 = vpop.f32.mrb[10].mxu1 }
 0x108   :  { %v254_v58 = vadd.f32 %v476_v18, %v234_v52  ;;  %v235_v59 = vmul.f32 %v471_v16, %v188_v56  ;;  %v339_v60 = vpop.f32.mrb[11].mxu0  ;;  %v262_v61 = vadd.f32 %v476_v18, %v242_v54  ;;  %v355_v62 = vpop.f32.mrb[11].mxu1 }
 0x10a   :  { %267 = vst [vmem:[%s547_s4 + $0x20] sm:$0xff] %v254_v58  ;;  %v255_v63 = vadd.f32 %v476_v18, %v235_v59  ;;  %275 = vst [vmem:[%s547_s4 + $0x60] sm:$0xff] %v262_v61 }
 0x10c   :  { %268 = vst [vmem:[%s547_s4 + $0x28] sm:$0xff] %v255_v63 }
 0x10d   :  { %v193_v0 = vpop.f32.mrb[12].mxu0 }
 0x10e   :  { %v236_v1 = vmul.f32 %v471_v16, %v193_v0  ;;  %v342_v2 = vpop.f32.mrb[13].mxu0 }
 0x10f   :  { %v196_v3 = vpop.f32.mrb[14].mxu0 }
 0x110   :  { %v256_v4 = vadd.f32 %v476_v18, %v236_v1  ;;  %v237_v5 = vmul.f32 %v471_v16, %v196_v3  ;;  %v343_v6 = vpop.f32.mrb[15].mxu0 }
 0x112   :  { %269 = vst [vmem:[%s547_s4 + $0x30] sm:$0xff] %v256_v4  ;;  %v257_v7 = vadd.f32 %v476_v18, %v237_v5 }
 0x114   :  { %270 = vst [vmem:[%s547_s4 + $0x38] sm:$0xff] %v257_v7 }

// kernel: _lambda_.119
= control target key start
LH: loop header
LB: loop body
LE: loop exit
PB: predicated region body
PF: predicated region fallthrough
CT: control target
= control target key end

     0   :  { %s1709_s15 = smov 0   ;;  %s1711_s16 = smov 0   ;;  %s1921_s0 = inlined_call_operand.vmem [shape: bf16[104,4608], index: 0, kind: input, shape index: {}]   ;;  %s1922_s1 = inlined_call_operand.vmem [shape: bf16[4608,128], index: 1, kind: input, shape index: {}]   ;;  %s1923_s2 = inlined_call_operand.vmem [shape: f32[1,128], index: 2, kind: input, shape index: {}]   ;;  %s1924_s3 = inlined_call_operand.vmem [shape: f32[1,128], index: 3, kind: input, shape index: {}]   ;;  %s1925_s4 = inlined_call_operand.vmem [shape: bf16[104,128], index: 4, kind: output, shape index: {}]  }
   0x1   :  { %s1713_s17 = smov 0   ;;  %s1715_s18 = smov 0  }
   0x2   :  { %s1717_s19 = smov 0  }
   0x3 LB: > { %s26_s20 = sadd.s32 1, %s1677_s18  ;;  %p49_p1 = scmp.ne.s32.totalorder %s1669_s16, %s1665_s15  ;;  %s1681_s19 = sphi %s1717_s19, %s14_s19   ;;  %s1677_s18 = sphi %s1715_s18, %s1929_s18   ;;  %s1673_s17 = sphi %s1713_s17, %s1928_s17   ;;  %s1669_s16 = sphi %s1711_s16, %s1927_s16   ;;  %s1665_s15 = sphi %s1709_s15, %s1926_s15  }
   0x4   : > { %p27_p0 = scmp.ge.s32.totalorder %s26_s20, 9  ;;  %p50_p2 = scmp.eq.s32.totalorder %s1681_s19, 0 }
   0x5   : > { %s42_s22 = sadd.s32 1, %s1669_s16  ;;  %p1276_p5 = scmp.ge.s32.totalorder %s1681_s19, 9 }
   0x6   : > { %s1931_s20 = smov (%p27_p0, %s26_s20), 0  ;;  %p51_p3 = por %p50_p2, %p49_p1 }
   0x7   : > { %s38_s21 = ssub.s32 %s1677_s18, %s1931_s20  ;;  %195 = sbr.rel (%p1276_p5) target bundleno = 32 (0x20), region = 24 }
   0x8   : > { %p40_p4 = scmp.eq.s32.totalorder %s38_s21, 0 }
   0xa   : > { %s1744_s23 = scalar_select %p40_p4, %s1669_s16, %s42_s22  }
   0xe   : > { %198 = sbr.rel (!%p51_p3) target bundleno = 32 (0x20), region = 28  ;;  %s200_s24 = sand.u32 (%p51_p3), 1, %s1669_s16  }
   0xf   : > { %s1363_s25 = sshll.u32 (%p51_p3), %s1677_s18, 4  ;;  %s1528_s26 = smul.u32 (%p51_p3), 208, %s200_s24 }
  0x10   : > { %s1752_s29 = scalar_lea.vmem (%p51_p3), %s1921_s0, %s1363_s25 }
  0x11   : > { %v221_v0 = vld [vmem:[%s1752_s29] sm:$0xff] (%p51_p3)  ;;  %v223_v1 = vld [vmem:[%s1752_s29 + $0x8] sm:$0xff] (%p51_p3)  ;;  %v225_v2 = vld [vmem:[%s1752_s29 + $0x90] sm:$0xff] (%p51_p3)  ;;  %s1760_s30 = scalar_lea.vmem (%p51_p3), [#allocation3], %s1528_s26 }
  0x12   : > { %v227_v3 = vld [vmem:[%s1752_s29 + $0x98] sm:$0xff] (%p51_p3)  ;;  %v229_v4 = vld [vmem:[%s1752_s29 + $0x120] sm:$0xff] (%p51_p3)  ;;  %v231_v5 = vld [vmem:[%s1752_s29 + $0x128] sm:$0xff] (%p51_p3)  ;;  %222 = vst [vmem:[%s1760_s30] sm:$0xff] (%p51_p3), %v221_v0 }
  0x13   : > { %224 = vst [vmem:[%s1760_s30 + $0x8] sm:$0xff] (%p51_p3), %v223_v1  ;;  %226 = vst [vmem:[%s1760_s30 + $0x10] sm:$0xff] (%p51_p3), %v225_v2  ;;  %v233_v6 = vld [vmem:[%s1752_s29 + $0x1b0] sm:$0xff] (%p51_p3)  ;;  %v235_v7 = vld [vmem:[%s1752_s29 + $0x1b8] sm:$0xff] (%p51_p3) }
  0x14   : > { %228 = vst [vmem:[%s1760_s30 + $0x18] sm:$0xff] (%p51_p3), %v227_v3  ;;  %230 = vst [vmem:[%s1760_s30 + $0x20] sm:$0xff] (%p51_p3), %v229_v4  ;;  %v237_v8 = vld [vmem:[%s1752_s29 + $0x240] sm:$0xff] (%p51_p3)  ;;  %v239_v9 = vld [vmem:[%s1752_s29 + $0x248] sm:$0xff] (%p51_p3) }
  0x15   : > { %232 = vst [vmem:[%s1760_s30 + $0x28] sm:$0xff] %v231_v5  ;;  %234 = vst [vmem:[%s1760_s30 + $0x30] sm:$0xff] %v233_v6  ;;  %v241_v10 = vld [vmem:[%s1752_s29 + $0x2d0] sm:$0xff]  ;;  %v243_v11 = vld [vmem:[%s1752_s29 + $0x2d8] sm:$0xff] }
  0x16   : > { %236 = vst [vmem:[%s1760_s30 + $0x38] sm:$0xff] %v235_v7  ;;  %238 = vst [vmem:[%s1760_s30 + $0x40] sm:$0xff] %v237_v8  ;;  %v245_v12 = vld [vmem:[%s1752_s29 + $0x360] sm:$0xff]  ;;  %v247_v13 = vld [vmem:[%s1752_s29 + $0x368] sm:$0xff] }
  0x17   : > { %240 = vst [vmem:[%s1760_s30 + $0x48] sm:$0xff] %v239_v9  ;;  %242 = vst [vmem:[%s1760_s30 + $0x50] sm:$0xff] %v241_v10  ;;  %v249_v14 = vld [vmem:[%s1752_s29 + $0x3f0] sm:$0xff]  ;;  %v251_v15 = vld [vmem:[%s1752_s29 + $0x3f8] sm:$0xff] }
  0x18   : > { %244 = vst [vmem:[%s1760_s30 + $0x58] sm:$0xff] %v243_v11  ;;  %246 = vst [vmem:[%s1760_s30 + $0x60] sm:$0xff] %v245_v12  ;;  %v253_v16 = vld [vmem:[%s1752_s29 + $0x480] sm:$0xff]  ;;  %v255_v17 = vld [vmem:[%s1752_s29 + $0x488] sm:$0xff] }
  0x19   : > { %248 = vst [vmem:[%s1760_s30 + $0x68] sm:$0xff] %v247_v13  ;;  %250 = vst [vmem:[%s1760_s30 + $0x70] sm:$0xff] %v249_v14  ;;  %v257_v18 = vld [vmem:[%s1752_s29 + $0x510] sm:$0xff]  ;;  %v259_v19 = vld [vmem:[%s1752_s29 + $0x518] sm:$0xff] }
  0x1a   : > { %252 = vst [vmem:[%s1760_s30 + $0x78] sm:$0xff] %v251_v15  ;;  %254 = vst [vmem:[%s1760_s30 + $0x80] sm:$0xff] %v253_v16  ;;  %v261_v20 = vld [vmem:[%s1752_s29 + $0x5a0] sm:$0xff]  ;;  %v263_v21 = vld [vmem:[%s1752_s29 + $0x5a8] sm:$0xff] }
  0x1b   : > { %256 = vst [vmem:[%s1760_s30 + $0x88] sm:$0xff] %v255_v17  ;;  %258 = vst [vmem:[%s1760_s30 + $0x90] sm:$0xff] %v257_v18  ;;  %v265_v22 = vld [vmem:[%s1752_s29 + $0x630] sm:$0xff]  ;;  %v267_v23 = vld [vmem:[%s1752_s29 + $0x638] sm:$0xff] }
  0x1c   : > { %260 = vst [vmem:[%s1760_s30 + $0x98] sm:$0xff] %v259_v19  ;;  %262 = vst [vmem:[%s1760_s30 + $0xa0] sm:$0xff] %v261_v20  ;;  %v269_v24 = vld [vmem:[%s1752_s29 + $0x6c0] sm:$0xff]  ;;  %v271_v25 = vld [vmem:[%s1752_s29 + $0x6c8] sm:$0xff] }
  0x1d   : > { %264 = vst [vmem:[%s1760_s30 + $0xa8] sm:$0xff] %v263_v21  ;;  %266 = vst [vmem:[%s1760_s30 + $0xb0] sm:$0xff] %v265_v22 }
  0x1e   : > { %268 = vst [vmem:[%s1760_s30 + $0xb8] sm:$0xff] %v267_v23  ;;  %270 = vst [vmem:[%s1760_s30 + $0xc0] sm:$0xff] %v269_v24 }
  0x1f   : > { %272 = vst [vmem:[%s1760_s30 + $0xc8] sm:$0xff] %v271_v25 }
  0x20 PF: > { %p1279_p6 = scmp.ge.s32.totalorder %s1681_s19, 1  ;;  %p289_p7 = scmp.lt.s32.totalorder %s1681_s19, 10 }
  0x22   : > { %p290_p8 = pnand %p1279_p6, %p289_p7 }
  0x23   : > { %s296_s5 = sand.u32 (!%p290_p8), 1, %s1665_s15   ;;  %s1280_s6 = sshll.u32 (!%p290_p8), %s1673_s17, 6 }
  0x24   : > { %293 = sbr.rel (%p290_p8) target bundleno = 371 (0x173), region = 55  ;;  %p341_p9 = scmp.lt.s32.totalorder (!%p290_p8), %s1280_s6, 575 }
  0x25   : > { %s1529_s7 = smul.u32 (!%p290_p8), 208, %s296_s5  ;;  %p1282_p10 = scmp.ne.s32.totalorder (!%p290_p8), %s1673_s17, 0 }
  0x27   : > { %s1817_s12 = scalar_lea.vmem (!%p290_p8), [#allocation3], %s1529_s7 }
  0x2b   : > { %s1933_s6 = smov (!%p341_p9, %s1280_s6), 575  ;;  %368 = sbr.rel (%p1282_p10) target bundleno = 52 (0x34), region = 63 }
  0x2c   : > { %s1281_s8 = sshll.u32 %s1933_s6, 2  ;;  %v1683_v26 = vmov (!%p1282_p10), 0.0  }
  0x2d   : > { %s1815_s11 = scalar_lea.vmem %s1922_s1, %s1281_s8  ;;  %369 = vst [vmem:[#allocation2] sm:$0xff] (!%p1282_p10), %v1683_v26  ;;  %370 = vst [vmem:[#allocation2 + $0x8] sm:$0xff] (!%p1282_p10), %v1683_v26 }
  0x2e   : > { %371 = vst [vmem:[#allocation2 + $0x10] sm:$0xff] (!%p1282_p10), %v1683_v26  ;;  %372 = vst [vmem:[#allocation2 + $0x18] sm:$0xff] (!%p1282_p10), %v1683_v26 }
  0x2f   : > { %373 = vst [vmem:[#allocation2 + $0x20] sm:$0xff] (!%p1282_p10), %v1683_v26  ;;  %374 = vst [vmem:[#allocation2 + $0x28] sm:$0xff] (!%p1282_p10), %v1683_v26 }
  0x30   : > { %375 = vst [vmem:[#allocation2 + $0x30] sm:$0xff] (!%p1282_p10), %v1683_v26  ;;  %376 = vst [vmem:[#allocation2 + $0x38] sm:$0xff] (!%p1282_p10), %v1683_v26 }
  0x31   : > { %377 = vst [vmem:[#allocation2 + $0x40] sm:$0xff] (!%p1282_p10), %v1683_v26  ;;  %378 = vst [vmem:[#allocation2 + $0x48] sm:$0xff] (!%p1282_p10), %v1683_v26 }
  0x32   : > { %379 = vst [vmem:[#allocation2 + $0x50] sm:$0xff] %v1683_v26  ;;  %380 = vst [vmem:[#allocation2 + $0x58] sm:$0xff] %v1683_v26 }
  0x33   : > { %381 = vst [vmem:[#allocation2 + $0x60] sm:$0xff] %v1683_v26 }
  0x34 PF: > { %v1571_v27 = vld [vmem:[%s1815_s11 + $0x40] sm:$0xff]   ;;  %v1575_v31 = vld [vmem:[%s1815_s11 + $0x48] sm:$0xff]   ;;  %v1579_v35 = vld [vmem:[%s1815_s11 + $0x50] sm:$0xff]   ;;  %p1343_p11 = scmp.ne.s32.totalorder %s1673_s17, 8 }
  0x35   : > { %v1572_v28 = vld [vmem:[%s1815_s11 + $0xc0] sm:$0xff]   ;;  %1412 = vmatprep.subr.bf16.mxu0 %v1571_v27  ;;  %v1576_v32 = vld [vmem:[%s1815_s11 + $0xc8] sm:$0xff]   ;;  %v1580_v36 = vld [vmem:[%s1815_s11 + $0xd0] sm:$0xff]  }
  0x36   : > { %v1573_v29 = vld [vmem:[%s1815_s11] sm:$0xff]   ;;  %1470 = vmatprep.subr.bf16.mxu1 %v1572_v28  ;;  %v1577_v33 = vld [vmem:[%s1815_s11 + $0x8] sm:$0xff]   ;;  %v1581_v37 = vld [vmem:[%s1815_s11 + $0x10] sm:$0xff]  }
  0x37   : > { %v1574_v30 = vld [vmem:[%s1815_s11 + $0x80] sm:$0xff]   ;;  %1413 = vmatpush3.bf16.msra.mxu0 %v1573_v29  ;;  %v1578_v34 = vld [vmem:[%s1815_s11 + $0x88] sm:$0xff]   ;;  %v1582_v38 = vld [vmem:[%s1815_s11 + $0x90] sm:$0xff]  }
  0x38   : > { %1471 = vmatpush3.bf16.msra.mxu1 %v1574_v30  ;;  %1414 = vmatprep.subr.bf16.mxu0 %v1575_v31  ;;  %v1583_v39 = vld [vmem:[%s1815_s11 + $0x58] sm:$0xff]   ;;  %v1587_v43 = vld [vmem:[%s1815_s11 + $0x60] sm:$0xff]   ;;  %v1591_v47 = vld [vmem:[%s1815_s11 + $0x68] sm:$0xff]  }
  0x39   : > { %1472 = vmatprep.subr.bf16.mxu1 %v1576_v32  ;;  %v1584_v40 = vld [vmem:[%s1815_s11 + $0xd8] sm:$0xff]   ;;  %v1588_v44 = vld [vmem:[%s1815_s11 + $0xe0] sm:$0xff]   ;;  %v1592_v48 = vld [vmem:[%s1815_s11 + $0xe8] sm:$0xff]  }
  0x3a   : > { %v1585_v41 = vld [vmem:[%s1815_s11 + $0x18] sm:$0xff]   ;;  %v1589_v45 = vld [vmem:[%s1815_s11 + $0x20] sm:$0xff]   ;;  %v1593_v49 = vld [vmem:[%s1815_s11 + $0x28] sm:$0xff]  }
  0x3b   : > { %1415 = vmatpush3.bf16.msra.mxu0 %v1577_v33  ;;  %v1586_v42 = vld [vmem:[%s1815_s11 + $0x98] sm:$0xff]   ;;  %v1590_v46 = vld [vmem:[%s1815_s11 + $0xa0] sm:$0xff]   ;;  %v1594_v50 = vld [vmem:[%s1815_s11 + $0xa8] sm:$0xff]  }
  0x3c   : > { %1473 = vmatpush3.bf16.msra.mxu1 %v1578_v34  ;;  %1416 = vmatprep.subr.bf16.mxu0 %v1579_v35  ;;  %v1595_v51 = vld [vmem:[%s1815_s11 + $0x70] sm:$0xff]   ;;  %v1599_v55 = vld [vmem:[%s1815_s11 + $0x78] sm:$0xff]   ;;  %v382_v34 = vld [vmem:[#allocation2] sm:$0xff] }
  0x3d   : > { %1474 = vmatprep.subr.bf16.mxu1 %v1580_v36  ;;  %v1596_v52 = vld [vmem:[%s1815_s11 + $0xf0] sm:$0xff]   ;;  %v1600_v56 = vld [vmem:[%s1815_s11 + $0xf8] sm:$0xff]  }
  0x3e   : > { %v1597_v53 = vld [vmem:[%s1815_s11 + $0x30] sm:$0xff]   ;;  %v1601_v57 = vld [vmem:[%s1815_s11 + $0x38] sm:$0xff]  }
  0x3f   : > { %1417 = vmatpush3.bf16.msra.mxu0 %v1581_v37  ;;  %v1598_v54 = vld [vmem:[%s1815_s11 + $0xb0] sm:$0xff]   ;;  %v1602_v58 = vld [vmem:[%s1815_s11 + $0xb8] sm:$0xff]  }
  0x40   : > { %1475 = vmatpush3.bf16.msra.mxu1 %v1582_v38  ;;  %1418 = vmatprep.subr.bf16.mxu0 %v1583_v39  ;;  %v1603_v59 = vld [vmem:[%s1817_s12] ss:$16 sps:$4 sm:$0xff]   ;;  %v1605_v60 = vld [vmem:[%s1817_s12 + $0x4] ss:$16 sps:$4 sm:$0xff]   ;;  %v1606_v61 = vld [vmem:[%s1817_s12 + $0x8] ss:$16 sps:$4 sm:$0xff]  }
  0x41   : > { %1476 = vmatprep.subr.bf16.mxu1 %v1584_v40  ;;  %v1608_v62 = vld [vmem:[%s1817_s12 + $0xc] ss:$16 sps:$4 sm:$0xff]   ;;  %843 = vmatprep.mubr.bf16.mxu0 %v1605_v60  ;;  %v1609_v63 = vld [vmem:[%s1817_s12 + $0x24] ss:$16 sps:$4 sm:$0xff]   ;;  %v1613_v1 = vld [vmem:[%s1817_s12 + $0x20] ss:$16 sps:$4 sm:$0xff]  }
  0x42   : > { %931 = vmatprep.mubr.bf16.mxu1 %v1608_v62  ;;  %v1611_v0 = vld [vmem:[%s1817_s12 + $0x2c] ss:$16 sps:$4 sm:$0xff]   ;;  %v1614_v2 = vld [vmem:[%s1817_s12 + $0x28] ss:$16 sps:$4 sm:$0xff]   ;;  %v1615_v3 = vld [vmem:[%s1817_s12 + $0x44] ss:$16 sps:$4 sm:$0xff]  }
  0x43   : > { %1419 = vmatpush3.bf16.msra.mxu0 %v1585_v41  ;;  %v1617_v4 = vld [vmem:[%s1817_s12 + $0x4c] ss:$16 sps:$4 sm:$0xff]   ;;  %v1619_v5 = vld [vmem:[%s1817_s12 + $0x40] ss:$16 sps:$4 sm:$0xff]   ;;  %v1620_v6 = vld [vmem:[%s1817_s12 + $0x48] ss:$16 sps:$4 sm:$0xff]  }
  0x44   : > { %1477 = vmatpush3.bf16.msra.mxu1 %v1586_v42  ;;  %1420 = vmatprep.subr.bf16.mxu0 %v1587_v43  ;;  %v1621_v7 = vld [vmem:[%s1817_s12 + $0x64] ss:$16 sps:$4 sm:$0xff]   ;;  %v1623_v8 = vld [vmem:[%s1817_s12 + $0x6c] ss:$16 sps:$4 sm:$0xff]   ;;  %v1625_v9 = vld [vmem:[%s1817_s12 + $0x60] ss:$16 sps:$4 sm:$0xff]  }
  0x45   : > { %1478 = vmatprep.subr.bf16.mxu1 %v1588_v44  ;;  %v1626_v10 = vld [vmem:[%s1817_s12 + $0x68] ss:$16 sps:$4 sm:$0xff]   ;;  %v1627_v11 = vld [vmem:[%s1817_s12 + $0x84] ss:$16 sps:$4 sm:$0xff]   ;;  %v1629_v12 = vld [vmem:[%s1817_s12 + $0x8c] ss:$16 sps:$4 sm:$0xff]  }
  0x46   : > { %v1631_v13 = vld [vmem:[%s1817_s12 + $0x80] ss:$16 sps:$4 sm:$0xff]   ;;  %v1632_v14 = vld [vmem:[%s1817_s12 + $0x88] ss:$16 sps:$4 sm:$0xff]   ;;  %v1633_v15 = vld [vmem:[%s1817_s12 + $0xa4] ss:$16 sps:$4 sm:$0xff]  }
  0x47   : > { %1421 = vmatpush3.bf16.msra.mxu0 %v1589_v45  ;;  %v1635_v16 = vld [vmem:[%s1817_s12 + $0xac] ss:$16 sps:$4 sm:$0xff]   ;;  %v419_v17 = vld [vmem:[%s1817_s12 + $0xc0] sm:$0xff]  ;;  %v1638_v20 = vld [vmem:[%s1817_s12 + $0xa8] ss:$16 sps:$4 sm:$0xff]  }
  0x48   : > { %1479 = vmatpush3.bf16.msra.mxu1 %v1590_v46  ;;  %1422 = vmatprep.subr.bf16.mxu0 %v1591_v47  ;;  %v420_v18 = vld [vmem:[%s1817_s12 + $0xc8] sm:$0xff]  ;;  %v1637_v19 = vld [vmem:[%s1817_s12 + $0xa0] ss:$16 sps:$4 sm:$0xff]   ;;  %v1308_v21 = vcombine.high %v419_v17, %v419_v17  ;;  %v1307_v23 = vcombine.low %v419_v17, %v419_v17 }
  0x49   : > { %1480 = vmatprep.subr.bf16.mxu1 %v1592_v48  ;;  %v1310_v22 = vcombine.high %v420_v18, %v420_v18  ;;  %v1309_v24 = vcombine.low %v420_v18, %v420_v18  ;;  %v383_v39 = vld [vmem:[#allocation2 + $0x8] sm:$0xff] }
  0x4b   : > { %1423 = vmatpush3.bf16.msra.mxu0 %v1593_v49 }
  0x4c   : > { %1481 = vmatpush3.bf16.msra.mxu1 %v1594_v50  ;;  %1424 = vmatprep.subr.bf16.mxu0 %v1595_v51 }
  0x4d   : > { %1482 = vmatprep.subr.bf16.mxu1 %v1596_v52  ;;  %v384_v52 = vld [vmem:[#allocation2 + $0x10] sm:$0xff] }
  0x4f   : > { %1425 = vmatpush3.bf16.msra.mxu0 %v1597_v53 }
  0x50   : > { %1483 = vmatpush3.bf16.msra.mxu1 %v1598_v54  ;;  %1426 = vmatprep.subr.bf16.mxu0 %v1599_v55 }
  0x51   : > { %1484 = vmatprep.subr.bf16.mxu1 %v1600_v56 }
  0x53   : > { %1427 = vmatpush3.bf16.msra.mxu0 %v1601_v57  ;;  %v385_v57 = vld [vmem:[#allocation2 + $0x18] sm:$0xff] }
  0x54   : > { %1485 = vmatpush3.bf16.msra.mxu1 %v1602_v58 }
  0x56   : > { %844 = vmatmul.mubr.bf16.vlgmr.msra.gmra.mrb[0].mxu0 %v1603_v59 }
  0x57   : > { %932 = vmatmul.mubr.bf16.vlgmr.msra.gmra.mrb[0].mxu1 %v1606_v61  ;;  %851 = vmatprep.mubr.bf16.mxu0 %v1609_v63 }
  0x58   : > { %939 = vmatprep.mubr.bf16.mxu1 %v1611_v0 }
  0x5e   : > { %852 = vmatmul.mubr.bf16.gmra.mrb[4].mxu0 %v1613_v1 }
  0x5f   : > { %940 = vmatmul.mubr.bf16.gmra.mrb[4].mxu1 %v1614_v2  ;;  %859 = vmatprep.mubr.bf16.mxu0 %v1615_v3 }
  0x60   : > { %947 = vmatprep.mubr.bf16.mxu1 %v1617_v4 }
  0x66   : > { %860 = vmatmul.mubr.bf16.gmra.mrb[8].mxu0 %v1619_v5 }
  0x67   : > { %948 = vmatmul.mubr.bf16.gmra.mrb[8].mxu1 %v1620_v6  ;;  %867 = vmatprep.mubr.bf16.mxu0 %v1621_v7  ;;  %v386_v6 = vld [vmem:[#allocation2 + $0x20] sm:$0xff] }
  0x68   : > { %955 = vmatprep.mubr.bf16.mxu1 %v1623_v8 }
  0x6e   : > { %868 = vmatmul.mubr.bf16.gmra.mrb[12].mxu0 %v1625_v9 }
  0x6f   : > { %956 = vmatmul.mubr.bf16.gmra.mrb[12].mxu1 %v1626_v10  ;;  %875 = vmatprep.mubr.bf16.mxu0 %v1627_v11  ;;  %v387_v11 = vld [vmem:[#allocation2 + $0x28] sm:$0xff] }
  0x70   : > { %963 = vmatprep.mubr.bf16.mxu1 %v1629_v12 }
  0x76   : > { %876 = vmatmul.mubr.bf16.gmra.mrb[16].mxu0 %v1631_v13 }
  0x77   : > { %964 = vmatmul.mubr.bf16.gmra.mrb[16].mxu1 %v1632_v14  ;;  %883 = vmatprep.mubr.bf16.mxu0 %v1633_v15 }
  0x78   : > { %971 = vmatprep.mubr.bf16.mxu1 %v1635_v16 }
  0x7e   : > { %884 = vmatmul.mubr.bf16.gmra.mrb[20].mxu0 %v1637_v19 }
  0x7f   : > { %972 = vmatmul.mubr.bf16.gmra.mrb[20].mxu1 %v1638_v20  ;;  %891 = vmatprep.mubr.bf16.mxu0 %v1308_v21 }
  0x80   : > { %979 = vmatprep.mubr.bf16.mxu1 %v1310_v22 }
  0x86   : > { %892 = vmatmul.mubr.bf16.gmra.mrb[24].mxu0 %v1307_v23 }
  0x87   : > { %980 = vmatmul.mubr.bf16.gmra.mrb[24].mxu1 %v1309_v24  ;;  %v388_v24 = vld [vmem:[#allocation2 + $0x30] sm:$0xff] }
 0x129   : > { %v1428_v25 = vpop.f32.mrb[0].mxu0 }
 0x12a   : > { %v1486_v26 = vpop.f32.mrb[0].mxu1  ;;  %v1429_v27 = vpop.f32.mrb[1].mxu0 }
 0x12b   : > { %v1430_v28 = vadd.f32 %v1429_v27, %v1428_v25  ;;  %v1487_v29 = vpop.f32.mrb[1].mxu1  ;;  %v1431_v30 = vpop.f32.mrb[2].mxu0 }
 0x12c   : > { %v1488_v31 = vadd.f32 %v1487_v29, %v1486_v26  ;;  %v1489_v32 = vpop.f32.mrb[2].mxu1  ;;  %v1432_v33 = vpop.f32.mrb[3].mxu0  ;;  %v389_v29 = vld [vmem:[#allocation2 + $0x38] sm:$0xff] }
 0x12d   : > { %v1433_v35 = vadd.f32 %v1432_v33, %v1431_v30  ;;  %v1490_v36 = vpop.f32.mrb[3].mxu1 }
 0x12e   : > { %v934_v37 = vadd.f32 %v1488_v31, %v1430_v28  ;;  %v1491_v38 = vadd.f32 %v1490_v36, %v1489_v32 }
 0x130   : > { %v987_v40 = vadd.f32 %v934_v37, %v382_v34  ;;  %v937_v41 = vadd.f32 %v1491_v38, %v1433_v35 }
 0x131   : > { %v1434_v42 = vpop.f32.mrb[4].mxu0 }
 0x132   : > { %1000 = vst [vmem:[#allocation2] sm:$0xff] %v987_v40  ;;  %v988_v43 = vadd.f32 %v937_v41, %v383_v39  ;;  %v1492_v44 = vpop.f32.mrb[4].mxu1  ;;  %v1435_v45 = vpop.f32.mrb[5].mxu0 }
 0x133   : > { %v1436_v46 = vadd.f32 %v1435_v45, %v1434_v42  ;;  %v1493_v47 = vpop.f32.mrb[5].mxu1  ;;  %v1437_v48 = vpop.f32.mrb[6].mxu0  ;;  %v390_v42 = vld [vmem:[#allocation2 + $0x40] sm:$0xff] }
 0x134   : > { %1001 = vst [vmem:[#allocation2 + $0x8] sm:$0xff] %v988_v43  ;;  %v1494_v49 = vadd.f32 %v1493_v47, %v1492_v44  ;;  %v1495_v50 = vpop.f32.mrb[6].mxu1  ;;  %v1438_v51 = vpop.f32.mrb[7].mxu0  ;;  %v391_v47 = vld [vmem:[#allocation2 + $0x48] sm:$0xff] }
 0x135   : > { %v1439_v53 = vadd.f32 %v1438_v51, %v1437_v48  ;;  %v1496_v54 = vpop.f32.mrb[7].mxu1 }
 0x136   : > { %v942_v55 = vadd.f32 %v1494_v49, %v1436_v46  ;;  %v1497_v56 = vadd.f32 %v1496_v54, %v1495_v50 }
 0x138   : > { %v989_v58 = vadd.f32 %v942_v55, %v384_v52  ;;  %v945_v59 = vadd.f32 %v1497_v56, %v1439_v53 }
 0x139   : > { %v1440_v60 = vpop.f32.mrb[8].mxu0 }
 0x13a   : > { %1002 = vst [vmem:[#allocation2 + $0x10] sm:$0xff] %v989_v58  ;;  %v990_v61 = vadd.f32 %v945_v59, %v385_v57  ;;  %v1498_v62 = vpop.f32.mrb[8].mxu1  ;;  %v1441_v63 = vpop.f32.mrb[9].mxu0 }
 0x13b   : > { %v1442_v0 = vadd.f32 %v1441_v63, %v1440_v60  ;;  %v1499_v1 = vpop.f32.mrb[9].mxu1  ;;  %v1443_v2 = vpop.f32.mrb[10].mxu0  ;;  %v392_v60 = vld [vmem:[#allocation2 + $0x50] sm:$0xff] }
 0x13c   : > { %1003 = vst [vmem:[#allocation2 + $0x18] sm:$0xff] %v990_v61  ;;  %v1500_v3 = vadd.f32 %v1499_v1, %v1498_v62  ;;  %v1501_v4 = vpop.f32.mrb[10].mxu1  ;;  %v1444_v5 = vpop.f32.mrb[11].mxu0  ;;  %v393_v1 = vld [vmem:[#allocation2 + $0x58] sm:$0xff] }
 0x13d   : > { %v1445_v7 = vadd.f32 %v1444_v5, %v1443_v2  ;;  %v1502_v8 = vpop.f32.mrb[11].mxu1 }
 0x13e   : > { %v950_v9 = vadd.f32 %v1500_v3, %v1442_v0  ;;  %v1503_v10 = vadd.f32 %v1502_v8, %v1501_v4 }
 0x140   : > { %v991_v12 = vadd.f32 %v950_v9, %v386_v6  ;;  %v953_v13 = vadd.f32 %v1503_v10, %v1445_v7 }
 0x141   : > { %v1446_v14 = vpop.f32.mrb[12].mxu0 }
 0x142   : > { %1004 = vst [vmem:[#allocation2 + $0x20] sm:$0xff] %v991_v12  ;;  %v992_v15 = vadd.f32 %v953_v13, %v387_v11  ;;  %v1504_v16 = vpop.f32.mrb[12].mxu1  ;;  %v1447_v17 = vpop.f32.mrb[13].mxu0 }
 0x143   : > { %v1448_v18 = vadd.f32 %v1447_v17, %v1446_v14  ;;  %v1505_v19 = vpop.f32.mrb[13].mxu1  ;;  %v1449_v20 = vpop.f32.mrb[14].mxu0  ;;  %v394_v14 = vld [vmem:[#allocation2 + $0x60] sm:$0xff] }
 0x144   : > { %1005 = vst [vmem:[#allocation2 + $0x28] sm:$0xff] %v992_v15  ;;  %v1506_v21 = vadd.f32 %v1505_v19, %v1504_v16  ;;  %v1507_v22 = vpop.f32.mrb[14].mxu1  ;;  %v1450_v23 = vpop.f32.mrb[15].mxu0  ;;  %v1018_v19 = vld [vmem:[#allocation2 + $0x8] sm:$0xff] (!%p1343_p11) }
 0x145   : > { %v1451_v25 = vadd.f32 %v1450_v23, %v1449_v20  ;;  %v1508_v26 = vpop.f32.mrb[15].mxu1  ;;  %v1344_v20 = vld [vmem:[%s1923_s2] ss:$0 sm:$0xff] (!%p1343_p11) }
 0x146   : > { %v958_v27 = vadd.f32 %v1506_v21, %v1448_v18  ;;  %v1509_v28 = vadd.f32 %v1508_v26, %v1507_v22  ;;  %v1017_v18 = vld [vmem:[#allocation2] sm:$0xff] (!%p1343_p11)  ;;  %v1038_v22 = vmul.f32 (!%p1343_p11), %v1344_v20, %v1018_v19 }
 0x147   : > { %v1037_v21 = vmul.f32 (!%p1343_p11), %v1344_v20, %v1017_v18  ;;  %v1345_v23 = vld [vmem:[%s1924_s3] ss:$0 sm:$0xff] (!%p1343_p11) }
 0x148   : > { %v993_v30 = vadd.f32 %v958_v27, %v388_v24  ;;  %v961_v31 = vadd.f32 %v1509_v28, %v1451_v25  ;;  %v1019_v24 = vld [vmem:[#allocation2 + $0x10] sm:$0xff] (!%p1343_p11)  ;;  %v1020_v25 = vld [vmem:[#allocation2 + $0x18] sm:$0xff] (!%p1343_p11) }
 0x149   : > { %v1452_v32 = vpop.f32.mrb[16].mxu0  ;;  %v1039_v26 = vmul.f32 (!%p1343_p11), %v1344_v20, %v1019_v24  ;;  %v1040_v27 = vmul.f32 (!%p1343_p11), %v1344_v20, %v1020_v25  ;;  %v1021_v28 = vld [vmem:[#allocation2 + $0x20] sm:$0xff] (!%p1343_p11) }
 0x14a   : > { %1006 = vst [vmem:[#allocation2 + $0x30] sm:$0xff] %v993_v30  ;;  %v994_v33 = vadd.f32 %v961_v31, %v389_v29  ;;  %v1510_v34 = vpop.f32.mrb[16].mxu1  ;;  %v1453_v35 = vpop.f32.mrb[17].mxu0  ;;  %v1057_v31 = vadd.f32 (!%p1343_p11), %v1345_v23, %v1037_v21 }
 0x14b   : > { %v1454_v36 = vadd.f32 %v1453_v35, %v1452_v32  ;;  %v1511_v37 = vpop.f32.mrb[17].mxu1  ;;  %v1455_v38 = vpop.f32.mrb[18].mxu0  ;;  %v1022_v29 = vld [vmem:[#allocation2 + $0x28] sm:$0xff] (!%p1343_p11)  ;;  %v1058_v32 = vadd.f32 (!%p1343_p11), %v1345_v23, %v1038_v22 }
 0x14c   : > { %1007 = vst [vmem:[#allocation2 + $0x38] sm:$0xff] %v994_v33  ;;  %v1512_v39 = vadd.f32 %v1511_v37, %v1510_v34  ;;  %v1513_v40 = vpop.f32.mrb[18].mxu1  ;;  %v1456_v41 = vpop.f32.mrb[19].mxu0  ;;  %v1041_v33 = vmul.f32 (!%p1343_p11), %v1344_v20, %v1021_v28  ;;  %v1042_v34 = vmul.f32 (!%p1343_p11), %v1344_v20, %v1022_v29  ;;  %v1060_v37 = vadd.f32 (!%p1343_p11), %v1345_v23, %v1040_v27 }
 0x14d   : > { %v1457_v43 = vadd.f32 %v1456_v41, %v1455_v38  ;;  %v1514_v44 = vpop.f32.mrb[19].mxu1  ;;  %v1070_v41 = vmax.f32 (!%p1343_p11), %v1057_v31, 0.0 }
 0x14e   : > { %v966_v45 = vadd.f32 %v1512_v39, %v1454_v36  ;;  %v1515_v46 = vadd.f32 %v1514_v44, %v1513_v40  ;;  %v1059_v36 = vadd.f32 (!%p1343_p11), %v1345_v23, %v1039_v26  ;;  %v1062_v44 = vadd.f32 (!%p1343_p11), %v1345_v23, %v1042_v34 }
 0x150   : > { %v995_v48 = vadd.f32 %v966_v45, %v390_v42  ;;  %v969_v49 = vadd.f32 %v1515_v46, %v1457_v43  ;;  %v1071_v42 = vmax.f32 (!%p1343_p11), %v1058_v32, 0.0  ;;  %v1061_v43 = vadd.f32 (!%p1343_p11), %v1345_v23, %v1041_v33 }
 0x151   : > { %v1458_v50 = vpop.f32.mrb[20].mxu0  ;;  %v1023_v30 = vld [vmem:[#allocation2 + $0x30] sm:$0xff] (!%p1343_p11)  ;;  %v1072_v46 = vmax.f32 (!%p1343_p11), %v1059_v36, 0.0 }
 0x152   : > { %1008 = vst [vmem:[#allocation2 + $0x40] sm:$0xff] %v995_v48  ;;  %v996_v51 = vadd.f32 %v969_v49, %v391_v47  ;;  %v1516_v52 = vpop.f32.mrb[20].mxu1  ;;  %v1459_v53 = vpop.f32.mrb[21].mxu0  ;;  %v1043_v38 = vmul.f32 (!%p1343_p11), %v1344_v20, %v1023_v30  ;;  %v1073_v47 = vmax.f32 (!%p1343_p11), %v1060_v37, 0.0 }
 0x153   : > { %v1460_v54 = vadd.f32 %v1459_v53, %v1458_v50  ;;  %v1517_v55 = vpop.f32.mrb[21].mxu1  ;;  %v1461_v56 = vpop.f32.mrb[22].mxu0  ;;  %v1024_v35 = vld [vmem:[#allocation2 + $0x38] sm:$0xff] (!%p1343_p11)  ;;  %v1074_v53 = vmax.f32 (!%p1343_p11), %v1061_v43, 0.0 }
 0x154   : > { %1009 = vst [vmem:[#allocation2 + $0x48] sm:$0xff] %v996_v51  ;;  %v1518_v57 = vadd.f32 %v1517_v55, %v1516_v52  ;;  %v1519_v58 = vpop.f32.mrb[22].mxu1  ;;  %v1462_v59 = vpop.f32.mrb[23].mxu0  ;;  %v1044_v39 = vmul.f32 (!%p1343_p11), %v1344_v20, %v1024_v35  ;;  %v1063_v48 = vadd.f32 (!%p1343_p11), %v1345_v23, %v1043_v38  ;;  %v1380_v52 = vpack.c.bf16 (!%p1343_p11), %v1071_v42, %v1070_v41 }
 0x155   : > { %v1463_v61 = vadd.f32 %v1462_v59, %v1461_v56  ;;  %v1520_v62 = vpop.f32.mrb[23].mxu1 }
 0x156   : > { %v974_v63 = vadd.f32 %v1518_v57, %v1460_v54  ;;  %v1521_v0 = vadd.f32 %v1520_v62, %v1519_v58  ;;  %v1064_v49 = vadd.f32 (!%p1343_p11), %v1345_v23, %v1044_v39  ;;  %v1075_v54 = vmax.f32 (!%p1343_p11), %v1062_v44, 0.0  ;;  %1381 = vst [vmem:[%s1925_s4] sm:$0xff] (!%p1343_p11), %v1380_v52  }
 0x157   : > { %v1385_v57 = vpack.c.bf16 (!%p1343_p11), %v1073_v47, %v1072_v46  ;;  %v1076_v58 = vmax.f32 (!%p1343_p11), %v1063_v48, 0.0 }
 0x158   : > { %v997_v2 = vadd.f32 %v974_v63, %v392_v60  ;;  %v977_v3 = vadd.f32 %v1521_v0, %v1463_v61  ;;  %v1077_v59 = vmax.f32 (!%p1343_p11), %v1064_v49, 0.0  ;;  %v1390_v61 = vpack.c.bf16 (!%p1343_p11), %v1075_v54, %v1074_v53 }
 0x159   : > { %v1464_v4 = vpop.f32.mrb[24].mxu0  ;;  %v1025_v40 = vld [vmem:[#allocation2 + $0x40] sm:$0xff] (!%p1343_p11)  ;;  %1407 = vst [vmem:[%s1925_s4 + $0x8] sm:$0xff] (!%p1343_p11), %v1385_v57  }
 0x15a   : > { %1010 = vst [vmem:[#allocation2 + $0x50] sm:$0xff] %v997_v2  ;;  %v998_v5 = vadd.f32 %v977_v3, %v393_v1  ;;  %v1522_v6 = vpop.f32.mrb[24].mxu1  ;;  %v1465_v7 = vpop.f32.mrb[25].mxu0  ;;  %v1045_v55 = vmul.f32 (!%p1343_p11), %v1344_v20, %v1025_v40  ;;  %v1395_v1 = vpack.c.bf16 (!%p1343_p11), %v1077_v59, %v1076_v58  ;;  %1408 = vst [vmem:[%s1925_s4 + $0x10] sm:$0xff] (!%p1343_p11), %v1390_v61  }
 0x15b   : > { %v1466_v8 = vadd.f32 %v1465_v7, %v1464_v4  ;;  %v1523_v9 = vpop.f32.mrb[25].mxu1  ;;  %v1467_v10 = vpop.f32.mrb[26].mxu0  ;;  %v1026_v45 = vld [vmem:[#allocation2 + $0x48] sm:$0xff] (!%p1343_p11) }
 0x15c   : > { %1011 = vst [vmem:[#allocation2 + $0x58] sm:$0xff] %v998_v5  ;;  %v1524_v11 = vadd.f32 %v1523_v9, %v1522_v6  ;;  %v1525_v12 = vpop.f32.mrb[26].mxu1  ;;  %v1468_v13 = vpop.f32.mrb[27].mxu0  ;;  %1016 = sbr.rel (%p1343_p11) target bundleno = 371 (0x173), region = 67  ;;  %v1046_v60 = vmul.f32 (!%p1343_p11), %v1344_v20, %v1026_v45  ;;  %v1065_v62 = vadd.f32 (!%p1343_p11), %v1345_v23, %v1045_v55  ;;  %1409 = vst [vmem:[%s1925_s4 + $0x18] sm:$0xff] (!%p1343_p11), %v1395_v1  }
 0x15d   : > { %v1526_v15 = vpop.f32.mrb[27].mxu1 }
 0x15e   : > { %v982_v16 = vadd.f32 %v1524_v11, %v1466_v8  ;;  %v1066_v2 = vadd.f32 (!%p1343_p11), %v1345_v23, %v1046_v60  ;;  %v1078_v4 = vmax.f32 (!%p1343_p11), %v1065_v62, 0.0 }
 0x160   : > { %v999_v17 = vadd.f32 %v982_v16, %v394_v14  ;;  %v1079_v7 = vmax.f32 (!%p1343_p11), %v1066_v2, 0.0 }
 0x161   : > { %v1027_v50 = vld [vmem:[#allocation2 + $0x50] sm:$0xff] (!%p1343_p11) }
 0x162   : > { %1012 = vst [vmem:[#allocation2 + $0x60] sm:$0xff] %v999_v17  ;;  %v1047_v63 = vmul.f32 (!%p1343_p11), %v1344_v20, %v1027_v50  ;;  %v1400_v11 = vpack.c.bf16 (!%p1343_p11), %v1079_v7, %v1078_v4 }
 0x163   : > { %v1028_v51 = vld [vmem:[#allocation2 + $0x58] sm:$0xff] }
 0x164   : > { %v1048_v0 = vmul.f32 %v1344_v20, %v1028_v51  ;;  %v1067_v5 = vadd.f32 %v1345_v23, %v1047_v63  ;;  %1410 = vst [vmem:[%s1925_s4 + $0x20] sm:$0xff] %v1400_v11  }
 0x166   : > { %v1068_v6 = vadd.f32 %v1345_v23, %v1048_v0  ;;  %v1080_v9 = vmax.f32 %v1067_v5, 0.0 }
 0x168   : > { %v1081_v10 = vmax.f32 %v1068_v6, 0.0 }
 0x169   : > { %v1029_v56 = vld [vmem:[#allocation2 + $0x60] sm:$0xff] }
 0x16a   : > { %v1049_v3 = vmul.f32 %v1344_v20, %v1029_v56  ;;  %v1405_v13 = vpack.c.bf16 %v1081_v10, %v1080_v9 }
 0x16c   : > { %v1069_v8 = vadd.f32 %v1345_v23, %v1049_v3  ;;  %1411 = vst [vmem:[%s1925_s4 + $0x28] sm:$0xff] %v1405_v13  }
 0x16e   : > { %v1082_v12 = vmax.f32 %v1069_v8, 0.0 }
 0x170   : > { %v1376_v14 = vpack.c.bf16 %v1082_v12, %v1082_v12 }
 0x172   : > { %1148 = vst [vmem:[%s1925_s4 + $0x30] sm:$0xf] %v1376_v14 }
 0x173 PF: > { %s14_s19 = sadd.s32 1, %s1681_s19   ;;  %s1926_s15 = smov %s1669_s16 }
 0x174   : > { %p11_p12 = scmp.ge.s32.totalorder %s14_s19, 11   ;;  %s1927_s16 = smov %s1744_s23 }
 0x175   : > { %s1928_s17 = smov %s1677_s18  ;;  %s1929_s18 = smov %s1931_s20 }
 0x176   :  { %13 = sbr.rel (!%p11_p12) target bundleno = 3 (0x3), region = 111 }

// kernel: _lambda_.121
= control target key start
LH: loop header
LB: loop body
LE: loop exit
PB: predicated region body
PF: predicated region fallthrough
CT: control target
= control target key end

     0   :  { %s1439_s9 = smov 0   ;;  %s1928_s0 = inlined_call_operand.vmem [shape: f32[49,2401], index: 0, kind: input, shape index: {}]   ;;  %s1929_s1 = inlined_call_operand.vmem [shape: f32[2,2,49], index: 1, kind: input, shape index: {}]   ;;  %s1930_s2 = inlined_call_operand.vmem [shape: f32[2,2,2401], index: 2, kind: output, shape index: {}]  }
   0x1 LB: > { %s1219_s10 = sadd.s32 4294967295, %s1418_s9   ;;  %p1223_p0 = scmp.ge.s32.totalorder %s1418_s9, 1  ;;  %s1418_s9 = sphi %s1439_s9, %s12_s9  }
   0x2   : > { %p111_p1 = scmp.lt.s32.totalorder %s1418_s9, 3 }
   0x4   : > { %p112_p2 = pnand %p1223_p0, %p111_p1 }
   0x5   : > { %v143_v0 = vld [vmem:[%s1928_s0 + $0x8] sm:$0xff] (!%p112_p2)  ;;  %v162_v1 = vld [vmem:[%s1928_s0 + $0xa0] sm:$0xff] (!%p112_p2)  ;;  %v145_v2 = vld [vmem:[%s1928_s0 + $0x18] sm:$0xff] (!%p112_p2)  ;;  %p1458_p3 = scmp.lt.s32.totalorder (!%p112_p2), %s1219_s10, 1  ;;  %v1420_v7 = vmov (!%p112_p2), 0.0   ;;  %vm279_vm0 = vcmask (!%p112_p2), 1040384  }
   0x6   : > { %115 = sbr.rel (%p112_p2) target bundleno = 302 (0x12e), region = 28  ;;  %v1282_v3 = vpack.c.bf16 (!%p112_p2), %v162_v1, %v143_v0  ;;  %v164_v4 = vld [vmem:[%s1928_s0 + $0xb0] sm:$0xff] (!%p112_p2)  ;;  %v142_v5 = vld [vmem:[%s1928_s0] sm:$0xff] (!%p112_p2)  ;;  %v161_v6 = vld [vmem:[%s1928_s0 + $0x98] sm:$0xff] (!%p112_p2)  ;;  %401 = vmatprep.mubr.f32.mxu0 (!%p112_p2), %v1420_v7  ;;  %472 = vmatprep.mubr.f32.mxu1 (!%p112_p2), %v1420_v7  ;;  %vm275_vm1 = vcmask (!%p112_p2), 400384   ;;  %vm1422_vm2 = vmmov (!%p112_p2), 0  }
   0x7   : > { %v1294_v8 = vpack.c.bf16 (!%p112_p2), %v164_v4, %v145_v2  ;;  %v1284_v9 = vpack.c.bf16 (!%p112_p2), %v161_v6, %v142_v5  ;;  %v144_v10 = vld [vmem:[%s1928_s0 + $0x10] sm:$0xff] (!%p112_p2)  ;;  %v163_v11 = vld [vmem:[%s1928_s0 + $0xa8] sm:$0xff] (!%p112_p2)  ;;  %v181_v12 = vld [vmem:[%s1928_s0 + $0x138] sm:$0xff] (!%p112_p2)  ;;  %vm1158_vm3 = vcmask (!%p112_p2), 1041408   ;;  %vm1159_vm4 = vcmask (!%p112_p2), 1043458  }
   0x8   : > { %1283 = vmatprep.subr.bf16.mxu0 (!%p112_p2), %v1282_v3  ;;  %v1296_v13 = vpack.c.bf16 (!%p112_p2), %v163_v11, %v144_v10  ;;  %v200_v14 = vld [vmem:[%s1928_s0 + $0x1d0] sm:$0xff] (!%p112_p2)  ;;  %v183_v15 = vld [vmem:[%s1928_s0 + $0x148] sm:$0xff] (!%p112_p2)  ;;  %v202_v16 = vld [vmem:[%s1928_s0 + $0x1e0] sm:$0xff] (!%p112_p2)  ;;  %vm1161_vm6 = vcmask (!%p112_p2), 791556  }
   0x9   : > { %1295 = vmatprep.subr.bf16.mxu1 (!%p112_p2), %v1294_v8  ;;  %1285 = vmatpush1.bf16.msra.mxu0 (!%p112_p2), %v1284_v9  ;;  %v1286_v17 = vpack.c.bf16 (!%p112_p2), %v200_v14, %v181_v12  ;;  %v1298_v18 = vpack.c.bf16 (!%p112_p2), %v202_v16, %v183_v15  ;;  %v180_v19 = vld [vmem:[%s1928_s0 + $0x130] sm:$0xff] (!%p112_p2)  ;;  %v199_v20 = vld [vmem:[%s1928_s0 + $0x1c8] sm:$0xff] (!%p112_p2)  ;;  %v182_v21 = vld [vmem:[%s1928_s0 + $0x140] sm:$0xff] (!%p112_p2) }
   0xa   : > { %1297 = vmatpush1.bf16.msra.mxu1 (!%p112_p2), %v1296_v13  ;;  %v1288_v22 = vpack.c.bf16 (!%p112_p2), %v199_v20, %v180_v19  ;;  %v201_v23 = vld [vmem:[%s1928_s0 + $0x1d8] sm:$0xff] (!%p112_p2)  ;;  %v219_v24 = vld [vmem:[%s1928_s0 + $0x268] sm:$0xff] (!%p112_p2)  ;;  %v238_v25 = vld [vmem:[%s1928_s0 + $0x300] sm:$0xff] (!%p112_p2) }
   0xb   : > { %1287 = vmatprep.subr.bf16.mxu0 (!%p112_p2), %v1286_v17  ;;  %1299 = vmatprep.subr.bf16.mxu1 (!%p112_p2), %v1298_v18  ;;  %v1300_v26 = vpack.c.bf16 (!%p112_p2), %v201_v23, %v182_v21  ;;  %v1290_v27 = vpack.c.bf16 (!%p112_p2), %v238_v25, %v219_v24  ;;  %v221_v28 = vld [vmem:[%s1928_s0 + $0x278] sm:$0xff] (!%p112_p2)  ;;  %v240_v29 = vld [vmem:[%s1928_s0 + $0x310] sm:$0xff] (!%p112_p2)  ;;  %v218_v30 = vld [vmem:[%s1928_s0 + $0x260] sm:$0xff] (!%p112_p2) }
   0xc   : > { %v1302_v31 = vpack.c.bf16 (!%p112_p2), %v240_v29, %v221_v28  ;;  %v237_v32 = vld [vmem:[%s1928_s0 + $0x2f8] sm:$0xff] (!%p112_p2)  ;;  %v220_v33 = vld [vmem:[%s1928_s0 + $0x270] sm:$0xff] (!%p112_p2)  ;;  %v239_v34 = vld [vmem:[%s1928_s0 + $0x308] sm:$0xff] (!%p112_p2) }
   0xd   : > { %s1933_s10 = smov (!%p1458_p3, %s1219_s10), 1  ;;  %1289 = vmatpush1.bf16.msra.mxu0 %v1288_v22  ;;  %v1292_v35 = vpack.c.bf16 %v237_v32, %v218_v30  ;;  %v1304_v36 = vpack.c.bf16 %v239_v34, %v220_v33  ;;  %v257_v37 = vld [vmem:[%s1928_s0 + $0x398] sm:$0x1]  ;;  %v259_v38 = vld [vmem:[%s1928_s0 + $0x3a8] sm:$0x1]  ;;  %v166_v41 = vld [vmem:[%s1928_s0 + $0xc0] sm:$0xff] }
   0xe   : > { %s1224_s6 = sshll.u32 %s1933_s10, 1  ;;  %1301 = vmatpush1.bf16.msra.mxu1 %v1300_v26  ;;  %1291 = vmatprep.subr.bf16.mxu0 %v1290_v27  ;;  %v147_v39 = vld [vmem:[%s1928_s0 + $0x28] sm:$0xff]  ;;  %v256_v40 = vld [vmem:[%s1928_s0 + $0x390] sm:$0x1]  ;;  %v149_v42 = vld [vmem:[%s1928_s0 + $0x38] sm:$0xff]  ;;  %s1399_s17 = smul.u32 38, %s1933_s10 }
   0xf   : > { %1303 = vmatprep.subr.bf16.mxu1 %v1302_v31  ;;  %s135_s20 = scalar_lea.vmem %s1929_s1, %s1224_s6  ;;  %v168_v43 = vld [vmem:[%s1928_s0 + $0xd0] sm:$0xff]  ;;  %v258_v44 = vld [vmem:[%s1928_s0 + $0x3a0] sm:$0x1]  ;;  %v165_v46 = vld [vmem:[%s1928_s0 + $0xb8] sm:$0xff]  ;;  %v1306_v52 = vpack.c.bf16 %v166_v41, %v147_v39 }
  0x10   : > { %v146_v45 = vld [vmem:[%s1928_s0 + $0x20] sm:$0xff]  ;;  %v148_v47 = vld [vmem:[%s1928_s0 + $0x30] sm:$0xff]  ;;  %v167_v48 = vld [vmem:[%s1928_s0 + $0xc8] sm:$0xff]  ;;  %v1318_v55 = vpack.c.bf16 %v168_v43, %v149_v42  ;;  %s1918_s25 = scalar_lea.vmem %s1930_s2, %s1399_s17 }
  0x11   : > { %1293 = vmatpush1.bf16.msra.mxu0 %v1292_v35  ;;  %v185_v49 = vld [vmem:[%s1928_s0 + $0x158] sm:$0xff]  ;;  %v204_v50 = vld [vmem:[%s1928_s0 + $0x1f0] sm:$0xff]  ;;  %v1581_v51 = vld [vmem:[%s135_s20] sm:$0x3]  ;;  %v1308_v56 = vpack.c.bf16 %v165_v46, %v146_v45  ;;  %v1320_v57 = vpack.c.bf16 %v167_v48, %v148_v47 }
  0x12   : > { %1305 = vmatpush1.bf16.msra.mxu1 %v1304_v36  ;;  %1226 = vmatprep.subr.msk.mxu0 %vm279_vm0, %v257_v37  ;;  %v187_v53 = vld [vmem:[%s1928_s0 + $0x168] sm:$0xff]  ;;  %v206_v54 = vld [vmem:[%s1928_s0 + $0x200] sm:$0xff]  ;;  %v1310_v58 = vpack.c.bf16 %v204_v50, %v185_v49  ;;  %v184_v59 = vld [vmem:[%s1928_s0 + $0x150] sm:$0xff] }
  0x13   : > { %1229 = vmatprep.subr.msk.mxu1 %vm279_vm0, %v259_v38  ;;  %v203_v60 = vld [vmem:[%s1928_s0 + $0x1e8] sm:$0xff]  ;;  %v186_v61 = vld [vmem:[%s1928_s0 + $0x160] sm:$0xff]  ;;  %v1322_v62 = vpack.c.bf16 %v206_v54, %v187_v53  ;;  %v205_v63 = vld [vmem:[%s1928_s0 + $0x1f8] sm:$0xff] }
  0x14   : > { %v223_v0 = vld [vmem:[%s1928_s0 + $0x288] sm:$0xff]  ;;  %v242_v1 = vld [vmem:[%s1928_s0 + $0x320] sm:$0xff]  ;;  %v225_v2 = vld [vmem:[%s1928_s0 + $0x298] sm:$0xff]  ;;  %v1312_v4 = vpack.c.bf16 %v203_v60, %v184_v59  ;;  %v1324_v5 = vpack.c.bf16 %v205_v63, %v186_v61 }
  0x15   : > { %1227 = vmatpush1.msk.msra.mxu0 %vm279_vm0, %v256_v40  ;;  %v244_v3 = vld [vmem:[%s1928_s0 + $0x330] sm:$0xff]  ;;  %v1314_v6 = vpack.c.bf16 %v242_v1, %v223_v0  ;;  %v222_v8 = vld [vmem:[%s1928_s0 + $0x280] sm:$0xff]  ;;  %v241_v9 = vld [vmem:[%s1928_s0 + $0x318] sm:$0xff] }
  0x16   : > { %1230 = vmatpush1.msk.msra.mxu1 %vm279_vm0, %v258_v44  ;;  %1228 = vmatmul.mubr.msk.f32.vlgmr.msra.gmra.mrb[0].mxu0 %vm275_vm1, %v1581_v51  ;;  %v1326_v10 = vpack.c.bf16 %v244_v3, %v225_v2  ;;  %v224_v11 = vld [vmem:[%s1928_s0 + $0x290] sm:$0xff]  ;;  %v243_v12 = vld [vmem:[%s1928_s0 + $0x328] sm:$0xff]  ;;  %v1316_v13 = vpack.c.bf16 %v241_v9, %v222_v8  ;;  %v261_v15 = vld [vmem:[%s1928_s0 + $0x3b8] sm:$0x1] }
  0x17   : > { %1231 = vmatmul.mubr.msk.f32.vlgmr.msra.gmra.mrb[0].mxu1 %vm275_vm1, %v1581_v51  ;;  %1307 = vmatprep.subr.bf16.mxu0 %v1306_v52  ;;  %v1328_v14 = vpack.c.bf16 %v243_v12, %v224_v11  ;;  %v263_v16 = vld [vmem:[%s1928_s0 + $0x3c8] sm:$0x1]  ;;  %v260_v18 = vld [vmem:[%s1928_s0 + $0x3b0] sm:$0x1]  ;;  %v170_v19 = vld [vmem:[%s1928_s0 + $0xe0] sm:$0xff] }
  0x18   : > { %1319 = vmatprep.subr.bf16.mxu1 %v1318_v55  ;;  %1309 = vmatpush1.bf16.msra.mxu0 %v1308_v56  ;;  %v151_v17 = vld [vmem:[%s1928_s0 + $0x48] sm:$0xff]  ;;  %v153_v20 = vld [vmem:[%s1928_s0 + $0x58] sm:$0xff]  ;;  %v172_v21 = vld [vmem:[%s1928_s0 + $0xf0] sm:$0xff] }
  0x19   : > { %1321 = vmatpush1.bf16.msra.mxu1 %v1320_v57  ;;  %1311 = vmatprep.subr.bf16.mxu0 %v1310_v58  ;;  %v150_v22 = vld [vmem:[%s1928_s0 + $0x40] sm:$0xff]  ;;  %v169_v23 = vld [vmem:[%s1928_s0 + $0xd8] sm:$0xff]  ;;  %v152_v24 = vld [vmem:[%s1928_s0 + $0x50] sm:$0xff]  ;;  %v1330_v29 = vpack.c.bf16 %v170_v19, %v151_v17  ;;  %v1342_v32 = vpack.c.bf16 %v172_v21, %v153_v20 }
  0x1a   : > { %1323 = vmatprep.subr.bf16.mxu1 %v1322_v62  ;;  %543 = vmatprep.mubr.f32.mxu0 %v1420_v7  ;;  %v171_v25 = vld [vmem:[%s1928_s0 + $0xe8] sm:$0xff]  ;;  %v189_v26 = vld [vmem:[%s1928_s0 + $0x178] sm:$0xff]  ;;  %v208_v27 = vld [vmem:[%s1928_s0 + $0x210] sm:$0xff]  ;;  %v1332_v33 = vpack.c.bf16 %v169_v23, %v150_v22 }
  0x1b   : > { %614 = vmatprep.mubr.f32.mxu1 %v1420_v7  ;;  %v262_v28 = vld [vmem:[%s1928_s0 + $0x3c0] sm:$0x1]  ;;  %v191_v30 = vld [vmem:[%s1928_s0 + $0x188] sm:$0xff]  ;;  %v1344_v34 = vpack.c.bf16 %v171_v25, %v152_v24  ;;  %v1334_v35 = vpack.c.bf16 %v208_v27, %v189_v26  ;;  %v188_v36 = vld [vmem:[%s1928_s0 + $0x170] sm:$0xff] }
  0x1c   : > { %1313 = vmatpush1.bf16.msra.mxu0 %v1312_v4  ;;  %v210_v31 = vld [vmem:[%s1928_s0 + $0x220] sm:$0xff]  ;;  %v207_v37 = vld [vmem:[%s1928_s0 + $0x208] sm:$0xff]  ;;  %v209_v40 = vld [vmem:[%s1928_s0 + $0x218] sm:$0xff] }
  0x1d   : > { %1325 = vmatpush1.bf16.msra.mxu1 %v1324_v5  ;;  %1315 = vmatprep.subr.bf16.mxu0 %v1314_v6  ;;  %v190_v38 = vld [vmem:[%s1928_s0 + $0x180] sm:$0xff]  ;;  %v1346_v39 = vpack.c.bf16 %v210_v31, %v191_v30  ;;  %v227_v41 = vld [vmem:[%s1928_s0 + $0x2a8] sm:$0xff]  ;;  %v229_v43 = vld [vmem:[%s1928_s0 + $0x2b8] sm:$0xff]  ;;  %v1336_v45 = vpack.c.bf16 %v207_v37, %v188_v36 }
  0x1e   : > { %1327 = vmatprep.subr.bf16.mxu1 %v1326_v10  ;;  %v246_v42 = vld [vmem:[%s1928_s0 + $0x340] sm:$0xff]  ;;  %v248_v44 = vld [vmem:[%s1928_s0 + $0x350] sm:$0xff]  ;;  %v1348_v46 = vpack.c.bf16 %v209_v40, %v190_v38  ;;  %v245_v49 = vld [vmem:[%s1928_s0 + $0x338] sm:$0xff] }
  0x1f   : > { %v1338_v47 = vpack.c.bf16 %v246_v42, %v227_v41  ;;  %v226_v48 = vld [vmem:[%s1928_s0 + $0x2a0] sm:$0xff]  ;;  %v1350_v50 = vpack.c.bf16 %v248_v44, %v229_v43  ;;  %v228_v52 = vld [vmem:[%s1928_s0 + $0x2b0] sm:$0xff]  ;;  %v247_v53 = vld [vmem:[%s1928_s0 + $0x348] sm:$0xff] }
  0x20   : > { %1317 = vmatpush1.bf16.msra.mxu0 %v1316_v13  ;;  %v1340_v54 = vpack.c.bf16 %v245_v49, %v226_v48  ;;  %v1352_v55 = vpack.c.bf16 %v247_v53, %v228_v52  ;;  %v265_v56 = vld [vmem:[%s1928_s0 + $0x3d8] sm:$0x1]  ;;  %v267_v57 = vld [vmem:[%s1928_s0 + $0x3e8] sm:$0x1]  ;;  %v264_v59 = vld [vmem:[%s1928_s0 + $0x3d0] sm:$0x1] }
  0x21   : > { %1329 = vmatpush1.bf16.msra.mxu1 %v1328_v14  ;;  %1232 = vmatprep.subr.msk.mxu0 %vm279_vm0, %v261_v15  ;;  %v155_v58 = vld [vmem:[%s1928_s0 + $0x68] sm:$0xff]  ;;  %v174_v60 = vld [vmem:[%s1928_s0 + $0x100] sm:$0xff]  ;;  %v157_v61 = vld [vmem:[%s1928_s0 + $0x78] sm:$0xff] }
  0x22   : > { %1235 = vmatprep.subr.msk.mxu1 %vm279_vm0, %v263_v16  ;;  %v176_v62 = vld [vmem:[%s1928_s0 + $0x110] sm:$0xff]  ;;  %v154_v63 = vld [vmem:[%s1928_s0 + $0x60] sm:$0xff]  ;;  %v173_v0 = vld [vmem:[%s1928_s0 + $0xf8] sm:$0xff]  ;;  %v1354_v6 = vpack.c.bf16 %v174_v60, %v155_v58 }
  0x23   : > { %v156_v1 = vld [vmem:[%s1928_s0 + $0x70] sm:$0xff]  ;;  %v175_v2 = vld [vmem:[%s1928_s0 + $0x108] sm:$0xff]  ;;  %v193_v3 = vld [vmem:[%s1928_s0 + $0x198] sm:$0xff]  ;;  %v1366_v10 = vpack.c.bf16 %v176_v62, %v157_v61  ;;  %v1356_v11 = vpack.c.bf16 %v173_v0, %v154_v63 }
  0x24   : > { %1233 = vmatpush1.msk.msra.mxu0 %vm279_vm0, %v260_v18  ;;  %v212_v4 = vld [vmem:[%s1928_s0 + $0x230] sm:$0xff]  ;;  %v266_v5 = vld [vmem:[%s1928_s0 + $0x3e0] sm:$0x1]  ;;  %v195_v8 = vld [vmem:[%s1928_s0 + $0x1a8] sm:$0xff]  ;;  %v1368_v12 = vpack.c.bf16 %v175_v2, %v156_v1 }
  0x25   : > { %1236 = vmatpush1.msk.msra.mxu1 %vm279_vm0, %v262_v28  ;;  %1234 = vmatmul.mubr.msk.f32.vlgmr.msra.gmra.mrb[2].mxu0 %vm275_vm1, %v1581_v51  ;;  %v214_v9 = vld [vmem:[%s1928_s0 + $0x240] sm:$0xff]  ;;  %v1358_v13 = vpack.c.bf16 %v212_v4, %v193_v3  ;;  %v192_v14 = vld [vmem:[%s1928_s0 + $0x190] sm:$0xff]  ;;  %v211_v15 = vld [vmem:[%s1928_s0 + $0x228] sm:$0xff] }
  0x26   : > { %1237 = vmatmul.mubr.msk.f32.vlgmr.msra.gmra.mrb[2].mxu1 %vm275_vm1, %v1581_v51  ;;  %1331 = vmatprep.subr.bf16.mxu0 %v1330_v29  ;;  %v194_v16 = vld [vmem:[%s1928_s0 + $0x1a0] sm:$0xff]  ;;  %v1370_v17 = vpack.c.bf16 %v214_v9, %v195_v8  ;;  %v213_v18 = vld [vmem:[%s1928_s0 + $0x238] sm:$0xff]  ;;  %v231_v19 = vld [vmem:[%s1928_s0 + $0x2c8] sm:$0xff]  ;;  %v1360_v23 = vpack.c.bf16 %v211_v15, %v192_v14  ;;  %v1070_v8 = vlaneseq }
  0x27   : > { %1343 = vmatprep.subr.bf16.mxu1 %v1342_v32  ;;  %1333 = vmatpush1.bf16.msra.mxu0 %v1332_v33  ;;  %v250_v20 = vld [vmem:[%s1928_s0 + $0x360] sm:$0xff]  ;;  %v233_v21 = vld [vmem:[%s1928_s0 + $0x2d8] sm:$0xff]  ;;  %v252_v22 = vld [vmem:[%s1928_s0 + $0x370] sm:$0xff]  ;;  %v1372_v24 = vpack.c.bf16 %v213_v18, %v194_v16 }
  0x28   : > { %1345 = vmatpush1.bf16.msra.mxu1 %v1344_v34  ;;  %1335 = vmatprep.subr.bf16.mxu0 %v1334_v35  ;;  %v1362_v25 = vpack.c.bf16 %v250_v20, %v231_v19  ;;  %v230_v26 = vld [vmem:[%s1928_s0 + $0x2c0] sm:$0xff]  ;;  %v249_v27 = vld [vmem:[%s1928_s0 + $0x358] sm:$0xff]  ;;  %v1374_v28 = vpack.c.bf16 %v252_v22, %v233_v21  ;;  %v232_v29 = vld [vmem:[%s1928_s0 + $0x2d0] sm:$0xff] }
  0x29   : > { %1347 = vmatprep.subr.bf16.mxu1 %v1346_v39  ;;  %685 = vmatprep.mubr.f32.mxu0 %v1420_v7  ;;  %v251_v30 = vld [vmem:[%s1928_s0 + $0x368] sm:$0xff]  ;;  %v1364_v31 = vpack.c.bf16 %v249_v27, %v230_v26  ;;  %v269_v33 = vld [vmem:[%s1928_s0 + $0x3f8] sm:$0x1]  ;;  %v268_v35 = vld [vmem:[%s1928_s0 + $0x3f0] sm:$0x1] }
  0x2a   : > { %756 = vmatprep.mubr.f32.mxu1 %v1420_v7  ;;  %v1376_v32 = vpack.c.bf16 %v251_v30, %v232_v29  ;;  %v271_v34 = vld [vmem:[%s1928_s0 + $0x408] sm:$0x1]  ;;  %v178_v37 = vld [vmem:[%s1928_s0 + $0x120] sm:$0xff]  ;;  %v177_v39 = vld [vmem:[%s1928_s0 + $0x118] sm:$0xff] }
  0x2b   : > { %1337 = vmatpush1.bf16.msra.mxu0 %v1336_v45  ;;  %v159_v36 = vld [vmem:[%s1928_s0 + $0x88] sm:$0xff]  ;;  %v158_v38 = vld [vmem:[%s1928_s0 + $0x80] sm:$0xff]  ;;  %v160_v40 = vld [vmem:[%s1928_s0 + $0x90] sm:$0xff] }
  0x2c   : > { %1349 = vmatpush1.bf16.msra.mxu1 %v1348_v46  ;;  %1339 = vmatprep.subr.bf16.mxu0 %v1338_v47  ;;  %v179_v41 = vld [vmem:[%s1928_s0 + $0x128] sm:$0xff]  ;;  %v197_v42 = vld [vmem:[%s1928_s0 + $0x1b8] sm:$0xff]  ;;  %v216_v43 = vld [vmem:[%s1928_s0 + $0x250] sm:$0xff]  ;;  %v1378_v45 = vpack.c.bf16 %v178_v37, %v159_v36  ;;  %v1380_v46 = vpack.c.bf16 %v177_v39, %v158_v38 }
  0x2d   : > { %1351 = vmatprep.subr.bf16.mxu1 %v1350_v50  ;;  %v270_v44 = vld [vmem:[%s1928_s0 + $0x400] sm:$0x1]  ;;  %v1391_v47 = vpack.c.bf16 %v179_v41, %v160_v40  ;;  %v1382_v48 = vpack.c.bf16 %v216_v43, %v197_v42  ;;  %v196_v49 = vld [vmem:[%s1928_s0 + $0x1b0] sm:$0xff]  ;;  %v215_v50 = vld [vmem:[%s1928_s0 + $0x248] sm:$0xff] }
  0x2e   : > { %v198_v52 = vld [vmem:[%s1928_s0 + $0x1c0] sm:$0xff]  ;;  %v217_v53 = vld [vmem:[%s1928_s0 + $0x258] sm:$0xff]  ;;  %v236_v62 = vld [vmem:[%s1928_s0 + $0x2f0] sm:$0xff] }
  0x2f   : > { %1341 = vmatpush1.bf16.msra.mxu0 %v1340_v54  ;;  %v235_v54 = vld [vmem:[%s1928_s0 + $0x2e8] sm:$0xff]  ;;  %v1394_v58 = vpack.c.bf16 %v217_v53, %v198_v52  ;;  %v234_v60 = vld [vmem:[%s1928_s0 + $0x2e0] sm:$0xff]  ;;  %v253_v61 = vld [vmem:[%s1928_s0 + $0x378] sm:$0xff] }
  0x30   : > { %1353 = vmatpush1.bf16.msra.mxu1 %v1352_v55  ;;  %1238 = vmatprep.subr.msk.mxu0 %vm279_vm0, %v265_v56  ;;  %v254_v55 = vld [vmem:[%s1928_s0 + $0x380] sm:$0xff]  ;;  %v1421_v56 = vmov 0.0|0.0   ;;  %v255_v63 = vld [vmem:[%s1928_s0 + $0x388] sm:$0xff]  ;;  %v1388_v0 = vpack.c.bf16 %v253_v61, %v234_v60  ;;  %v273_v2 = vld [vmem:[%s1928_s0 + $0x418] sm:$0x1] }
  0x31   : > { %1241 = vmatprep.subr.msk.mxu1 %vm279_vm0, %v267_v57  ;;  %v1384_v57 = vpack.c.bf16 %v215_v50, %v196_v49  ;;  %v1397_v1 = vpack.c.bf16 %v255_v63, %v236_v62  ;;  %v272_v3 = vld [vmem:[%s1928_s0 + $0x410] sm:$0x1]  ;;  %v274_v4 = vld [vmem:[%s1928_s0 + $0x420] sm:$0x1]  ;;  %vm1160_vm5 = vmor %vm1159_vm4, %vm1158_vm3 }
  0x32   : > { %vm1162_vm7 = vmor %vm1161_vm6, %vm1160_vm5 }
  0x33   : > { %1239 = vmatpush1.msk.msra.mxu0 %vm279_vm0, %v264_v59  ;;  %v1386_v59 = vpack.c.bf16 %v254_v55, %v235_v54 }
  0x34   : > { %1242 = vmatpush1.msk.msra.mxu1 %vm279_vm0, %v266_v5  ;;  %1240 = vmatmul.mubr.msk.f32.vlgmr.msra.gmra.mrb[4].mxu0 %vm275_vm1, %v1581_v51  ;;  %v1423_v5 = vmov 1983009808  }
  0x35   : > { %1243 = vmatmul.mubr.msk.f32.vlgmr.msra.gmra.mrb[4].mxu1 %vm275_vm1, %v1581_v51  ;;  %1355 = vmatprep.subr.bf16.mxu0 %v1354_v6  ;;  %v1068_v6 = vunpack.c.l.s4 %v1423_v5 }
  0x36   : > { %1367 = vmatprep.subr.bf16.mxu1 %v1366_v10  ;;  %1357 = vmatpush1.bf16.msra.mxu0 %v1356_v11 }
  0x37   : > { %1369 = vmatpush1.bf16.msra.mxu1 %v1368_v12  ;;  %1359 = vmatprep.subr.bf16.mxu0 %v1358_v13  ;;  %v1069_v9 = vunpack.c.0.s8 %v1068_v6 }
  0x38   : > { %1371 = vmatprep.subr.bf16.mxu1 %v1370_v17  ;;  %827 = vmatprep.mubr.f32.mxu0 %v1420_v7 }
  0x39   : > { %898 = vmatprep.mubr.f32.mxu1 %v1420_v7 }
  0x3a   : > { %1361 = vmatpush1.bf16.msra.mxu0 %v1360_v23 }
  0x3b   : > { %1373 = vmatpush1.bf16.msra.mxu1 %v1372_v24  ;;  %1363 = vmatprep.subr.bf16.mxu0 %v1362_v25 }
  0x3c   : > { %1375 = vmatprep.subr.bf16.mxu1 %v1374_v28 }
  0x3e   : > { %1365 = vmatpush1.bf16.msra.mxu0 %v1364_v31 }
  0x3f   : > { %1377 = vmatpush1.bf16.msra.mxu1 %v1376_v32  ;;  %1244 = vmatprep.subr.msk.mxu0 %vm279_vm0, %v269_v33 }
  0x40   : > { %1247 = vmatprep.subr.msk.mxu1 %vm279_vm0, %v271_v34 }
  0x42   : > { %1245 = vmatpush1.msk.msra.mxu0 %vm279_vm0, %v268_v35 }
  0x43   : > { %1248 = vmatpush1.msk.msra.mxu1 %vm279_vm0, %v270_v44  ;;  %1246 = vmatmul.mubr.msk.f32.vlgmr.msra.gmra.mrb[6].mxu0 %vm275_vm1, %v1581_v51 }
  0x44   : > { %1249 = vmatmul.mubr.msk.f32.vlgmr.msra.gmra.mrb[6].mxu1 %vm275_vm1, %v1581_v51  ;;  %1379 = vmatprep.subr.bf16.mxu0 %v1378_v45 }
  0x45   : > { %1381 = vmatpush1.bf16.msra.mxu0 %v1380_v46  ;;  %1390 = vmatprep.subr.bf16.mxu1 %v1421_v56 }
  0x46   : > { %1392 = vmatpush3.bf16.msra.mxu1 %v1391_v47  ;;  %1383 = vmatprep.subr.bf16.mxu0 %v1382_v48 }
  0x47   : > { %1393 = vmatprep.subr.bf16.mxu1 %v1421_v56  ;;  %969 = vmatprep.mubr.f32.mxu0 %v1420_v7 }
  0x48   : > { %1279 = vmatprep.mubr.msk.f32.mxu1 %vm1422_vm2, %v1420_v7 }
  0x49   : > { %1385 = vmatpush1.bf16.msra.mxu0 %v1384_v57 }
  0x4a   : > { %1395 = vmatpush3.bf16.msra.mxu1 %v1394_v58  ;;  %1387 = vmatprep.subr.bf16.mxu0 %v1386_v59 }
  0x4b   : > { %1396 = vmatprep.subr.bf16.mxu1 %v1421_v56 }
  0x4d   : > { %1389 = vmatpush1.bf16.msra.mxu0 %v1388_v0 }
  0x4e   : > { %1398 = vmatpush3.bf16.msra.mxu1 %v1397_v1  ;;  %1250 = vmatprep.subr.msk.mxu0 %vm279_vm0, %v273_v2 }
  0x4f   : > { %1277 = vmatprep.subr.mxu1 %v1420_v7  ;;  %v1071_v7 = vshrl.u32 %v1070_v8, 7 }
  0x51   : > { %1251 = vmatpush1.msk.msra.mxu0 %vm279_vm0, %v272_v3  ;;  %v1072_v11 = vsub.s32 %v1069_v9, %v1071_v7 }
  0x52   : > { %1252 = vmatmul.mubr.msk.f32.vlgmr.msra.gmra.mrb[8].mxu0 %vm275_vm1, %v1581_v51  ;;  %1278 = vmatpush3.msk.msra.mxu1 %vm279_vm0, %v274_v4 }
  0x53   : > { %1280 = vmatmul.mubr.msk.f32.vlgmr.msra.gmra.mrb[8].mxu1 %vm275_vm1, %v1581_v51 }
  0xe9   : > { %v403_v10 = vpop.f32.mrb[0].mxu0 }
  0xea   : > { %v474_v12 = vpop.f32.mrb[0].mxu1  ;;  %v405_v13 = vpop.f32.mrb[1].mxu0 }
  0xeb   : > { %v1065_v14 = vcombine.low %v403_v10, %v405_v13  ;;  %v476_v15 = vpop.f32.mrb[1].mxu1 }
  0xec   : > { %v1066_v16 = vcombine.low %v474_v12, %v476_v15 }
  0xed   : > { %v1073_v17 = vrot.slane %v1065_v14, %v1072_v11 }
  0xee   : > { %v1080_v18 = vrot.slane %v1066_v16, %v1072_v11 }
  0xf0   : > { %v1081_v51 = vcombine.low %v1073_v17, %v1080_v18 }
  0xf2   : > { %1154 = vst [vmem:[%s1918_s25] sm:$0xff] %v1081_v51 }
  0xf8   : > { %v545_v19 = vpop.f32.mrb[2].mxu0 }
  0xf9   : > { %v616_v20 = vpop.f32.mrb[2].mxu1  ;;  %v547_v21 = vpop.f32.mrb[3].mxu0 }
  0xfa   : > { %v1082_v22 = vcombine.low %v545_v19, %v547_v21  ;;  %v618_v23 = vpop.f32.mrb[3].mxu1 }
  0xfb   : > { %v1083_v24 = vcombine.low %v616_v20, %v618_v23 }
  0xfc   : > { %v1090_v25 = vrot.slane %v1082_v22, %v1072_v11 }
  0xfd   : > { %v1097_v26 = vrot.slane %v1083_v24, %v1072_v11 }
  0xff   : > { %v1098_v27 = vcombine.low %v1090_v25, %v1097_v26 }
 0x101   : > { %1155 = vst [vmem:[%s1918_s25 + $0x8] sm:$0xff] %v1098_v27 }
 0x107   : > { %v687_v28 = vpop.f32.mrb[4].mxu0 }
 0x108   : > { %v758_v29 = vpop.f32.mrb[4].mxu1  ;;  %v689_v30 = vpop.f32.mrb[5].mxu0 }
 0x109   : > { %v1099_v31 = vcombine.low %v687_v28, %v689_v30  ;;  %v760_v32 = vpop.f32.mrb[5].mxu1 }
 0x10a   : > { %v1100_v33 = vcombine.low %v758_v29, %v760_v32 }
 0x10b   : > { %v1107_v34 = vrot.slane %v1099_v31, %v1072_v11 }
 0x10c   : > { %v1114_v35 = vrot.slane %v1100_v33, %v1072_v11 }
 0x10e   : > { %v1115_v36 = vcombine.low %v1107_v34, %v1114_v35 }
 0x110   : > { %1156 = vst [vmem:[%s1918_s25 + $0x10] sm:$0xff] %v1115_v36 }
 0x116   : > { %v829_v37 = vpop.f32.mrb[6].mxu0 }
 0x117   : > { %v900_v38 = vpop.f32.mrb[6].mxu1  ;;  %v831_v39 = vpop.f32.mrb[7].mxu0 }
 0x118   : > { %v1116_v40 = vcombine.low %v829_v37, %v831_v39  ;;  %v902_v41 = vpop.f32.mrb[7].mxu1 }
 0x119   : > { %v1117_v42 = vcombine.low %v900_v38, %v902_v41 }
 0x11a   : > { %v1124_v43 = vrot.slane %v1116_v40, %v1072_v11 }
 0x11b   : > { %v1131_v44 = vrot.slane %v1117_v42, %v1072_v11 }
 0x11d   : > { %v1132_v45 = vcombine.low %v1124_v43, %v1131_v44 }
 0x11f   : > { %1157 = vst [vmem:[%s1918_s25 + $0x18] sm:$0xff] %v1132_v45 }
 0x125   : > { %v971_v46 = vpop.f32.mrb[8].mxu0 }
 0x126   : > { %v973_v47 = vpop.f32.mrb[9].mxu0  ;;  %v1042_v48 = vpop.f32.mrb[8].mxu1 }
 0x127   : > { %v1133_v49 = vcombine.low %v971_v46, %v973_v47  ;;  %v1147_v50 = vrot.slane %v1042_v48, %v1072_v11  ;;  %v1281_v52 = vpop.f32.mrb[9].mxu1 }
 0x129   : > { %v1140_v53 = vrot.slane %v1133_v49, %v1072_v11 }
 0x12b   : > { %v1148_v54 = vcombine.low %v1140_v53, %v1147_v50 }
 0x12d   : > { %1163 = vst.msk [vmem:[%s1918_s25 + $0x20] sm:$0x3f] %vm1162_vm7, %v1148_v54 }
 0x12e PF: > { %s12_s9 = sadd.s32 1, %s1418_s9  }
 0x12f   : > { %p9_p4 = scmp.ge.s32.totalorder %s12_s9, 4  }
 0x131   :  { %11 = sbr.rel (!%p9_p4) target bundleno = 1 (0x1), region = 58 }

</bundles_post_ra>
